<compile_context>
chip_gen: v7x
topology: tpu7x:2x2x1
jax: 0.10.0
libtpu: 0.0.40
codegen_flags: <defaults>
</compile_context>

<pallas_src>
import functools

import jax
import jax.numpy as jnp
from jax.experimental import pallas as pl
from jax.experimental.pallas import tpu as pltpu

LEAKY_SLOPE = 0.01   # nn.LeakyReLU default negative_slope
BN_EPS = 1e-5        # nn.BatchNorm2d default eps


def _leaky(v):
    return jnp.where(v > 0, v, LEAKY_SLOPE * v)


def _conv3x3_im2col(xp, wf, bias, patches_ref, Ho, Wo, stride):
    """One 3x3 conv layer as a single im2col matmul.

    xp:          (Hp, Wp, C) zero-padded f32 activation (value).
    wf:          (9*C, Cout) flattened weights (kh, kw, cin order).
    bias:        (1, Cout).
    patches_ref: VMEM scratch (Ho*Wo, >= 9*C) that receives the im2col matrix.
    Returns LeakyReLU(conv + bias) as (Ho*Wo, Cout) f32.
    """
    c = xp.shape[-1]
    s = stride
    for kh in range(3):
        for kw in range(3):
            t = kh * 3 + kw
            win = xp[kh:kh + (Ho - 1) * s + 1:s,
                     kw:kw + (Wo - 1) * s + 1:s, :]
            patches_ref[:, t * c:(t + 1) * c] = win.reshape(Ho * Wo, c)
    acc = jnp.dot(patches_ref[:, :9 * c], wf,
                  preferred_element_type=jnp.float32)
    return _leaky(acc + bias)


# ----------------------------------------------------------------------------
# Kernel 1: fused conv chain (+ identity residual, or 1x1-residual BN stats)
# One batch element per grid step; everything stays in VMEM.
# ----------------------------------------------------------------------------
def _res_chain_kernel(*refs, num_blocks, stride, has_adjust,
                      H, W, Cin, Cout, Ho, Wo):
    i = 0
    x_ref = refs[i]; i += 1
    layer_refs = []
    for _ in range(num_blocks):
        layer_refs.append((refs[i], refs[i + 1]))
        i += 2
    w1_ref = None
    if has_adjust:
        w1_ref = refs[i]; i += 1
    y_ref = refs[i]; i += 1
    stats_ref = None
    if has_adjust:
        stats_ref = refs[i]; i += 1
    pad_in_ref = refs[i]; i += 1
    n_mid = min(num_blocks - 1, 2)
    mid_refs = [refs[i + k] for k in range(n_mid)]
    i += n_mid
    patches_ref = refs[i]; i += 1

    x0 = x_ref[0].astype(jnp.float32)                       # (H, W, Cin)

    # --- layer 0: zero-pad the input inside the kernel (no jnp.pad pass) ---
    pad_in_ref[...] = jnp.zeros_like(pad_in_ref)
    pad_in_ref[1:H + 1, 1:W + 1, :] = x0
    act = _conv3x3_im2col(pad_in_ref[...], layer_refs[0][0][...],
                          layer_refs[0][1][...], patches_ref, Ho, Wo, stride)

    # --- remaining layers: activations stay VMEM-resident (ping-pong pads) ---
    for l in range(1, num_blocks):
        buf = mid_refs[(l - 1) % n_mid]
        buf[...] = jnp.zeros_like(buf)
        buf[1:Ho + 1, 1:Wo + 1, :] = act.reshape(Ho, Wo, Cout)
        act = _conv3x3_im2col(buf[...], layer_refs[l][0][...],
                              layer_refs[l][1][...], patches_ref, Ho, Wo, 1)

    if has_adjust:
        # Conv-chain output (pre residual add); residual finished in kernel 2.
        y_ref[...] = act.reshape(1, Ho, Wo, Cout).astype(y_ref.dtype)
        # 1x1 residual conv -> per-batch partial BN stats (sum, sum of squares)
        xs = x0
        if stride != 1:
            xs = x0[0:(Ho - 1) * stride + 1:stride,
                    0:(Wo - 1) * stride + 1:stride, :]
        r = jnp.dot(xs.reshape(Ho * Wo, Cin), w1_ref[...],
                    preferred_element_type=jnp.float32)      # (Ho*Wo, Cout)
        stats_ref[0, 0:1, :] = jnp.sum(r, axis=0, keepdims=True)
        stats_ref[0, 1:2, :] = jnp.sum(r * r, axis=0, keepdims=True)
    else:
        # Identity residual (Cin == Cout, stride == 1): finish everything here.
        res = x0.reshape(Ho * Wo, Cout)
        out = _leaky(act + res)
        y_ref[...] = out.reshape(1, Ho, Wo, Cout).astype(y_ref.dtype)


# ----------------------------------------------------------------------------
# Kernel 2 (only if adjust_residual exists): recompute the tiny 1x1 conv with
# the BN scale already folded into the weights, add shift + conv-chain output,
# final LeakyReLU.  No per-step stats work; no BN multiply over (Ho*Wo, Cout).
# ----------------------------------------------------------------------------
def _bn_add_lrelu_kernel(x_ref, w1_ref, shift_ref, y_ref, o_ref,
                         *, stride, Cin, Cout, Ho, Wo):
    xs = x_ref[0].astype(jnp.float32)                        # (H, W, Cin)
    if stride != 1:
        xs = xs[0:(Ho - 1) * stride + 1:stride,
                0:(Wo - 1) * stride + 1:stride, :]
    rn = jnp.dot(xs.reshape(Ho * Wo, Cin), w1_ref[...],
                 preferred_element_type=jnp.float32) + shift_ref[...]
    y = y_ref[0].astype(jnp.float32).reshape(Ho * Wo, Cout)
    out = _leaky(y + rn)
    o_ref[...] = out.reshape(1, Ho, Wo, Cout).astype(o_ref.dtype)


# ----------------------------------------------------------------------------
# Full Res_C2D_Block forward (NCHW in / NCHW out, like PyTorch)
# ----------------------------------------------------------------------------
def res_c2d_block_forward(x_nchw, params, *, stride=1):
    # NOTE: in a stacked model keep NHWC end-to-end and hoist these transposes.
    x = jnp.transpose(x_nchw, (0, 2, 3, 1))                  # -> NHWC
    N, H, W, Cin = x.shape
    blocks = params["blocks"]
    num_blocks = len(blocks)
    Cout = blocks[0][0].shape[-1]
    Ho = (H - 1) // stride + 1                               # (H + 2 - 3)//s + 1
    Wo = (W - 1) // stride + 1
    has_adjust = params["adjust"] is not None
    dtype = x.dtype

    cparams = pltpu.CompilerParams(
        dimension_semantics=("parallel",),
        vmem_limit_bytes=32 * 1024 * 1024,
    )

    # ---------------- kernel 1: fused conv chain ----------------
    inputs = [x]
    in_specs = [pl.BlockSpec((1, H, W, Cin), lambda n: (n, 0, 0, 0))]
    for (w, b) in blocks:                # w: (3, 3, cin_l, Cout) HWIO
        cin_l = w.shape[2]
        inputs += [w.reshape(9 * cin_l, Cout), b.reshape(1, Cout)]
        in_specs += [pl.BlockSpec((9 * cin_l, Cout), lambda n: (0, 0)),
                     pl.BlockSpec((1, Cout), lambda n: (0, 0))]
    if has_adjust:
        w1, gamma, beta = params["adjust"]       # w1: (Cin, Cout), no bias
        inputs.append(w1)
        in_specs.append(pl.BlockSpec((Cin, Cout), lambda n: (0, 0)))

    if has_adjust:
        out_shape = (jax.ShapeDtypeStruct((N, Ho, Wo, Cout), dtype),
                     jax.ShapeDtypeStruct((N, 2, Cout), jnp.float32))
        out_specs = (pl.BlockSpec((1, Ho, Wo, Cout), lambda n: (n, 0, 0, 0)),
                     pl.BlockSpec((1, 2, Cout), lambda n: (n, 0, 0)))
    else:
        out_shape = jax.ShapeDtypeStruct((N, Ho, Wo, Cout), dtype)
        out_specs = pl.BlockSpec((1, Ho, Wo, Cout), lambda n: (n, 0, 0, 0))

    n_mid = min(num_blocks - 1, 2)
    c_patch = Cin if num_blocks == 1 else max(Cin, Cout)
    scratch = [pltpu.VMEM((H + 2, W + 2, Cin), jnp.float32)]
    scratch += [pltpu.VMEM((Ho + 2, Wo + 2, Cout), jnp.float32)] * n_mid
    scratch += [pltpu.VMEM((Ho * Wo, 9 * c_patch), jnp.float32)]

    kern1 = functools.partial(
        _res_chain_kernel, num_blocks=num_blocks, stride=stride,
        has_adjust=has_adjust, H=H, W=W, Cin=Cin, Cout=Cout, Ho=Ho, Wo=Wo)

    res1 = pl.pallas_call(
        kern1,
        grid=(N,),
        in_specs=in_specs,
        out_specs=out_specs,
        out_shape=out_shape,
        scratch_shapes=scratch,
        compiler_params=cparams,
    )(*inputs)

    if not has_adjust:
        out_nhwc = res1
    else:
        y, stats = res1
        # Tiny O(N*Cout) BN-stat reduction + scale folding, done in plain JAX
        # between the two pallas calls (cheaper than redoing it per grid step).
        count = float(N * Ho * Wo)
        tot = jnp.sum(stats, axis=0)                          # (2, Cout)
        mean = tot[0] / count                                 # (Cout,)
        var = tot[1] / count - mean * mean                    # biased variance
        inv_std = jax.lax.rsqrt(var + BN_EPS)
        scale = gamma * inv_std                               # (Cout,)
        shift = beta - mean * scale                           # (Cout,)
        w1_eff = w1 * scale[None, :]                          # fold BN scale

        kern2 = functools.partial(
            _bn_add_lrelu_kernel, stride=stride, Cin=Cin, Cout=Cout,
            Ho=Ho, Wo=Wo)
        out_nhwc = pl.pallas_call(
            kern2,
            grid=(N,),
            in_specs=[
                pl.BlockSpec((1, H, W, Cin), lambda n: (n, 0, 0, 0)),
                pl.BlockSpec((Cin, Cout), lambda n: (0, 0)),
                pl.BlockSpec((1, Cout), lambda n: (0, 0)),
                pl.BlockSpec((1, Ho, Wo, Cout), lambda n: (n, 0, 0, 0)),
            ],
            out_specs=pl.BlockSpec((1, Ho, Wo, Cout), lambda n: (n, 0, 0, 0)),
            out_shape=jax.ShapeDtypeStruct((N, Ho, Wo, Cout), dtype),
            compiler_params=cparams,
        )(x, w1_eff, shift.reshape(1, Cout), y)

    return jnp.transpose(out_nhwc, (0, 3, 1, 2))             # -> NCHW


# ----------------------------------------------------------------------------
# Pure-JAX reference (for a correctness self-check)
# ----------------------------------------------------------------------------
def _reference_forward(x_nchw, params, *, stride=1):
    y = x_nchw
    for i, (w, b) in enumerate(params["blocks"]):
        s = stride if i == 0 else 1
        y = jax.lax.conv_general_dilated(
            y, w, window_strides=(s, s), padding=((1, 1), (1, 1)),
            dimension_numbers=("NCHW", "HWIO", "NCHW"),
            precision=jax.lax.Precision.HIGHEST)
        y = y + b.reshape(1, -1, 1, 1)
        y = jnp.where(y > 0, y, LEAKY_SLOPE * y)
    if params["adjust"] is not None:
        w1, gamma, beta = params["adjust"]
        r = jax.lax.conv_general_dilated(
            x_nchw, w1.reshape(1, 1, *w1.shape),
            window_strides=(stride, stride), padding=((0, 0), (0, 0)),
            dimension_numbers=("NCHW", "HWIO", "NCHW"),
            precision=jax.lax.Precision.HIGHEST)
        mean = jnp.mean(r, axis=(0, 2, 3), keepdims=True)
        var = jnp.mean(jnp.square(r - mean), axis=(0, 2, 3), keepdims=True)
        res = (r - mean) * jax.lax.rsqrt(var + BN_EPS)
        res = res * gamma.reshape(1, -1, 1, 1) + beta.reshape(1, -1, 1, 1)
    else:
        res = x_nchw
    out = y + res
    return jnp.where(out > 0, out, LEAKY_SLOPE * out)


if __name__ == "__main__":
    key = jax.random.PRNGKey(0)
    keys = jax.random.split(key, 12)

    fwd = jax.jit(functools.partial(res_c2d_block_forward, stride=1))

    # ---- case 1: in_dim != out_dim -> 1x1-conv + BatchNorm residual path ----
    N, Cin, Cout, H, W = 2, 4, 8, 16, 16
    num_blocks = 2
    x = jax.random.normal(keys[0], (N, Cin, H, W), jnp.float32)
    blocks = []
    cin = Cin
    for i in range(num_blocks):
        w = 0.1 * jax.random.normal(keys[1 + 2 * i], (3, 3, cin, Cout), jnp.float32)
        b = 0.1 * jax.random.normal(keys[2 + 2 * i], (Cout,), jnp.float32)
        blocks.append((w, b))
        cin = Cout
    w1 = 0.1 * jax.random.normal(keys[5], (Cin, Cout), jnp.float32)
    gamma = jnp.ones((Cout,), jnp.float32)   # BatchNorm2d default weight
    beta = jnp.zeros((Cout,), jnp.float32)   # BatchNorm2d default bias
    params = {"blocks": blocks, "adjust": (w1, gamma, beta)}

    out = fwd(x, params)
    jax.block_until_ready(out)
    assert out.shape == (N, Cout, H, W)
    ref = _reference_forward(x, params, stride=1)
    err = float(jnp.max(jnp.abs(out - ref)))
    assert err < 2e-4, f"adjust-path mismatch: max abs err {err}"

    # ---- case 2: in_dim == out_dim, stride 1 -> identity residual path ----
    C2 = 8
    x2 = jax.random.normal(keys[6], (N, C2, H, W), jnp.float32)
    blocks2 = []
    for i in range(num_blocks):
        w = 0.1 * jax.random.normal(keys[7 + 2 * i], (3, 3, C2, C2), jnp.float32)
        b = 0.1 * jax.random.normal(keys[8 + 2 * i], (C2,), jnp.float32)
        blocks2.append((w, b))
    params2 = {"blocks": blocks2, "adjust": None}

    out2 = fwd(x2, params2)
    jax.block_until_ready(out2)
    assert out2.shape == (N, C2, H, W)
    ref2 = _reference_forward(x2, params2, stride=1)
    err2 = float(jnp.max(jnp.abs(out2 - ref2)))
    assert err2 < 2e-4, f"identity-path mismatch: max abs err {err2}"

    print("KERNEL_OK")
</pallas_src>

<mosaic_0001>
module attributes {stable_mosaic.version = 11 : i64} {
  func.func @_res_chain_kernel(%arg0: i32, %arg1: memref<1x16x16x4xf32, #tpu.memory_space<vmem>>, %arg2: memref<36x8xf32, #tpu.memory_space<vmem>>, %arg3: memref<1x8xf32, #tpu.memory_space<vmem>>, %arg4: memref<72x8xf32, #tpu.memory_space<vmem>>, %arg5: memref<1x8xf32, #tpu.memory_space<vmem>>, %arg6: memref<4x8xf32, #tpu.memory_space<vmem>>, %arg7: memref<1x16x16x8xf32, #tpu.memory_space<vmem>>, %arg8: memref<1x2x8xf32, #tpu.memory_space<vmem>>, %arg9: memref<18x18x4xf32, #tpu.memory_space<vmem>>, %arg10: memref<18x18x8xf32, #tpu.memory_space<vmem>>, %arg11: memref<256x72xf32, #tpu.memory_space<vmem>>) attributes {dimension_semantics = [#tpu.dimension_semantics<parallel>], iteration_bounds = array<i64: 2>, scalar_prefetch = 0 : i64, scratch_operands = 3 : i64, tpu.core_type = #tpu.core_type<tc>, window_params = [{transform_indices = @transform_0, window_bounds = array<i64: 1, 16, 16, 4>}, {pipeline_mode = #tpu.pipeline_mode<synchronous>, transform_indices = @transform_1, window_bounds = array<i64: 36, 8>}, {pipeline_mode = #tpu.pipeline_mode<synchronous>, transform_indices = @transform_2, window_bounds = array<i64: 1, 8>}, {pipeline_mode = #tpu.pipeline_mode<synchronous>, transform_indices = @transform_3, window_bounds = array<i64: 72, 8>}, {pipeline_mode = #tpu.pipeline_mode<synchronous>, transform_indices = @transform_4, window_bounds = array<i64: 1, 8>}, {pipeline_mode = #tpu.pipeline_mode<synchronous>, transform_indices = @transform_5, window_bounds = array<i64: 4, 8>}, {transform_indices = @transform_6, window_bounds = array<i64: 1, 16, 16, 8>}, {transform_indices = @transform_7, window_bounds = array<i64: 1, 2, 8>}]} {
    %c0 = arith.constant 0 : index
    %c0_0 = arith.constant 0 : index
    %c0_1 = arith.constant 0 : index
    %c0_2 = arith.constant 0 : index
    %0 = vector.load %arg1[%c0, %c0_0, %c0_1, %c0_2] : memref<1x16x16x4xf32, #tpu.memory_space<vmem>>, vector<1x16x16x4xf32>
    %1 = vector.shape_cast %0 : vector<1x16x16x4xf32> to vector<16x16x4xf32>
    %cst = arith.constant 0.000000e+00 : f32
    %2 = vector.broadcast %cst : f32 to vector<18x18x4xf32>
    %c0_3 = arith.constant 0 : index
    %c0_4 = arith.constant 0 : index
    %c0_5 = arith.constant 0 : index
    %3 = vector.load %arg9[%c0_3, %c0_4, %c0_5] : memref<18x18x4xf32, #tpu.memory_space<vmem>>, vector<18x18x4xf32>
    tpu.vector_store %arg9[%c0_3, %c0_4, %c0_5], %2 {strides = array<i32>} : memref<18x18x4xf32, #tpu.memory_space<vmem>>, vector<18x18x4xf32>,
    %c1 = arith.constant 1 : index
    %c1_6 = arith.constant 1 : index
    %c0_7 = arith.constant 0 : index
    %4 = vector.load %arg9[%c1, %c1_6, %c0_7] : memref<18x18x4xf32, #tpu.memory_space<vmem>>, vector<16x16x4xf32>
    tpu.vector_store %arg9[%c1, %c1_6, %c0_7], %1 {strides = array<i32>} : memref<18x18x4xf32, #tpu.memory_space<vmem>>, vector<16x16x4xf32>,
    %c0_8 = arith.constant 0 : index
    %c0_9 = arith.constant 0 : index
    %c0_10 = arith.constant 0 : index
    %5 = vector.load %arg9[%c0_8, %c0_9, %c0_10] : memref<18x18x4xf32, #tpu.memory_space<vmem>>, vector<18x18x4xf32>
    %c0_11 = arith.constant 0 : index
    %c0_12 = arith.constant 0 : index
    %6 = vector.load %arg2[%c0_11, %c0_12] : memref<36x8xf32, #tpu.memory_space<vmem>>, vector<36x8xf32>
    %c0_13 = arith.constant 0 : index
    %c0_14 = arith.constant 0 : index
    %7 = vector.load %arg3[%c0_13, %c0_14] : memref<1x8xf32, #tpu.memory_space<vmem>>, vector<1x8xf32>
    %8 = vector.extract_strided_slice %5 {offsets = [0, 0, 0], sizes = [16, 16, 4], strides = [1, 1, 1]} : vector<18x18x4xf32> to vector<16x16x4xf32>
    %9 = vector.shape_cast %8 : vector<16x16x4xf32> to vector<256x4xf32>
    %c0_15 = arith.constant 0 : index
    %c0_16 = arith.constant 0 : index
    %10 = vector.load %arg11[%c0_15, %c0_16] : memref<256x72xf32, #tpu.memory_space<vmem>>, vector<256x4xf32>
    tpu.vector_store %arg11[%c0_15, %c0_16], %9 {strides = array<i32>} : memref<256x72xf32, #tpu.memory_space<vmem>>, vector<256x4xf32>,
    %11 = vector.extract_strided_slice %5 {offsets = [0, 1, 0], sizes = [16, 16, 4], strides = [1, 1, 1]} : vector<18x18x4xf32> to vector<16x16x4xf32>
    %12 = vector.shape_cast %11 : vector<16x16x4xf32> to vector<256x4xf32>
    %c0_17 = arith.constant 0 : index
    %c4 = arith.constant 4 : index
    %13 = vector.load %arg11[%c0_17, %c4] : memref<256x72xf32, #tpu.memory_space<vmem>>, vector<256x4xf32>
    tpu.vector_store %arg11[%c0_17, %c4], %12 {strides = array<i32>} : memref<256x72xf32, #tpu.memory_space<vmem>>, vector<256x4xf32>,
    %14 = vector.extract_strided_slice %5 {offsets = [0, 2, 0], sizes = [16, 16, 4], strides = [1, 1, 1]} : vector<18x18x4xf32> to vector<16x16x4xf32>
    %15 = vector.shape_cast %14 : vector<16x16x4xf32> to vector<256x4xf32>
    %c0_18 = arith.constant 0 : index
    %c8 = arith.constant 8 : index
    %16 = vector.load %arg11[%c0_18, %c8] : memref<256x72xf32, #tpu.memory_space<vmem>>, vector<256x4xf32>
    tpu.vector_store %arg11[%c0_18, %c8], %15 {strides = array<i32>} : memref<256x72xf32, #tpu.memory_space<vmem>>, vector<256x4xf32>,
    %17 = vector.extract_strided_slice %5 {offsets = [1, 0, 0], sizes = [16, 16, 4], strides = [1, 1, 1]} : vector<18x18x4xf32> to vector<16x16x4xf32>
    %18 = vector.shape_cast %17 : vector<16x16x4xf32> to vector<256x4xf32>
    %c0_19 = arith.constant 0 : index
    %c12 = arith.constant 12 : index
    %19 = vector.load %arg11[%c0_19, %c12] : memref<256x72xf32, #tpu.memory_space<vmem>>, vector<256x4xf32>
    tpu.vector_store %arg11[%c0_19, %c12], %18 {strides = array<i32>} : memref<256x72xf32, #tpu.memory_space<vmem>>, vector<256x4xf32>,
    %20 = vector.extract_strided_slice %5 {offsets = [1, 1, 0], sizes = [16, 16, 4], strides = [1, 1, 1]} : vector<18x18x4xf32> to vector<16x16x4xf32>
    %21 = vector.shape_cast %20 : vector<16x16x4xf32> to vector<256x4xf32>
    %c0_20 = arith.constant 0 : index
    %c16 = arith.constant 16 : index
    %22 = vector.load %arg11[%c0_20, %c16] : memref<256x72xf32, #tpu.memory_space<vmem>>, vector<256x4xf32>
    tpu.vector_store %arg11[%c0_20, %c16], %21 {strides = array<i32>} : memref<256x72xf32, #tpu.memory_space<vmem>>, vector<256x4xf32>,
    %23 = vector.extract_strided_slice %5 {offsets = [1, 2, 0], sizes = [16, 16, 4], strides = [1, 1, 1]} : vector<18x18x4xf32> to vector<16x16x4xf32>
    %24 = vector.shape_cast %23 : vector<16x16x4xf32> to vector<256x4xf32>
    %c0_21 = arith.constant 0 : index
    %c20 = arith.constant 20 : index
    %25 = vector.load %arg11[%c0_21, %c20] : memref<256x72xf32, #tpu.memory_space<vmem>>, vector<256x4xf32>
    tpu.vector_store %arg11[%c0_21, %c20], %24 {strides = array<i32>} : memref<256x72xf32, #tpu.memory_space<vmem>>, vector<256x4xf32>,
    %26 = vector.extract_strided_slice %5 {offsets = [2, 0, 0], sizes = [16, 16, 4], strides = [1, 1, 1]} : vector<18x18x4xf32> to vector<16x16x4xf32>
    %27 = vector.shape_cast %26 : vector<16x16x4xf32> to vector<256x4xf32>
    %c0_22 = arith.constant 0 : index
    %c24 = arith.constant 24 : index
    %28 = vector.load %arg11[%c0_22, %c24] : memref<256x72xf32, #tpu.memory_space<vmem>>, vector<256x4xf32>
    tpu.vector_store %arg11[%c0_22, %c24], %27 {strides = array<i32>} : memref<256x72xf32, #tpu.memory_space<vmem>>, vector<256x4xf32>,
    %29 = vector.extract_strided_slice %5 {offsets = [2, 1, 0], sizes = [16, 16, 4], strides = [1, 1, 1]} : vector<18x18x4xf32> to vector<16x16x4xf32>
    %30 = vector.shape_cast %29 : vector<16x16x4xf32> to vector<256x4xf32>
    %c0_23 = arith.constant 0 : index
    %c28 = arith.constant 28 : index
    %31 = vector.load %arg11[%c0_23, %c28] : memref<256x72xf32, #tpu.memory_space<vmem>>, vector<256x4xf32>
    tpu.vector_store %arg11[%c0_23, %c28], %30 {strides = array<i32>} : memref<256x72xf32, #tpu.memory_space<vmem>>, vector<256x4xf32>,
    %32 = vector.extract_strided_slice %5 {offsets = [2, 2, 0], sizes = [16, 16, 4], strides = [1, 1, 1]} : vector<18x18x4xf32> to vector<16x16x4xf32>
    %33 = vector.shape_cast %32 : vector<16x16x4xf32> to vector<256x4xf32>
    %c0_24 = arith.constant 0 : index
    %c32 = arith.constant 32 : index
    %34 = vector.load %arg11[%c0_24, %c32] : memref<256x72xf32, #tpu.memory_space<vmem>>, vector<256x4xf32>
    tpu.vector_store %arg11[%c0_24, %c32], %33 {strides = array<i32>} : memref<256x72xf32, #tpu.memory_space<vmem>>, vector<256x4xf32>,
    %c0_25 = arith.constant 0 : index
    %c0_26 = arith.constant 0 : index
    %35 = vector.load %arg11[%c0_25, %c0_26] : memref<256x72xf32, #tpu.memory_space<vmem>>, vector<256x36xf32>
    %cst_27 = arith.constant dense<0.000000e+00> : vector<256x8xf32>
    %36 = tpu.matmul %35, %6, %cst_27 {dimension_numbers = #tpu.dot_dimension_numbers<[1], [0], [0], [1], [0, 0, 1, 1], [], []>} : vector<256x36xf32>, vector<36x8xf32>, vector<256x8xf32> -> vector<256x8xf32>
    %37 = vector.broadcast %7 : vector<1x8xf32> to vector<256x8xf32>
    %38 = arith.addf %36, %37 : vector<256x8xf32>
    %cst_28 = arith.constant 0.000000e+00 : f32
    %39 = vector.broadcast %cst_28 : f32 to vector<256x8xf32>
    %40 = arith.cmpf ogt, %38, %39 : vector<256x8xf32>
    %cst_29 = arith.constant 0.00999999977 : f32
    %41 = vector.broadcast %cst_29 : f32 to vector<256x8xf32>
    %42 = arith.mulf %41, %38 : vector<256x8xf32>
    %43 = arith.select %40, %38, %42 : vector<256x8xi1>, vector<256x8xf32>
    %cst_30 = arith.constant 0.000000e+00 : f32
    %44 = vector.broadcast %cst_30 : f32 to vector<18x18x8xf32>
    %c0_31 = arith.constant 0 : index
    %c0_32 = arith.constant 0 : index
    %c0_33 = arith.constant 0 : index
    %45 = vector.load %arg10[%c0_31, %c0_32, %c0_33] : memref<18x18x8xf32, #tpu.memory_space<vmem>>, vector<18x18x8xf32>
    tpu.vector_store %arg10[%c0_31, %c0_32, %c0_33], %44 {strides = array<i32>} : memref<18x18x8xf32, #tpu.memory_space<vmem>>, vector<18x18x8xf32>,
    %46 = vector.shape_cast %43 : vector<256x8xf32> to vector<16x16x8xf32>
    %c1_34 = arith.constant 1 : index
    %c1_35 = arith.constant 1 : index
    %c0_36 = arith.constant 0 : index
    %47 = vector.load %arg10[%c1_34, %c1_35, %c0_36] : memref<18x18x8xf32, #tpu.memory_space<vmem>>, vector<16x16x8xf32>
    tpu.vector_store %arg10[%c1_34, %c1_35, %c0_36], %46 {strides = array<i32>} : memref<18x18x8xf32, #tpu.memory_space<vmem>>, vector<16x16x8xf32>,
    %c0_37 = arith.constant 0 : index
    %c0_38 = arith.constant 0 : index
    %c0_39 = arith.constant 0 : index
    %48 = vector.load %arg10[%c0_37, %c0_38, %c0_39] : memref<18x18x8xf32, #tpu.memory_space<vmem>>, vector<18x18x8xf32>
    %c0_40 = arith.constant 0 : index
    %c0_41 = arith.constant 0 : index
    %49 = vector.load %arg4[%c0_40, %c0_41] : memref<72x8xf32, #tpu.memory_space<vmem>>, vector<72x8xf32>
    %c0_42 = arith.constant 0 : index
    %c0_43 = arith.constant 0 : index
    %50 = vector.load %arg5[%c0_42, %c0_43] : memref<1x8xf32, #tpu.memory_space<vmem>>, vector<1x8xf32>
    %51 = vector.extract_strided_slice %48 {offsets = [0, 0, 0], sizes = [16, 16, 8], strides = [1, 1, 1]} : vector<18x18x8xf32> to vector<16x16x8xf32>
    %52 = vector.shape_cast %51 : vector<16x16x8xf32> to vector<256x8xf32>
    %c0_44 = arith.constant 0 : index
    %c0_45 = arith.constant 0 : index
    %53 = vector.load %arg11[%c0_44, %c0_45] : memref<256x72xf32, #tpu.memory_space<vmem>>, vector<256x8xf32>
    tpu.vector_store %arg11[%c0_44, %c0_45], %52 {strides = array<i32>} : memref<256x72xf32, #tpu.memory_space<vmem>>, vector<256x8xf32>,
    %54 = vector.extract_strided_slice %48 {offsets = [0, 1, 0], sizes = [16, 16, 8], strides = [1, 1, 1]} : vector<18x18x8xf32> to vector<16x16x8xf32>
    %55 = vector.shape_cast %54 : vector<16x16x8xf32> to vector<256x8xf32>
    %c0_46 = arith.constant 0 : index
    %c8_47 = arith.constant 8 : index
    %56 = vector.load %arg11[%c0_46, %c8_47] : memref<256x72xf32, #tpu.memory_space<vmem>>, vector<256x8xf32>
    tpu.vector_store %arg11[%c0_46, %c8_47], %55 {strides = array<i32>} : memref<256x72xf32, #tpu.memory_space<vmem>>, vector<256x8xf32>,
    %57 = vector.extract_strided_slice %48 {offsets = [0, 2, 0], sizes = [16, 16, 8], strides = [1, 1, 1]} : vector<18x18x8xf32> to vector<16x16x8xf32>
    %58 = vector.shape_cast %57 : vector<16x16x8xf32> to vector<256x8xf32>
    %c0_48 = arith.constant 0 : index
    %c16_49 = arith.constant 16 : index
    %59 = vector.load %arg11[%c0_48, %c16_49] : memref<256x72xf32, #tpu.memory_space<vmem>>, vector<256x8xf32>
    tpu.vector_store %arg11[%c0_48, %c16_49], %58 {strides = array<i32>} : memref<256x72xf32, #tpu.memory_space<vmem>>, vector<256x8xf32>,
    %60 = vector.extract_strided_slice %48 {offsets = [1, 0, 0], sizes = [16, 16, 8], strides = [1, 1, 1]} : vector<18x18x8xf32> to vector<16x16x8xf32>
    %61 = vector.shape_cast %60 : vector<16x16x8xf32> to vector<256x8xf32>
    %c0_50 = arith.constant 0 : index
    %c24_51 = arith.constant 24 : index
    %62 = vector.load %arg11[%c0_50, %c24_51] : memref<256x72xf32, #tpu.memory_space<vmem>>, vector<256x8xf32>
    tpu.vector_store %arg11[%c0_50, %c24_51], %61 {strides = array<i32>} : memref<256x72xf32, #tpu.memory_space<vmem>>, vector<256x8xf32>,
    %63 = vector.extract_strided_slice %48 {offsets = [1, 1, 0], sizes = [16, 16, 8], strides = [1, 1, 1]} : vector<18x18x8xf32> to vector<16x16x8xf32>
    %64 = vector.shape_cast %63 : vector<16x16x8xf32> to vector<256x8xf32>
    %c0_52 = arith.constant 0 : index
    %c32_53 = arith.constant 32 : index
    %65 = vector.load %arg11[%c0_52, %c32_53] : memref<256x72xf32, #tpu.memory_space<vmem>>, vector<256x8xf32>
    tpu.vector_store %arg11[%c0_52, %c32_53], %64 {strides = array<i32>} : memref<256x72xf32, #tpu.memory_space<vmem>>, vector<256x8xf32>,
    %66 = vector.extract_strided_slice %48 {offsets = [1, 2, 0], sizes = [16, 16, 8], strides = [1, 1, 1]} : vector<18x18x8xf32> to vector<16x16x8xf32>
    %67 = vector.shape_cast %66 : vector<16x16x8xf32> to vector<256x8xf32>
    %c0_54 = arith.constant 0 : index
    %c40 = arith.constant 40 : index
    %68 = vector.load %arg11[%c0_54, %c40] : memref<256x72xf32, #tpu.memory_space<vmem>>, vector<256x8xf32>
    tpu.vector_store %arg11[%c0_54, %c40], %67 {strides = array<i32>} : memref<256x72xf32, #tpu.memory_space<vmem>>, vector<256x8xf32>,
    %69 = vector.extract_strided_slice %48 {offsets = [2, 0, 0], sizes = [16, 16, 8], strides = [1, 1, 1]} : vector<18x18x8xf32> to vector<16x16x8xf32>
    %70 = vector.shape_cast %69 : vector<16x16x8xf32> to vector<256x8xf32>
    %c0_55 = arith.constant 0 : index
    %c48 = arith.constant 48 : index
    %71 = vector.load %arg11[%c0_55, %c48] : memref<256x72xf32, #tpu.memory_space<vmem>>, vector<256x8xf32>
    tpu.vector_store %arg11[%c0_55, %c48], %70 {strides = array<i32>} : memref<256x72xf32, #tpu.memory_space<vmem>>, vector<256x8xf32>,
    %72 = vector.extract_strided_slice %48 {offsets = [2, 1, 0], sizes = [16, 16, 8], strides = [1, 1, 1]} : vector<18x18x8xf32> to vector<16x16x8xf32>
    %73 = vector.shape_cast %72 : vector<16x16x8xf32> to vector<256x8xf32>
    %c0_56 = arith.constant 0 : index
    %c56 = arith.constant 56 : index
    %74 = vector.load %arg11[%c0_56, %c56] : memref<256x72xf32, #tpu.memory_space<vmem>>, vector<256x8xf32>
    tpu.vector_store %arg11[%c0_56, %c56], %73 {strides = array<i32>} : memref<256x72xf32, #tpu.memory_space<vmem>>, vector<256x8xf32>,
    %75 = vector.extract_strided_slice %48 {offsets = [2, 2, 0], sizes = [16, 16, 8], strides = [1, 1, 1]} : vector<18x18x8xf32> to vector<16x16x8xf32>
    %76 = vector.shape_cast %75 : vector<16x16x8xf32> to vector<256x8xf32>
    %c0_57 = arith.constant 0 : index
    %c64 = arith.constant 64 : index
    %77 = vector.load %arg11[%c0_57, %c64] : memref<256x72xf32, #tpu.memory_space<vmem>>, vector<256x8xf32>
    tpu.vector_store %arg11[%c0_57, %c64], %76 {strides = array<i32>} : memref<256x72xf32, #tpu.memory_space<vmem>>, vector<256x8xf32>,
    %c0_58 = arith.constant 0 : index
    %c0_59 = arith.constant 0 : index
    %78 = vector.load %arg11[%c0_58, %c0_59] : memref<256x72xf32, #tpu.memory_space<vmem>>, vector<256x72xf32>
    %cst_60 = arith.constant dense<0.000000e+00> : vector<256x8xf32>
    %79 = tpu.matmul %78, %49, %cst_60 {dimension_numbers = #tpu.dot_dimension_numbers<[1], [0], [0], [1], [0, 0, 1, 1], [], []>} : vector<256x72xf32>, vector<72x8xf32>, vector<256x8xf32> -> vector<256x8xf32>
    %80 = vector.broadcast %50 : vector<1x8xf32> to vector<256x8xf32>
    %81 = arith.addf %79, %80 : vector<256x8xf32>
    %cst_61 = arith.constant 0.000000e+00 : f32
    %82 = vector.broadcast %cst_61 : f32 to vector<256x8xf32>
    %83 = arith.cmpf ogt, %81, %82 : vector<256x8xf32>
    %cst_62 = arith.constant 0.00999999977 : f32
    %84 = vector.broadcast %cst_62 : f32 to vector<256x8xf32>
    %85 = arith.mulf %84, %81 : vector<256x8xf32>
    %86 = arith.select %83, %81, %85 : vector<256x8xi1>, vector<256x8xf32>
    %87 = vector.shape_cast %86 : vector<256x8xf32> to vector<1x16x16x8xf32>
    %c0_63 = arith.constant 0 : index
    %c0_64 = arith.constant 0 : index
    %c0_65 = arith.constant 0 : index
    %c0_66 = arith.constant 0 : index
    %88 = vector.load %arg7[%c0_63, %c0_64, %c0_65, %c0_66] : memref<1x16x16x8xf32, #tpu.memory_space<vmem>>, vector<1x16x16x8xf32>
    tpu.vector_store %arg7[%c0_63, %c0_64, %c0_65, %c0_66], %87 {strides = array<i32>} : memref<1x16x16x8xf32, #tpu.memory_space<vmem>>, vector<1x16x16x8xf32>,
    %89 = vector.shape_cast %1 : vector<16x16x4xf32> to vector<256x4xf32>
    %c0_67 = arith.constant 0 : index
    %c0_68 = arith.constant 0 : index
    %90 = vector.load %arg6[%c0_67, %c0_68] : memref<4x8xf32, #tpu.memory_space<vmem>>, vector<4x8xf32>
    %cst_69 = arith.constant dense<0.000000e+00> : vector<256x8xf32>
    %91 = tpu.matmul %89, %90, %cst_69 {dimension_numbers = #tpu.dot_dimension_numbers<[1], [0], [0], [1], [0, 0, 1, 1], [], []>} : vector<256x4xf32>, vector<4x8xf32>, vector<256x8xf32> -> vector<256x8xf32>
    %cst_70 = arith.constant dense<0.000000e+00> : vector<8xf32>
    %92 = vector.multi_reduction <add>, %91, %cst_70 [0] : vector<256x8xf32> to vector<8xf32>
    %93 = vector.shape_cast %92 : vector<8xf32> to vector<1x8xf32>
    %c0_71 = arith.constant 0 : index
    %c0_72 = arith.constant 0 : index
    %c0_73 = arith.constant 0 : index
    %94 = vector.load %arg8[%c0_71, %c0_72, %c0_73] : memref<1x2x8xf32, #tpu.memory_space<vmem>>, vector<1x1x8xf32>
    %95 = vector.shape_cast %94 : vector<1x1x8xf32> to vector<1x8xf32>
    %96 = vector.shape_cast %93 : vector<1x8xf32> to vector<1x1x8xf32>
    tpu.vector_store %arg8[%c0_71, %c0_72, %c0_73], %96 {strides = array<i32>} : memref<1x2x8xf32, #tpu.memory_space<vmem>>, vector<1x1x8xf32>,
    %97 = arith.mulf %91, %91 : vector<256x8xf32>
    %cst_74 = arith.constant dense<0.000000e+00> : vector<8xf32>
    %98 = vector.multi_reduction <add>, %97, %cst_74 [0] : vector<256x8xf32> to vector<8xf32>
    %99 = vector.shape_cast %98 : vector<8xf32> to vector<1x8xf32>
    %c0_75 = arith.constant 0 : index
    %c1_76 = arith.constant 1 : index
    %c0_77 = arith.constant 0 : index
    %100 = vector.load %arg8[%c0_75, %c1_76, %c0_77] : memref<1x2x8xf32, #tpu.memory_space<vmem>>, vector<1x1x8xf32>
    %101 = vector.shape_cast %100 : vector<1x1x8xf32> to vector<1x8xf32>
    %102 = vector.shape_cast %99 : vector<1x8xf32> to vector<1x1x8xf32>
    tpu.vector_store %arg8[%c0_75, %c1_76, %c0_77], %102 {strides = array<i32>} : memref<1x2x8xf32, #tpu.memory_space<vmem>>, vector<1x1x8xf32>,
    return
  }
  func.func @transform_0(%arg0: i32) -> (i32, i32, i32, i32) {
    %c0_i32 = arith.constant 0 : i32
    %c0_i32_0 = arith.constant 0 : i32
    %c0_i32_1 = arith.constant 0 : i32
    %c0_i32_2 = arith.constant 0 : i32
    return %arg0, %c0_i32, %c0_i32_0, %c0_i32_1 : i32, i32, i32, i32
  }
  func.func @transform_1(%arg0: i32) -> (i32, i32) {
    %c0_i32 = arith.constant 0 : i32
    %c0_i32_0 = arith.constant 0 : i32
    %c0_i32_1 = arith.constant 0 : i32
    return %c0_i32, %c0_i32_0 : i32, i32
  }
  func.func @transform_2(%arg0: i32) -> (i32, i32) {
    %c0_i32 = arith.constant 0 : i32
    %c0_i32_0 = arith.constant 0 : i32
    %c0_i32_1 = arith.constant 0 : i32
    return %c0_i32, %c0_i32_0 : i32, i32
  }
  func.func @transform_3(%arg0: i32) -> (i32, i32) {
    %c0_i32 = arith.constant 0 : i32
    %c0_i32_0 = arith.constant 0 : i32
    %c0_i32_1 = arith.constant 0 : i32
    return %c0_i32, %c0_i32_0 : i32, i32
  }
  func.func @transform_4(%arg0: i32) -> (i32, i32) {
    %c0_i32 = arith.constant 0 : i32
    %c0_i32_0 = arith.constant 0 : i32
    %c0_i32_1 = arith.constant 0 : i32
    return %c0_i32, %c0_i32_0 : i32, i32
  }
  func.func @transform_5(%arg0: i32) -> (i32, i32) {
    %c0_i32 = arith.constant 0 : i32
    %c0_i32_0 = arith.constant 0 : i32
    %c0_i32_1 = arith.constant 0 : i32
    return %c0_i32, %c0_i32_0 : i32, i32
  }
  func.func @transform_6(%arg0: i32) -> (i32, i32, i32, i32) {
    %c0_i32 = arith.constant 0 : i32
    %c0_i32_0 = arith.constant 0 : i32
    %c0_i32_1 = arith.constant 0 : i32
    %c0_i32_2 = arith.constant 0 : i32
    return %arg0, %c0_i32, %c0_i32_0, %c0_i32_1 : i32, i32, i32, i32
  }
  func.func @transform_7(%arg0: i32) -> (i32, i32, i32) {
    %c0_i32 = arith.constant 0 : i32
    %c0_i32_0 = arith.constant 0 : i32
    %c0_i32_1 = arith.constant 0 : i32
    return %arg0, %c0_i32, %c0_i32_0 : i32, i32, i32
  }
}

module attributes {stable_mosaic.version = 11 : i64} {
  func.func @_bn_add_lrelu_kernel(%arg0: i32, %arg1: memref<1x16x16x4xf32, #tpu.memory_space<vmem>>, %arg2: memref<4x8xf32, #tpu.memory_space<vmem>>, %arg3: memref<1x8xf32, #tpu.memory_space<vmem>>, %arg4: memref<1x16x16x8xf32, #tpu.memory_space<vmem>>, %arg5: memref<1x16x16x8xf32, #tpu.memory_space<vmem>>) attributes {dimension_semantics = [#tpu.dimension_semantics<parallel>], iteration_bounds = array<i64: 2>, scalar_prefetch = 0 : i64, scratch_operands = 0 : i64, tpu.core_type = #tpu.core_type<tc>, window_params = [{transform_indices = @transform_0, window_bounds = array<i64: 1, 16, 16, 4>}, {pipeline_mode = #tpu.pipeline_mode<synchronous>, transform_indices = @transform_1, window_bounds = array<i64: 4, 8>}, {pipeline_mode = #tpu.pipeline_mode<synchronous>, transform_indices = @transform_2, window_bounds = array<i64: 1, 8>}, {transform_indices = @transform_3, window_bounds = array<i64: 1, 16, 16, 8>}, {transform_indices = @transform_4, window_bounds = array<i64: 1, 16, 16, 8>}]} {
    %c0 = arith.constant 0 : index
    %c0_0 = arith.constant 0 : index
    %c0_1 = arith.constant 0 : index
    %c0_2 = arith.constant 0 : index
    %0 = vector.load %arg1[%c0, %c0_0, %c0_1, %c0_2] : memref<1x16x16x4xf32, #tpu.memory_space<vmem>>, vector<1x16x16x4xf32>
    %1 = vector.shape_cast %0 : vector<1x16x16x4xf32> to vector<16x16x4xf32>
    %2 = vector.shape_cast %1 : vector<16x16x4xf32> to vector<256x4xf32>
    %c0_3 = arith.constant 0 : index
    %c0_4 = arith.constant 0 : index
    %3 = vector.load %arg2[%c0_3, %c0_4] : memref<4x8xf32, #tpu.memory_space<vmem>>, vector<4x8xf32>
    %cst = arith.constant dense<0.000000e+00> : vector<256x8xf32>
    %4 = tpu.matmul %2, %3, %cst {dimension_numbers = #tpu.dot_dimension_numbers<[1], [0], [0], [1], [0, 0, 1, 1], [], []>} : vector<256x4xf32>, vector<4x8xf32>, vector<256x8xf32> -> vector<256x8xf32>
    %c0_5 = arith.constant 0 : index
    %c0_6 = arith.constant 0 : index
    %5 = vector.load %arg3[%c0_5, %c0_6] : memref<1x8xf32, #tpu.memory_space<vmem>>, vector<1x8xf32>
    %6 = vector.broadcast %5 : vector<1x8xf32> to vector<256x8xf32>
    %7 = arith.addf %4, %6 : vector<256x8xf32>
    %c0_7 = arith.constant 0 : index
    %c0_8 = arith.constant 0 : index
    %c0_9 = arith.constant 0 : index
    %c0_10 = arith.constant 0 : index
    %8 = vector.load %arg4[%c0_7, %c0_8, %c0_9, %c0_10] : memref<1x16x16x8xf32, #tpu.memory_space<vmem>>, vector<1x16x16x8xf32>
    %9 = vector.shape_cast %8 : vector<1x16x16x8xf32> to vector<16x16x8xf32>
    %10 = vector.shape_cast %9 : vector<16x16x8xf32> to vector<256x8xf32>
    %11 = arith.addf %10, %7 : vector<256x8xf32>
    %cst_11 = arith.constant 0.000000e+00 : f32
    %12 = vector.broadcast %cst_11 : f32 to vector<256x8xf32>
    %13 = arith.cmpf ogt, %11, %12 : vector<256x8xf32>
    %cst_12 = arith.constant 0.00999999977 : f32
    %14 = vector.broadcast %cst_12 : f32 to vector<256x8xf32>
    %15 = arith.mulf %14, %11 : vector<256x8xf32>
    %16 = arith.select %13, %11, %15 : vector<256x8xi1>, vector<256x8xf32>
    %17 = vector.shape_cast %16 : vector<256x8xf32> to vector<1x16x16x8xf32>
    %c0_13 = arith.constant 0 : index
    %c0_14 = arith.constant 0 : index
    %c0_15 = arith.constant 0 : index
    %c0_16 = arith.constant 0 : index
    %18 = vector.load %arg5[%c0_13, %c0_14, %c0_15, %c0_16] : memref<1x16x16x8xf32, #tpu.memory_space<vmem>>, vector<1x16x16x8xf32>
    tpu.vector_store %arg5[%c0_13, %c0_14, %c0_15, %c0_16], %17 {strides = array<i32>} : memref<1x16x16x8xf32, #tpu.memory_space<vmem>>, vector<1x16x16x8xf32>,
    return
  }
  func.func @transform_0(%arg0: i32) -> (i32, i32, i32, i32) {
    %c0_i32 = arith.constant 0 : i32
    %c0_i32_0 = arith.constant 0 : i32
    %c0_i32_1 = arith.constant 0 : i32
    %c0_i32_2 = arith.constant 0 : i32
    return %arg0, %c0_i32, %c0_i32_0, %c0_i32_1 : i32, i32, i32, i32
  }
  func.func @transform_1(%arg0: i32) -> (i32, i32) {
    %c0_i32 = arith.constant 0 : i32
    %c0_i32_0 = arith.constant 0 : i32
    %c0_i32_1 = arith.constant 0 : i32
    return %c0_i32, %c0_i32_0 : i32, i32
  }
  func.func @transform_2(%arg0: i32) -> (i32, i32) {
    %c0_i32 = arith.constant 0 : i32
    %c0_i32_0 = arith.constant 0 : i32
    %c0_i32_1 = arith.constant 0 : i32
    return %c0_i32, %c0_i32_0 : i32, i32
  }
  func.func @transform_3(%arg0: i32) -> (i32, i32, i32, i32) {
    %c0_i32 = arith.constant 0 : i32
    %c0_i32_0 = arith.constant 0 : i32
    %c0_i32_1 = arith.constant 0 : i32
    %c0_i32_2 = arith.constant 0 : i32
    return %arg0, %c0_i32, %c0_i32_0, %c0_i32_1 : i32, i32, i32, i32
  }
  func.func @transform_4(%arg0: i32) -> (i32, i32, i32, i32) {
    %c0_i32 = arith.constant 0 : i32
    %c0_i32_0 = arith.constant 0 : i32
    %c0_i32_1 = arith.constant 0 : i32
    %c0_i32_2 = arith.constant 0 : i32
    return %arg0, %c0_i32, %c0_i32_0, %c0_i32_1 : i32, i32, i32, i32
  }
}

</mosaic_0001>

<bundles_post_ra>
// kernel: res_c2d_block_forward.3
= control target key start
LH: loop header
LB: loop body
LE: loop exit
PB: predicated region body
PF: predicated region fallthrough
CT: control target
= control target key end

     0   :  { %s1020_s15 = smov 0   ;;  %s1251_s0 = inlined_call_operand.vmem [shape: f32[2,16,16,4], index: 0, kind: input, shape index: {}]   ;;  %s1252_s1 = inlined_call_operand.vmem [shape: f32[4,8], index: 1, kind: input, shape index: {}]   ;;  %s1253_s2 = inlined_call_operand.vmem [shape: f32[1,8], index: 2, kind: input, shape index: {}]   ;;  %s1254_s3 = inlined_call_operand.vmem [shape: f32[2,16,16,8], index: 3, kind: input, shape index: {}]   ;;  %s1255_s4 = inlined_call_operand.vmem [shape: f32[2,16,16,8], index: 4, kind: output, shape index: {}]  }
   0x1 LB: > { %s844_s16 = sadd.s32 4294967295, %s993_s15   ;;  %p848_p0 = scmp.ge.s32.totalorder %s993_s15, 1  ;;  %s993_s15 = sphi %s1020_s15, %s14_s15  }
   0x2   : > { %p172_p1 = scmp.lt.s32.totalorder %s993_s15, 3 }
   0x4   : > { %p173_p2 = pnand %p848_p0, %p172_p1 }
   0x5   : > { %v250_v0 = vld [vmem:[%s1252_s1] sm:$0xf] (!%p173_p2)  ;;  %vm355_vm0 = vcmask (!%p173_p2), 1043456   ;;  %p203_p3 = scmp.lt.s32.totalorder (!%p173_p2), %s844_s16, 1  ;;  %vm258_vm1 = vcmask (!%p173_p2), 31744   ;;  %vm744_vm2 = vcmask (!%p173_p2), 64512  }
   0x6   : > { %176 = sbr.rel (%p173_p2) target bundleno = 276 (0x114), region = 36  ;;  %927 = vmatprep.subr.msk.mxu0 (!%p173_p2), %vm355_vm0, %v250_v0  ;;  %977 = vmatprep.subr.msk.mxu1 (!%p173_p2), %vm355_vm0, %v250_v0  ;;  %v1112_v33 = vld [vmem:[%s1253_s2] ss:$0 sm:$0xff] (!%p173_p2) }
   0x7   : > { %928 = vmatpush3.msk.msra.mxu0 (!%p173_p2), %vm355_vm0, %v250_v0  ;;  %978 = vmatpush3.msk.msra.mxu1 (!%p173_p2), %vm355_vm0, %v250_v0 }
   0xd   : > { %s1257_s16 = smov (!%p203_p3, %s844_s16), 1 }
   0xe   : > { %s1031_s19 = sshll.u32 %s1257_s16, 8 }
   0xf   : > { %s1037_s22 = scalar_lea.vmem %s1251_s0, %s1031_s19  ;;  %s1107_s25 = scalar_lea.vmem %s1254_s3, %s1031_s19 }
  0x10   : > { %v218_v1 = vld [vmem:[%s1037_s22] sm:$0xff]  ;;  %v219_v3 = vld [vmem:[%s1037_s22 + $0x8] sm:$0xff]  ;;  %v220_v5 = vld [vmem:[%s1037_s22 + $0x10] sm:$0xff]  ;;  %s1128_s30 = scalar_lea.vmem %s1255_s4, %s1031_s19 }
  0x11   : > { %v234_v2 = vld [vmem:[%s1037_s22 + $0x80] sm:$0xff]  ;;  %929 = vmatprep.mubr.msk.f32.mxu0 %vm258_vm1, %v218_v1  ;;  %v235_v4 = vld [vmem:[%s1037_s22 + $0x88] sm:$0xff]  ;;  %v236_v6 = vld [vmem:[%s1037_s22 + $0x90] sm:$0xff] }
  0x12   : > { %953 = vmatprep.mubr.msk.f32.mxu1 %vm258_vm1, %v234_v2  ;;  %930 = vmatmul.mubr.msk.f32.vlgmr.msra.gmra.mrb[0].mxu0 %vm258_vm1, %v219_v3  ;;  %v221_v7 = vld [vmem:[%s1037_s22 + $0x18] sm:$0xff]  ;;  %v222_v9 = vld [vmem:[%s1037_s22 + $0x20] sm:$0xff]  ;;  %v223_v11 = vld [vmem:[%s1037_s22 + $0x28] sm:$0xff] }
  0x13   : > { %954 = vmatmul.mubr.msk.f32.vlgmr.msra.gmra.mrb[0].mxu1 %vm258_vm1, %v235_v4  ;;  %932 = vmatprep.mubr.msk.f32.mxu0 %vm258_vm1, %v220_v5  ;;  %v237_v8 = vld [vmem:[%s1037_s22 + $0x98] sm:$0xff]  ;;  %v238_v10 = vld [vmem:[%s1037_s22 + $0xa0] sm:$0xff]  ;;  %v239_v12 = vld [vmem:[%s1037_s22 + $0xa8] sm:$0xff] }
  0x14   : > { %956 = vmatprep.mubr.msk.f32.mxu1 %vm258_vm1, %v236_v6  ;;  %v224_v13 = vld [vmem:[%s1037_s22 + $0x30] sm:$0xff]  ;;  %v225_v15 = vld [vmem:[%s1037_s22 + $0x38] sm:$0xff]  ;;  %v226_v17 = vld [vmem:[%s1037_s22 + $0x40] sm:$0xff] }
  0x15   : > { %v240_v14 = vld [vmem:[%s1037_s22 + $0xb0] sm:$0xff]  ;;  %v241_v16 = vld [vmem:[%s1037_s22 + $0xb8] sm:$0xff]  ;;  %v242_v18 = vld [vmem:[%s1037_s22 + $0xc0] sm:$0xff] }
  0x16   : > { %933 = vmatmul.mubr.msk.f32.gmra.mrb[2].mxu0 %vm258_vm1, %v221_v7  ;;  %v227_v19 = vld [vmem:[%s1037_s22 + $0x48] sm:$0xff]  ;;  %v228_v21 = vld [vmem:[%s1037_s22 + $0x50] sm:$0xff]  ;;  %v229_v23 = vld [vmem:[%s1037_s22 + $0x58] sm:$0xff] }
  0x17   : > { %957 = vmatmul.mubr.msk.f32.gmra.mrb[2].mxu1 %vm258_vm1, %v237_v8  ;;  %935 = vmatprep.mubr.msk.f32.mxu0 %vm258_vm1, %v222_v9  ;;  %v243_v20 = vld [vmem:[%s1037_s22 + $0xc8] sm:$0xff]  ;;  %v244_v22 = vld [vmem:[%s1037_s22 + $0xd0] sm:$0xff]  ;;  %v245_v24 = vld [vmem:[%s1037_s22 + $0xd8] sm:$0xff] }
  0x18   : > { %959 = vmatprep.mubr.msk.f32.mxu1 %vm258_vm1, %v238_v10  ;;  %v230_v25 = vld [vmem:[%s1037_s22 + $0x60] sm:$0xff]  ;;  %v231_v27 = vld [vmem:[%s1037_s22 + $0x68] sm:$0xff]  ;;  %v232_v29 = vld [vmem:[%s1037_s22 + $0x70] sm:$0xff] }
  0x19   : > { %v246_v26 = vld [vmem:[%s1037_s22 + $0xe0] sm:$0xff]  ;;  %v247_v28 = vld [vmem:[%s1037_s22 + $0xe8] sm:$0xff]  ;;  %v248_v30 = vld [vmem:[%s1037_s22 + $0xf0] sm:$0xff] }
  0x1a   : > { %936 = vmatmul.mubr.msk.f32.gmra.mrb[4].mxu0 %vm258_vm1, %v223_v11  ;;  %v233_v31 = vld [vmem:[%s1037_s22 + $0x78] sm:$0xff]  ;;  %v585_v35 = vld [vmem:[%s1107_s25 + $0x8] sm:$0xff]  ;;  %v584_v41 = vld [vmem:[%s1107_s25] sm:$0xff] }
  0x1b   : > { %960 = vmatmul.mubr.msk.f32.gmra.mrb[4].mxu1 %vm258_vm1, %v239_v12  ;;  %938 = vmatprep.mubr.msk.f32.mxu0 %vm258_vm1, %v224_v13  ;;  %v249_v32 = vld [vmem:[%s1037_s22 + $0xf8] sm:$0xff]  ;;  %v601_v37 = vld [vmem:[%s1107_s25 + $0x88] sm:$0xff]  ;;  %v600_v43 = vld [vmem:[%s1107_s25 + $0x80] sm:$0xff] }
  0x1c   : > { %962 = vmatprep.mubr.msk.f32.mxu1 %vm258_vm1, %v240_v14  ;;  %v587_v51 = vld [vmem:[%s1107_s25 + $0x18] sm:$0xff]  ;;  %v586_v63 = vld [vmem:[%s1107_s25 + $0x10] sm:$0xff]  ;;  %v589_v11 = vld [vmem:[%s1107_s25 + $0x28] sm:$0xff] }
  0x1d   : > { %v603_v53 = vld [vmem:[%s1107_s25 + $0x98] sm:$0xff]  ;;  %v602_v1 = vld [vmem:[%s1107_s25 + $0x90] sm:$0xff] }
  0x1e   : > { %939 = vmatmul.mubr.msk.f32.gmra.mrb[6].mxu0 %vm258_vm1, %v225_v15 }
  0x1f   : > { %963 = vmatmul.mubr.msk.f32.gmra.mrb[6].mxu1 %vm258_vm1, %v241_v16  ;;  %941 = vmatprep.mubr.msk.f32.mxu0 %vm258_vm1, %v226_v17  ;;  %v605_v17 = vld [vmem:[%s1107_s25 + $0xa8] sm:$0xff] }
  0x20   : > { %965 = vmatprep.mubr.msk.f32.mxu1 %vm258_vm1, %v242_v18 }
  0x22   : > { %942 = vmatmul.mubr.msk.f32.gmra.mrb[8].mxu0 %vm258_vm1, %v227_v19  ;;  %v588_v19 = vld [vmem:[%s1107_s25 + $0x20] sm:$0xff] }
  0x23   : > { %966 = vmatmul.mubr.msk.f32.gmra.mrb[8].mxu1 %vm258_vm1, %v243_v20  ;;  %944 = vmatprep.mubr.msk.f32.mxu0 %vm258_vm1, %v228_v21  ;;  %v604_v21 = vld [vmem:[%s1107_s25 + $0xa0] sm:$0xff] }
  0x24   : > { %968 = vmatprep.mubr.msk.f32.mxu1 %vm258_vm1, %v244_v22 }
  0x26   : > { %945 = vmatmul.mubr.msk.f32.gmra.mrb[10].mxu0 %vm258_vm1, %v229_v23 }
  0x27   : > { %969 = vmatmul.mubr.msk.f32.gmra.mrb[10].mxu1 %vm258_vm1, %v245_v24  ;;  %947 = vmatprep.mubr.msk.f32.mxu0 %vm258_vm1, %v230_v25 }
  0x28   : > { %971 = vmatprep.mubr.msk.f32.mxu1 %vm258_vm1, %v246_v26 }
  0x2a   : > { %948 = vmatmul.mubr.msk.f32.gmra.mrb[12].mxu0 %vm258_vm1, %v231_v27 }
  0x2b   : > { %972 = vmatmul.mubr.msk.f32.gmra.mrb[12].mxu1 %vm258_vm1, %v247_v28  ;;  %950 = vmatprep.mubr.msk.f32.mxu0 %vm258_vm1, %v232_v29 }
  0x2c   : > { %974 = vmatprep.mubr.msk.f32.mxu1 %vm258_vm1, %v248_v30 }
  0x2e   : > { %951 = vmatmul.mubr.msk.f32.gmra.mrb[14].mxu0 %vm258_vm1, %v233_v31 }
  0x2f   : > { %975 = vmatmul.mubr.msk.f32.gmra.mrb[14].mxu1 %vm258_vm1, %v249_v32 }
  0xe5   : > { %v931_v34 = vpop.f32.mrb[0].mxu0 }
  0xe6   : > { %v955_v36 = vpop.f32.mrb[0].mxu1  ;;  %v431_v38 = vadd.f32 %v931_v34, %v1112_v33  ;;  %v425_v40 = vpop.f32.mrb[1].mxu0 }
  0xe7   : > { %v511_v39 = vadd.f32 %v955_v36, %v1112_v33  ;;  %v505_v42 = vpop.f32.mrb[1].mxu1  ;;  %v426_v44 = vadd.f32 %v1112_v33, %v425_v40 }
  0xe8   : > { %v506_v45 = vadd.f32 %v1112_v33, %v505_v42  ;;  %v617_v46 = vadd.f32 %v585_v35, %v431_v38  ;;  %v607_v38 = vld [vmem:[%s1107_s25 + $0xb8] sm:$0xff] }
  0xe9   : > { %v633_v47 = vadd.f32 %v601_v37, %v511_v39  ;;  %v616_v48 = vadd.f32 %v584_v41, %v426_v44  ;;  %v934_v50 = vpop.f32.mrb[2].mxu0  ;;  %v591_v37 = vld [vmem:[%s1107_s25 + $0x38] sm:$0xff] }
  0xea   : > { %v632_v49 = vadd.f32 %v600_v43, %v506_v45  ;;  %v958_v52 = vpop.f32.mrb[2].mxu1  ;;  %vm649_vm3 = vcmp.gt.f32.partialorder %v617_v46, 0.0  ;;  %v681_v54 = vmul.f32 0.01, %v617_v46  ;;  %v441_v60 = vadd.f32 %v934_v50, %v1112_v33  ;;  %v435_v62 = vpop.f32.mrb[3].mxu0  ;;  %v606_v50 = vld [vmem:[%s1107_s25 + $0xb0] sm:$0xff] }
  0xeb   : > { %vm665_vm4 = vcmp.gt.f32.partialorder %v633_v47, 0.0  ;;  %v697_v55 = vmul.f32 0.01, %v633_v47  ;;  %vm648_vm5 = vcmp.gt.f32.partialorder %v616_v48, 0.0  ;;  %v680_v56 = vmul.f32 0.01, %v616_v48 }
  0xec   : > { %vm664_vm6 = vcmp.gt.f32.partialorder %v632_v49, 0.0  ;;  %v696_v57 = vmul.f32 0.01, %v632_v49  ;;  %v713_v58 = vsel %vm649_vm3, %v617_v46, %v681_v54  ;;  %v521_v61 = vadd.f32 %v958_v52, %v1112_v33  ;;  %v515_v0 = vpop.f32.mrb[3].mxu1 }
  0xed   : > { %v729_v59 = vsel %vm665_vm4, %v633_v47, %v697_v55  ;;  %746 = vst.msk [vmem:[%s1128_s30 + $0x8] sm:$0xff] %vm744_vm2, %v713_v58  ;;  %v712_v2 = vsel %vm648_vm5, %v616_v48, %v680_v56  ;;  %v436_v4 = vadd.f32 %v1112_v33, %v435_v62  ;;  %v516_v5 = vadd.f32 %v1112_v33, %v515_v0  ;;  %v937_v6 = vpop.f32.mrb[4].mxu0  ;;  %v593_v62 = vld [vmem:[%s1107_s25 + $0x48] sm:$0xff] }
  0xee   : > { %762 = vst.msk [vmem:[%s1128_s30 + $0x88] sm:$0xff] %vm744_vm2, %v729_v59  ;;  %v728_v3 = vsel %vm664_vm6, %v632_v49, %v696_v57  ;;  %v961_v7 = vpop.f32.mrb[4].mxu1  ;;  %745 = vst.msk [vmem:[%s1128_s30] sm:$0xff] %vm744_vm2, %v712_v2  ;;  %v619_v8 = vadd.f32 %v587_v51, %v441_v60  ;;  %v635_v9 = vadd.f32 %v603_v53, %v521_v61  ;;  %v445_v13 = vpop.f32.mrb[5].mxu0  ;;  %v590_v49 = vld [vmem:[%s1107_s25 + $0x30] sm:$0xff]  ;;  %v609_v2 = vld [vmem:[%s1107_s25 + $0xc8] sm:$0xff] }
  0xef   : > { %761 = vst.msk [vmem:[%s1128_s30 + $0x80] sm:$0xff] %vm744_vm2, %v728_v3  ;;  %v451_v10 = vadd.f32 %v937_v6, %v1112_v33  ;;  %v531_v12 = vadd.f32 %v961_v7, %v1112_v33  ;;  %v525_v14 = vpop.f32.mrb[5].mxu1  ;;  %v618_v15 = vadd.f32 %v586_v63, %v436_v4  ;;  %v634_v16 = vadd.f32 %v602_v1, %v516_v5  ;;  %v592_v4 = vld [vmem:[%s1107_s25 + $0x40] sm:$0xff] }
  0xf0   : > { %v446_v18 = vadd.f32 %v1112_v33, %v445_v13  ;;  %v526_v20 = vadd.f32 %v1112_v33, %v525_v14  ;;  %vm651_vm7 = vcmp.gt.f32.partialorder %v619_v8, 0.0  ;;  %v683_v22 = vmul.f32 0.01, %v619_v8  ;;  %v608_v6 = vld [vmem:[%s1107_s25 + $0xc0] sm:$0xff] }
  0xf1   : > { %vm667_vm8 = vcmp.gt.f32.partialorder %v635_v9, 0.0  ;;  %v699_v23 = vmul.f32 0.01, %v635_v9  ;;  %vm650_vm9 = vcmp.gt.f32.partialorder %v618_v15, 0.0  ;;  %v682_v24 = vmul.f32 0.01, %v618_v15 }
  0xf2   : > { %vm666_vm10 = vcmp.gt.f32.partialorder %v634_v16, 0.0  ;;  %v698_v25 = vmul.f32 0.01, %v634_v16  ;;  %v715_v26 = vsel %vm651_vm7, %v619_v8, %v683_v22  ;;  %v621_v28 = vadd.f32 %v589_v11, %v451_v10  ;;  %v940_v30 = vpop.f32.mrb[6].mxu0  ;;  %v964_v31 = vpop.f32.mrb[6].mxu1 }
  0xf3   : > { %v731_v27 = vsel %vm667_vm8, %v635_v9, %v699_v23  ;;  %v637_v29 = vadd.f32 %v605_v17, %v531_v12  ;;  %748 = vst.msk [vmem:[%s1128_s30 + $0x18] sm:$0xff] %vm744_vm2, %v715_v26  ;;  %v714_v32 = vsel %vm650_vm9, %v618_v15, %v682_v24  ;;  %v620_v35 = vadd.f32 %v588_v19, %v446_v18  ;;  %v455_v39 = vpop.f32.mrb[7].mxu0  ;;  %v535_v40 = vpop.f32.mrb[7].mxu1  ;;  %v595_v23 = vld [vmem:[%s1107_s25 + $0x58] sm:$0xff] }
  0xf4   : > { %764 = vst.msk [vmem:[%s1128_s30 + $0x98] sm:$0xff] %vm744_vm2, %v731_v27  ;;  %v730_v34 = vsel %vm666_vm10, %v634_v16, %v698_v25  ;;  %v636_v36 = vadd.f32 %v604_v21, %v526_v20  ;;  %747 = vst.msk [vmem:[%s1128_s30 + $0x10] sm:$0xff] %vm744_vm2, %v714_v32  ;;  %vm653_vm11 = vcmp.gt.f32.partialorder %v621_v28, 0.0  ;;  %v685_v41 = vmul.f32 0.01, %v621_v28  ;;  %v611_v24 = vld [vmem:[%s1107_s25 + $0xd8] sm:$0xff] }
  0xf5   : > { %763 = vst.msk [vmem:[%s1128_s30 + $0x90] sm:$0xff] %vm744_vm2, %v730_v34  ;;  %vm669_vm12 = vcmp.gt.f32.partialorder %v637_v29, 0.0  ;;  %v701_v42 = vmul.f32 0.01, %v637_v29  ;;  %vm652_vm13 = vcmp.gt.f32.partialorder %v620_v35, 0.0  ;;  %v461_v47 = vadd.f32 %v940_v30, %v1112_v33  ;;  %v943_v51 = vpop.f32.mrb[8].mxu0 }
  0xf6   : > { %v684_v43 = vmul.f32 0.01, %v620_v35  ;;  %vm668_vm14 = vcmp.gt.f32.partialorder %v636_v36, 0.0  ;;  %v700_v44 = vmul.f32 0.01, %v636_v36  ;;  %v717_v45 = vsel %vm653_vm11, %v621_v28, %v685_v41  ;;  %v967_v52 = vpop.f32.mrb[8].mxu1 }
  0xf7   : > { %v733_v46 = vsel %vm669_vm12, %v637_v29, %v701_v42  ;;  %v541_v48 = vadd.f32 %v964_v31, %v1112_v33  ;;  %750 = vst.msk [vmem:[%s1128_s30 + $0x28] sm:$0xff] %vm744_vm2, %v717_v45  ;;  %v456_v55 = vadd.f32 %v1112_v33, %v455_v39  ;;  %v536_v56 = vadd.f32 %v1112_v33, %v535_v40  ;;  %v465_v57 = vpop.f32.mrb[9].mxu0  ;;  %v545_v58 = vpop.f32.mrb[9].mxu1 }
  0xf8   : > { %766 = vst.msk [vmem:[%s1128_s30 + $0xa8] sm:$0xff] %vm744_vm2, %v733_v46  ;;  %v716_v53 = vsel %vm652_vm13, %v620_v35, %v684_v43  ;;  %v732_v54 = vsel %vm668_vm14, %v636_v36, %v700_v44  ;;  %v623_v59 = vadd.f32 %v591_v37, %v461_v47  ;;  %v471_v61 = vadd.f32 %v943_v51, %v1112_v33  ;;  %v594_v36 = vld [vmem:[%s1107_s25 + $0x50] sm:$0xff] }
  0xf9   : > { %749 = vst.msk [vmem:[%s1128_s30 + $0x20] sm:$0xff] %vm744_vm2, %v716_v53  ;;  %765 = vst.msk [vmem:[%s1128_s30 + $0xa0] sm:$0xff] %vm744_vm2, %v732_v54  ;;  %v639_v60 = vadd.f32 %v607_v38, %v541_v48  ;;  %v551_v63 = vadd.f32 %v967_v52, %v1112_v33  ;;  %v622_v0 = vadd.f32 %v590_v49, %v456_v55  ;;  %v946_v7 = vpop.f32.mrb[10].mxu0  ;;  %v610_v37 = vld [vmem:[%s1107_s25 + $0xd0] sm:$0xff]  ;;  %v597_v49 = vld [vmem:[%s1107_s25 + $0x68] sm:$0xff] }
  0xfa   : > { %v638_v1 = vadd.f32 %v606_v50, %v536_v56  ;;  %v466_v3 = vadd.f32 %v1112_v33, %v465_v57  ;;  %v546_v5 = vadd.f32 %v1112_v33, %v545_v58  ;;  %v970_v8 = vpop.f32.mrb[10].mxu1  ;;  %vm655_vm15 = vcmp.gt.f32.partialorder %v623_v59, 0.0  ;;  %v475_v17 = vpop.f32.mrb[11].mxu0  ;;  %v613_v55 = vld [vmem:[%s1107_s25 + $0xe8] sm:$0xff]  ;;  %v596_v57 = vld [vmem:[%s1107_s25 + $0x60] sm:$0xff] }
  0xfb   : > { %v687_v9 = vmul.f32 0.01, %v623_v59  ;;  %vm671_vm0 = vcmp.gt.f32.partialorder %v639_v60, 0.0  ;;  %v703_v10 = vmul.f32 0.01, %v639_v60  ;;  %vm654_vm1 = vcmp.gt.f32.partialorder %v622_v0, 0.0 }
  0xfc   : > { %v686_v11 = vmul.f32 0.01, %v622_v0  ;;  %vm670_vm3 = vcmp.gt.f32.partialorder %v638_v1, 0.0  ;;  %v702_v12 = vmul.f32 0.01, %v638_v1  ;;  %v625_v15 = vadd.f32 %v593_v62, %v471_v61  ;;  %v555_v18 = vpop.f32.mrb[11].mxu1 }
  0xfd   : > { %v719_v13 = vsel %vm655_vm15, %v623_v59, %v687_v9  ;;  %v735_v14 = vsel %vm671_vm0, %v639_v60, %v703_v10  ;;  %v641_v16 = vadd.f32 %v609_v2, %v551_v63  ;;  %v624_v21 = vadd.f32 %v592_v4, %v466_v3  ;;  %v949_v25 = vpop.f32.mrb[12].mxu0  ;;  %v612_v59 = vld [vmem:[%s1107_s25 + $0xe0] sm:$0xff]  ;;  %v615_v9 = vld [vmem:[%s1107_s25 + $0xf8] sm:$0xff] }
  0xfe   : > { %752 = vst.msk [vmem:[%s1128_s30 + $0x38] sm:$0xff] %vm744_vm2, %v719_v13  ;;  %768 = vst.msk [vmem:[%s1128_s30 + $0xb8] sm:$0xff] %vm744_vm2, %v735_v14  ;;  %v718_v19 = vsel %vm654_vm1, %v622_v0, %v686_v11  ;;  %v734_v20 = vsel %vm670_vm3, %v638_v1, %v702_v12  ;;  %v640_v22 = vadd.f32 %v608_v6, %v546_v5  ;;  %v973_v26 = vpop.f32.mrb[12].mxu1  ;;  %vm657_vm4 = vcmp.gt.f32.partialorder %v625_v15, 0.0  ;;  %v485_v38 = vpop.f32.mrb[13].mxu0 }
  0xff   : > { %751 = vst.msk [vmem:[%s1128_s30 + $0x30] sm:$0xff] %vm744_vm2, %v718_v19  ;;  %767 = vst.msk [vmem:[%s1128_s30 + $0xb0] sm:$0xff] %vm744_vm2, %v734_v20  ;;  %v689_v27 = vmul.f32 0.01, %v625_v15  ;;  %vm673_vm5 = vcmp.gt.f32.partialorder %v641_v16, 0.0  ;;  %vm656_vm6 = vcmp.gt.f32.partialorder %v624_v21, 0.0  ;;  %v481_v34 = vadd.f32 %v946_v7, %v1112_v33 }
 0x100   : > { %v705_v28 = vmul.f32 0.01, %v641_v16  ;;  %v688_v29 = vmul.f32 0.01, %v624_v21  ;;  %vm672_vm7 = vcmp.gt.f32.partialorder %v640_v22, 0.0  ;;  %v561_v35 = vadd.f32 %v970_v8, %v1112_v33  ;;  %v565_v39 = vpop.f32.mrb[13].mxu1 }
 0x101   : > { %v704_v30 = vmul.f32 0.01, %v640_v22  ;;  %v721_v31 = vsel %vm657_vm4, %v625_v15, %v689_v27  ;;  %v476_v42 = vadd.f32 %v1112_v33, %v475_v17  ;;  %v556_v43 = vadd.f32 %v1112_v33, %v555_v18  ;;  %v952_v44 = vpop.f32.mrb[14].mxu0  ;;  %v599_v8 = vld [vmem:[%s1107_s25 + $0x78] sm:$0xff]  ;;  %v598_v18 = vld [vmem:[%s1107_s25 + $0x70] sm:$0xff] }
 0x102   : > { %v737_v32 = vsel %vm673_vm5, %v641_v16, %v705_v28  ;;  %754 = vst.msk [vmem:[%s1128_s30 + $0x48] sm:$0xff] %vm744_vm2, %v721_v31  ;;  %v720_v40 = vsel %vm656_vm6, %v624_v21, %v688_v29  ;;  %v976_v45 = vpop.f32.mrb[14].mxu1  ;;  %v627_v46 = vadd.f32 %v595_v23, %v481_v34  ;;  %v643_v47 = vadd.f32 %v611_v24, %v561_v35  ;;  %v495_v51 = vpop.f32.mrb[15].mxu0  ;;  %v614_v19 = vld [vmem:[%s1107_s25 + $0xf0] sm:$0xff] }
 0x103   : > { %770 = vst.msk [vmem:[%s1128_s30 + $0xc8] sm:$0xff] %vm744_vm2, %v737_v32  ;;  %v736_v41 = vsel %vm672_vm7, %v640_v22, %v704_v30  ;;  %753 = vst.msk [vmem:[%s1128_s30 + $0x40] sm:$0xff] %vm744_vm2, %v720_v40  ;;  %v491_v48 = vadd.f32 %v949_v25, %v1112_v33  ;;  %v571_v50 = vadd.f32 %v973_v26, %v1112_v33  ;;  %v575_v52 = vpop.f32.mrb[15].mxu1 }
 0x104   : > { %769 = vst.msk [vmem:[%s1128_s30 + $0xc0] sm:$0xff] %vm744_vm2, %v736_v41  ;;  %v626_v53 = vadd.f32 %v594_v36, %v476_v42  ;;  %v642_v54 = vadd.f32 %v610_v37, %v556_v43  ;;  %v486_v56 = vadd.f32 %v1112_v33, %v485_v38  ;;  %v566_v58 = vadd.f32 %v1112_v33, %v565_v39 }
 0x105   : > { %vm659_vm8 = vcmp.gt.f32.partialorder %v627_v46, 0.0  ;;  %v691_v60 = vmul.f32 0.01, %v627_v46  ;;  %vm675_vm9 = vcmp.gt.f32.partialorder %v643_v47, 0.0  ;;  %v707_v61 = vmul.f32 0.01, %v643_v47 }
 0x106   : > { %vm658_vm10 = vcmp.gt.f32.partialorder %v626_v53, 0.0  ;;  %v690_v62 = vmul.f32 0.01, %v626_v53  ;;  %vm674_vm11 = vcmp.gt.f32.partialorder %v642_v54, 0.0  ;;  %v706_v63 = vmul.f32 0.01, %v642_v54 }
 0x107   : > { %v723_v0 = vsel %vm659_vm8, %v627_v46, %v691_v60  ;;  %v739_v1 = vsel %vm675_vm9, %v643_v47, %v707_v61  ;;  %v629_v2 = vadd.f32 %v597_v49, %v491_v48  ;;  %v645_v3 = vadd.f32 %v613_v55, %v571_v50 }
 0x108   : > { %756 = vst.msk [vmem:[%s1128_s30 + $0x58] sm:$0xff] %vm744_vm2, %v723_v0  ;;  %772 = vst.msk [vmem:[%s1128_s30 + $0xd8] sm:$0xff] %vm744_vm2, %v739_v1  ;;  %v722_v4 = vsel %vm658_vm10, %v626_v53, %v690_v62  ;;  %v738_v5 = vsel %vm674_vm11, %v642_v54, %v706_v63  ;;  %v628_v6 = vadd.f32 %v596_v57, %v486_v56 }
 0x109   : > { %v644_v7 = vadd.f32 %v612_v59, %v566_v58  ;;  %755 = vst.msk [vmem:[%s1128_s30 + $0x50] sm:$0xff] %vm744_vm2, %v722_v4  ;;  %771 = vst.msk [vmem:[%s1128_s30 + $0xd0] sm:$0xff] %vm744_vm2, %v738_v5  ;;  %vm661_vm12 = vcmp.gt.f32.partialorder %v629_v2, 0.0  ;;  %v693_v10 = vmul.f32 0.01, %v629_v2  ;;  %vm677_vm13 = vcmp.gt.f32.partialorder %v645_v3, 0.0 }
 0x10a   : > { %v709_v11 = vmul.f32 0.01, %v645_v3  ;;  %vm660_vm14 = vcmp.gt.f32.partialorder %v628_v6, 0.0  ;;  %v692_v12 = vmul.f32 0.01, %v628_v6  ;;  %v501_v16 = vadd.f32 %v952_v44, %v1112_v33 }
 0x10b   : > { %vm676_vm15 = vcmp.gt.f32.partialorder %v644_v7, 0.0  ;;  %v708_v13 = vmul.f32 0.01, %v644_v7  ;;  %v725_v14 = vsel %vm661_vm12, %v629_v2, %v693_v10  ;;  %v581_v17 = vadd.f32 %v976_v45, %v1112_v33 }
 0x10c   : > { %v741_v15 = vsel %vm677_vm13, %v645_v3, %v709_v11  ;;  %758 = vst.msk [vmem:[%s1128_s30 + $0x68] sm:$0xff] %vm744_vm2, %v725_v14  ;;  %v724_v20 = vsel %vm660_vm14, %v628_v6, %v692_v12  ;;  %v496_v22 = vadd.f32 %v1112_v33, %v495_v51  ;;  %v576_v23 = vadd.f32 %v1112_v33, %v575_v52 }
 0x10d   : > { %774 = vst.msk [vmem:[%s1128_s30 + $0xe8] sm:$0xff] %vm744_vm2, %v741_v15  ;;  %v740_v21 = vsel %vm676_vm15, %v644_v7, %v708_v13  ;;  %757 = vst.msk [vmem:[%s1128_s30 + $0x60] sm:$0xff] %vm744_vm2, %v724_v20  ;;  %v631_v24 = vadd.f32 %v599_v8, %v501_v16  ;;  %v647_v25 = vadd.f32 %v615_v9, %v581_v17 }
 0x10e   : > { %773 = vst.msk [vmem:[%s1128_s30 + $0xe0] sm:$0xff] %vm744_vm2, %v740_v21  ;;  %v630_v26 = vadd.f32 %v598_v18, %v496_v22  ;;  %v646_v27 = vadd.f32 %v614_v19, %v576_v23 }
 0x10f   : > { %vm663_vm0 = vcmp.gt.f32.partialorder %v631_v24, 0.0  ;;  %v695_v28 = vmul.f32 0.01, %v631_v24  ;;  %vm679_vm1 = vcmp.gt.f32.partialorder %v647_v25, 0.0  ;;  %v711_v29 = vmul.f32 0.01, %v647_v25 }
 0x110   : > { %vm662_vm3 = vcmp.gt.f32.partialorder %v630_v26, 0.0  ;;  %v694_v30 = vmul.f32 0.01, %v630_v26  ;;  %vm678_vm4 = vcmp.gt.f32.partialorder %v646_v27, 0.0  ;;  %v710_v33 = vmul.f32 0.01, %v646_v27 }
 0x111   : > { %v727_v31 = vsel %vm663_vm0, %v631_v24, %v695_v28  ;;  %v743_v32 = vsel %vm679_vm1, %v647_v25, %v711_v29 }
 0x112   : > { %760 = vst.msk [vmem:[%s1128_s30 + $0x78] sm:$0xff] %vm744_vm2, %v727_v31  ;;  %776 = vst.msk [vmem:[%s1128_s30 + $0xf8] sm:$0xff] %vm744_vm2, %v743_v32  ;;  %v726_v34 = vsel %vm662_vm3, %v630_v26, %v694_v30  ;;  %v742_v35 = vsel %vm678_vm4, %v646_v27, %v710_v33 }
 0x113   : > { %759 = vst.msk [vmem:[%s1128_s30 + $0x70] sm:$0xff] %vm744_vm2, %v726_v34  ;;  %775 = vst.msk [vmem:[%s1128_s30 + $0xf0] sm:$0xff] %vm744_vm2, %v742_v35 }
 0x114 PF: > { %s14_s15 = sadd.s32 1, %s993_s15  }
 0x115   : > { %p11_p4 = scmp.ge.s32.totalorder %s14_s15, 4  }
 0x117   :  { %13 = sbr.rel (!%p11_p4) target bundleno = 1 (0x1), region = 69 }

// kernel: res_c2d_block_forward.2
= control target key start
LH: loop header
LB: loop body
LE: loop exit
PB: predicated region body
PF: predicated region fallthrough
CT: control target
= control target key end

     0   :  { %s5267_s24 = smov 0   ;;  %s8535_s0 = inlined_call_operand.vmem [shape: f32[2,16,16,4], index: 0, kind: input, shape index: {}]   ;;  %s8536_s1 = inlined_call_operand.vmem [shape: f32[36,8], index: 1, kind: input, shape index: {}]   ;;  %s8537_s2 = inlined_call_operand.vmem [shape: f32[1,8], index: 2, kind: input, shape index: {}]   ;;  %s8538_s3 = inlined_call_operand.vmem [shape: f32[72,8], index: 3, kind: input, shape index: {}]   ;;  %s8539_s4 = inlined_call_operand.vmem [shape: f32[1,8], index: 4, kind: input, shape index: {}]   ;;  %s8540_s5 = inlined_call_operand.vmem [shape: f32[4,8], index: 5, kind: input, shape index: {}]   ;;  %s8541_s6 = inlined_call_operand.vmem [shape: f32[2,16,16,8], index: 6, kind: output, shape index: {0}]   ;;  %s8542_s7 = inlined_call_operand.vmem [shape: f32[2,2,8], index: 7, kind: output, shape index: {1}]  }
   0x1 LB: > { %s4754_s25 = sadd.s32 4294967295, %s5212_s24   ;;  %p4758_p0 = scmp.ge.s32.totalorder %s5212_s24, 1  ;;  %s5212_s24 = sphi %s5267_s24, %s18_s24  }
   0x2   : > { %p240_p1 = scmp.lt.s32.totalorder %s5212_s24, 3 }
   0x4   : > { %p241_p2 = pnand %p4758_p0, %p240_p1 }
   0x6   : > { %244 = sbr.rel (%p241_p2) target bundleno = 1706 (0x6aa), region = 44 }
   0xd   : > { %vm322_vm0 = vcmask 31744   ;;  %p5277_p3 = scmp.lt.s32.totalorder %s4754_s25, 1  ;;  %vm325_vm1 = vcmask 25600   ;;  %v8543_v0 = vmov 0.0   ;;  %vm551_vm2 = vcmask 1046528   ;;  %s5215_s8 = smov 4  }
   0xe   : > { %323 = vst.msk [vmem:[#allocation2] sm:$0xff] %vm322_vm0, %v8543_v0  ;;  %324 = vst.msk [vmem:[#allocation2 + $0x8] sm:$0xff] %vm322_vm0, %v8543_v0  ;;  %vm761_vm3 = vcmask 1045504   ;;  %s5216_s9 = smov 8   ;;  %vm728_vm4 = vcmask 64544   ;;  %s5217_s10 = smov 12  }
   0xf   : > { %327 = vst.msk [vmem:[#allocation2 + $0x18] sm:$0xff] %vm322_vm0, %v8543_v0  ;;  %328 = vst.msk [vmem:[#allocation2 + $0x20] sm:$0xff] %vm322_vm0, %v8543_v0  ;;  %s8973_s25 = smov (!%p5277_p3, %s4754_s25), 1  ;;  %vm938_vm5 = vcmask 97344   ;;  %s5218_s11 = smov 16   ;;  %vm1069_vm6 = vcmask 130144  }
  0x10   : > { %330 = vst.msk [vmem:[#allocation2 + $0x30] sm:$0xff] %vm322_vm0, %v8543_v0  ;;  %331 = vst.msk [vmem:[#allocation2 + $0x38] sm:$0xff] %vm322_vm0, %v8543_v0  ;;  %s4866_s27 = sshll.u32 %s8973_s25, 8  ;;  %s5219_s12 = smov 20   ;;  %vm1204_vm7 = vcmask 162944   ;;  %vm1338_vm8 = vcmask 195744  }
  0x11   : > { %333 = vst.msk [vmem:[#allocation2 + $0x48] sm:$0xff] %vm322_vm0, %v8543_v0  ;;  %334 = vst.msk [vmem:[#allocation2 + $0x50] sm:$0xff] %vm322_vm0, %v8543_v0  ;;  %s5401_s30 = scalar_lea.vmem %s8535_s0, %s4866_s27  ;;  %s5220_s13 = smov 24   ;;  %vm1906_vm9 = vcmask 1043456   ;;  %vm1469_vm10 = vcmask 228544   ;;  %vm1604_vm11 = vcmask 261344  }
  0x12   : > { %336 = vst.msk [vmem:[#allocation2 + $0x60] sm:$0xff] %vm322_vm0, %v8543_v0  ;;  %337 = vst.msk [vmem:[#allocation2 + $0x68] sm:$0xff] %vm322_vm0, %v8543_v0  ;;  %v5404_v1 = vld [vmem:[%s5401_s30] sm:$0xff]  ;;  %v5407_v2 = vld [vmem:[%s5401_s30 + $0x8] sm:$0xff]  ;;  %s5221_s26 = smov 28   ;;  %s5222_s28 = smov 32  }
  0x13   : > { %339 = vst.msk [vmem:[#allocation2 + $0x78] sm:$0xff] %vm322_vm0, %v8543_v0  ;;  %340 = vst.msk [vmem:[#allocation2 + $0x80] sm:$0xff] %vm322_vm0, %v8543_v0  ;;  %v5410_v3 = vld [vmem:[%s5401_s30 + $0x10] sm:$0xff]  ;;  %v5417_v4 = vld [vmem:[%s5401_s30 + $0x18] sm:$0xff]  ;;  %vm1738_vm12 = vcmask 294144   ;;  %vm1809_vm13 = vcmask 293888   ;;  %s8307_s19 = scalar_lea.vmem %s8541_s6, %s4866_s27 }
  0x14   : > { %342 = vst.msk [vmem:[#allocation2 + $0x90] sm:$0xff] %vm322_vm0, %v8543_v0  ;;  %343 = vst.msk [vmem:[#allocation2 + $0x98] sm:$0xff] %vm322_vm0, %v8543_v0  ;;  %v5422_v5 = vld [vmem:[%s5401_s30 + $0x20] sm:$0xff]  ;;  %v5425_v6 = vld [vmem:[%s5401_s30 + $0x28] sm:$0xff]  ;;  %vm2231_vm14 = vcmask 64512   ;;  %vm2234_vm15 = vcmask 58368  }
  0x15   : > { %345 = vst.msk [vmem:[#allocation2 + $0xa8] sm:$0xff] %vm322_vm0, %v8543_v0  ;;  %346 = vst.msk [vmem:[#allocation2 + $0xb0] sm:$0xff] %vm322_vm0, %v8543_v0  ;;  %v411_v7 = vld [vmem:[#allocation2] sm:$0xff]  ;;  %v412_v8 = vld [vmem:[#allocation2 + $0x8] sm:$0xff]  ;;  %s5224_s18 = smov 48   ;;  %s5225_s23 = smov 56  }
  0x16   : > { %348 = vst.msk [vmem:[#allocation2 + $0xc0] sm:$0xff] %vm322_vm0, %v8543_v0  ;;  %349 = vst.msk [vmem:[#allocation2 + $0xc8] sm:$0xff] %vm322_vm0, %v8543_v0  ;;  %v552_v10 = vrot.slane %v411_v7, 1  ;;  %v553_v11 = vrot.slane %v412_v8, 1  ;;  %v5436_v13 = vld [vmem:[%s5401_s30 + $0x30] sm:$0xff]  ;;  %v5439_v14 = vld [vmem:[%s5401_s30 + $0x38] sm:$0xff] }
  0x17   : > { %351 = vst.msk [vmem:[#allocation2 + $0xd8] sm:$0xff] %vm322_vm0, %v8543_v0  ;;  %352 = vst.msk [vmem:[#allocation2 + $0xe0] sm:$0xff] %vm322_vm0, %v8543_v0  ;;  %v5442_v15 = vld [vmem:[%s5401_s30 + $0x40] sm:$0xff]  ;;  %v5449_v16 = vld [vmem:[%s5401_s30 + $0x48] sm:$0xff]  ;;  %v762_v19 = vrot.slane %v411_v7, 2  ;;  %v763_v20 = vrot.slane %v412_v8, 2 }
  0x18   : > { %354 = vst.msk [vmem:[#allocation2 + $0xf0] sm:$0xff] %vm322_vm0, %v8543_v0  ;;  %355 = vst.msk [vmem:[#allocation2 + $0xf8] sm:$0xff] %vm322_vm0, %v8543_v0  ;;  %v5454_v17 = vld [vmem:[%s5401_s30 + $0x50] sm:$0xff]  ;;  %v5457_v18 = vld [vmem:[%s5401_s30 + $0x58] sm:$0xff]  ;;  %v554_v22 = vsel %vm551_vm2, %v552_v10, %v553_v11  ;;  %s4763_s27 = sshll.u32 %s8973_s25, 1 }
  0x19   : > { %357 = vst.msk [vmem:[#allocation2 + $0x108] sm:$0xff] %vm322_vm0, %v8543_v0  ;;  %358 = vst.msk [vmem:[#allocation2 + $0x110] sm:$0xff] %vm322_vm0, %v8543_v0  ;;  %v5467_v23 = vld [vmem:[%s5401_s30 + $0x60] sm:$0xff]  ;;  %v5470_v24 = vld [vmem:[%s5401_s30 + $0x68] sm:$0xff]  ;;  %632 = vrot.lane.b32.xlu0 %v554_v22, %s5215_s8  ;;  %v5492_v29 = vsel %vm761_vm3, %v762_v19, %v763_v20  ;;  %s289_s22 = scalar_lea.vmem %s8542_s7, %s4763_s27 }
  0x1a   : > { %360 = vst.msk [vmem:[#allocation2 + $0x120] sm:$0xff] %vm322_vm0, %v8543_v0  ;;  %361 = vst.msk [vmem:[#allocation2 + $0x128] sm:$0xff] %vm322_vm0, %v8543_v0  ;;  %v5473_v25 = vld [vmem:[%s5401_s30 + $0x70] sm:$0xff]  ;;  %v5481_v26 = vld [vmem:[%s5401_s30 + $0x78] sm:$0xff] }
  0x1b   : > { %363 = vst.msk [vmem:[#allocation2 + $0x138] sm:$0xff] %vm322_vm0, %v8543_v0  ;;  %364 = vst.msk [vmem:[#allocation2 + $0x140] sm:$0xff] %vm322_vm0, %v8543_v0  ;;  %v5486_v27 = vld [vmem:[%s5401_s30 + $0x80] sm:$0xff]  ;;  %v5489_v28 = vld [vmem:[%s5401_s30 + $0x88] sm:$0xff] }
  0x1c   : > { %366 = vst.msk [vmem:[#allocation2 + $0x150] sm:$0xff] %vm322_vm0, %v8543_v0  ;;  %367 = vst.msk [vmem:[#allocation2 + $0x158] sm:$0xff] %vm322_vm0, %v8543_v0  ;;  %v5505_v32 = vld [vmem:[%s5401_s30 + $0x90] sm:$0xff]  ;;  %v5508_v33 = vld [vmem:[%s5401_s30 + $0x98] sm:$0xff] }
  0x1d   : > { %369 = vst.msk [vmem:[#allocation2 + $0x168] sm:$0xff] %vm322_vm0, %v8543_v0  ;;  %370 = vst.msk [vmem:[#allocation2 + $0x170] sm:$0xff] %vm322_vm0, %v8543_v0  ;;  %v5511_v34 = vld [vmem:[%s5401_s30 + $0xa0] sm:$0xff] }
  0x1e   : > { %372 = vst.msk [vmem:[#allocation2 + $0x180] sm:$0xff] %vm322_vm0, %v8543_v0  ;;  %373 = vst.msk [vmem:[#allocation2 + $0x188] sm:$0xff] %vm322_vm0, %v8543_v0 }
  0x1f   : > { %375 = vst.msk [vmem:[#allocation2 + $0x198] sm:$0xff] %vm322_vm0, %v8543_v0  ;;  %376 = vst.msk [vmem:[#allocation2 + $0x1a0] sm:$0xff] %vm322_vm0, %v8543_v0 }
  0x20   : > { %329 = vst.msk [vmem:[#allocation2 + $0x28] sm:$0x3] %vm325_vm1, %v8543_v0  ;;  %326 = vst.msk [vmem:[#allocation2 + $0x10] sm:$0x3] %vm325_vm1, %v8543_v0 }
  0x21   : > { %332 = vst.msk [vmem:[#allocation2 + $0x40] sm:$0x3] %vm325_vm1, %v8543_v0  ;;  %335 = vst.msk [vmem:[#allocation2 + $0x58] sm:$0x3] %vm325_vm1, %v8543_v0 }
  0x22   : > { %338 = vst.msk [vmem:[#allocation2 + $0x70] sm:$0x3] %vm325_vm1, %v8543_v0  ;;  %341 = vst.msk [vmem:[#allocation2 + $0x88] sm:$0x3] %vm325_vm1, %v8543_v0 }
  0x23   : > { %344 = vst.msk [vmem:[#allocation2 + $0xa0] sm:$0x3] %vm325_vm1, %v8543_v0  ;;  %347 = vst.msk [vmem:[#allocation2 + $0xb8] sm:$0x3] %vm325_vm1, %v8543_v0 }
  0x24   : > { %350 = vst.msk [vmem:[#allocation2 + $0xd0] sm:$0x3] %vm325_vm1, %v8543_v0  ;;  %353 = vst.msk [vmem:[#allocation2 + $0xe8] sm:$0x3] %vm325_vm1, %v8543_v0 }
  0x25   : > { %356 = vst.msk [vmem:[#allocation2 + $0x100] sm:$0x3] %vm325_vm1, %v8543_v0  ;;  %359 = vst.msk [vmem:[#allocation2 + $0x118] sm:$0x3] %vm325_vm1, %v8543_v0 }
  0x26   : > { %362 = vst.msk [vmem:[#allocation2 + $0x130] sm:$0x3] %vm325_vm1, %v8543_v0  ;;  %365 = vst.msk [vmem:[#allocation2 + $0x148] sm:$0x3] %vm325_vm1, %v8543_v0 }
  0x27   : > { %368 = vst.msk [vmem:[#allocation2 + $0x160] sm:$0x3] %vm325_vm1, %v8543_v0  ;;  %371 = vst.msk [vmem:[#allocation2 + $0x178] sm:$0x3] %vm325_vm1, %v8543_v0  ;;  %v413_v9 = vld [vmem:[#allocation2 + $0x10] sm:$0x3] }
  0x28   : > { %374 = vst.msk [vmem:[#allocation2 + $0x190] sm:$0x3] %vm325_vm1, %v8543_v0  ;;  %377 = vst.msk [vmem:[#allocation2 + $0x1a8] sm:$0x3] %vm325_vm1, %v8543_v0  ;;  %v555_v12 = vrot.slane %v413_v9, 1  ;;  %v765_v21 = vrot.slane %v413_v9, 2 }
  0x29   : > { %8725 = vst [vmem:[#allocation5_spill] sm:$0xff] %v5404_v1  ;;  %8726 = vst [vmem:[#allocation6_spill] sm:$0xff] %v5407_v2  ;;  %vm2640_vm1 = vcmask 130112  }
  0x2a   : > { %8727 = vst [vmem:[#allocation7_spill] sm:$0xff] %v5410_v3  ;;  %379 = vst.msk [vmem:[#allocation2 + $0x19] sm:$0xff] %vm322_vm0, %v5404_v1  ;;  %v5495_v30 = vsel %vm761_vm3, %v763_v20, %v765_v21  ;;  %v556_v31 = vsel %vm551_vm2, %v553_v11, %v555_v12 }
  0x2b   : > { %380 = vst.msk [vmem:[#allocation2 + $0x21] sm:$0xff] %vm322_vm0, %v5407_v2  ;;  %8728 = vst [vmem:[#allocation8_spill] sm:$0xff] %v5417_v4  ;;  %634 = vrot.lane.b32.xlu0 %v556_v31, %s5215_s8 }
  0x2c   : > { %381 = vst.msk [vmem:[#allocation2 + $0x31] sm:$0xff] %vm322_vm0, %v5410_v3  ;;  %8729 = vst [vmem:[#allocation9_spill] sm:$0xff] %v5422_v5 }
  0x2d   : > { %8730 = vst [vmem:[#allocation10_spill] sm:$0xff] %v5425_v6  ;;  %382 = vst.msk [vmem:[#allocation2 + $0x39] sm:$0xff] %vm322_vm0, %v5417_v4 }
  0x2e   : > { %383 = vst.msk [vmem:[#allocation2 + $0x49] sm:$0xff] %vm322_vm0, %v5422_v5  ;;  %384 = vst.msk [vmem:[#allocation2 + $0x51] sm:$0xff] %vm322_vm0, %v5425_v6 }
  0x2f   : > { %471 = vst.msk [vmem:[#allocation4] sm:$0xff] %vm322_vm0, %v411_v7  ;;  %472 = vst.msk [vmem:[#allocation4 + $0x8] sm:$0xff] %vm322_vm0, %v412_v8 }
  0x30   : > { %8731 = vst [vmem:[#allocation11_spill] sm:$0xff] %v5436_v13  ;;  %8732 = vst [vmem:[#allocation12_spill] sm:$0xff] %v5439_v14 }
  0x31   : > { %8733 = vst [vmem:[#allocation13_spill] sm:$0xff] %v5442_v15  ;;  %385 = vst.msk [vmem:[#allocation2 + $0x61] sm:$0xff] %vm322_vm0, %v5436_v13  ;;  %v5513_v35 = vld [vmem:[#allocation2 + $0x18] sm:$0xff] }
  0x32   : > { %386 = vst.msk [vmem:[#allocation2 + $0x69] sm:$0xff] %vm322_vm0, %v5439_v14  ;;  %8734 = vst [vmem:[#allocation14_spill] sm:$0xff] %v5449_v16  ;;  %v5515_v36 = vld [vmem:[#allocation2 + $0x20] sm:$0xff]  ;;  %v5517_v37 = vld [vmem:[#allocation2 + $0x28] sm:$0x3]  ;;  %v557_v38 = vrot.slane %v5513_v35, 1 }
  0x33   : > { %387 = vst.msk [vmem:[#allocation2 + $0x79] sm:$0xff] %vm322_vm0, %v5442_v15  ;;  %8735 = vst [vmem:[#allocation15_spill] sm:$0xff] %v5454_v17  ;;  %v558_v39 = vrot.slane %v5515_v36, 1  ;;  %v560_v40 = vrot.slane %v5517_v37, 1  ;;  %v5532_v41 = vld [vmem:[#allocation2 + $0x30] sm:$0xff] }
  0x34   : > { %8736 = vst [vmem:[#allocation16_spill] sm:$0xff] %v5457_v18  ;;  %388 = vst.msk [vmem:[#allocation2 + $0x81] sm:$0xff] %vm322_vm0, %v5449_v16  ;;  %v5534_v42 = vld [vmem:[#allocation2 + $0x38] sm:$0xff]  ;;  %v562_v44 = vrot.slane %v5532_v41, 1  ;;  %v5545_v46 = vld [vmem:[#allocation2 + $0x40] sm:$0x3] }
  0x35   : > { %389 = vst.msk [vmem:[#allocation2 + $0x91] sm:$0xff] %vm322_vm0, %v5454_v17  ;;  %390 = vst.msk [vmem:[#allocation2 + $0x99] sm:$0xff] %vm322_vm0, %v5457_v18  ;;  %v5536_v43 = vld [vmem:[#allocation2 + $0x48] sm:$0xff]  ;;  %v563_v45 = vrot.slane %v5534_v42, 1  ;;  %v5547_v47 = vld [vmem:[#allocation2 + $0x50] sm:$0xff]  ;;  %v5552_v48 = vsel %vm551_vm2, %v557_v38, %v558_v39  ;;  %v5574_v55 = vsel %vm551_vm2, %v558_v39, %v560_v40  ;;  %v565_v56 = vrot.slane %v5545_v46, 1 }
  0x36   : > { %8737 = vst [vmem:[#allocation17_spill] sm:$0xff] %v5467_v23  ;;  %8738 = vst [vmem:[#allocation18_spill] sm:$0xff] %v5470_v24  ;;  %v567_v49 = vrot.slane %v5536_v43, 1  ;;  %v568_v50 = vrot.slane %v5547_v47, 1  ;;  %636 = vrot.lane.b32.xlu1 %v5552_v48, %s5215_s8  ;;  %v5585_v59 = vld [vmem:[#allocation2 + $0x58] sm:$0x3] }
  0x37   : > { %8739 = vst [vmem:[#allocation19_spill] sm:$0xff] %v5473_v25  ;;  %391 = vst.msk [vmem:[#allocation2 + $0xa9] sm:$0xff] %vm322_vm0, %v5467_v23  ;;  %v5565_v53 = vsel %vm551_vm2, %v562_v44, %v563_v45  ;;  %v5615_v11 = vsel %vm551_vm2, %v563_v45, %v565_v56  ;;  %v570_v12 = vrot.slane %v5585_v59, 1  ;;  %v5639_v38 = vld [vmem:[%s5401_s30 + $0xa8] sm:$0xff]  ;;  %v5662_v56 = vld [vmem:[%s5401_s30 + $0xb8] sm:$0xff] }
  0x38   : > { %392 = vst.msk [vmem:[#allocation2 + $0xb1] sm:$0xff] %vm322_vm0, %v5470_v24  ;;  %8740 = vst [vmem:[#allocation20_spill] sm:$0xff] %v5481_v26  ;;  %v5558_v51 = vld [vmem:[#allocation2 + $0x60] sm:$0xff]  ;;  %640 = vrot.lane.b32.xlu0 %v5565_v53, %s5215_s8  ;;  %v5596_v62 = vsel %vm551_vm2, %v567_v49, %v568_v50  ;;  %v5659_v49 = vld [vmem:[%s5401_s30 + $0xb0] sm:$0xff] }
  0x39   : > { %393 = vst.msk [vmem:[#allocation2 + $0xc1] sm:$0xff] %vm322_vm0, %v5473_v25  ;;  %8741 = vst [vmem:[#allocation21_spill] sm:$0xff] %v5486_v27  ;;  %v5560_v52 = vld [vmem:[#allocation2 + $0x68] sm:$0xff]  ;;  %v572_v63 = vrot.slane %v5558_v51, 1  ;;  %v5618_v19 = vld [vmem:[#allocation2 + $0x70] sm:$0x3]  ;;  %v5668_v0 = vsel %vm551_vm2, %v568_v50, %v570_v12 }
  0x3a   : > { %8742 = vst [vmem:[#allocation22_spill] sm:$0xff] %v5489_v28  ;;  %394 = vst.msk [vmem:[#allocation2 + $0xc9] sm:$0xff] %vm322_vm0, %v5481_v26  ;;  %v5571_v54 = vld [vmem:[#allocation2 + $0x78] sm:$0xff]  ;;  %v573_v7 = vrot.slane %v5560_v52, 1  ;;  %638 = vrot.lane.b32.xlu1 %v5574_v55, %s5215_s8  ;;  %v5697_v12 = vld [vmem:[%s5401_s30 + $0xe0] sm:$0xff] }
  0x3b   : > { %395 = vst.msk [vmem:[#allocation2 + $0xd9] sm:$0xff] %vm322_vm0, %v5486_v27  ;;  %396 = vst.msk [vmem:[#allocation2 + $0xe1] sm:$0xff] %vm322_vm0, %v5489_v28  ;;  %v5577_v57 = vld [vmem:[#allocation2 + $0x80] sm:$0xff]  ;;  %v577_v40 = vrot.slane %v5571_v54, 1  ;;  %v5688_v50 = vld [vmem:[#allocation2 + $0x88] sm:$0x3] }
  0x3c   : > { %8743 = vst [vmem:[#allocation23_spill] sm:$0xff] %v5505_v32  ;;  %8744 = vst [vmem:[#allocation24_spill] sm:$0xff] %v5508_v33  ;;  %v5581_v58 = vld [vmem:[#allocation2 + $0x90] sm:$0xff]  ;;  %v5589_v60 = vld [vmem:[#allocation2 + $0x98] sm:$0xff]  ;;  %644 = vrot.lane.b32.xlu0 %v5596_v62, %s5215_s8  ;;  %v5642_v39 = vsel %vm551_vm2, %v572_v63, %v573_v7  ;;  %v578_v44 = vrot.slane %v5577_v57, 1 }
  0x3d   : > { %8745 = vst [vmem:[#allocation25_spill] sm:$0xff] %v5511_v34  ;;  %397 = vst.msk [vmem:[#allocation2 + $0xf1] sm:$0xff] %vm322_vm0, %v5505_v32  ;;  %v5665_v63 = vld [vmem:[%s5401_s30 + $0xc0] sm:$0xff]  ;;  %v5684_v32 = vld [vmem:[%s5401_s30 + $0xd8] sm:$0xff]  ;;  %v583_v28 = vrot.slane %v5589_v60, 1 }
  0x3e   : > { %398 = vst.msk [vmem:[#allocation2 + $0xf9] sm:$0xff] %vm322_vm0, %v5508_v33  ;;  %399 = vst.msk [vmem:[#allocation2 + $0x109] sm:$0xff] %vm322_vm0, %v5511_v34  ;;  %v5593_v61 = vld [vmem:[#allocation2 + $0xa8] sm:$0xff]  ;;  %642 = vrot.lane.b32.xlu1 %v5615_v11, %s5215_s8  ;;  %v5681_v33 = vld [vmem:[%s5401_s30 + $0xd0] sm:$0xff] }
  0x3f   : > { %473 = vst.msk [vmem:[#allocation4 + $0x10] sm:$0xff] %vm322_vm0, %v5513_v35  ;;  %474 = vst.msk [vmem:[#allocation4 + $0x18] sm:$0xff] %vm322_vm0, %v5515_v36  ;;  %v5602_v8 = vld [vmem:[#allocation2 + $0xb0] sm:$0xff]  ;;  %v5676_v34 = vld [vmem:[%s5401_s30 + $0xc8] sm:$0xff] }
  0x40   : > { %475 = vst.msk [vmem:[#allocation4 + $0x20] sm:$0xff] %vm322_vm0, %v5532_v41  ;;  %476 = vst.msk [vmem:[#allocation4 + $0x28] sm:$0xff] %vm322_vm0, %v5534_v42  ;;  %v5610_v9 = vld [vmem:[#allocation2 + $0xc0] sm:$0xff]  ;;  %648 = vrot.lane.b32.xlu0 %v5642_v39, %s5215_s8  ;;  %v588_v27 = vrot.slane %v5602_v8, 1  ;;  %v5750_v23 = vld [vmem:[#allocation2 + $0xb8] sm:$0x3] }
  0x41   : > { %477 = vst.msk [vmem:[#allocation4 + $0x30] sm:$0xff] %vm322_vm0, %v5536_v43  ;;  %478 = vst.msk [vmem:[#allocation4 + $0x38] sm:$0xff] %vm322_vm0, %v5547_v47  ;;  %v5612_v10 = vld [vmem:[#allocation2 + $0xc8] sm:$0xff]  ;;  %v592_v17 = vrot.slane %v5610_v9, 1  ;;  %v590_v13 = vrot.slane %v5750_v23, 1 }
  0x42   : > { %479 = vst.msk [vmem:[#allocation4 + $0x40] sm:$0xff] %vm322_vm0, %v5558_v51  ;;  %480 = vst.msk [vmem:[#allocation4 + $0x48] sm:$0xff] %vm322_vm0, %v5560_v52  ;;  %v5624_v20 = vld [vmem:[#allocation2 + $0xd8] sm:$0xff]  ;;  %v5626_v21 = vld [vmem:[#allocation2 + $0xe0] sm:$0xff]  ;;  %646 = vrot.lane.b32.xlu1 %v5668_v0, %s5215_s8  ;;  %v593_v16 = vrot.slane %v5612_v10, 1 }
  0x43   : > { %481 = vst.msk [vmem:[#allocation4 + $0x50] sm:$0xff] %vm322_vm0, %v5571_v54  ;;  %482 = vst.msk [vmem:[#allocation4 + $0x58] sm:$0xff] %vm322_vm0, %v5577_v57  ;;  %v5785_v6 = vld [vmem:[#allocation2 + $0xd0] sm:$0x3]  ;;  %v597_v4 = vrot.slane %v5624_v20, 1  ;;  %v598_v3 = vrot.slane %v5626_v21, 1 }
  0x44   : > { %483 = vst.msk [vmem:[#allocation4 + $0x60] sm:$0xff] %vm322_vm0, %v5581_v58  ;;  %484 = vst.msk [vmem:[#allocation4 + $0x68] sm:$0xff] %vm322_vm0, %v5589_v60  ;;  %v5634_v22 = vld [vmem:[#allocation2 + $0xf0] sm:$0xff]  ;;  %v5788_v5 = vsel %vm551_vm2, %v592_v17, %v593_v16  ;;  %v5800_v2 = vld [vmem:[#allocation2 + $0xe8] sm:$0x3] }
  0x45   : > { %485 = vst.msk [vmem:[#allocation4 + $0x70] sm:$0xff] %vm322_vm0, %v5593_v61  ;;  %486 = vst.msk [vmem:[#allocation4 + $0x78] sm:$0xff] %vm322_vm0, %v5602_v8  ;;  %v5636_v31 = vld [vmem:[#allocation2 + $0xf8] sm:$0xff]  ;;  %v5652_v45 = vld [vmem:[#allocation2 + $0x108] sm:$0xff]  ;;  %v5803_v17 = vsel %vm551_vm2, %v597_v4, %v598_v3  ;;  %v602_v1 = vrot.slane %v5634_v22, 1 }
  0x46   : > { %487 = vst.msk [vmem:[#allocation4 + $0x80] sm:$0xff] %vm322_vm0, %v5610_v9  ;;  %488 = vst.msk [vmem:[#allocation4 + $0x88] sm:$0xff] %vm322_vm0, %v5612_v10 }
  0x47   : > { %489 = vst.msk [vmem:[#allocation4 + $0x90] sm:$0xff] %vm322_vm0, %v5624_v20  ;;  %490 = vst.msk [vmem:[#allocation4 + $0x98] sm:$0xff] %vm322_vm0, %v5626_v21 }
  0x48   : > { %8746 = vst [vmem:[#allocation26_spill] sm:$0xff] %v5639_v38  ;;  %8747 = vst [vmem:[#allocation27_spill] sm:$0xff] %v5642_v39  ;;  %v5901_v39 = vld [vmem:[%s5401_s30 + $0xf8] sm:$0xff] }
  0x49   : > { %491 = vst.msk [vmem:[#allocation4 + $0xa0] sm:$0xff] %vm322_vm0, %v5634_v22  ;;  %492 = vst.msk [vmem:[#allocation4 + $0xa8] sm:$0xff] %vm322_vm0, %v5636_v31 }
  0x4a   : > { %400 = vst.msk [vmem:[#allocation2 + $0x111] sm:$0xff] %vm322_vm0, %v5639_v38  ;;  %493 = vst.msk [vmem:[#allocation4 + $0xb0] sm:$0xff] %vm322_vm0, %v5652_v45  ;;  %v575_v38 = vrot.slane %v5618_v19, 1 }
  0x4b   : > { %8748 = vst [vmem:[#allocation28_spill] sm:$0xff] %v5659_v49  ;;  %8749 = vst [vmem:[#allocation29_spill] sm:$0xff] %v5662_v56 }
  0x4c   : > { %8750 = vst [vmem:[#allocation30_spill] sm:$0xff] %v5665_v63  ;;  %8751 = vst [vmem:[#allocation31_spill] sm:$0xff] %v5668_v0 }
  0x4d   : > { %401 = vst.msk [vmem:[#allocation2 + $0x121] sm:$0xff] %vm322_vm0, %v5659_v49  ;;  %402 = vst.msk [vmem:[#allocation2 + $0x129] sm:$0xff] %vm322_vm0, %v5662_v56  ;;  %v5703_v56 = vsel %vm551_vm2, %v577_v40, %v578_v44  ;;  %v582_v49 = vrot.slane %v5581_v58, 1  ;;  %v5719_v40 = vld [vmem:[#allocation2 + $0xa0] sm:$0x3] }
  0x4e   : > { %8752 = vst [vmem:[#allocation32_spill] sm:$0xff] %v5676_v34  ;;  %403 = vst.msk [vmem:[#allocation2 + $0x139] sm:$0xff] %vm322_vm0, %v5665_v63  ;;  %v5700_v63 = vld [vmem:[%s5401_s30 + $0xe8] sm:$0xff]  ;;  %652 = vrot.lane.b32.xlu0 %v5703_v56, %s5215_s8 }
  0x4f   : > { %8753 = vst [vmem:[#allocation33_spill] sm:$0xff] %v5681_v33  ;;  %8754 = vst [vmem:[#allocation34_spill] sm:$0xff] %v5684_v32 }
  0x50   : > { %404 = vst.msk [vmem:[#allocation2 + $0x141] sm:$0xff] %vm322_vm0, %v5676_v34  ;;  %405 = vst.msk [vmem:[#allocation2 + $0x151] sm:$0xff] %vm322_vm0, %v5681_v33  ;;  %v580_v33 = vrot.slane %v5688_v50, 1 }
  0x51   : > { %406 = vst.msk [vmem:[#allocation2 + $0x159] sm:$0xff] %vm322_vm0, %v5684_v32  ;;  %8755 = vst [vmem:[#allocation35_spill] sm:$0xff] %v5697_v12  ;;  %v5714_v32 = vsel %vm551_vm2, %v573_v7, %v575_v38  ;;  %v5721_v34 = vld [vmem:[#allocation2 + $0x110] sm:$0xff] }
  0x52   : > { %8756 = vst [vmem:[#allocation36_spill] sm:$0xff] %v5700_v63  ;;  %8757 = vst [vmem:[#allocation37_spill] sm:$0xff] %v5703_v56  ;;  %650 = vrot.lane.b32.xlu1 %v5714_v32, %s5215_s8  ;;  %v5737_v26 = vsel %vm551_vm2, %v578_v44, %v580_v33 }
  0x53   : > { %407 = vst.msk [vmem:[#allocation2 + $0x169] sm:$0xff] %vm322_vm0, %v5697_v12  ;;  %408 = vst.msk [vmem:[#allocation2 + $0x171] sm:$0xff] %vm322_vm0, %v5700_v63  ;;  %v5724_v12 = vsel %vm551_vm2, %v582_v49, %v583_v28  ;;  %v587_v63 = vrot.slane %v5593_v61, 1  ;;  %v585_v49 = vrot.slane %v5719_v40, 1 }
  0x54   : > { %8758 = vst [vmem:[#allocation38_spill] sm:$0xff] %v5714_v32  ;;  %8759 = vst [vmem:[#allocation39_spill] sm:$0xff] %v5724_v12  ;;  %v5732_v7 = vld [vmem:[#allocation2 + $0x120] sm:$0xff]  ;;  %v5734_v38 = vld [vmem:[#allocation2 + $0x128] sm:$0xff]  ;;  %656 = vrot.lane.b32.xlu0 %v5724_v12, %s5215_s8 }
  0x55   : > { %494 = vst.msk [vmem:[#allocation4 + $0xb8] sm:$0xff] %vm322_vm0, %v5721_v34  ;;  %8760 = vst [vmem:[#allocation40_spill] sm:$0xff] %v5737_v26  ;;  %v5744_v25 = vld [vmem:[#allocation2 + $0x138] sm:$0xff]  ;;  %v5761_v18 = vsel %vm551_vm2, %v587_v63, %v588_v27  ;;  %v5780_v63 = vsel %vm551_vm2, %v583_v28, %v585_v49  ;;  %v5795_v28 = vsel %vm551_vm2, %v588_v27, %v590_v13  ;;  %v595_v49 = vrot.slane %v5785_v6, 1 }
  0x56   : > { %495 = vst.msk [vmem:[#allocation4 + $0xc0] sm:$0xff] %vm322_vm0, %v5732_v7  ;;  %496 = vst.msk [vmem:[#allocation4 + $0xc8] sm:$0xff] %vm322_vm0, %v5734_v38  ;;  %654 = vrot.lane.b32.xlu1 %v5737_v26, %s5215_s8  ;;  %v600_v27 = vrot.slane %v5800_v2, 1  ;;  %v608_v26 = vrot.slane %v5721_v34, 1  ;;  %v613_v12 = vrot.slane %v5734_v38, 1 }
  0x57   : > { %v5746_v24 = vld [vmem:[#allocation2 + $0x140] sm:$0xff]  ;;  %497 = vst.msk [vmem:[#allocation4 + $0xd0] sm:$0xff] %vm322_vm0, %v5744_v25  ;;  %v5756_v33 = vld [vmem:[#allocation2 + $0x150] sm:$0xff]  ;;  %8761 = vst [vmem:[#allocation41_spill] sm:$0xff] %v5761_v18  ;;  %v5810_v13 = vsel %vm551_vm2, %v593_v16, %v595_v49 }
  0x58   : > { %498 = vst.msk [vmem:[#allocation4 + $0xd8] sm:$0xff] %vm322_vm0, %v5746_v24  ;;  %v5758_v44 = vld [vmem:[#allocation2 + $0x158] sm:$0xff]  ;;  %499 = vst.msk [vmem:[#allocation4 + $0xe0] sm:$0xff] %vm322_vm0, %v5756_v33  ;;  %660 = vrot.lane.b32.xlu0 %v5761_v18, %s5215_s8  ;;  %v603_v18 = vrot.slane %v5636_v31, 1  ;;  %v5825_v16 = vsel %vm551_vm2, %v598_v3, %v600_v27  ;;  %v618_v32 = vrot.slane %v5746_v24, 1 }
  0x59   : > { %500 = vst.msk [vmem:[#allocation4 + $0xe8] sm:$0xff] %vm322_vm0, %v5758_v44  ;;  %8762 = vst [vmem:[#allocation42_spill] sm:$0xff] %v5780_v63  ;;  %v623_v56 = vrot.slane %v5758_v44, 1 }
  0x5a   : > { %v5769_v15 = vld [vmem:[#allocation2 + $0x168] sm:$0xff]  ;;  %v5771_v14 = vld [vmem:[#allocation2 + $0x170] sm:$0xff]  ;;  %8763 = vst [vmem:[#allocation43_spill] sm:$0xff] %v5788_v5  ;;  %658 = vrot.lane.b32.xlu1 %v5780_v63, %s5215_s8  ;;  %8764 = vst [vmem:[#allocation44_spill] sm:$0xff] %v5795_v28  ;;  %v5818_v4 = vsel %vm551_vm2, %v602_v1, %v603_v18  ;;  %v607_v63 = vrot.slane %v5652_v45, 1 }
  0x5b   : > { %501 = vst.msk [vmem:[#allocation4 + $0xf0] sm:$0xff] %vm322_vm0, %v5769_v15  ;;  %502 = vst.msk [vmem:[#allocation4 + $0xf8] sm:$0xff] %vm322_vm0, %v5771_v14  ;;  %v628_v0 = vrot.slane %v5771_v14, 1 }
  0x5c   : > { %664 = vrot.lane.b32.xlu0 %v5788_v5, %s5215_s8  ;;  %8765 = vst [vmem:[#allocation45_spill] sm:$0xff] %v5803_v17  ;;  %8766 = vst [vmem:[#allocation46_spill] sm:$0xff] %v5810_v13  ;;  %v5815_v5 = vld [vmem:[#allocation2 + $0x100] sm:$0x3]  ;;  %v5833_v1 = vsel %vm551_vm2, %v607_v63, %v608_v26 }
  0x5d   : > { %8767 = vst [vmem:[#allocation47_spill] sm:$0xff] %v5818_v4  ;;  %8768 = vst [vmem:[#allocation48_spill] sm:$0xff] %v5825_v16  ;;  %v605_v49 = vrot.slane %v5815_v5, 1 }
  0x5e   : > { %662 = vrot.lane.b32.xlu1 %v5795_v28, %s5215_s8  ;;  %8769 = vst [vmem:[#allocation49_spill] sm:$0xff] %v5833_v1  ;;  %v612_v28 = vrot.slane %v5732_v7, 1  ;;  %8779 = vst [vmem:[#allocation59_spill] sm:$0xff] %v5901_v39 }
  0x5f   : > { %v5840_v3 = vsel %vm551_vm2, %v603_v18, %v605_v49  ;;  %410 = vst.msk [vmem:[#allocation2 + $0x189] sm:$0xff] %vm322_vm0, %v5901_v39  ;;  %v773_v39 = vrot.slane %v5534_v42, 2 }
  0x60   : > { %668 = vrot.lane.b32.xlu0 %v5803_v17, %s5215_s8  ;;  %v5830_v17 = vld [vmem:[#allocation2 + $0x118] sm:$0x3]  ;;  %8770 = vst [vmem:[#allocation50_spill] sm:$0xff] %v5840_v3  ;;  %v5848_v63 = vsel %vm551_vm2, %v612_v28, %v613_v12 }
  0x61   : > { %v610_v27 = vrot.slane %v5830_v17, 1  ;;  %8771 = vst [vmem:[#allocation51_spill] sm:$0xff] %v5848_v63 }
  0x62   : > { %666 = vrot.lane.b32.xlu1 %v5810_v13, %s5215_s8  ;;  %v617_v13 = vrot.slane %v5744_v25, 1 }
  0x63   : > { %v5855_v18 = vsel %vm551_vm2, %v608_v26, %v610_v27 }
  0x64   : > { %672 = vrot.lane.b32.xlu0 %v5818_v4, %s5215_s8  ;;  %v5845_v4 = vld [vmem:[#allocation2 + $0x130] sm:$0x3]  ;;  %8772 = vst [vmem:[#allocation52_spill] sm:$0xff] %v5855_v18  ;;  %v5863_v28 = vsel %vm551_vm2, %v617_v13, %v618_v32 }
  0x65   : > { %v615_v49 = vrot.slane %v5845_v4, 1  ;;  %8773 = vst [vmem:[#allocation53_spill] sm:$0xff] %v5863_v28 }
  0x66   : > { %670 = vrot.lane.b32.xlu1 %v5825_v16, %s5215_s8  ;;  %v622_v16 = vrot.slane %v5756_v33, 1 }
  0x67   : > { %v5870_v26 = vsel %vm551_vm2, %v613_v12, %v615_v49 }
  0x68   : > { %676 = vrot.lane.b32.xlu0 %v5833_v1, %s5215_s8  ;;  %v5860_v1 = vld [vmem:[#allocation2 + $0x148] sm:$0x3]  ;;  %8774 = vst [vmem:[#allocation54_spill] sm:$0xff] %v5870_v26  ;;  %v5878_v13 = vsel %vm551_vm2, %v622_v16, %v623_v56  ;;  %v5895_v16 = vld [vmem:[#allocation2 + $0x178] sm:$0x3] }
  0x69   : > { %v620_v27 = vrot.slane %v5860_v1, 1  ;;  %8775 = vst [vmem:[#allocation55_spill] sm:$0xff] %v5878_v13 }
  0x6a   : > { %674 = vrot.lane.b32.xlu1 %v5840_v3, %s5215_s8  ;;  %v627_v3 = vrot.slane %v5769_v15, 1 }
  0x6b   : > { %v5888_v12 = vsel %vm551_vm2, %v618_v32, %v620_v27  ;;  %v630_v27 = vrot.slane %v5895_v16, 1 }
  0x6c   : > { %680 = vrot.lane.b32.xlu0 %v5848_v63, %s5215_s8  ;;  %v5875_v63 = vld [vmem:[#allocation2 + $0x160] sm:$0x3]  ;;  %8777 = vst [vmem:[#allocation57_spill] sm:$0xff] %v5888_v12 }
  0x6d   : > { %v625_v49 = vrot.slane %v5875_v63, 1 }
  0x6e   : > { %678 = vrot.lane.b32.xlu1 %v5855_v18, %s5215_s8  ;;  %v5885_v18 = vld [vmem:[%s5401_s30 + $0xf0] sm:$0xff] }
  0x6f   : > { %8776 = vst [vmem:[#allocation56_spill] sm:$0xff] %v5885_v18  ;;  %409 = vst.msk [vmem:[#allocation2 + $0x181] sm:$0xff] %vm322_vm0, %v5885_v18  ;;  %v5908_v32 = vsel %vm551_vm2, %v623_v56, %v625_v49  ;;  %v767_v18 = vrot.slane %v5513_v35, 2  ;;  %v772_v49 = vrot.slane %v5532_v41, 2 }
  0x70   : > { %684 = vrot.lane.b32.xlu0 %v5863_v28, %s5215_s8  ;;  %v5898_v28 = vsel %vm551_vm2, %v627_v3, %v628_v0  ;;  %8780 = vst [vmem:[#allocation60_spill] sm:$0xff] %v5908_v32  ;;  %v768_v3 = vrot.slane %v5515_v36, 2 }
  0x71   : > { %8778 = vst [vmem:[#allocation58_spill] sm:$0xff] %v5898_v28 }
  0x72   : > { %682 = vrot.lane.b32.xlu1 %v5870_v26, %s5215_s8  ;;  %v5923_v56 = vsel %vm761_vm3, %v767_v18, %v768_v3  ;;  %v778_v18 = vrot.slane %v5547_v47, 2 }
  0x73   : > { %8782 = vst [vmem:[#allocation62_spill] sm:$0xff] %v5923_v56 }
  0x74   : > { %688 = vrot.lane.b32.xlu0 %v5878_v13, %s5215_s8 }
  0x76   : > { %686 = vrot.lane.b32.xlu1 %v5888_v12, %s5215_s8  ;;  %v5918_v12 = vsel %vm551_vm2, %v628_v0, %v630_v27  ;;  %v5933_v0 = vsel %vm761_vm3, %v772_v49, %v773_v39  ;;  %v782_v49 = vrot.slane %v5558_v51, 2 }
  0x77   : > { %8781 = vst [vmem:[#allocation61_spill] sm:$0xff] %v5918_v12 }
  0x78   : > { %692 = vrot.lane.b32.xlu0 %v5898_v28, %s5215_s8  ;;  %v770_v28 = vrot.slane %v5517_v37, 2 }
  0x7a   : > { %690 = vrot.lane.b32.xlu1 %v5908_v32, %s5215_s8  ;;  %v5940_v27 = vsel %vm761_vm3, %v768_v3, %v770_v28  ;;  %v780_v28 = vrot.slane %v5585_v59, 2  ;;  %v787_v3 = vrot.slane %v5571_v54, 2 }
  0x7b   : > { %8783 = vst [vmem:[#allocation63_spill] sm:$0xff] %v5940_v27 }
  0x7c   : > { %842 = vrot.lane.b32.xlu0 %v5492_v29, %s5216_s9  ;;  %v777_v29 = vrot.slane %v5536_v43, 2 }
  0x7e   : > { %694 = vrot.lane.b32.xlu1 %v5918_v12, %s5215_s8  ;;  %v775_v12 = vrot.slane %v5545_v46, 2  ;;  %v5946_v37 = vsel %vm761_vm3, %v777_v29, %v778_v18  ;;  %v788_v29 = vrot.slane %v5577_v57, 2 }
  0x80   : > { %846 = vrot.lane.b32.xlu0 %v5923_v56, %s5216_s9  ;;  %v783_v56 = vrot.slane %v5560_v52, 2  ;;  %v5972_v59 = vsel %vm761_vm3, %v787_v3, %v788_v29  ;;  %v798_v3 = vrot.slane %v5602_v8, 2 }
  0x82   : > { %844 = vrot.lane.b32.xlu1 %v5495_v30, %s5216_s9  ;;  %v5953_v30 = vsel %vm761_vm3, %v773_v39, %v775_v12  ;;  %v5959_v46 = vsel %vm761_vm3, %v782_v49, %v783_v56  ;;  %v785_v39 = vrot.slane %v5618_v19, 2  ;;  %v792_v12 = vrot.slane %v5581_v58, 2 }
  0x83   : > { %8784 = vst [vmem:[#allocation64_spill] sm:$0xff] %v5953_v30  ;;  %v793_v49 = vrot.slane %v5589_v60, 2 }
  0x84   : > { %850 = vrot.lane.b32.xlu0 %v5933_v0, %s5216_s9 }
  0x85   : > { %v5985_v19 = vsel %vm761_vm3, %v792_v12, %v793_v49  ;;  %v803_v12 = vrot.slane %v5612_v10, 2 }
  0x86   : > { %848 = vrot.lane.b32.xlu1 %v5940_v27, %s5216_s9  ;;  %v5966_v27 = vsel %vm761_vm3, %v778_v18, %v780_v28  ;;  %v790_v18 = vrot.slane %v5688_v50, 2  ;;  %v797_v28 = vrot.slane %v5593_v61, 2 }
  0x87   : > { %8785 = vst [vmem:[#allocation65_spill] sm:$0xff] %v5966_v27 }
  0x88   : > { %854 = vrot.lane.b32.xlu0 %v5946_v37, %s5216_s9  ;;  %v5998_v50 = vsel %vm761_vm3, %v797_v28, %v798_v3  ;;  %v808_v28 = vrot.slane %v5626_v21, 2 }
  0x89   : > { %8788 = vst [vmem:[#allocation68_spill] sm:$0xff] %v5998_v50 }
  0x8a   : > { %852 = vrot.lane.b32.xlu1 %v5953_v30, %s5216_s9  ;;  %v5979_v30 = vsel %vm761_vm3, %v783_v56, %v785_v39  ;;  %v795_v56 = vrot.slane %v5719_v40, 2  ;;  %v802_v39 = vrot.slane %v5610_v9, 2 }
  0x8b   : > { %8786 = vst [vmem:[#allocation66_spill] sm:$0xff] %v5979_v30 }
  0x8c   : > { %858 = vrot.lane.b32.xlu0 %v5959_v46, %s5216_s9  ;;  %v6011_v40 = vsel %vm761_vm3, %v802_v39, %v803_v12  ;;  %v813_v39 = vrot.slane %v5636_v31, 2 }
  0x8d   : > { %8790 = vst [vmem:[#allocation70_spill] sm:$0xff] %v6011_v40 }
  0x8e   : > { %856 = vrot.lane.b32.xlu1 %v5966_v27, %s5216_s9  ;;  %v5992_v27 = vsel %vm761_vm3, %v788_v29, %v790_v18  ;;  %v800_v29 = vrot.slane %v5750_v23, 2  ;;  %v807_v18 = vrot.slane %v5624_v20, 2 }
  0x8f   : > { %8787 = vst [vmem:[#allocation67_spill] sm:$0xff] %v5992_v27 }
  0x90   : > { %862 = vrot.lane.b32.xlu0 %v5972_v59, %s5216_s9  ;;  %v6024_v23 = vsel %vm761_vm3, %v807_v18, %v808_v28  ;;  %v818_v18 = vrot.slane %v5721_v34, 2 }
  0x91   : > { %8792 = vst [vmem:[#allocation72_spill] sm:$0xff] %v6024_v23 }
  0x92   : > { %860 = vrot.lane.b32.xlu1 %v5979_v30, %s5216_s9  ;;  %v6005_v30 = vsel %vm761_vm3, %v793_v49, %v795_v56  ;;  %v805_v49 = vrot.slane %v5785_v6, 2  ;;  %v812_v56 = vrot.slane %v5634_v22, 2 }
  0x93   : > { %8789 = vst [vmem:[#allocation69_spill] sm:$0xff] %v6005_v30 }
  0x94   : > { %866 = vrot.lane.b32.xlu0 %v5985_v19, %s5216_s9  ;;  %v6037_v6 = vsel %vm761_vm3, %v812_v56, %v813_v39  ;;  %v823_v56 = vrot.slane %v5734_v38, 2 }
  0x95   : > { %8794 = vst [vmem:[#allocation74_spill] sm:$0xff] %v6037_v6 }
  0x96   : > { %864 = vrot.lane.b32.xlu1 %v5992_v27, %s5216_s9  ;;  %v6018_v27 = vsel %vm761_vm3, %v798_v3, %v800_v29  ;;  %v810_v3 = vrot.slane %v5800_v2, 2  ;;  %v817_v29 = vrot.slane %v5652_v45, 2 }
  0x97   : > { %8791 = vst [vmem:[#allocation71_spill] sm:$0xff] %v6018_v27 }
  0x98   : > { %870 = vrot.lane.b32.xlu0 %v5998_v50, %s5216_s9  ;;  %v6050_v2 = vsel %vm761_vm3, %v817_v29, %v818_v18  ;;  %v828_v29 = vrot.slane %v5746_v24, 2 }
  0x99   : > { %8796 = vst [vmem:[#allocation76_spill] sm:$0xff] %v6050_v2 }
  0x9a   : > { %868 = vrot.lane.b32.xlu1 %v6005_v30, %s5216_s9  ;;  %v6031_v30 = vsel %vm761_vm3, %v803_v12, %v805_v49  ;;  %v815_v12 = vrot.slane %v5815_v5, 2  ;;  %v822_v49 = vrot.slane %v5732_v7, 2 }
  0x9b   : > { %8793 = vst [vmem:[#allocation73_spill] sm:$0xff] %v6031_v30 }
  0x9c   : > { %874 = vrot.lane.b32.xlu0 %v6011_v40, %s5216_s9  ;;  %v6063_v5 = vsel %vm761_vm3, %v822_v49, %v823_v56  ;;  %v833_v49 = vrot.slane %v5758_v44, 2 }
  0x9d   : > { %8798 = vst [vmem:[#allocation78_spill] sm:$0xff] %v6063_v5 }
  0x9e   : > { %872 = vrot.lane.b32.xlu1 %v6018_v27, %s5216_s9  ;;  %v6044_v27 = vsel %vm761_vm3, %v808_v28, %v810_v3  ;;  %v820_v28 = vrot.slane %v5830_v17, 2  ;;  %v827_v3 = vrot.slane %v5744_v25, 2 }
  0x9f   : > { %8795 = vst [vmem:[#allocation75_spill] sm:$0xff] %v6044_v27 }
  0xa0   : > { %878 = vrot.lane.b32.xlu0 %v6024_v23, %s5216_s9  ;;  %v6076_v17 = vsel %vm761_vm3, %v827_v3, %v828_v29  ;;  %v837_v3 = vrot.slane %v5769_v15, 2 }
  0xa1   : > { %8800 = vst [vmem:[#allocation80_spill] sm:$0xff] %v6076_v17 }
  0xa2   : > { %876 = vrot.lane.b32.xlu1 %v6031_v30, %s5216_s9  ;;  %v6057_v30 = vsel %vm761_vm3, %v813_v39, %v815_v12  ;;  %v825_v39 = vrot.slane %v5845_v4, 2  ;;  %v832_v12 = vrot.slane %v5756_v33, 2  ;;  %v830_v4 = vrot.slane %v5860_v1, 2 }
  0xa3   : > { %8797 = vst [vmem:[#allocation77_spill] sm:$0xff] %v6057_v30  ;;  %v835_v1 = vrot.slane %v5875_v63, 2  ;;  %v840_v63 = vrot.slane %v5895_v16, 2 }
  0xa4   : > { %882 = vrot.lane.b32.xlu0 %v6037_v6, %s5216_s9 }
  0xa6   : > { %880 = vrot.lane.b32.xlu1 %v6044_v27, %s5216_s9  ;;  %v6070_v27 = vsel %vm761_vm3, %v818_v18, %v820_v28  ;;  %v6084_v18 = vsel %vm761_vm3, %v823_v56, %v825_v39  ;;  %v6090_v28 = vsel %vm761_vm3, %v832_v12, %v833_v49 }
  0xa7   : > { %8799 = vst [vmem:[#allocation79_spill] sm:$0xff] %v6070_v27  ;;  %8801 = vst [vmem:[#allocation81_spill] sm:$0xff] %v6090_v28 }
  0xa8   : > { %886 = vrot.lane.b32.xlu0 %v6050_v2, %s5216_s9  ;;  %v637_v56 = vpop.permute.xlu1 %636 }
  0xa9   : > { %731 = vst.msk [vmem:[#allocation4 + $0x10] sm:$0xff] %vm728_vm4, %v637_v56 }
  0xaa   : > { %884 = vrot.lane.b32.xlu1 %v6057_v30, %s5216_s9  ;;  %v633_v30 = vpop.permute.xlu0 %632 }
  0xab   : > { %729 = vst.msk [vmem:[#allocation4] sm:$0xff] %vm728_vm4, %v633_v30  ;;  %v6098_v30 = vsel %vm761_vm3, %v828_v29, %v830_v4 }
  0xac   : > { %890 = vrot.lane.b32.xlu0 %v6063_v5, %s5216_s9  ;;  %v838_v5 = vrot.slane %v5771_v14, 2  ;;  %v639_v29 = vpop.permute.xlu1 %638 }
  0xad   : > { %732 = vst.msk [vmem:[#allocation4 + $0x18] sm:$0xff] %vm728_vm4, %v639_v29 }
  0xae   : > { %888 = vrot.lane.b32.xlu1 %v6070_v27, %s5216_s9  ;;  %v635_v27 = vpop.permute.xlu0 %634  ;;  %v6105_v39 = vsel %vm761_vm3, %v837_v3, %v838_v5  ;;  %v6121_v3 = vsel %vm761_vm3, %v838_v5, %v840_v63 }
  0xaf   : > { %730 = vst.msk [vmem:[#allocation4 + $0x8] sm:$0xff] %vm728_vm4, %v635_v27  ;;  %v6111_v27 = vsel %vm761_vm3, %v833_v49, %v835_v1 }
  0xb0   : > { %894 = vrot.lane.b32.xlu0 %v6076_v17, %s5216_s9  ;;  %v643_v56 = vpop.permute.xlu1 %642 }
  0xb1   : > { %734 = vst.msk [vmem:[#allocation4 + $0x28] sm:$0xff] %vm728_vm4, %v643_v56 }
  0xb2   : > { %892 = vrot.lane.b32.xlu1 %v6084_v18, %s5216_s9  ;;  %v641_v12 = vpop.permute.xlu0 %640 }
  0xb3   : > { %733 = vst.msk [vmem:[#allocation4 + $0x20] sm:$0xff] %vm728_vm4, %v641_v12 }
  0xb4   : > { %898 = vrot.lane.b32.xlu0 %v6090_v28, %s5216_s9  ;;  %v647_v49 = vpop.permute.xlu1 %646 }
  0xb5   : > { %736 = vst.msk [vmem:[#allocation4 + $0x38] sm:$0xff] %vm728_vm4, %v647_v49 }
  0xb6   : > { %896 = vrot.lane.b32.xlu1 %v6098_v30, %s5216_s9  ;;  %v645_v4 = vpop.permute.xlu0 %644 }
  0xb7   : > { %735 = vst.msk [vmem:[#allocation4 + $0x30] sm:$0xff] %vm728_vm4, %v645_v4 }
  0xb8   : > { %902 = vrot.lane.b32.xlu0 %v6105_v39, %s5216_s9 }
  0xba   : > { %900 = vrot.lane.b32.xlu1 %v6111_v27, %s5216_s9  ;;  %v649_v16 = vpop.permute.xlu0 %648 }
  0xbb   : > { %737 = vst.msk [vmem:[#allocation4 + $0x40] sm:$0xff] %vm728_vm4, %v649_v16 }
  0xbc   : > { %973 = vrot.lane.b32.xlu0 %v5513_v35, %s5217_s10 }
  0xbe   : > { %904 = vrot.lane.b32.xlu1 %v6121_v3, %s5216_s9 }
  0xc0   : > { %977 = vrot.lane.b32.xlu0 %v5532_v41, %s5217_s10  ;;  %v653_v5 = vpop.permute.xlu0 %652 }
  0xc1   : > { %739 = vst.msk [vmem:[#allocation4 + $0x50] sm:$0xff] %vm728_vm4, %v653_v5 }
  0xc2   : > { %975 = vrot.lane.b32.xlu1 %v5515_v36, %s5217_s10 }
  0xc4   : > { %v651_v35 = vpop.permute.xlu1 %650  ;;  %981 = vrot.lane.b32.xlu0 %v5536_v43, %s5217_s10 }
  0xc5   : > { %738 = vst.msk [vmem:[#allocation4 + $0x48] sm:$0xff] %vm728_vm4, %v651_v35 }
  0xc6   : > { %979 = vrot.lane.b32.xlu1 %v5534_v42, %s5217_s10  ;;  %v657_v1 = vpop.permute.xlu0 %656 }
  0xc7   : > { %741 = vst.msk [vmem:[#allocation4 + $0x60] sm:$0xff] %vm728_vm4, %v657_v1 }
  0xc8   : > { %v655_v12 = vpop.permute.xlu1 %654  ;;  %985 = vrot.lane.b32.xlu0 %v5558_v51, %s5217_s10 }
  0xc9   : > { %740 = vst.msk [vmem:[#allocation4 + $0x58] sm:$0xff] %vm728_vm4, %v655_v12 }
  0xca   : > { %983 = vrot.lane.b32.xlu1 %v5547_v47, %s5217_s10  ;;  %v661_v36 = vpop.permute.xlu0 %660 }
  0xcb   : > { %743 = vst.msk [vmem:[#allocation4 + $0x70] sm:$0xff] %vm728_vm4, %v661_v36 }
  0xcc   : > { %v659_v63 = vpop.permute.xlu1 %658  ;;  %989 = vrot.lane.b32.xlu0 %v5571_v54, %s5217_s10 }
  0xcd   : > { %742 = vst.msk [vmem:[#allocation4 + $0x68] sm:$0xff] %vm728_vm4, %v659_v63 }
  0xce   : > { %987 = vrot.lane.b32.xlu1 %v5560_v52, %s5217_s10  ;;  %v665_v29 = vpop.permute.xlu0 %664 }
  0xcf   : > { %745 = vst.msk [vmem:[#allocation4 + $0x80] sm:$0xff] %vm728_vm4, %v665_v29 }
  0xd0   : > { %v663_v4 = vpop.permute.xlu1 %662  ;;  %993 = vrot.lane.b32.xlu0 %v5581_v58, %s5217_s10 }
  0xd1   : > { %744 = vst.msk [vmem:[#allocation4 + $0x78] sm:$0xff] %vm728_vm4, %v663_v4 }
  0xd2   : > { %991 = vrot.lane.b32.xlu1 %v5577_v57, %s5217_s10  ;;  %v669_v56 = vpop.permute.xlu0 %668 }
  0xd3   : > { %747 = vst.msk [vmem:[#allocation4 + $0x90] sm:$0xff] %vm728_vm4, %v669_v56 }
  0xd4   : > { %v667_v16 = vpop.permute.xlu1 %666  ;;  %997 = vrot.lane.b32.xlu0 %v5593_v61, %s5217_s10 }
  0xd5   : > { %746 = vst.msk [vmem:[#allocation4 + $0x88] sm:$0xff] %vm728_vm4, %v667_v16 }
  0xd6   : > { %995 = vrot.lane.b32.xlu1 %v5589_v60, %s5217_s10  ;;  %v673_v49 = vpop.permute.xlu0 %672 }
  0xd7   : > { %749 = vst.msk [vmem:[#allocation4 + $0xa0] sm:$0xff] %vm728_vm4, %v673_v49 }
  0xd8   : > { %v671_v5 = vpop.permute.xlu1 %670  ;;  %1001 = vrot.lane.b32.xlu0 %v5610_v9, %s5217_s10 }
  0xd9   : > { %748 = vst.msk [vmem:[#allocation4 + $0x98] sm:$0xff] %vm728_vm4, %v671_v5 }
  0xda   : > { %999 = vrot.lane.b32.xlu1 %v5602_v8, %s5217_s10  ;;  %v677_v35 = vpop.permute.xlu0 %676 }
  0xdb   : > { %751 = vst.msk [vmem:[#allocation4 + $0xb0] sm:$0xff] %vm728_vm4, %v677_v35 }
  0xdc   : > { %v675_v1 = vpop.permute.xlu1 %674  ;;  %1005 = vrot.lane.b32.xlu0 %v5624_v20, %s5217_s10 }
  0xdd   : > { %750 = vst.msk [vmem:[#allocation4 + $0xa8] sm:$0xff] %vm728_vm4, %v675_v1 }
  0xde   : > { %1003 = vrot.lane.b32.xlu1 %v5612_v10, %s5217_s10  ;;  %v681_v12 = vpop.permute.xlu0 %680 }
  0xdf   : > { %753 = vst.msk [vmem:[#allocation4 + $0xc0] sm:$0xff] %vm728_vm4, %v681_v12 }
  0xe0   : > { %v679_v36 = vpop.permute.xlu1 %678  ;;  %1009 = vrot.lane.b32.xlu0 %v5634_v22, %s5217_s10 }
  0xe1   : > { %752 = vst.msk [vmem:[#allocation4 + $0xb8] sm:$0xff] %vm728_vm4, %v679_v36  ;;  %v6210_v36 = vld [vmem:[#allocation2 + $0x180] sm:$0xff] }
  0xe2   : > { %1007 = vrot.lane.b32.xlu1 %v5626_v21, %s5217_s10  ;;  %v685_v63 = vpop.permute.xlu0 %684 }
  0xe3   : > { %755 = vst.msk [vmem:[#allocation4 + $0xd0] sm:$0xff] %vm728_vm4, %v685_v63 }
  0xe4   : > { %v683_v29 = vpop.permute.xlu1 %682  ;;  %1013 = vrot.lane.b32.xlu0 %v5652_v45, %s5217_s10 }
  0xe5   : > { %754 = vst.msk [vmem:[#allocation4 + $0xc8] sm:$0xff] %vm728_vm4, %v683_v29 }
  0xe6   : > { %1011 = vrot.lane.b32.xlu1 %v5636_v31, %s5217_s10  ;;  %v689_v4 = vpop.permute.xlu0 %688 }
  0xe7   : > { %757 = vst.msk [vmem:[#allocation4 + $0xe0] sm:$0xff] %vm728_vm4, %v689_v4 }
  0xe8   : > { %v687_v56 = vpop.permute.xlu1 %686  ;;  %1017 = vrot.lane.b32.xlu0 %v5732_v7, %s5217_s10 }
  0xe9   : > { %756 = vst.msk [vmem:[#allocation4 + $0xd8] sm:$0xff] %vm728_vm4, %v687_v56  ;;  %v6221_v56 = vld [vmem:[#allocation2 + $0x188] sm:$0xff] }
  0xea   : > { %1015 = vrot.lane.b32.xlu1 %v5721_v34, %s5217_s10  ;;  %v693_v16 = vpop.permute.xlu0 %692  ;;  %8802 = vst [vmem:[#allocation82_spill] sm:$0xff] %v6221_v56 }
  0xeb   : > { %759 = vst.msk [vmem:[#allocation4 + $0xf0] sm:$0xff] %vm728_vm4, %v693_v16 }
  0xec   : > { %v691_v49 = vpop.permute.xlu1 %690  ;;  %1021 = vrot.lane.b32.xlu0 %v5744_v25, %s5217_s10 }
  0xed   : > { %758 = vst.msk [vmem:[#allocation4 + $0xe8] sm:$0xff] %vm728_vm4, %v691_v49 }
  0xee   : > { %1019 = vrot.lane.b32.xlu1 %v5734_v38, %s5217_s10  ;;  %v843_v5 = vpop.permute.xlu0 %842 }
  0xef   : > { %939 = vst.msk [vmem:[#allocation4] sm:$0xff] %vm938_vm5, %v843_v5 }
  0xf0   : > { %v695_v35 = vpop.permute.xlu1 %694  ;;  %1025 = vrot.lane.b32.xlu0 %v5756_v33, %s5217_s10 }
  0xf1   : > { %760 = vst.msk [vmem:[#allocation4 + $0xf8] sm:$0xff] %vm728_vm4, %v695_v35 }
  0xf2   : > { %1023 = vrot.lane.b32.xlu1 %v5746_v24, %s5217_s10  ;;  %v847_v1 = vpop.permute.xlu0 %846 }
  0xf3   : > { %941 = vst.msk [vmem:[#allocation4 + $0x10] sm:$0xff] %vm938_vm5, %v847_v1 }
  0xf4   : > { %v845_v12 = vpop.permute.xlu1 %844  ;;  %1029 = vrot.lane.b32.xlu0 %v5769_v15, %s5217_s10 }
  0xf5   : > { %940 = vst.msk [vmem:[#allocation4 + $0x8] sm:$0xff] %vm938_vm5, %v845_v12 }
  0xf6   : > { %1027 = vrot.lane.b32.xlu1 %v5758_v44, %s5217_s10  ;;  %v851_v63 = vpop.permute.xlu0 %850 }
  0xf7   : > { %943 = vst.msk [vmem:[#allocation4 + $0x20] sm:$0xff] %vm938_vm5, %v851_v63  ;;  %v8803_v63 = vld [vmem:[#allocation27_spill] sm:$0xff] }
  0xf8   : > { %v849_v29 = vpop.permute.xlu1 %848  ;;  %1033 = vrot.lane.b32.xlu0 %v6210_v36, %s5217_s10 }
  0xf9   : > { %942 = vst.msk [vmem:[#allocation4 + $0x18] sm:$0xff] %vm938_vm5, %v849_v29 }
  0xfa   : > { %1031 = vrot.lane.b32.xlu1 %v5771_v14, %s5217_s10  ;;  %v855_v4 = vpop.permute.xlu0 %854 }
  0xfb   : > { %945 = vst.msk [vmem:[#allocation4 + $0x30] sm:$0xff] %vm938_vm5, %v855_v4 }
  0xfc   : > { %v853_v16 = vpop.permute.xlu1 %852  ;;  %1108 = vrot.lane.b32.xlu0 %v5552_v48, %s5218_s11 }
  0xfd   : > { %944 = vst.msk [vmem:[#allocation4 + $0x28] sm:$0xff] %vm938_vm5, %v853_v16  ;;  %v8805_v16 = vld [vmem:[#allocation37_spill] sm:$0xff] }
  0xfe   : > { %1035 = vrot.lane.b32.xlu1 %v6221_v56, %s5217_s10  ;;  %v859_v49 = vpop.permute.xlu0 %858 }
  0xff   : > { %947 = vst.msk [vmem:[#allocation4 + $0x40] sm:$0xff] %vm938_vm5, %v859_v49  ;;  %v8806_v49 = vld [vmem:[#allocation38_spill] sm:$0xff] }
 0x100   : > { %v857_v5 = vpop.permute.xlu1 %856  ;;  %1112 = vrot.lane.b32.xlu0 %v5565_v53, %s5218_s11 }
 0x101   : > { %946 = vst.msk [vmem:[#allocation4 + $0x38] sm:$0xff] %vm938_vm5, %v857_v5 }
 0x102   : > { %1110 = vrot.lane.b32.xlu1 %v5574_v55, %s5218_s11  ;;  %v863_v35 = vpop.permute.xlu0 %862  ;;  %v8804_v55 = vld [vmem:[#allocation31_spill] sm:$0xff] }
 0x103   : > { %949 = vst.msk [vmem:[#allocation4 + $0x50] sm:$0xff] %vm938_vm5, %v863_v35 }
 0x104   : > { %v861_v48 = vpop.permute.xlu1 %860  ;;  %1116 = vrot.lane.b32.xlu0 %v5596_v62, %s5218_s11 }
 0x105   : > { %948 = vst.msk [vmem:[#allocation4 + $0x48] sm:$0xff] %vm938_vm5, %v861_v48  ;;  %v8807_v48 = vld [vmem:[#allocation39_spill] sm:$0xff] }
 0x106   : > { %1114 = vrot.lane.b32.xlu1 %v5615_v11, %s5218_s11  ;;  %v867_v1 = vpop.permute.xlu0 %866 }
 0x107   : > { %951 = vst.msk [vmem:[#allocation4 + $0x60] sm:$0xff] %vm938_vm5, %v867_v1  ;;  %v8808_v1 = vld [vmem:[#allocation40_spill] sm:$0xff] }
 0x108   : > { %v865_v12 = vpop.permute.xlu1 %864  ;;  %1120 = vrot.lane.b32.xlu0 %v8803_v63, %s5218_s11 }
 0x109   : > { %950 = vst.msk [vmem:[#allocation4 + $0x58] sm:$0xff] %vm938_vm5, %v865_v12 }
 0x10a   : > { %1118 = vrot.lane.b32.xlu1 %v8804_v55, %s5218_s11  ;;  %v871_v29 = vpop.permute.xlu0 %870 }
 0x10b   : > { %953 = vst.msk [vmem:[#allocation4 + $0x70] sm:$0xff] %vm938_vm5, %v871_v29 }
 0x10c   : > { %v869_v4 = vpop.permute.xlu1 %868  ;;  %1124 = vrot.lane.b32.xlu0 %v8805_v16, %s5218_s11 }
 0x10d   : > { %952 = vst.msk [vmem:[#allocation4 + $0x68] sm:$0xff] %vm938_vm5, %v869_v4  ;;  %v8809_v4 = vld [vmem:[#allocation41_spill] sm:$0xff] }
 0x10e   : > { %1122 = vrot.lane.b32.xlu1 %v8806_v49, %s5218_s11  ;;  %v875_v5 = vpop.permute.xlu0 %874 }
 0x10f   : > { %955 = vst.msk [vmem:[#allocation4 + $0x80] sm:$0xff] %vm938_vm5, %v875_v5  ;;  %v8810_v5 = vld [vmem:[#allocation42_spill] sm:$0xff] }
 0x110   : > { %v873_v35 = vpop.permute.xlu1 %872  ;;  %1128 = vrot.lane.b32.xlu0 %v8807_v48, %s5218_s11 }
 0x111   : > { %954 = vst.msk [vmem:[#allocation4 + $0x78] sm:$0xff] %vm938_vm5, %v873_v35  ;;  %v8811_v35 = vld [vmem:[#allocation43_spill] sm:$0xff] }
 0x112   : > { %1126 = vrot.lane.b32.xlu1 %v8808_v1, %s5218_s11  ;;  %v879_v12 = vpop.permute.xlu0 %878 }
 0x113   : > { %957 = vst.msk [vmem:[#allocation4 + $0x90] sm:$0xff] %vm938_vm5, %v879_v12  ;;  %v8812_v12 = vld [vmem:[#allocation44_spill] sm:$0xff] }
 0x114   : > { %v877_v29 = vpop.permute.xlu1 %876  ;;  %1132 = vrot.lane.b32.xlu0 %v8809_v4, %s5218_s11 }
 0x115   : > { %956 = vst.msk [vmem:[#allocation4 + $0x88] sm:$0xff] %vm938_vm5, %v877_v29  ;;  %v8813_v29 = vld [vmem:[#allocation45_spill] sm:$0xff] }
 0x116   : > { %1130 = vrot.lane.b32.xlu1 %v8810_v5, %s5218_s11  ;;  %v883_v16 = vpop.permute.xlu0 %882 }
 0x117   : > { %959 = vst.msk [vmem:[#allocation4 + $0xa0] sm:$0xff] %vm938_vm5, %v883_v16  ;;  %v8814_v16 = vld [vmem:[#allocation46_spill] sm:$0xff] }
 0x118   : > { %v881_v48 = vpop.permute.xlu1 %880  ;;  %1136 = vrot.lane.b32.xlu0 %v8811_v35, %s5218_s11 }
 0x119   : > { %958 = vst.msk [vmem:[#allocation4 + $0x98] sm:$0xff] %vm938_vm5, %v881_v48  ;;  %v8815_v48 = vld [vmem:[#allocation47_spill] sm:$0xff] }
 0x11a   : > { %1134 = vrot.lane.b32.xlu1 %v8812_v12, %s5218_s11  ;;  %v887_v1 = vpop.permute.xlu0 %886 }
 0x11b   : > { %961 = vst.msk [vmem:[#allocation4 + $0xb0] sm:$0xff] %vm938_vm5, %v887_v1  ;;  %v8816_v1 = vld [vmem:[#allocation48_spill] sm:$0xff] }
 0x11c   : > { %v885_v4 = vpop.permute.xlu1 %884  ;;  %1140 = vrot.lane.b32.xlu0 %v8813_v29, %s5218_s11 }
 0x11d   : > { %960 = vst.msk [vmem:[#allocation4 + $0xa8] sm:$0xff] %vm938_vm5, %v885_v4  ;;  %v8817_v4 = vld [vmem:[#allocation49_spill] sm:$0xff] }
 0x11e   : > { %1138 = vrot.lane.b32.xlu1 %v8814_v16, %s5218_s11  ;;  %v891_v5 = vpop.permute.xlu0 %890 }
 0x11f   : > { %963 = vst.msk [vmem:[#allocation4 + $0xc0] sm:$0xff] %vm938_vm5, %v891_v5  ;;  %v8818_v5 = vld [vmem:[#allocation50_spill] sm:$0xff] }
 0x120   : > { %v889_v35 = vpop.permute.xlu1 %888  ;;  %1144 = vrot.lane.b32.xlu0 %v8815_v48, %s5218_s11 }
 0x121   : > { %962 = vst.msk [vmem:[#allocation4 + $0xb8] sm:$0xff] %vm938_vm5, %v889_v35  ;;  %v8819_v35 = vld [vmem:[#allocation51_spill] sm:$0xff] }
 0x122   : > { %1142 = vrot.lane.b32.xlu1 %v8816_v1, %s5218_s11  ;;  %v895_v12 = vpop.permute.xlu0 %894 }
 0x123   : > { %965 = vst.msk [vmem:[#allocation4 + $0xd0] sm:$0xff] %vm938_vm5, %v895_v12  ;;  %v8820_v12 = vld [vmem:[#allocation52_spill] sm:$0xff] }
 0x124   : > { %v893_v29 = vpop.permute.xlu1 %892  ;;  %1148 = vrot.lane.b32.xlu0 %v8817_v4, %s5218_s11 }
 0x125   : > { %964 = vst.msk [vmem:[#allocation4 + $0xc8] sm:$0xff] %vm938_vm5, %v893_v29  ;;  %v8821_v29 = vld [vmem:[#allocation53_spill] sm:$0xff] }
 0x126   : > { %1146 = vrot.lane.b32.xlu1 %v8818_v5, %s5218_s11  ;;  %v899_v16 = vpop.permute.xlu0 %898 }
 0x127   : > { %967 = vst.msk [vmem:[#allocation4 + $0xe0] sm:$0xff] %vm938_vm5, %v899_v16 }
 0x128   : > { %v897_v48 = vpop.permute.xlu1 %896  ;;  %1152 = vrot.lane.b32.xlu0 %v8819_v35, %s5218_s11  ;;  %v1103_v35 = vrot.slane %v6210_v36, 1 }
 0x129   : > { %966 = vst.msk [vmem:[#allocation4 + $0xd8] sm:$0xff] %vm938_vm5, %v897_v48 }
 0x12a   : > { %1150 = vrot.lane.b32.xlu1 %v8820_v12, %s5218_s11  ;;  %v903_v1 = vpop.permute.xlu0 %902  ;;  %v8823_v12 = vld [vmem:[#allocation58_spill] sm:$0xff] }
 0x12b   : > { %969 = vst.msk [vmem:[#allocation4 + $0xf0] sm:$0xff] %vm938_vm5, %v903_v1  ;;  %v1104_v1 = vrot.slane %v6221_v56, 1 }
 0x12c   : > { %v901_v4 = vpop.permute.xlu1 %900  ;;  %1156 = vrot.lane.b32.xlu0 %v8821_v29, %s5218_s11  ;;  %v8822_v29 = vld [vmem:[#allocation57_spill] sm:$0xff] }
 0x12d   : > { %968 = vst.msk [vmem:[#allocation4 + $0xe8] sm:$0xff] %vm938_vm5, %v901_v4 }
 0x12e   : > { %1154 = vrot.lane.b32.xlu1 %v5870_v26, %s5218_s11  ;;  %v974_v16 = vpop.permute.xlu0 %973 }
 0x12f   : > { %1070 = vst.msk [vmem:[#allocation4] sm:$0xff] %vm1069_vm6, %v974_v16  ;;  %v6311_v16 = vld [vmem:[#allocation2 + $0x190] sm:$0x3] }
 0x130   : > { %v905_v48 = vpop.permute.xlu1 %904  ;;  %1160 = vrot.lane.b32.xlu0 %v5878_v13, %s5218_s11  ;;  %v6315_v13 = vsel %vm551_vm2, %v1103_v35, %v1104_v1 }
 0x131   : > { %970 = vst.msk [vmem:[#allocation4 + $0xf8] sm:$0xff] %vm938_vm5, %v905_v48  ;;  %8824 = vst [vmem:[#allocation27_spill] sm:$0xff] %v6315_v13 }
 0x132   : > { %1158 = vrot.lane.b32.xlu1 %v8822_v29, %s5218_s11  ;;  %v978_v4 = vpop.permute.xlu0 %977  ;;  %v1106_v29 = vrot.slane %v6311_v16, 1 }
 0x133   : > { %1072 = vst.msk [vmem:[#allocation4 + $0x10] sm:$0xff] %vm1069_vm6, %v978_v4 }
 0x134   : > { %v976_v26 = vpop.permute.xlu1 %975  ;;  %1164 = vrot.lane.b32.xlu0 %v8823_v12, %s5218_s11  ;;  %v8825_v12 = vld [vmem:[#allocation61_spill] sm:$0xff]  ;;  %v6328_v35 = vsel %vm551_vm2, %v1104_v1, %v1106_v29  ;;  %v8828_v29 = vld [vmem:[#allocation63_spill] sm:$0xff] }
 0x135   : > { %1071 = vst.msk [vmem:[#allocation4 + $0x8] sm:$0xff] %vm1069_vm6, %v976_v26  ;;  %8826 = vst [vmem:[#allocation31_spill] sm:$0xff] %v6328_v35 }
 0x136   : > { %1162 = vrot.lane.b32.xlu1 %v5908_v32, %s5218_s11  ;;  %v982_v48 = vpop.permute.xlu0 %981 }
 0x137   : > { %1074 = vst.msk [vmem:[#allocation4 + $0x20] sm:$0xff] %vm1069_vm6, %v982_v48  ;;  %v8827_v48 = vld [vmem:[#allocation62_spill] sm:$0xff] }
 0x138   : > { %v980_v4 = vpop.permute.xlu1 %979  ;;  %1168 = vrot.lane.b32.xlu0 %v6315_v13, %s5218_s11 }
 0x139   : > { %1073 = vst.msk [vmem:[#allocation4 + $0x18] sm:$0xff] %vm1069_vm6, %v980_v4 }
 0x13a   : > { %1166 = vrot.lane.b32.xlu1 %v8825_v12, %s5218_s11  ;;  %v986_v26 = vpop.permute.xlu0 %985 }
 0x13b   : > { %1076 = vst.msk [vmem:[#allocation4 + $0x30] sm:$0xff] %vm1069_vm6, %v986_v26 }
 0x13c   : > { %v984_v32 = vpop.permute.xlu1 %983  ;;  %1242 = vrot.lane.b32.xlu0 %v8827_v48, %s5219_s12 }
 0x13d   : > { %1075 = vst.msk [vmem:[#allocation4 + $0x28] sm:$0xff] %vm1069_vm6, %v984_v32  ;;  %v8829_v32 = vld [vmem:[#allocation64_spill] sm:$0xff] }
 0x13e   : > { %1170 = vrot.lane.b32.xlu1 %v6328_v35, %s5218_s11  ;;  %v990_v4 = vpop.permute.xlu0 %989 }
 0x13f   : > { %1078 = vst.msk [vmem:[#allocation4 + $0x40] sm:$0xff] %vm1069_vm6, %v990_v4 }
 0x140   : > { %v988_v13 = vpop.permute.xlu1 %987  ;;  %1246 = vrot.lane.b32.xlu0 %v5933_v0, %s5219_s12 }
 0x141   : > { %1077 = vst.msk [vmem:[#allocation4 + $0x38] sm:$0xff] %vm1069_vm6, %v988_v13  ;;  %v8830_v13 = vld [vmem:[#allocation65_spill] sm:$0xff] }
 0x142   : > { %1244 = vrot.lane.b32.xlu1 %v8828_v29, %s5219_s12  ;;  %v994_v1 = vpop.permute.xlu0 %993 }
 0x143   : > { %1080 = vst.msk [vmem:[#allocation4 + $0x50] sm:$0xff] %vm1069_vm6, %v994_v1 }
 0x144   : > { %v992_v26 = vpop.permute.xlu1 %991  ;;  %1250 = vrot.lane.b32.xlu0 %v5946_v37, %s5219_s12 }
 0x145   : > { %1079 = vst.msk [vmem:[#allocation4 + $0x48] sm:$0xff] %vm1069_vm6, %v992_v26  ;;  %v8831_v26 = vld [vmem:[#allocation66_spill] sm:$0xff] }
 0x146   : > { %1248 = vrot.lane.b32.xlu1 %v8829_v32, %s5219_s12  ;;  %v998_v48 = vpop.permute.xlu0 %997 }
 0x147   : > { %1082 = vst.msk [vmem:[#allocation4 + $0x60] sm:$0xff] %vm1069_vm6, %v998_v48 }
 0x148   : > { %v996_v4 = vpop.permute.xlu1 %995  ;;  %1254 = vrot.lane.b32.xlu0 %v5959_v46, %s5219_s12 }
 0x149   : > { %1081 = vst.msk [vmem:[#allocation4 + $0x58] sm:$0xff] %vm1069_vm6, %v996_v4  ;;  %v8832_v4 = vld [vmem:[#allocation67_spill] sm:$0xff] }
 0x14a   : > { %1252 = vrot.lane.b32.xlu1 %v8830_v13, %s5219_s12  ;;  %v1002_v29 = vpop.permute.xlu0 %1001 }
 0x14b   : > { %1084 = vst.msk [vmem:[#allocation4 + $0x70] sm:$0xff] %vm1069_vm6, %v1002_v29 }
 0x14c   : > { %v1000_v1 = vpop.permute.xlu1 %999  ;;  %1258 = vrot.lane.b32.xlu0 %v5972_v59, %s5219_s12 }
 0x14d   : > { %1083 = vst.msk [vmem:[#allocation4 + $0x68] sm:$0xff] %vm1069_vm6, %v1000_v1  ;;  %v8833_v1 = vld [vmem:[#allocation69_spill] sm:$0xff] }
 0x14e   : > { %1256 = vrot.lane.b32.xlu1 %v8831_v26, %s5219_s12  ;;  %v1006_v48 = vpop.permute.xlu0 %1005 }
 0x14f   : > { %1086 = vst.msk [vmem:[#allocation4 + $0x80] sm:$0xff] %vm1069_vm6, %v1006_v48 }
 0x150   : > { %v1004_v35 = vpop.permute.xlu1 %1003  ;;  %1262 = vrot.lane.b32.xlu0 %v5985_v19, %s5219_s12 }
 0x151   : > { %1085 = vst.msk [vmem:[#allocation4 + $0x78] sm:$0xff] %vm1069_vm6, %v1004_v35  ;;  %v8834_v35 = vld [vmem:[#allocation71_spill] sm:$0xff] }
 0x152   : > { %1260 = vrot.lane.b32.xlu1 %v8832_v4, %s5219_s12  ;;  %v1010_v29 = vpop.permute.xlu0 %1009 }
 0x153   : > { %1088 = vst.msk [vmem:[#allocation4 + $0x90] sm:$0xff] %vm1069_vm6, %v1010_v29 }
 0x154   : > { %v1008_v12 = vpop.permute.xlu1 %1007  ;;  %1266 = vrot.lane.b32.xlu0 %v5998_v50, %s5219_s12 }
 0x155   : > { %1087 = vst.msk [vmem:[#allocation4 + $0x88] sm:$0xff] %vm1069_vm6, %v1008_v12  ;;  %v8835_v12 = vld [vmem:[#allocation73_spill] sm:$0xff] }
 0x156   : > { %1264 = vrot.lane.b32.xlu1 %v8833_v1, %s5219_s12  ;;  %v1014_v48 = vpop.permute.xlu0 %1013 }
 0x157   : > { %1090 = vst.msk [vmem:[#allocation4 + $0xa0] sm:$0xff] %vm1069_vm6, %v1014_v48 }
 0x158   : > { %v1012_v5 = vpop.permute.xlu1 %1011  ;;  %1270 = vrot.lane.b32.xlu0 %v6011_v40, %s5219_s12 }
 0x159   : > { %1089 = vst.msk [vmem:[#allocation4 + $0x98] sm:$0xff] %vm1069_vm6, %v1012_v5  ;;  %v8836_v5 = vld [vmem:[#allocation75_spill] sm:$0xff] }
 0x15a   : > { %1268 = vrot.lane.b32.xlu1 %v8834_v35, %s5219_s12  ;;  %v1018_v29 = vpop.permute.xlu0 %1017 }
 0x15b   : > { %1092 = vst.msk [vmem:[#allocation4 + $0xb0] sm:$0xff] %vm1069_vm6, %v1018_v29 }
 0x15c   : > { %v1016_v50 = vpop.permute.xlu1 %1015  ;;  %1274 = vrot.lane.b32.xlu0 %v6024_v23, %s5219_s12 }
 0x15d   : > { %1091 = vst.msk [vmem:[#allocation4 + $0xa8] sm:$0xff] %vm1069_vm6, %v1016_v50  ;;  %v8837_v50 = vld [vmem:[#allocation77_spill] sm:$0xff] }
 0x15e   : > { %1272 = vrot.lane.b32.xlu1 %v8835_v12, %s5219_s12  ;;  %v1022_v48 = vpop.permute.xlu0 %1021 }
 0x15f   : > { %1094 = vst.msk [vmem:[#allocation4 + $0xc0] sm:$0xff] %vm1069_vm6, %v1022_v48 }
 0x160   : > { %v1020_v40 = vpop.permute.xlu1 %1019  ;;  %1278 = vrot.lane.b32.xlu0 %v6037_v6, %s5219_s12 }
 0x161   : > { %1093 = vst.msk [vmem:[#allocation4 + $0xb8] sm:$0xff] %vm1069_vm6, %v1020_v40  ;;  %v8838_v40 = vld [vmem:[#allocation78_spill] sm:$0xff] }
 0x162   : > { %1276 = vrot.lane.b32.xlu1 %v8836_v5, %s5219_s12  ;;  %v1026_v29 = vpop.permute.xlu0 %1025 }
 0x163   : > { %1096 = vst.msk [vmem:[#allocation4 + $0xd0] sm:$0xff] %vm1069_vm6, %v1026_v29  ;;  %v8839_v29 = vld [vmem:[#allocation79_spill] sm:$0xff] }
 0x164   : > { %v1024_v23 = vpop.permute.xlu1 %1023  ;;  %1282 = vrot.lane.b32.xlu0 %v6050_v2, %s5219_s12 }
 0x165   : > { %1095 = vst.msk [vmem:[#allocation4 + $0xc8] sm:$0xff] %vm1069_vm6, %v1024_v23 }
 0x166   : > { %1280 = vrot.lane.b32.xlu1 %v8837_v50, %s5219_s12  ;;  %v1030_v48 = vpop.permute.xlu0 %1029 }
 0x167   : > { %1098 = vst.msk [vmem:[#allocation4 + $0xe0] sm:$0xff] %vm1069_vm6, %v1030_v48  ;;  %v1237_v48 = vrot.slane %v6210_v36, 2 }
 0x168   : > { %v1028_v6 = vpop.permute.xlu1 %1027  ;;  %1286 = vrot.lane.b32.xlu0 %v8838_v40, %s5219_s12 }
 0x169   : > { %1097 = vst.msk [vmem:[#allocation4 + $0xd8] sm:$0xff] %vm1069_vm6, %v1028_v6 }
 0x16a   : > { %1284 = vrot.lane.b32.xlu1 %v8839_v29, %s5219_s12  ;;  %v1034_v5 = vpop.permute.xlu0 %1033 }
 0x16b   : > { %1100 = vst.msk [vmem:[#allocation4 + $0xf0] sm:$0xff] %vm1069_vm6, %v1034_v5  ;;  %v1238_v5 = vrot.slane %v6221_v56, 2 }
 0x16c   : > { %v1032_v2 = vpop.permute.xlu1 %1031  ;;  %1290 = vrot.lane.b32.xlu0 %v6076_v17, %s5219_s12 }
 0x16d   : > { %1099 = vst.msk [vmem:[#allocation4 + $0xe8] sm:$0xff] %vm1069_vm6, %v1032_v2 }
 0x16e   : > { %1288 = vrot.lane.b32.xlu1 %v6084_v18, %s5219_s12  ;;  %v1109_v23 = vpop.permute.xlu0 %1108 }
 0x16f   : > { %1205 = vst.msk [vmem:[#allocation4] sm:$0xff] %vm1204_vm7, %v1109_v23  ;;  %v6420_v23 = vsel %vm761_vm3, %v1237_v48, %v1238_v5 }
 0x170   : > { %v1036_v6 = vpop.permute.xlu1 %1035  ;;  %1294 = vrot.lane.b32.xlu0 %v6090_v28, %s5219_s12 }
 0x171   : > { %1101 = vst.msk [vmem:[#allocation4 + $0xf8] sm:$0xff] %vm1069_vm6, %v1036_v6  ;;  %v1240_v6 = vrot.slane %v6311_v16, 2 }
 0x172   : > { %1292 = vrot.lane.b32.xlu1 %v6098_v30, %s5219_s12  ;;  %v1113_v2 = vpop.permute.xlu0 %1112 }
 0x173   : > { %1207 = vst.msk [vmem:[#allocation4 + $0x10] sm:$0xff] %vm1204_vm7, %v1113_v2  ;;  %v6433_v48 = vsel %vm761_vm3, %v1238_v5, %v1240_v6 }
 0x174   : > { %v1111_v17 = vpop.permute.xlu1 %1110  ;;  %1298 = vrot.lane.b32.xlu0 %v6105_v39, %s5219_s12 }
 0x175   : > { %1206 = vst.msk [vmem:[#allocation4 + $0x8] sm:$0xff] %vm1204_vm7, %v1111_v17 }
 0x176   : > { %1296 = vrot.lane.b32.xlu1 %v6111_v27, %s5219_s12  ;;  %v1117_v56 = vpop.permute.xlu0 %1116 }
 0x177   : > { %1209 = vst.msk [vmem:[#allocation4 + $0x20] sm:$0xff] %vm1204_vm7, %v1117_v56 }
 0x178   : > { %v1115_v28 = vpop.permute.xlu1 %1114  ;;  %1302 = vrot.lane.b32.xlu0 %v6420_v23, %s5219_s12 }
 0x179   : > { %1208 = vst.msk [vmem:[#allocation4 + $0x18] sm:$0xff] %vm1204_vm7, %v1115_v28 }
 0x17a   : > { %1300 = vrot.lane.b32.xlu1 %v6121_v3, %s5219_s12  ;;  %v1121_v17 = vpop.permute.xlu0 %1120 }
 0x17b   : > { %1211 = vst.msk [vmem:[#allocation4 + $0x30] sm:$0xff] %vm1204_vm7, %v1121_v17 }
 0x17c   : > { %v1119_v2 = vpop.permute.xlu1 %1118  ;;  %1373 = vrot.lane.b32.xlu0 %v5532_v41, %s5220_s13 }
 0x17d   : > { %1210 = vst.msk [vmem:[#allocation4 + $0x28] sm:$0xff] %vm1204_vm7, %v1119_v2 }
 0x17e   : > { %1304 = vrot.lane.b32.xlu1 %v6433_v48, %s5219_s12  ;;  %v1125_v28 = vpop.permute.xlu0 %1124  ;;  %s5223_s12 = smov 40  }
 0x17f   : > { %1213 = vst.msk [vmem:[#allocation4 + $0x40] sm:$0xff] %vm1204_vm7, %v1125_v28 }
 0x180   : > { %v1123_v56 = vpop.permute.xlu1 %1122  ;;  %1377 = vrot.lane.b32.xlu0 %v5536_v43, %s5220_s13 }
 0x181   : > { %1212 = vst.msk [vmem:[#allocation4 + $0x38] sm:$0xff] %vm1204_vm7, %v1123_v56  ;;  %v469_v56 = vld [vmem:[%s8536_s1 + $0x20] sm:$0xf] }
 0x182   : > { %1375 = vrot.lane.b32.xlu1 %v5534_v42, %s5220_s13  ;;  %v1129_v16 = vpop.permute.xlu0 %1128 }
 0x183   : > { %1215 = vst.msk [vmem:[#allocation4 + $0x50] sm:$0xff] %vm1204_vm7, %v1129_v16 }
 0x184   : > { %v1127_v41 = vpop.permute.xlu1 %1126  ;;  %1381 = vrot.lane.b32.xlu0 %v5558_v51, %s5220_s13 }
 0x185   : > { %1214 = vst.msk [vmem:[#allocation4 + $0x48] sm:$0xff] %vm1204_vm7, %v1127_v41 }
 0x186   : > { %1379 = vrot.lane.b32.xlu1 %v5547_v47, %s5220_s13  ;;  %v1133_v5 = vpop.permute.xlu0 %1132 }
 0x187   : > { %1217 = vst.msk [vmem:[#allocation4 + $0x60] sm:$0xff] %vm1204_vm7, %v1133_v5  ;;  %v8840_v5 = vld [vmem:[#allocation40_spill] sm:$0xff] }
 0x188   : > { %v1131_v43 = vpop.permute.xlu1 %1130  ;;  %1385 = vrot.lane.b32.xlu0 %v5571_v54, %s5220_s13 }
 0x189   : > { %1216 = vst.msk [vmem:[#allocation4 + $0x58] sm:$0xff] %vm1204_vm7, %v1131_v43 }
 0x18a   : > { %1383 = vrot.lane.b32.xlu1 %v5560_v52, %s5220_s13  ;;  %v1137_v42 = vpop.permute.xlu0 %1136 }
 0x18b   : > { %1219 = vst.msk [vmem:[#allocation4 + $0x70] sm:$0xff] %vm1204_vm7, %v1137_v42 }
 0x18c   : > { %v1135_v51 = vpop.permute.xlu1 %1134  ;;  %1389 = vrot.lane.b32.xlu0 %v5581_v58, %s5220_s13 }
 0x18d   : > { %1218 = vst.msk [vmem:[#allocation4 + $0x68] sm:$0xff] %vm1204_vm7, %v1135_v51  ;;  %v8842_v51 = vld [vmem:[#allocation42_spill] sm:$0xff] }
 0x18e   : > { %1387 = vrot.lane.b32.xlu1 %v5577_v57, %s5220_s13  ;;  %v1141_v47 = vpop.permute.xlu0 %1140 }
 0x18f   : > { %1221 = vst.msk [vmem:[#allocation4 + $0x80] sm:$0xff] %vm1204_vm7, %v1141_v47  ;;  %v8843_v47 = vld [vmem:[#allocation39_spill] sm:$0xff] }
 0x190   : > { %v1139_v54 = vpop.permute.xlu1 %1138  ;;  %1393 = vrot.lane.b32.xlu0 %v5593_v61, %s5220_s13 }
 0x191   : > { %1220 = vst.msk [vmem:[#allocation4 + $0x78] sm:$0xff] %vm1204_vm7, %v1139_v54 }
 0x192   : > { %1391 = vrot.lane.b32.xlu1 %v5589_v60, %s5220_s13  ;;  %v1145_v52 = vpop.permute.xlu0 %1144 }
 0x193   : > { %1223 = vst.msk [vmem:[#allocation4 + $0x90] sm:$0xff] %vm1204_vm7, %v1145_v52 }
 0x194   : > { %v1143_v58 = vpop.permute.xlu1 %1142  ;;  %1397 = vrot.lane.b32.xlu0 %v5610_v9, %s5220_s13 }
 0x195   : > { %1222 = vst.msk [vmem:[#allocation4 + $0x88] sm:$0xff] %vm1204_vm7, %v1143_v58  ;;  %v8844_v58 = vld [vmem:[#allocation44_spill] sm:$0xff] }
 0x196   : > { %1395 = vrot.lane.b32.xlu1 %v5602_v8, %s5220_s13  ;;  %v1149_v57 = vpop.permute.xlu0 %1148 }
 0x197   : > { %1225 = vst.msk [vmem:[#allocation4 + $0xa0] sm:$0xff] %vm1204_vm7, %v1149_v57  ;;  %v8845_v57 = vld [vmem:[#allocation41_spill] sm:$0xff] }
 0x198   : > { %v1147_v61 = vpop.permute.xlu1 %1146  ;;  %1401 = vrot.lane.b32.xlu0 %v5624_v20, %s5220_s13 }
 0x199   : > { %1224 = vst.msk [vmem:[#allocation4 + $0x98] sm:$0xff] %vm1204_vm7, %v1147_v61 }
 0x19a   : > { %1399 = vrot.lane.b32.xlu1 %v5612_v10, %s5220_s13  ;;  %v1153_v60 = vpop.permute.xlu0 %1152 }
 0x19b   : > { %1227 = vst.msk [vmem:[#allocation4 + $0xb0] sm:$0xff] %vm1204_vm7, %v1153_v60 }
 0x19c   : > { %v1151_v9 = vpop.permute.xlu1 %1150  ;;  %1405 = vrot.lane.b32.xlu0 %v5634_v22, %s5220_s13 }
 0x19d   : > { %1226 = vst.msk [vmem:[#allocation4 + $0xa8] sm:$0xff] %vm1204_vm7, %v1151_v9 }
 0x19e   : > { %1403 = vrot.lane.b32.xlu1 %v5626_v21, %s5220_s13  ;;  %v1157_v8 = vpop.permute.xlu0 %1156 }
 0x19f   : > { %1229 = vst.msk [vmem:[#allocation4 + $0xc0] sm:$0xff] %vm1204_vm7, %v1157_v8  ;;  %v8847_v8 = vld [vmem:[#allocation46_spill] sm:$0xff] }
 0x1a0   : > { %v1155_v20 = vpop.permute.xlu1 %1154  ;;  %1409 = vrot.lane.b32.xlu0 %v5652_v45, %s5220_s13 }
 0x1a1   : > { %1228 = vst.msk [vmem:[#allocation4 + $0xb8] sm:$0xff] %vm1204_vm7, %v1155_v20  ;;  %v8848_v20 = vld [vmem:[#allocation43_spill] sm:$0xff] }
 0x1a2   : > { %1407 = vrot.lane.b32.xlu1 %v5636_v31, %s5220_s13  ;;  %v1161_v10 = vpop.permute.xlu0 %1160 }
 0x1a3   : > { %1231 = vst.msk [vmem:[#allocation4 + $0xd0] sm:$0xff] %vm1204_vm7, %v1161_v10 }
 0x1a4   : > { %v1159_v22 = vpop.permute.xlu1 %1158  ;;  %1413 = vrot.lane.b32.xlu0 %v5732_v7, %s5220_s13 }
 0x1a5   : > { %1230 = vst.msk [vmem:[#allocation4 + $0xc8] sm:$0xff] %vm1204_vm7, %v1159_v22  ;;  %v8849_v22 = vld [vmem:[#allocation70_spill] sm:$0xff] }
 0x1a6   : > { %1411 = vrot.lane.b32.xlu1 %v5721_v34, %s5220_s13  ;;  %v1165_v21 = vpop.permute.xlu0 %1164  ;;  %v465_v34 = vld [vmem:[%s8536_s1] sm:$0xff] }
 0x1a7   : > { %1233 = vst.msk [vmem:[#allocation4 + $0xe0] sm:$0xff] %vm1204_vm7, %v1165_v21 }
 0x1a8   : > { %v1163_v45 = vpop.permute.xlu1 %1162  ;;  %1417 = vrot.lane.b32.xlu0 %v5744_v25, %s5220_s13  ;;  %v466_v25 = vld [vmem:[%s8536_s1 + $0x8] sm:$0xff] }
 0x1a9   : > { %1232 = vst.msk [vmem:[#allocation4 + $0xd8] sm:$0xff] %vm1204_vm7, %v1163_v45  ;;  %v5153_v6 = vpack.c.bf16 %v466_v25, %v465_v34  ;;  %v8852_v25 = vld [vmem:[#allocation75_spill] sm:$0xff] }
 0x1aa   : > { %1415 = vrot.lane.b32.xlu1 %v5734_v38, %s5220_s13  ;;  %v1169_v31 = vpop.permute.xlu0 %1168 }
 0x1ab   : > { %1235 = vst.msk [vmem:[#allocation4 + $0xf0] sm:$0xff] %vm1204_vm7, %v1169_v31  ;;  %5154 = vmatprep.subr.bf16.mxu0 %v5153_v6  ;;  %5177 = vmatprep.subr.bf16.mxu1 %v5153_v6  ;;  %v8850_v31 = vld [vmem:[#allocation48_spill] sm:$0xff] }
 0x1ac   : > { %v1167_v7 = vpop.permute.xlu1 %1166  ;;  %1421 = vrot.lane.b32.xlu0 %v5756_v33, %s5220_s13  ;;  %5156 = vmatpush3.bf16.msra.mxu0 %v5153_v6  ;;  %v467_v33 = vld [vmem:[%s8536_s1 + $0x10] sm:$0xff] }
 0x1ad   : > { %1234 = vst.msk [vmem:[#allocation4 + $0xe8] sm:$0xff] %vm1204_vm7, %v1167_v7  ;;  %5180 = vmatpush3.bf16.msra.mxu1 %v5153_v6  ;;  %v8851_v7 = vld [vmem:[#allocation45_spill] sm:$0xff] }
 0x1ae   : > { %1419 = vrot.lane.b32.xlu1 %v5746_v24, %s5220_s13  ;;  %v1243_v38 = vpop.permute.xlu0 %1242  ;;  %v468_v24 = vld [vmem:[%s8536_s1 + $0x18] sm:$0xff] }
 0x1af   : > { %1339 = vst.msk [vmem:[#allocation4] sm:$0xff] %vm1338_vm8, %v1243_v38  ;;  %v5157_v28 = vpack.c.bf16 %v468_v24, %v467_v33  ;;  %v8853_v38 = vld [vmem:[#allocation72_spill] sm:$0xff]  ;;  %v8854_v33 = vld [vmem:[#allocation50_spill] sm:$0xff]  ;;  %v8855_v24 = vld [vmem:[#allocation47_spill] sm:$0xff] }
 0x1b0   : > { %v1171_v17 = vpop.permute.xlu1 %1170  ;;  %1425 = vrot.lane.b32.xlu0 %v5769_v15, %s5220_s13 }
 0x1b1   : > { %1236 = vst.msk [vmem:[#allocation4 + $0xf8] sm:$0xff] %vm1204_vm7, %v1171_v17  ;;  %5158 = vmatprep.subr.bf16.mxu0 %v5157_v28  ;;  %5178 = vmatprep.subr.bf16.mxu1 %v5157_v28 }
 0x1b2   : > { %1423 = vrot.lane.b32.xlu1 %v5758_v44, %s5220_s13  ;;  %v1247_v2 = vpop.permute.xlu0 %1246  ;;  %5160 = vmatpush3.bf16.msra.mxu0 %v5157_v28 }
 0x1b3   : > { %1341 = vst.msk [vmem:[#allocation4 + $0x10] sm:$0xff] %vm1338_vm8, %v1247_v2  ;;  %4987 = vmatprep.subr.msk.mxu0 %vm1906_vm9, %v469_v56  ;;  %5181 = vmatpush3.bf16.msra.mxu1 %v5157_v28 }
 0x1b4   : > { %v1245_v15 = vpop.permute.xlu1 %1244  ;;  %1429 = vrot.lane.b32.xlu0 %v6210_v36, %s5220_s13  ;;  %5179 = vmatprep.subr.msk.mxu1 %vm1906_vm9, %v469_v56 }
 0x1b5   : > { %1340 = vst.msk [vmem:[#allocation4 + $0x8] sm:$0xff] %vm1338_vm8, %v1245_v15  ;;  %v8856_v15 = vld [vmem:[#allocation74_spill] sm:$0xff] }
 0x1b6   : > { %1427 = vrot.lane.b32.xlu1 %v5771_v14, %s5220_s13  ;;  %v1251_v44 = vpop.permute.xlu0 %1250  ;;  %4988 = vmatpush3.msk.msra.mxu0 %vm1906_vm9, %v469_v56 }
 0x1b7   : > { %1343 = vst.msk [vmem:[#allocation4 + $0x20] sm:$0xff] %vm1338_vm8, %v1251_v44  ;;  %5182 = vmatpush3.msk.msra.mxu1 %vm1906_vm9, %v469_v56 }
 0x1b8   : > { %v1249_v36 = vpop.permute.xlu1 %1248  ;;  %1510 = vrot.lane.b32.xlu0 %v5615_v11, %s5221_s26 }
 0x1b9   : > { %1342 = vst.msk [vmem:[#allocation4 + $0x18] sm:$0xff] %vm1338_vm8, %v1249_v36  ;;  %v8857_v36 = vld [vmem:[#allocation52_spill] sm:$0xff] }
 0x1ba   : > { %1508 = vrot.lane.b32.xlu1 %v5565_v53, %s5221_s26  ;;  %v1255_v14 = vpop.permute.xlu0 %1254 }
 0x1bb   : > { %1345 = vst.msk [vmem:[#allocation4 + $0x30] sm:$0xff] %vm1338_vm8, %v1255_v14  ;;  %v8858_v14 = vld [vmem:[#allocation49_spill] sm:$0xff] }
 0x1bc   : > { %v1253_v16 = vpop.permute.xlu1 %1252  ;;  %1644 = vrot.lane.b32.xlu0 %v8829_v32, %s5222_s28 }
 0x1bd   : > { %1344 = vst.msk [vmem:[#allocation4 + $0x28] sm:$0xff] %vm1338_vm8, %v1253_v16 }
 0x1be   : > { %1642 = vrot.lane.b32.xlu1 %v5933_v0, %s5222_s28  ;;  %v1259_v11 = vpop.permute.xlu0 %1258 }
 0x1bf   : > { %1347 = vst.msk [vmem:[#allocation4 + $0x40] sm:$0xff] %vm1338_vm8, %v1259_v11  ;;  %v8859_v11 = vld [vmem:[#allocation76_spill] sm:$0xff] }
 0x1c0   : > { %v1257_v41 = vpop.permute.xlu1 %1256  ;;  %1514 = vrot.lane.b32.xlu0 %v8804_v55, %s5221_s26 }
 0x1c1   : > { %1346 = vst.msk [vmem:[#allocation4 + $0x38] sm:$0xff] %vm1338_vm8, %v1257_v41 }
 0x1c2   : > { %1512 = vrot.lane.b32.xlu1 %v5596_v62, %s5221_s26  ;;  %v1263_v53 = vpop.permute.xlu0 %1262 }
 0x1c3   : > { %1349 = vst.msk [vmem:[#allocation4 + $0x50] sm:$0xff] %vm1338_vm8, %v1263_v53 }
 0x1c4   : > { %v1261_v32 = vpop.permute.xlu1 %1260  ;;  %1648 = vrot.lane.b32.xlu0 %v8830_v13, %s5222_s28 }
 0x1c5   : > { %1348 = vst.msk [vmem:[#allocation4 + $0x48] sm:$0xff] %vm1338_vm8, %v1261_v32  ;;  %v8860_v32 = vld [vmem:[#allocation54_spill] sm:$0xff] }
 0x1c6   : > { %1646 = vrot.lane.b32.xlu1 %v5946_v37, %s5222_s28  ;;  %v1267_v0 = vpop.permute.xlu0 %1266 }
 0x1c7   : > { %1351 = vst.msk [vmem:[#allocation4 + $0x60] sm:$0xff] %vm1338_vm8, %v1267_v0  ;;  %v8861_v0 = vld [vmem:[#allocation51_spill] sm:$0xff] }
 0x1c8   : > { %v1265_v55 = vpop.permute.xlu1 %1264  ;;  %1518 = vrot.lane.b32.xlu0 %v8806_v49, %s5221_s26 }
 0x1c9   : > { %1350 = vst.msk [vmem:[#allocation4 + $0x58] sm:$0xff] %vm1338_vm8, %v1265_v55 }
 0x1ca   : > { %1516 = vrot.lane.b32.xlu1 %v8803_v63, %s5221_s26  ;;  %v1271_v62 = vpop.permute.xlu0 %1270  ;;  %v8841_v63 = vld [vmem:[#allocation37_spill] sm:$0xff] }
 0x1cb   : > { %1353 = vst.msk [vmem:[#allocation4 + $0x70] sm:$0xff] %vm1338_vm8, %v1271_v62 }
 0x1cc   : > { %v1269_v13 = vpop.permute.xlu1 %1268  ;;  %1652 = vrot.lane.b32.xlu0 %v8831_v26, %s5222_s28 }
 0x1cd   : > { %1352 = vst.msk [vmem:[#allocation4 + $0x68] sm:$0xff] %vm1338_vm8, %v1269_v13 }
 0x1ce   : > { %1650 = vrot.lane.b32.xlu1 %v5959_v46, %s5222_s28  ;;  %v1275_v37 = vpop.permute.xlu0 %1274 }
 0x1cf   : > { %1355 = vst.msk [vmem:[#allocation4 + $0x80] sm:$0xff] %vm1338_vm8, %v1275_v37  ;;  %v8862_v37 = vld [vmem:[#allocation57_spill] sm:$0xff] }
 0x1d0   : > { %v1273_v49 = vpop.permute.xlu1 %1272  ;;  %1522 = vrot.lane.b32.xlu0 %v8840_v5, %s5221_s26 }
 0x1d1   : > { %1354 = vst.msk [vmem:[#allocation4 + $0x78] sm:$0xff] %vm1338_vm8, %v1273_v49  ;;  %v8863_v49 = vld [vmem:[#allocation53_spill] sm:$0xff] }
 0x1d2   : > { %1520 = vrot.lane.b32.xlu1 %v8841_v63, %s5221_s26  ;;  %v1279_v43 = vpop.permute.xlu0 %1278 }
 0x1d3   : > { %1357 = vst.msk [vmem:[#allocation4 + $0x90] sm:$0xff] %vm1338_vm8, %v1279_v43 }
 0x1d4   : > { %v1277_v26 = vpop.permute.xlu1 %1276  ;;  %1656 = vrot.lane.b32.xlu0 %v8832_v4, %s5222_s28 }
 0x1d5   : > { %1356 = vst.msk [vmem:[#allocation4 + $0x88] sm:$0xff] %vm1338_vm8, %v1277_v26  ;;  %v8865_v26 = vld [vmem:[#allocation60_spill] sm:$0xff] }
 0x1d6   : > { %1654 = vrot.lane.b32.xlu1 %v5972_v59, %s5222_s28  ;;  %v1283_v46 = vpop.permute.xlu0 %1282 }
 0x1d7   : > { %1359 = vst.msk [vmem:[#allocation4 + $0xa0] sm:$0xff] %vm1338_vm8, %v1283_v46  ;;  %v8866_v46 = vld [vmem:[#allocation55_spill] sm:$0xff] }
 0x1d8   : > { %v1281_v42 = vpop.permute.xlu1 %1280  ;;  %1526 = vrot.lane.b32.xlu0 %v8842_v51, %s5221_s26  ;;  %v8867_v51 = vld [vmem:[#allocation81_spill] sm:$0xff] }
 0x1d9   : > { %1358 = vst.msk [vmem:[#allocation4 + $0x98] sm:$0xff] %vm1338_vm8, %v1281_v42 }
 0x1da   : > { %1524 = vrot.lane.b32.xlu1 %v8843_v47, %s5221_s26  ;;  %v1287_v54 = vpop.permute.xlu0 %1286 }
 0x1db   : > { %1361 = vst.msk [vmem:[#allocation4 + $0xb0] sm:$0xff] %vm1338_vm8, %v1287_v54 }
 0x1dc   : > { %v1285_v4 = vpop.permute.xlu1 %1284  ;;  %1660 = vrot.lane.b32.xlu0 %v8833_v1, %s5222_s28 }
 0x1dd   : > { %1360 = vst.msk [vmem:[#allocation4 + $0xa8] sm:$0xff] %vm1338_vm8, %v1285_v4  ;;  %v8868_v4 = vld [vmem:[#allocation61_spill] sm:$0xff] }
 0x1de   : > { %1658 = vrot.lane.b32.xlu1 %v5985_v19, %s5222_s28  ;;  %v1291_v59 = vpop.permute.xlu0 %1290  ;;  %v8846_v19 = vld [vmem:[#allocation68_spill] sm:$0xff] }
 0x1df   : > { %1363 = vst.msk [vmem:[#allocation4 + $0xc0] sm:$0xff] %vm1338_vm8, %v1291_v59  ;;  %v8869_v59 = vld [vmem:[#allocation58_spill] sm:$0xff] }
 0x1e0   : > { %v1289_v52 = vpop.permute.xlu1 %1288  ;;  %1530 = vrot.lane.b32.xlu0 %v8844_v58, %s5221_s26 }
 0x1e1   : > { %1362 = vst.msk [vmem:[#allocation4 + $0xb8] sm:$0xff] %vm1338_vm8, %v1289_v52 }
 0x1e2   : > { %1528 = vrot.lane.b32.xlu1 %v8845_v57, %s5221_s26  ;;  %v1295_v61 = vpop.permute.xlu0 %1294 }
 0x1e3   : > { %1365 = vst.msk [vmem:[#allocation4 + $0xd0] sm:$0xff] %vm1338_vm8, %v1295_v61  ;;  %v8870_v61 = vld [vmem:[#allocation27_spill] sm:$0xff] }
 0x1e4   : > { %v1293_v1 = vpop.permute.xlu1 %1292  ;;  %1664 = vrot.lane.b32.xlu0 %v8834_v35, %s5222_s28 }
 0x1e5   : > { %1364 = vst.msk [vmem:[#allocation4 + $0xc8] sm:$0xff] %vm1338_vm8, %v1293_v1  ;;  %v8871_v1 = vld [vmem:[#allocation82_spill] sm:$0xff] }
 0x1e6   : > { %1662 = vrot.lane.b32.xlu1 %v8846_v19, %s5222_s28  ;;  %v1299_v60 = vpop.permute.xlu0 %1298 }
 0x1e7   : > { %1367 = vst.msk [vmem:[#allocation4 + $0xe0] sm:$0xff] %vm1338_vm8, %v1299_v60  ;;  %v8872_v60 = vld [vmem:[#allocation31_spill] sm:$0xff] }
 0x1e8   : > { %v1297_v9 = vpop.permute.xlu1 %1296  ;;  %1534 = vrot.lane.b32.xlu0 %v8847_v8, %s5221_s26 }
 0x1e9   : > { %1366 = vst.msk [vmem:[#allocation4 + $0xd8] sm:$0xff] %vm1338_vm8, %v1297_v9 }
 0x1ea   : > { %1532 = vrot.lane.b32.xlu1 %v8848_v20, %s5221_s26  ;;  %v1303_v10 = vpop.permute.xlu0 %1302  ;;  %v6732_v20 = vld [vmem:[#allocation2 + $0x1a0] sm:$0xff] }
 0x1eb   : > { %1369 = vst.msk [vmem:[#allocation4 + $0xf0] sm:$0xff] %vm1338_vm8, %v1303_v10 }
 0x1ec   : > { %v1301_v35 = vpop.permute.xlu1 %1300  ;;  %1668 = vrot.lane.b32.xlu0 %v8835_v12, %s5222_s28 }
 0x1ed   : > { %1368 = vst.msk [vmem:[#allocation4 + $0xe8] sm:$0xff] %vm1338_vm8, %v1301_v35 }
 0x1ee   : > { %1666 = vrot.lane.b32.xlu1 %v8849_v22, %s5222_s28  ;;  %v1374_v21 = vpop.permute.xlu0 %1373 }
 0x1ef   : > { %1470 = vst.msk [vmem:[#allocation4] sm:$0xff] %vm1469_vm10, %v1374_v21 }
 0x1f0   : > { %v1305_v45 = vpop.permute.xlu1 %1304  ;;  %1538 = vrot.lane.b32.xlu0 %v8850_v31, %s5221_s26 }
 0x1f1   : > { %1370 = vst.msk [vmem:[#allocation4 + $0xf8] sm:$0xff] %vm1338_vm8, %v1305_v45 }
 0x1f2   : > { %1536 = vrot.lane.b32.xlu1 %v8851_v7, %s5221_s26  ;;  %v1378_v34 = vpop.permute.xlu0 %1377 }
 0x1f3   : > { %1472 = vst.msk [vmem:[#allocation4 + $0x10] sm:$0xff] %vm1469_vm10, %v1378_v34 }
 0x1f4   : > { %v1376_v12 = vpop.permute.xlu1 %1375  ;;  %1672 = vrot.lane.b32.xlu0 %v8852_v25, %s5222_s28 }
 0x1f5   : > { %1471 = vst.msk [vmem:[#allocation4 + $0x8] sm:$0xff] %vm1469_vm10, %v1376_v12 }
 0x1f6   : > { %1670 = vrot.lane.b32.xlu1 %v8853_v38, %s5222_s28  ;;  %v1382_v6 = vpop.permute.xlu0 %1381 }
 0x1f7   : > { %1474 = vst.msk [vmem:[#allocation4 + $0x20] sm:$0xff] %vm1469_vm10, %v1382_v6 }
 0x1f8   : > { %v1380_v17 = vpop.permute.xlu1 %1379  ;;  %1542 = vrot.lane.b32.xlu0 %v8854_v33, %s5221_s26 }
 0x1f9   : > { %1473 = vst.msk [vmem:[#allocation4 + $0x18] sm:$0xff] %vm1469_vm10, %v1380_v17 }
 0x1fa   : > { %1540 = vrot.lane.b32.xlu1 %v8855_v24, %s5221_s26  ;;  %v1386_v2 = vpop.permute.xlu0 %1385 }
 0x1fb   : > { %1476 = vst.msk [vmem:[#allocation4 + $0x30] sm:$0xff] %vm1469_vm10, %v1386_v2 }
 0x1fc   : > { %v1384_v28 = vpop.permute.xlu1 %1383  ;;  %1676 = vrot.lane.b32.xlu0 %v8837_v50, %s5222_s28 }
 0x1fd   : > { %1475 = vst.msk [vmem:[#allocation4 + $0x28] sm:$0xff] %vm1469_vm10, %v1384_v28 }
 0x1fe   : > { %1674 = vrot.lane.b32.xlu1 %v8856_v15, %s5222_s28  ;;  %v1390_v56 = vpop.permute.xlu0 %1389 }
 0x1ff   : > { %1478 = vst.msk [vmem:[#allocation4 + $0x40] sm:$0xff] %vm1469_vm10, %v1390_v56 }
 0x200   : > { %v1388_v44 = vpop.permute.xlu1 %1387  ;;  %1546 = vrot.lane.b32.xlu0 %v8857_v36, %s5221_s26 }
 0x201   : > { %1477 = vst.msk [vmem:[#allocation4 + $0x38] sm:$0xff] %vm1469_vm10, %v1388_v44 }
 0x202   : > { %1544 = vrot.lane.b32.xlu1 %v8858_v14, %s5221_s26  ;;  %v1394_v16 = vpop.permute.xlu0 %1393 }
 0x203   : > { %1480 = vst.msk [vmem:[#allocation4 + $0x50] sm:$0xff] %vm1469_vm10, %v1394_v16 }
 0x204   : > { %v1392_v50 = vpop.permute.xlu1 %1391  ;;  %1680 = vrot.lane.b32.xlu0 %v8839_v29, %s5222_s28 }
 0x205   : > { %1479 = vst.msk [vmem:[#allocation4 + $0x48] sm:$0xff] %vm1469_vm10, %v1392_v50 }
 0x206   : > { %1678 = vrot.lane.b32.xlu1 %v8859_v11, %s5222_s28  ;;  %v1398_v41 = vpop.permute.xlu0 %1397 }
 0x207   : > { %1482 = vst.msk [vmem:[#allocation4 + $0x60] sm:$0xff] %vm1469_vm10, %v1398_v41 }
 0x208   : > { %v1396_v53 = vpop.permute.xlu1 %1395  ;;  %1550 = vrot.lane.b32.xlu0 %v8860_v32, %s5221_s26 }
 0x209   : > { %1481 = vst.msk [vmem:[#allocation4 + $0x58] sm:$0xff] %vm1469_vm10, %v1396_v53 }
 0x20a   : > { %1548 = vrot.lane.b32.xlu1 %v8861_v0, %s5221_s26  ;;  %v1402_v55 = vpop.permute.xlu0 %1401 }
 0x20b   : > { %1484 = vst.msk [vmem:[#allocation4 + $0x70] sm:$0xff] %vm1469_vm10, %v1402_v55 }
 0x20c   : > { %v1400_v29 = vpop.permute.xlu1 %1399  ;;  %1684 = vrot.lane.b32.xlu0 %v6084_v18, %s5222_s28 }
 0x20d   : > { %1483 = vst.msk [vmem:[#allocation4 + $0x68] sm:$0xff] %vm1469_vm10, %v1400_v29 }
 0x20e   : > { %1682 = vrot.lane.b32.xlu1 %v8838_v40, %s5222_s28  ;;  %v1406_v62 = vpop.permute.xlu0 %1405  ;;  %v8864_v40 = vld [vmem:[#allocation80_spill] sm:$0xff] }
 0x20f   : > { %1486 = vst.msk [vmem:[#allocation4 + $0x80] sm:$0xff] %vm1469_vm10, %v1406_v62 }
 0x210   : > { %v1404_v13 = vpop.permute.xlu1 %1403  ;;  %1554 = vrot.lane.b32.xlu0 %v8862_v37, %s5221_s26 }
 0x211   : > { %1485 = vst.msk [vmem:[#allocation4 + $0x78] sm:$0xff] %vm1469_vm10, %v1404_v13 }
 0x212   : > { %1552 = vrot.lane.b32.xlu1 %v8863_v49, %s5221_s26  ;;  %v1410_v5 = vpop.permute.xlu0 %1409 }
 0x213   : > { %1488 = vst.msk [vmem:[#allocation4 + $0x90] sm:$0xff] %vm1469_vm10, %v1410_v5 }
 0x214   : > { %v1408_v18 = vpop.permute.xlu1 %1407  ;;  %1688 = vrot.lane.b32.xlu0 %v6098_v30, %s5222_s28 }
 0x215   : > { %1487 = vst.msk [vmem:[#allocation4 + $0x88] sm:$0xff] %vm1469_vm10, %v1408_v18 }
 0x216   : > { %1686 = vrot.lane.b32.xlu1 %v8864_v40, %s5222_s28  ;;  %v1414_v63 = vpop.permute.xlu0 %1413 }
 0x217   : > { %1490 = vst.msk [vmem:[#allocation4 + $0xa0] sm:$0xff] %vm1469_vm10, %v1414_v63 }
 0x218   : > { %v1412_v43 = vpop.permute.xlu1 %1411  ;;  %1558 = vrot.lane.b32.xlu0 %v8865_v26, %s5221_s26 }
 0x219   : > { %1489 = vst.msk [vmem:[#allocation4 + $0x98] sm:$0xff] %vm1469_vm10, %v1412_v43 }
 0x21a   : > { %1556 = vrot.lane.b32.xlu1 %v8866_v46, %s5221_s26  ;;  %v1418_v42 = vpop.permute.xlu0 %1417 }
 0x21b   : > { %1492 = vst.msk [vmem:[#allocation4 + $0xb0] sm:$0xff] %vm1469_vm10, %v1418_v42 }
 0x21c   : > { %v1416_v30 = vpop.permute.xlu1 %1415  ;;  %1692 = vrot.lane.b32.xlu0 %v6111_v27, %s5222_s28 }
 0x21d   : > { %1491 = vst.msk [vmem:[#allocation4 + $0xa8] sm:$0xff] %vm1469_vm10, %v1416_v30 }
 0x21e   : > { %1690 = vrot.lane.b32.xlu1 %v8867_v51, %s5222_s28  ;;  %v1422_v47 = vpop.permute.xlu0 %1421 }
 0x21f   : > { %1494 = vst.msk [vmem:[#allocation4 + $0xc0] sm:$0xff] %vm1469_vm10, %v1422_v47 }
 0x220   : > { %v1420_v54 = vpop.permute.xlu1 %1419  ;;  %1562 = vrot.lane.b32.xlu0 %v8868_v4, %s5221_s26  ;;  %v8873_v4 = vld [vmem:[#allocation5_spill] sm:$0xff] }
 0x221   : > { %1493 = vst.msk [vmem:[#allocation4 + $0xb8] sm:$0xff] %vm1469_vm10, %v1420_v54 }
 0x222   : > { %1560 = vrot.lane.b32.xlu1 %v8869_v59, %s5221_s26  ;;  %v1426_v52 = vpop.permute.xlu0 %1425 }
 0x223   : > { %1496 = vst.msk [vmem:[#allocation4 + $0xd0] sm:$0xff] %vm1469_vm10, %v1426_v52 }
 0x224   : > { %v1424_v27 = vpop.permute.xlu1 %1423  ;;  %1696 = vrot.lane.b32.xlu0 %v6121_v3, %s5222_s28 }
 0x225   : > { %1495 = vst.msk [vmem:[#allocation4 + $0xc8] sm:$0xff] %vm1469_vm10, %v1424_v27 }
 0x226   : > { %1694 = vrot.lane.b32.xlu1 %v6105_v39, %s5222_s28  ;;  %v1430_v58 = vpop.permute.xlu0 %1429  ;;  %v6721_v39 = vld [vmem:[#allocation2 + $0x198] sm:$0xff] }
 0x227   : > { %1498 = vst.msk [vmem:[#allocation4 + $0xe0] sm:$0xff] %vm1469_vm10, %v1430_v58 }
 0x228   : > { %v1428_v57 = vpop.permute.xlu1 %1427  ;;  %1564 = vrot.lane.b32.xlu0 %v8870_v61, %s5221_s26 }
 0x229   : > { %1497 = vst.msk [vmem:[#allocation4 + $0xd8] sm:$0xff] %vm1469_vm10, %v1428_v57 }
 0x22a   : > { %1431 = vrot.lane.b32.xlu1 %v8871_v1, %s5220_s13  ;;  %v1511_v19 = vpop.permute.xlu0 %1510 }
 0x22b   : > { %1606 = vst.msk [vmem:[#allocation4 + $0x8] sm:$0xff] %vm1604_vm11, %v1511_v19 }
 0x22c   : > { %v1509_v3 = vpop.permute.xlu1 %1508  ;;  %1698 = vrot.lane.b32.xlu0 %v6420_v23, %s5222_s28 }
 0x22d   : > { %1605 = vst.msk [vmem:[#allocation4] sm:$0xff] %vm1604_vm11, %v1509_v3 }
 0x22e   : > { %1566 = vrot.lane.b32.xlu1 %v8872_v60, %s5221_s26  ;;  %v1645_v9 = vpop.permute.xlu0 %1644 }
 0x22f   : > { %1740 = vst.msk [vmem:[#allocation4 + $0x8] sm:$0xff] %vm1738_vm12, %v1645_v9 }
 0x230   : > { %v1643_v8 = vpop.permute.xlu1 %1642  ;;  %1433 = vrot.lane.b32.xlu0 %v6721_v39, %s5220_s13 }
 0x231   : > { %1739 = vst.msk [vmem:[#allocation4] sm:$0xff] %vm1738_vm12, %v1643_v8 }
 0x232   : > { %1700 = vrot.lane.b32.xlu1 %v6433_v48, %s5222_s28  ;;  %v1515_v23 = vpop.permute.xlu0 %1514 }
 0x233   : > { %1608 = vst.msk [vmem:[#allocation4 + $0x18] sm:$0xff] %vm1604_vm11, %v1515_v23 }
 0x234   : > { %v1513_v10 = vpop.permute.xlu1 %1512 }
 0x235   : > { %1607 = vst.msk [vmem:[#allocation4 + $0x10] sm:$0xff] %vm1604_vm11, %v1513_v10 }
 0x236   : > { %v1649_v35 = vpop.permute.xlu0 %1648  ;;  %1435 = vrot.lane.b32.xlu1 %v6732_v20, %s5220_s13  ;;  %v1772_v22 = vld [vmem:[#allocation4 + $0x8] sm:$0xff] }
 0x237   : > { %1742 = vst.msk [vmem:[#allocation4 + $0x18] sm:$0xff] %vm1738_vm12, %v1649_v35 }
 0x238   : > { %v1647_v21 = vpop.permute.xlu1 %1646  ;;  %v1771_v45 = vld [vmem:[#allocation4] sm:$0xff] }
 0x239   : > { %1741 = vst.msk [vmem:[#allocation4 + $0x10] sm:$0xff] %vm1738_vm12, %v1647_v21  ;;  %4989 = vmatprep.mubr.msk.f32.mxu0 %vm1809_vm13, %v1771_v45 }
 0x23a   : > { %4990 = vmatmul.mubr.msk.f32.vlgmr.msra.gmra.mrb[0].mxu0 %vm1809_vm13, %v1772_v22  ;;  %v1519_v48 = vpop.permute.xlu0 %1518 }
 0x23b   : > { %1610 = vst.msk [vmem:[#allocation4 + $0x28] sm:$0xff] %vm1604_vm11, %v1519_v48  ;;  %v1503_v48 = vrot.slane %v6721_v39, 1 }
 0x23c   : > { %v1517_v31 = vpop.permute.xlu1 %1516 }
 0x23d   : > { %1609 = vst.msk [vmem:[#allocation4 + $0x20] sm:$0xff] %vm1604_vm11, %v1517_v31  ;;  %v1504_v31 = vrot.slane %v6732_v20, 1 }
 0x23e   : > { %v1653_v7 = vpop.permute.xlu0 %1652  ;;  %v1774_v34 = vld [vmem:[#allocation4 + $0x18] sm:$0xff] }
 0x23f   : > { %1744 = vst.msk [vmem:[#allocation4 + $0x28] sm:$0xff] %vm1738_vm12, %v1653_v7 }
 0x240   : > { %v1651_v12 = vpop.permute.xlu1 %1650  ;;  %v1773_v25 = vld [vmem:[#allocation4 + $0x10] sm:$0xff] }
 0x241   : > { %1743 = vst.msk [vmem:[#allocation4 + $0x20] sm:$0xff] %vm1738_vm12, %v1651_v12  ;;  %4992 = vmatprep.mubr.msk.f32.mxu0 %vm1809_vm13, %v1773_v25 }
 0x242   : > { %4993 = vmatmul.mubr.msk.f32.gmra.mrb[2].mxu0 %vm1809_vm13, %v1774_v34  ;;  %v1523_v38 = vpop.permute.xlu0 %1522  ;;  %v6806_v34 = vld [vmem:[#allocation2 + $0x1a8] sm:$0x3] }
 0x243   : > { %1612 = vst.msk [vmem:[#allocation4 + $0x38] sm:$0xff] %vm1604_vm11, %v1523_v38  ;;  %v1506_v12 = vrot.slane %v6806_v34, 1  ;;  %v1637_v38 = vrot.slane %v6721_v39, 2 }
 0x244   : > { %v1521_v6 = vpop.permute.xlu1 %1520 }
 0x245   : > { %1611 = vst.msk [vmem:[#allocation4 + $0x30] sm:$0xff] %vm1604_vm11, %v1521_v6  ;;  %v1638_v6 = vrot.slane %v6732_v20, 2 }
 0x246   : > { %v1657_v17 = vpop.permute.xlu0 %1656  ;;  %v1776_v33 = vld [vmem:[#allocation4 + $0x28] sm:$0xff] }
 0x247   : > { %1746 = vst.msk [vmem:[#allocation4 + $0x38] sm:$0xff] %vm1738_vm12, %v1657_v17 }
 0x248   : > { %v1655_v24 = vpop.permute.xlu1 %1654  ;;  %v1775_v2 = vld [vmem:[#allocation4 + $0x20] sm:$0xff] }
 0x249   : > { %1745 = vst.msk [vmem:[#allocation4 + $0x30] sm:$0xff] %vm1738_vm12, %v1655_v24  ;;  %4995 = vmatprep.mubr.msk.f32.mxu0 %vm1809_vm13, %v1775_v2  ;;  %v1507_v24 = vsel %vm551_vm2, %v1504_v31, %v1506_v12 }
 0x24a   : > { %4996 = vmatmul.mubr.msk.f32.gmra.mrb[4].mxu0 %vm1809_vm13, %v1776_v33  ;;  %v1527_v28 = vpop.permute.xlu0 %1526  ;;  %v1505_v33 = vsel %vm551_vm2, %v1503_v48, %v1504_v31  ;;  %1570 = vrot.lane.b32.xlu1 %v1507_v24, %s5221_s26 }
 0x24b   : > { %1614 = vst.msk [vmem:[#allocation4 + $0x48] sm:$0xff] %vm1604_vm11, %v1527_v28  ;;  %1568 = vrot.lane.b32.xlu0 %v1505_v33, %s5221_s26 }
 0x24c   : > { %v1525_v15 = vpop.permute.xlu1 %1524 }
 0x24d   : > { %1613 = vst.msk [vmem:[#allocation4 + $0x40] sm:$0xff] %vm1604_vm11, %v1525_v15  ;;  %v8874_v15 = vmov 0.0  }
 0x24e   : > { %v1661_v56 = vpop.permute.xlu0 %1660  ;;  %v1778_v44 = vld [vmem:[#allocation4 + $0x38] sm:$0xff]  ;;  %2237 = vst.msk [vmem:[#allocation3 + $0x20] sm:$0xff] %vm2231_vm14, %v8874_v15  ;;  %2232 = vst.msk [vmem:[#allocation3] sm:$0xff] %vm2231_vm14, %v8874_v15 }
 0x24f   : > { %1748 = vst.msk [vmem:[#allocation4 + $0x48] sm:$0xff] %vm1738_vm12, %v1661_v56  ;;  %v1640_v56 = vrot.slane %v6806_v34, 2 }
 0x250   : > { %v1659_v36 = vpop.permute.xlu1 %1658  ;;  %v1777_v14 = vld [vmem:[#allocation4 + $0x30] sm:$0xff]  ;;  %2238 = vst.msk [vmem:[#allocation3 + $0x28] sm:$0x3] %vm2234_vm15, %v8874_v15  ;;  %2235 = vst.msk [vmem:[#allocation3 + $0x10] sm:$0x3] %vm2234_vm15, %v8874_v15 }
 0x251   : > { %1747 = vst.msk [vmem:[#allocation4 + $0x40] sm:$0xff] %vm1738_vm12, %v1659_v36  ;;  %4998 = vmatprep.mubr.msk.f32.mxu0 %vm1809_vm13, %v1777_v14  ;;  %v1639_v36 = vsel %vm761_vm3, %v1637_v38, %v1638_v6  ;;  %v1641_v14 = vsel %vm761_vm3, %v1638_v6, %v1640_v56 }
 0x252   : > { %4999 = vmatmul.mubr.msk.f32.gmra.mrb[6].mxu0 %vm1809_vm13, %v1778_v44  ;;  %v1531_v16 = vpop.permute.xlu0 %1530  ;;  %2233 = vst.msk [vmem:[#allocation3 + $0x8] sm:$0xff] %vm2231_vm14, %v8874_v15  ;;  %2236 = vst.msk [vmem:[#allocation3 + $0x18] sm:$0xff] %vm2231_vm14, %v8874_v15  ;;  %1702 = vrot.lane.b32.xlu0 %v1639_v36, %s5222_s28 }
 0x253   : > { %1616 = vst.msk [vmem:[#allocation4 + $0x58] sm:$0xff] %vm1604_vm11, %v1531_v16  ;;  %1704 = vrot.lane.b32.xlu1 %v1641_v14, %s5222_s28 }
 0x254   : > { %v1529_v50 = vpop.permute.xlu1 %1528  ;;  %2239 = vst.msk [vmem:[#allocation3 + $0x30] sm:$0xff] %vm2231_vm14, %v8874_v15  ;;  %2240 = vst.msk [vmem:[#allocation3 + $0x38] sm:$0xff] %vm2231_vm14, %v8874_v15 }
 0x255   : > { %1615 = vst.msk [vmem:[#allocation4 + $0x50] sm:$0xff] %vm1604_vm11, %v1529_v50 }
 0x256   : > { %v1665_v11 = vpop.permute.xlu0 %1664  ;;  %v1780_v41 = vld [vmem:[#allocation4 + $0x48] sm:$0xff]  ;;  %2241 = vst.msk [vmem:[#allocation3 + $0x40] sm:$0x3] %vm2234_vm15, %v8874_v15  ;;  %2244 = vst.msk [vmem:[#allocation3 + $0x58] sm:$0x3] %vm2234_vm15, %v8874_v15 }
 0x257   : > { %1750 = vst.msk [vmem:[#allocation4 + $0x58] sm:$0xff] %vm1738_vm12, %v1665_v11 }
 0x258   : > { %v1663_v53 = vpop.permute.xlu1 %1662  ;;  %v1779_v32 = vld [vmem:[#allocation4 + $0x40] sm:$0xff]  ;;  %2242 = vst.msk [vmem:[#allocation3 + $0x48] sm:$0xff] %vm2231_vm14, %v8874_v15  ;;  %2243 = vst.msk [vmem:[#allocation3 + $0x50] sm:$0xff] %vm2231_vm14, %v8874_v15 }
 0x259   : > { %1749 = vst.msk [vmem:[#allocation4 + $0x50] sm:$0xff] %vm1738_vm12, %v1663_v53  ;;  %5001 = vmatprep.mubr.msk.f32.mxu0 %vm1809_vm13, %v1779_v32  ;;  %v6947_v39 = vld [vmem:[#allocation3 + $0x8] sm:$0xff]  ;;  %v6949_v53 = vld [vmem:[#allocation3 + $0x10] sm:$0x3] }
 0x25a   : > { %5002 = vmatmul.mubr.msk.f32.gmra.mrb[8].mxu0 %vm1809_vm13, %v1780_v41  ;;  %v1535_v0 = vpop.permute.xlu0 %1534  ;;  %2245 = vst.msk [vmem:[#allocation3 + $0x60] sm:$0xff] %vm2231_vm14, %v8874_v15  ;;  %2246 = vst.msk [vmem:[#allocation3 + $0x68] sm:$0xff] %vm2231_vm14, %v8874_v15  ;;  %v6945_v41 = vld [vmem:[#allocation3] sm:$0xff] }
 0x25b   : > { %1618 = vst.msk [vmem:[#allocation4 + $0x68] sm:$0xff] %vm1604_vm11, %v1535_v0  ;;  %v2464_v0 = vrot.slane %v6945_v41, 1 }
 0x25c   : > { %v1533_v55 = vpop.permute.xlu1 %1532  ;;  %2247 = vst.msk [vmem:[#allocation3 + $0x70] sm:$0x3] %vm2234_vm15, %v8874_v15  ;;  %2250 = vst.msk [vmem:[#allocation3 + $0x88] sm:$0x3] %vm2234_vm15, %v8874_v15 }
 0x25d   : > { %1617 = vst.msk [vmem:[#allocation4 + $0x60] sm:$0xff] %vm1604_vm11, %v1533_v55  ;;  %v2465_v55 = vrot.slane %v6947_v39, 1 }
 0x25e   : > { %v1669_v29 = vpop.permute.xlu0 %1668  ;;  %v1782_v62 = vld [vmem:[#allocation4 + $0x58] sm:$0xff]  ;;  %2248 = vst.msk [vmem:[#allocation3 + $0x78] sm:$0xff] %vm2231_vm14, %v8874_v15  ;;  %2249 = vst.msk [vmem:[#allocation3 + $0x80] sm:$0xff] %vm2231_vm14, %v8874_v15 }
 0x25f   : > { %1752 = vst.msk [vmem:[#allocation4 + $0x68] sm:$0xff] %vm1738_vm12, %v1669_v29  ;;  %v2467_v29 = vrot.slane %v6949_v53, 1 }
 0x260   : > { %v1667_v13 = vpop.permute.xlu1 %1666  ;;  %v1781_v37 = vld [vmem:[#allocation4 + $0x50] sm:$0xff]  ;;  %2251 = vst.msk [vmem:[#allocation3 + $0x90] sm:$0xff] %vm2231_vm14, %v8874_v15  ;;  %2252 = vst.msk [vmem:[#allocation3 + $0x98] sm:$0xff] %vm2231_vm14, %v8874_v15 }
 0x261   : > { %1751 = vst.msk [vmem:[#allocation4 + $0x60] sm:$0xff] %vm1738_vm12, %v1667_v13  ;;  %5004 = vmatprep.mubr.msk.f32.mxu0 %vm1809_vm13, %v1781_v37  ;;  %v2466_v13 = vsel %vm551_vm2, %v2464_v0, %v2465_v55  ;;  %v2468_v37 = vsel %vm551_vm2, %v2465_v55, %v2467_v29 }
 0x262   : > { %5005 = vmatmul.mubr.msk.f32.gmra.mrb[10].mxu0 %vm1809_vm13, %v1782_v62  ;;  %v1539_v49 = vpop.permute.xlu0 %1538  ;;  %2253 = vst.msk [vmem:[#allocation3 + $0xa0] sm:$0x3] %vm2234_vm15, %v8874_v15  ;;  %2256 = vst.msk [vmem:[#allocation3 + $0xb8] sm:$0x3] %vm2234_vm15, %v8874_v15  ;;  %2544 = vrot.lane.b32.xlu0 %v2466_v13, %s5216_s9 }
 0x263   : > { %1620 = vst.msk [vmem:[#allocation4 + $0x78] sm:$0xff] %vm1604_vm11, %v1539_v49  ;;  %2546 = vrot.lane.b32.xlu1 %v2468_v37, %s5216_s9 }
 0x264   : > { %v1537_v5 = vpop.permute.xlu1 %1536  ;;  %2254 = vst.msk [vmem:[#allocation3 + $0xa8] sm:$0xff] %vm2231_vm14, %v8874_v15  ;;  %2255 = vst.msk [vmem:[#allocation3 + $0xb0] sm:$0xff] %vm2231_vm14, %v8874_v15 }
 0x265   : > { %1619 = vst.msk [vmem:[#allocation4 + $0x70] sm:$0xff] %vm1604_vm11, %v1537_v5 }
 0x266   : > { %v1673_v18 = vpop.permute.xlu0 %1672  ;;  %v1784_v40 = vld [vmem:[#allocation4 + $0x68] sm:$0xff]  ;;  %2257 = vst.msk [vmem:[#allocation3 + $0xc0] sm:$0xff] %vm2231_vm14, %v8874_v15  ;;  %2258 = vst.msk [vmem:[#allocation3 + $0xc8] sm:$0xff] %vm2231_vm14, %v8874_v15 }
 0x267   : > { %1754 = vst.msk [vmem:[#allocation4 + $0x78] sm:$0xff] %vm1738_vm12, %v1673_v18 }
 0x268   : > { %v1671_v63 = vpop.permute.xlu1 %1670  ;;  %v1783_v43 = vld [vmem:[#allocation4 + $0x60] sm:$0xff]  ;;  %2259 = vst.msk [vmem:[#allocation3 + $0xd0] sm:$0x3] %vm2234_vm15, %v8874_v15  ;;  %2262 = vst.msk [vmem:[#allocation3 + $0xe8] sm:$0x3] %vm2234_vm15, %v8874_v15 }
 0x269   : > { %1753 = vst.msk [vmem:[#allocation4 + $0x70] sm:$0xff] %vm1738_vm12, %v1671_v63  ;;  %5007 = vmatprep.mubr.msk.f32.mxu0 %vm1809_vm13, %v1783_v43 }
 0x26a   : > { %5008 = vmatmul.mubr.msk.f32.gmra.mrb[12].mxu0 %vm1809_vm13, %v1784_v40  ;;  %v1543_v26 = vpop.permute.xlu0 %1542  ;;  %2260 = vst.msk [vmem:[#allocation3 + $0xd8] sm:$0xff] %vm2231_vm14, %v8874_v15  ;;  %2261 = vst.msk [vmem:[#allocation3 + $0xe0] sm:$0xff] %vm2231_vm14, %v8874_v15 }
 0x26b   : > { %1622 = vst.msk [vmem:[#allocation4 + $0x88] sm:$0xff] %vm1604_vm11, %v1543_v26 }
 0x26c   : > { %v1541_v46 = vpop.permute.xlu1 %1540  ;;  %2263 = vst.msk [vmem:[#allocation3 + $0xf0] sm:$0xff] %vm2231_vm14, %v8874_v15  ;;  %2264 = vst.msk [vmem:[#allocation3 + $0xf8] sm:$0xff] %vm2231_vm14, %v8874_v15 }
 0x26d   : > { %1621 = vst.msk [vmem:[#allocation4 + $0x80] sm:$0xff] %vm1604_vm11, %v1541_v46 }
 0x26e   : > { %v1677_v42 = vpop.permute.xlu0 %1676  ;;  %v1786_v30 = vld [vmem:[#allocation4 + $0x78] sm:$0xff]  ;;  %2265 = vst.msk [vmem:[#allocation3 + $0x100] sm:$0x3] %vm2234_vm15, %v8874_v15  ;;  %2268 = vst.msk [vmem:[#allocation3 + $0x118] sm:$0x3] %vm2234_vm15, %v8874_v15 }
 0x26f   : > { %1756 = vst.msk [vmem:[#allocation4 + $0x88] sm:$0xff] %vm1738_vm12, %v1677_v42 }
 0x270   : > { %v1675_v51 = vpop.permute.xlu1 %1674  ;;  %v1785_v47 = vld [vmem:[#allocation4 + $0x70] sm:$0xff]  ;;  %2266 = vst.msk [vmem:[#allocation3 + $0x108] sm:$0xff] %vm2231_vm14, %v8874_v15  ;;  %2267 = vst.msk [vmem:[#allocation3 + $0x110] sm:$0xff] %vm2231_vm14, %v8874_v15 }
 0x271   : > { %1755 = vst.msk [vmem:[#allocation4 + $0x80] sm:$0xff] %vm1738_vm12, %v1675_v51  ;;  %5010 = vmatprep.mubr.msk.f32.mxu0 %vm1809_vm13, %v1785_v47 }
 0x272   : > { %5011 = vmatmul.mubr.msk.f32.gmra.mrb[14].mxu0 %vm1809_vm13, %v1786_v30  ;;  %v1547_v54 = vpop.permute.xlu0 %1546  ;;  %2269 = vst.msk [vmem:[#allocation3 + $0x120] sm:$0xff] %vm2231_vm14, %v8874_v15  ;;  %2270 = vst.msk [vmem:[#allocation3 + $0x128] sm:$0xff] %vm2231_vm14, %v8874_v15 }
 0x273   : > { %1624 = vst.msk [vmem:[#allocation4 + $0x98] sm:$0xff] %vm1604_vm11, %v1547_v54  ;;  %5105 = vmatprep.mubr.msk.f32.mxu0 %vm322_vm0, %v8873_v4 }
 0x274   : > { %v1545_v59 = vpop.permute.xlu1 %1544  ;;  %2271 = vst.msk [vmem:[#allocation3 + $0x130] sm:$0x3] %vm2234_vm15, %v8874_v15  ;;  %2274 = vst.msk [vmem:[#allocation3 + $0x148] sm:$0x3] %vm2234_vm15, %v8874_v15 }
 0x275   : > { %1623 = vst.msk [vmem:[#allocation4 + $0x90] sm:$0xff] %vm1604_vm11, %v1545_v59  ;;  %v6983_v59 = vld [vmem:[%s8537_s2] ss:$0 sm:$0xff] }
 0x276   : > { %v1681_v52 = vpop.permute.xlu0 %1680  ;;  %v1788_v27 = vld [vmem:[#allocation4 + $0x88] sm:$0xff]  ;;  %2272 = vst.msk [vmem:[#allocation3 + $0x138] sm:$0xff] %vm2231_vm14, %v8874_v15  ;;  %2273 = vst.msk [vmem:[#allocation3 + $0x140] sm:$0xff] %vm2231_vm14, %v8874_v15 }
 0x277   : > { %1758 = vst.msk [vmem:[#allocation4 + $0x98] sm:$0xff] %vm1738_vm12, %v1681_v52 }
 0x278   : > { %v1679_v58 = vpop.permute.xlu1 %1678  ;;  %v1787_v57 = vld [vmem:[#allocation4 + $0x80] sm:$0xff]  ;;  %2275 = vst.msk [vmem:[#allocation3 + $0x150] sm:$0xff] %vm2231_vm14, %v8874_v15  ;;  %2276 = vst.msk [vmem:[#allocation3 + $0x158] sm:$0xff] %vm2231_vm14, %v8874_v15 }
 0x279   : > { %1757 = vst.msk [vmem:[#allocation4 + $0x90] sm:$0xff] %vm1738_vm12, %v1679_v58  ;;  %5013 = vmatprep.mubr.msk.f32.mxu1 %vm1809_vm13, %v1787_v57 }
 0x27a   : > { %5014 = vmatmul.mubr.msk.f32.vlgmr.msra.gmra.mrb[0].mxu1 %vm1809_vm13, %v1788_v27  ;;  %v1551_v61 = vpop.permute.xlu0 %1550  ;;  %2277 = vst.msk [vmem:[#allocation3 + $0x160] sm:$0x3] %vm2234_vm15, %v8874_v15  ;;  %2280 = vst.msk [vmem:[#allocation3 + $0x178] sm:$0x3] %vm2234_vm15, %v8874_v15 }
 0x27b   : > { %1626 = vst.msk [vmem:[#allocation4 + $0xa8] sm:$0xff] %vm1604_vm11, %v1551_v61 }
 0x27c   : > { %v1549_v1 = vpop.permute.xlu1 %1548  ;;  %2278 = vst.msk [vmem:[#allocation3 + $0x168] sm:$0xff] %vm2231_vm14, %v8874_v15  ;;  %2279 = vst.msk [vmem:[#allocation3 + $0x170] sm:$0xff] %vm2231_vm14, %v8874_v15 }
 0x27d   : > { %1625 = vst.msk [vmem:[#allocation4 + $0xa0] sm:$0xff] %vm1604_vm11, %v1549_v1 }
 0x27e   : > { %v1685_v19 = vpop.permute.xlu0 %1684  ;;  %v1790_v3 = vld [vmem:[#allocation4 + $0x98] sm:$0xff]  ;;  %2281 = vst.msk [vmem:[#allocation3 + $0x180] sm:$0xff] %vm2231_vm14, %v8874_v15  ;;  %2282 = vst.msk [vmem:[#allocation3 + $0x188] sm:$0xff] %vm2231_vm14, %v8874_v15 }
 0x27f   : > { %1760 = vst.msk [vmem:[#allocation4 + $0xa8] sm:$0xff] %vm1738_vm12, %v1685_v19 }
 0x280   : > { %v1683_v60 = vpop.permute.xlu1 %1682  ;;  %v1789_v9 = vld [vmem:[#allocation4 + $0x90] sm:$0xff]  ;;  %2283 = vst.msk [vmem:[#allocation3 + $0x190] sm:$0x3] %vm2234_vm15, %v8874_v15  ;;  %2286 = vst.msk [vmem:[#allocation3 + $0x1a8] sm:$0x3] %vm2234_vm15, %v8874_v15 }
 0x281   : > { %1759 = vst.msk [vmem:[#allocation4 + $0xa0] sm:$0xff] %vm1738_vm12, %v1683_v60  ;;  %5016 = vmatprep.mubr.msk.f32.mxu1 %vm1809_vm13, %v1789_v9 }
 0x282   : > { %5017 = vmatmul.mubr.msk.f32.gmra.mrb[2].mxu1 %vm1809_vm13, %v1790_v3  ;;  %v1555_v8 = vpop.permute.xlu0 %1554  ;;  %2284 = vst.msk [vmem:[#allocation3 + $0x198] sm:$0xff] %vm2231_vm14, %v8874_v15  ;;  %2285 = vst.msk [vmem:[#allocation3 + $0x1a0] sm:$0xff] %vm2231_vm14, %v8874_v15 }
 0x283   : > { %1628 = vst.msk [vmem:[#allocation4 + $0xb8] sm:$0xff] %vm1604_vm11, %v1555_v8 }
 0x284   : > { %v1553_v23 = vpop.permute.xlu1 %1552  ;;  %2384 = vst.msk [vmem:[#allocation4] sm:$0xff] %vm2231_vm14, %v6945_v41  ;;  %2385 = vst.msk [vmem:[#allocation4 + $0x8] sm:$0xff] %vm2231_vm14, %v6947_v39 }
 0x285   : > { %1627 = vst.msk [vmem:[#allocation4 + $0xb0] sm:$0xff] %vm1604_vm11, %v1553_v23 }
 0x286   : > { %v1689_v10 = vpop.permute.xlu0 %1688  ;;  %v1792_v35 = vld [vmem:[#allocation4 + $0xa8] sm:$0xff] }
 0x287   : > { %1762 = vst.msk [vmem:[#allocation4 + $0xb8] sm:$0xff] %vm1738_vm12, %v1689_v10 }
 0x288   : > { %v1687_v22 = vpop.permute.xlu1 %1686  ;;  %v1791_v21 = vld [vmem:[#allocation4 + $0xa0] sm:$0xff] }
 0x289   : > { %1761 = vst.msk [vmem:[#allocation4 + $0xb0] sm:$0xff] %vm1738_vm12, %v1687_v22  ;;  %5019 = vmatprep.mubr.msk.f32.mxu1 %vm1809_vm13, %v1791_v21 }
 0x28a   : > { %5020 = vmatmul.mubr.msk.f32.gmra.mrb[4].mxu1 %vm1809_vm13, %v1792_v35  ;;  %v1559_v45 = vpop.permute.xlu0 %1558 }
 0x28b   : > { %1630 = vst.msk [vmem:[#allocation4 + $0xc8] sm:$0xff] %vm1604_vm11, %v1559_v45 }
 0x28c   : > { %v1557_v7 = vpop.permute.xlu1 %1556 }
 0x28d   : > { %1629 = vst.msk [vmem:[#allocation4 + $0xc0] sm:$0xff] %vm1604_vm11, %v1557_v7 }
 0x28e   : > { %v1693_v25 = vpop.permute.xlu0 %1692  ;;  %v6813_v17 = vld [vmem:[#allocation4 + $0xb8] sm:$0xff] }
 0x28f   : > { %1764 = vst.msk [vmem:[#allocation4 + $0xc8] sm:$0xff] %vm1738_vm12, %v1693_v25 }
 0x290   : > { %v1691_v2 = vpop.permute.xlu1 %1690  ;;  %v1793_v28 = vld [vmem:[#allocation4 + $0xb0] sm:$0xff] }
 0x291   : > { %1763 = vst.msk [vmem:[#allocation4 + $0xc0] sm:$0xff] %vm1738_vm12, %v1691_v2  ;;  %5022 = vmatprep.mubr.msk.f32.mxu1 %vm1809_vm13, %v1793_v28 }
 0x292   : > { %5023 = vmatmul.mubr.msk.f32.gmra.mrb[6].mxu1 %vm1809_vm13, %v6813_v17  ;;  %v1563_v44 = vpop.permute.xlu0 %1562 }
 0x293   : > { %1632 = vst.msk [vmem:[#allocation4 + $0xd8] sm:$0xff] %vm1604_vm11, %v1563_v44 }
 0x294   : > { %v1561_v16 = vpop.permute.xlu1 %1560 }
 0x295   : > { %1631 = vst.msk [vmem:[#allocation4 + $0xd0] sm:$0xff] %vm1604_vm11, %v1561_v16 }
 0x296   : > { %v1697_v50 = vpop.permute.xlu0 %1696  ;;  %v1796_v11 = vld [vmem:[#allocation4 + $0xc8] sm:$0xff] }
 0x297   : > { %1766 = vst.msk [vmem:[#allocation4 + $0xd8] sm:$0xff] %vm1738_vm12, %v1697_v50 }
 0x298   : > { %v1695_v20 = vpop.permute.xlu1 %1694  ;;  %v1795_v32 = vld [vmem:[#allocation4 + $0xc0] sm:$0xff] }
 0x299   : > { %1765 = vst.msk [vmem:[#allocation4 + $0xd0] sm:$0xff] %vm1738_vm12, %v1695_v20  ;;  %5025 = vmatprep.mubr.msk.f32.mxu1 %vm1809_vm13, %v1795_v32 }
 0x29a   : > { %5026 = vmatmul.mubr.msk.f32.gmra.mrb[8].mxu1 %vm1809_vm13, %v1796_v11  ;;  %v1565_v62 = vpop.permute.xlu0 %1564 }
 0x29b   : > { %1633 = vst.msk [vmem:[#allocation4 + $0xe0] sm:$0xff] %vm1604_vm11, %v1565_v62 }
 0x29c   : > { %v1432_v49 = vpop.permute.xlu1 %1431 }
 0x29d   : > { %1499 = vst.msk [vmem:[#allocation4 + $0xe8] sm:$0xff] %vm1469_vm10, %v1432_v49 }
 0x29e   : > { %v1699_v5 = vpop.permute.xlu0 %1698  ;;  %v1798_v18 = vld [vmem:[#allocation4 + $0xd8] sm:$0xff] }
 0x29f   : > { %1767 = vst.msk [vmem:[#allocation4 + $0xe0] sm:$0xff] %vm1738_vm12, %v1699_v5 }
 0x2a0   : > { %v1567_v40 = vpop.permute.xlu1 %1566  ;;  %v1797_v63 = vld [vmem:[#allocation4 + $0xd0] sm:$0xff] }
 0x2a1   : > { %1634 = vst.msk [vmem:[#allocation4 + $0xe8] sm:$0xff] %vm1604_vm11, %v1567_v40  ;;  %5028 = vmatprep.mubr.msk.f32.mxu1 %vm1809_vm13, %v1797_v63 }
 0x2a2   : > { %5029 = vmatmul.mubr.msk.f32.gmra.mrb[10].mxu1 %vm1809_vm13, %v1798_v18  ;;  %v1434_v42 = vpop.permute.xlu0 %1433 }
 0x2a3   : > { %1500 = vst.msk [vmem:[#allocation4 + $0xf0] sm:$0xff] %vm1469_vm10, %v1434_v42 }
 0x2a4   : > { %v1701_v43 = vpop.permute.xlu1 %1700 }
 0x2a5   : > { %1768 = vst.msk [vmem:[#allocation4 + $0xe8] sm:$0xff] %vm1738_vm12, %v1701_v43 }
 0x2a6   : > { %v1799_v26 = vld [vmem:[#allocation4 + $0xe0] sm:$0xff] }
 0x2a7   : > { %5031 = vmatprep.mubr.msk.f32.mxu1 %vm1809_vm13, %v1799_v26 }
 0x2a8   : > { %v1436_v30 = vpop.permute.xlu1 %1435 }
 0x2a9   : > { %1501 = vst.msk [vmem:[#allocation4 + $0xf8] sm:$0xff] %vm1469_vm10, %v1436_v30 }
 0x2ac   : > { %v1800_v46 = vld [vmem:[#allocation4 + $0xe8] sm:$0xff] }
 0x2ad   : > { %5032 = vmatmul.mubr.msk.f32.gmra.mrb[12].mxu1 %vm1809_vm13, %v1800_v46 }
 0x2bc   : > { %v1571_v47 = vpop.permute.xlu1 %1570 }
 0x2bd   : > { %v1569_v51 = vpop.permute.xlu0 %1568  ;;  %1636 = vst.msk [vmem:[#allocation4 + $0xf8] sm:$0xff] %vm1604_vm11, %v1571_v47 }
 0x2be   : > { %1635 = vst.msk [vmem:[#allocation4 + $0xf0] sm:$0xff] %vm1604_vm11, %v1569_v51 }
 0x2c4   : > { %v1703_v54 = vpop.permute.xlu0 %1702 }
 0x2c5   : > { %v1705_v4 = vpop.permute.xlu1 %1704  ;;  %1769 = vst.msk [vmem:[#allocation4 + $0xf0] sm:$0xff] %vm1738_vm12, %v1703_v54 }
 0x2c6   : > { %1770 = vst.msk [vmem:[#allocation4 + $0xf8] sm:$0xff] %vm1738_vm12, %v1705_v4 }
 0x2cc   : > { %v1801_v19 = vld [vmem:[#allocation4 + $0xf0] sm:$0xff] }
 0x2cd   : > { %5034 = vmatprep.mubr.msk.f32.mxu1 %vm1809_vm13, %v1801_v19  ;;  %v1802_v60 = vld [vmem:[#allocation4 + $0xf8] sm:$0xff] }
 0x2ce   : > { %5035 = vmatmul.mubr.msk.f32.gmra.mrb[14].mxu1 %vm1809_vm13, %v1802_v60 }
 0x2d4   : > { %v2545_v27 = vpop.permute.xlu0 %2544 }
 0x2d5   : > { %2641 = vst.msk [vmem:[#allocation4] sm:$0xff] %vm2640_vm1, %v2545_v27  ;;  %v2547_v61 = vpop.permute.xlu1 %2546 }
 0x2d6   : > { %2642 = vst.msk [vmem:[#allocation4 + $0x8] sm:$0xff] %vm2640_vm1, %v2547_v61 }
 0x30d   : > { %v4991_v52 = vpop.f32.mrb[0].mxu0 }
 0x30e   : > { %v1982_v58 = vadd.f32 %v4991_v52, %v6983_v59  ;;  %v1976_v57 = vpop.f32.mrb[1].mxu0 }
 0x30f   : > { %v1977_v1 = vadd.f32 %v6983_v59, %v1976_v57 }
 0x310   : > { %vm2136_vm4 = vcmp.gt.f32.partialorder %v1982_v58, 0.0  ;;  %v2168_v3 = vmul.f32 0.01, %v1982_v58 }
 0x311   : > { %vm2135_vm5 = vcmp.gt.f32.partialorder %v1977_v1, 0.0  ;;  %v2167_v9 = vmul.f32 0.01, %v1977_v1 }
 0x312   : > { %v2200_v8 = vsel %vm2136_vm4, %v1982_v58, %v2168_v3 }
 0x313   : > { %2289 = vst.msk [vmem:[#allocation3 + $0x21] sm:$0xff] %vm2231_vm14, %v2200_v8  ;;  %v2199_v23 = vsel %vm2135_vm5, %v1977_v1, %v2167_v9 }
 0x314   : > { %2288 = vst.msk [vmem:[#allocation3 + $0x19] sm:$0xff] %vm2231_vm14, %v2199_v23 }
 0x315   : > { %v4994_v10 = vpop.f32.mrb[2].mxu0 }
 0x316   : > { %v1992_v35 = vadd.f32 %v4994_v10, %v6983_v59  ;;  %v1986_v22 = vpop.f32.mrb[3].mxu0 }
 0x317   : > { %v1987_v21 = vadd.f32 %v6983_v59, %v1986_v22 }
 0x318   : > { %vm2138_vm6 = vcmp.gt.f32.partialorder %v1992_v35, 0.0  ;;  %v2170_v45 = vmul.f32 0.01, %v1992_v35 }
 0x319   : > { %vm2137_vm7 = vcmp.gt.f32.partialorder %v1987_v21, 0.0  ;;  %v2169_v48 = vmul.f32 0.01, %v1987_v21 }
 0x31a   : > { %v2202_v31 = vsel %vm2138_vm6, %v1992_v35, %v2170_v45  ;;  %v6995_v7 = vld [vmem:[#allocation3 + $0x28] sm:$0x3] }
 0x31b   : > { %2291 = vst.msk [vmem:[#allocation3 + $0x39] sm:$0xff] %vm2231_vm14, %v2202_v31  ;;  %v2201_v34 = vsel %vm2137_vm7, %v1987_v21, %v2169_v48  ;;  %v6998_v12 = vld [vmem:[#allocation3 + $0x20] sm:$0xff]  ;;  %v2472_v25 = vrot.slane %v6995_v7, 1  ;;  %v7001_v38 = vld [vmem:[#allocation3 + $0x18] sm:$0xff] }
 0x31c   : > { %2290 = vst.msk [vmem:[#allocation3 + $0x31] sm:$0xff] %vm2231_vm14, %v2201_v34  ;;  %v2470_v6 = vrot.slane %v6998_v12, 1  ;;  %2387 = vst.msk [vmem:[#allocation4 + $0x18] sm:$0xff] %vm2231_vm14, %v6998_v12  ;;  %v2469_v17 = vrot.slane %v7001_v38, 1 }
 0x31d   : > { %2386 = vst.msk [vmem:[#allocation4 + $0x10] sm:$0xff] %vm2231_vm14, %v7001_v38  ;;  %v4997_v33 = vpop.f32.mrb[4].mxu0 }
 0x31e   : > { %v2002_v24 = vadd.f32 %v4997_v33, %v6983_v59  ;;  %v1996_v2 = vpop.f32.mrb[5].mxu0  ;;  %v7012_v28 = vsel %vm551_vm2, %v2470_v6, %v2472_v25  ;;  %v7015_v15 = vsel %vm551_vm2, %v2469_v17, %v2470_v6 }
 0x31f   : > { %v1997_v56 = vadd.f32 %v6983_v59, %v1996_v2  ;;  %2550 = vrot.lane.b32.xlu1 %v7012_v28, %s5216_s9  ;;  %2548 = vrot.lane.b32.xlu0 %v7015_v15, %s5216_s9 }
 0x320   : > { %vm2140_vm8 = vcmp.gt.f32.partialorder %v2002_v24, 0.0  ;;  %v2172_v44 = vmul.f32 0.01, %v2002_v24 }
 0x321   : > { %vm2139_vm10 = vcmp.gt.f32.partialorder %v1997_v56, 0.0  ;;  %v2171_v36 = vmul.f32 0.01, %v1997_v56 }
 0x322   : > { %v2204_v14 = vsel %vm2140_vm8, %v2002_v24, %v2172_v44  ;;  %v7022_v16 = vld [vmem:[#allocation3 + $0x40] sm:$0x3] }
 0x323   : > { %2293 = vst.msk [vmem:[#allocation3 + $0x51] sm:$0xff] %vm2231_vm14, %v2204_v14  ;;  %v2203_v50 = vsel %vm2139_vm10, %v1997_v56, %v2171_v36  ;;  %v7025_v11 = vld [vmem:[#allocation3 + $0x38] sm:$0xff]  ;;  %v2477_v20 = vrot.slane %v7022_v16, 1  ;;  %v7028_v32 = vld [vmem:[#allocation3 + $0x30] sm:$0xff] }
 0x324   : > { %2292 = vst.msk [vmem:[#allocation3 + $0x49] sm:$0xff] %vm2231_vm14, %v2203_v50  ;;  %v2475_v0 = vrot.slane %v7025_v11, 1  ;;  %2389 = vst.msk [vmem:[#allocation4 + $0x28] sm:$0xff] %vm2231_vm14, %v7025_v11  ;;  %v2474_v55 = vrot.slane %v7028_v32, 1 }
 0x325   : > { %2388 = vst.msk [vmem:[#allocation4 + $0x20] sm:$0xff] %vm2231_vm14, %v7028_v32  ;;  %v5000_v29 = vpop.f32.mrb[6].mxu0 }
 0x326   : > { %v2012_v62 = vadd.f32 %v5000_v29, %v6983_v59  ;;  %v2006_v13 = vpop.f32.mrb[7].mxu0  ;;  %v7039_v37 = vsel %vm551_vm2, %v2475_v0, %v2477_v20  ;;  %v7042_v49 = vsel %vm551_vm2, %v2474_v55, %v2475_v0 }
 0x327   : > { %v2007_v5 = vadd.f32 %v6983_v59, %v2006_v13  ;;  %2554 = vrot.lane.b32.xlu1 %v7039_v37, %s5216_s9  ;;  %2552 = vrot.lane.b32.xlu0 %v7042_v49, %s5216_s9 }
 0x328   : > { %vm2142_vm11 = vcmp.gt.f32.partialorder %v2012_v62, 0.0  ;;  %v2174_v18 = vmul.f32 0.01, %v2012_v62 }
 0x329   : > { %vm2141_vm12 = vcmp.gt.f32.partialorder %v2007_v5, 0.0  ;;  %v2173_v40 = vmul.f32 0.01, %v2007_v5 }
 0x32a   : > { %v2206_v63 = vsel %vm2142_vm11, %v2012_v62, %v2174_v18  ;;  %v7049_v43 = vld [vmem:[#allocation3 + $0x58] sm:$0x3] }
 0x32b   : > { %2295 = vst.msk [vmem:[#allocation3 + $0x69] sm:$0xff] %vm2231_vm14, %v2206_v63  ;;  %v2205_v26 = vsel %vm2141_vm12, %v2007_v5, %v2173_v40  ;;  %v7052_v46 = vld [vmem:[#allocation3 + $0x50] sm:$0xff]  ;;  %v2482_v42 = vrot.slane %v7049_v43, 1  ;;  %v7055_v30 = vld [vmem:[#allocation3 + $0x48] sm:$0xff] }
 0x32c   : > { %2294 = vst.msk [vmem:[#allocation3 + $0x61] sm:$0xff] %vm2231_vm14, %v2205_v26  ;;  %v2480_v51 = vrot.slane %v7052_v46, 1  ;;  %2391 = vst.msk [vmem:[#allocation4 + $0x38] sm:$0xff] %vm2231_vm14, %v7052_v46  ;;  %v2479_v47 = vrot.slane %v7055_v30, 1 }
 0x32d   : > { %2390 = vst.msk [vmem:[#allocation4 + $0x30] sm:$0xff] %vm2231_vm14, %v7055_v30  ;;  %v5003_v54 = vpop.f32.mrb[8].mxu0 }
 0x32e   : > { %v2022_v4 = vadd.f32 %v5003_v54, %v6983_v59  ;;  %v2016_v52 = vpop.f32.mrb[9].mxu0  ;;  %v7066_v27 = vsel %vm551_vm2, %v2480_v51, %v2482_v42  ;;  %v7069_v58 = vsel %vm551_vm2, %v2479_v47, %v2480_v51 }
 0x32f   : > { %v2017_v57 = vadd.f32 %v6983_v59, %v2016_v52  ;;  %2558 = vrot.lane.b32.xlu1 %v7066_v27, %s5216_s9  ;;  %2556 = vrot.lane.b32.xlu0 %v7069_v58, %s5216_s9 }
 0x330   : > { %vm2144_vm13 = vcmp.gt.f32.partialorder %v2022_v4, 0.0  ;;  %v2176_v61 = vmul.f32 0.01, %v2022_v4 }
 0x331   : > { %vm2143_vm15 = vcmp.gt.f32.partialorder %v2017_v57, 0.0  ;;  %v2175_v1 = vmul.f32 0.01, %v2017_v57 }
 0x332   : > { %v2208_v19 = vsel %vm2144_vm13, %v2022_v4, %v2176_v61  ;;  %v7076_v3 = vld [vmem:[#allocation3 + $0x70] sm:$0x3] }
 0x333   : > { %2297 = vst.msk [vmem:[#allocation3 + $0x81] sm:$0xff] %vm2231_vm14, %v2208_v19  ;;  %v2207_v60 = vsel %vm2143_vm15, %v2017_v57, %v2175_v1  ;;  %v7079_v9 = vld [vmem:[#allocation3 + $0x68] sm:$0xff]  ;;  %v2487_v8 = vrot.slane %v7076_v3, 1  ;;  %v7082_v23 = vld [vmem:[#allocation3 + $0x60] sm:$0xff] }
 0x334   : > { %2296 = vst.msk [vmem:[#allocation3 + $0x79] sm:$0xff] %vm2231_vm14, %v2207_v60  ;;  %v2485_v10 = vrot.slane %v7079_v9, 1  ;;  %2393 = vst.msk [vmem:[#allocation4 + $0x48] sm:$0xff] %vm2231_vm14, %v7079_v9  ;;  %v2484_v35 = vrot.slane %v7082_v23, 1 }
 0x335   : > { %2392 = vst.msk [vmem:[#allocation4 + $0x40] sm:$0xff] %vm2231_vm14, %v7082_v23  ;;  %v5006_v22 = vpop.f32.mrb[10].mxu0 }
 0x336   : > { %v2032_v21 = vadd.f32 %v5006_v22, %v6983_v59  ;;  %v2026_v45 = vpop.f32.mrb[11].mxu0  ;;  %v7093_v48 = vsel %vm551_vm2, %v2485_v10, %v2487_v8  ;;  %v7096_v31 = vsel %vm551_vm2, %v2484_v35, %v2485_v10 }
 0x337   : > { %8875 = vst [vmem:[#allocation38_spill] sm:$0xff] %v7093_v48  ;;  %8876 = vst [vmem:[#allocation62_spill] sm:$0xff] %v7096_v31  ;;  %v2027_v34 = vadd.f32 %v6983_v59, %v2026_v45  ;;  %2562 = vrot.lane.b32.xlu1 %v7093_v48, %s5216_s9  ;;  %2560 = vrot.lane.b32.xlu0 %v7096_v31, %s5216_s9  ;;  %v2681_v31 = vrot.slane %v6995_v7, 2  ;;  %v2683_v7 = vrot.slane %v7028_v32, 2 }
 0x338   : > { %vm2146_vm4 = vcmp.gt.f32.partialorder %v2032_v21, 0.0  ;;  %v2178_v25 = vmul.f32 0.01, %v2032_v21 }
 0x339   : > { %vm2145_vm5 = vcmp.gt.f32.partialorder %v2027_v34, 0.0  ;;  %v2177_v6 = vmul.f32 0.01, %v2027_v34 }
 0x33a   : > { %v2210_v17 = vsel %vm2146_vm4, %v2032_v21, %v2178_v25  ;;  %v7103_v33 = vld [vmem:[#allocation3 + $0x88] sm:$0x3] }
 0x33b   : > { %2299 = vst.msk [vmem:[#allocation3 + $0x99] sm:$0xff] %vm2231_vm14, %v2210_v17  ;;  %v2209_v24 = vsel %vm2145_vm5, %v2027_v34, %v2177_v6  ;;  %v7106_v2 = vld [vmem:[#allocation3 + $0x80] sm:$0xff]  ;;  %v2492_v56 = vrot.slane %v7103_v33, 1  ;;  %v7109_v44 = vld [vmem:[#allocation3 + $0x78] sm:$0xff] }
 0x33c   : > { %2298 = vst.msk [vmem:[#allocation3 + $0x91] sm:$0xff] %vm2231_vm14, %v2209_v24  ;;  %v2490_v36 = vrot.slane %v7106_v2, 1  ;;  %2395 = vst.msk [vmem:[#allocation4 + $0x58] sm:$0xff] %vm2231_vm14, %v7106_v2  ;;  %v2489_v14 = vrot.slane %v7109_v44, 1 }
 0x33d   : > { %2394 = vst.msk [vmem:[#allocation4 + $0x50] sm:$0xff] %vm2231_vm14, %v7109_v44  ;;  %v5009_v50 = vpop.f32.mrb[12].mxu0 }
 0x33e   : > { %v2042_v20 = vadd.f32 %v5009_v50, %v6983_v59  ;;  %v2036_v0 = vpop.f32.mrb[13].mxu0  ;;  %v7120_v55 = vsel %vm551_vm2, %v2490_v36, %v2492_v56  ;;  %v7123_v29 = vsel %vm551_vm2, %v2489_v14, %v2490_v36 }
 0x33f   : > { %8877 = vst [vmem:[#allocation63_spill] sm:$0xff] %v7120_v55  ;;  %8878 = vst [vmem:[#allocation64_spill] sm:$0xff] %v7123_v29  ;;  %v2037_v62 = vadd.f32 %v6983_v59, %v2036_v0  ;;  %2566 = vrot.lane.b32.xlu1 %v7120_v55, %s5216_s9  ;;  %2564 = vrot.lane.b32.xlu0 %v7123_v29, %s5216_s9 }
 0x340   : > { %vm2148_vm6 = vcmp.gt.f32.partialorder %v2042_v20, 0.0  ;;  %v2180_v13 = vmul.f32 0.01, %v2042_v20 }
 0x341   : > { %vm2147_vm7 = vcmp.gt.f32.partialorder %v2037_v62, 0.0  ;;  %v2179_v5 = vmul.f32 0.01, %v2037_v62 }
 0x342   : > { %v2212_v18 = vsel %vm2148_vm6, %v2042_v20, %v2180_v13  ;;  %v7130_v40 = vld [vmem:[#allocation3 + $0xa0] sm:$0x3] }
 0x343   : > { %2301 = vst.msk [vmem:[#allocation3 + $0xb1] sm:$0xff] %vm2231_vm14, %v2212_v18  ;;  %v2211_v63 = vsel %vm2147_vm7, %v2037_v62, %v2179_v5  ;;  %v7133_v26 = vld [vmem:[#allocation3 + $0x98] sm:$0xff]  ;;  %v2497_v42 = vrot.slane %v7130_v40, 1  ;;  %v7136_v51 = vld [vmem:[#allocation3 + $0x90] sm:$0xff] }
 0x344   : > { %2300 = vst.msk [vmem:[#allocation3 + $0xa9] sm:$0xff] %vm2231_vm14, %v2211_v63  ;;  %v2495_v47 = vrot.slane %v7133_v26, 1  ;;  %2397 = vst.msk [vmem:[#allocation4 + $0x68] sm:$0xff] %vm2231_vm14, %v7133_v26  ;;  %v2494_v54 = vrot.slane %v7136_v51, 1 }
 0x345   : > { %2396 = vst.msk [vmem:[#allocation4 + $0x60] sm:$0xff] %vm2231_vm14, %v7136_v51  ;;  %v5012_v4 = vpop.f32.mrb[14].mxu0 }
 0x346   : > { %v2052_v52 = vadd.f32 %v5012_v4, %v6983_v59  ;;  %v2046_v57 = vpop.f32.mrb[15].mxu0  ;;  %v7147_v61 = vsel %vm551_vm2, %v2495_v47, %v2497_v42  ;;  %v7150_v1 = vsel %vm551_vm2, %v2494_v54, %v2495_v47 }
 0x347   : > { %8879 = vst [vmem:[#allocation65_spill] sm:$0xff] %v7147_v61  ;;  %8880 = vst [vmem:[#allocation66_spill] sm:$0xff] %v7150_v1  ;;  %v2047_v19 = vadd.f32 %v6983_v59, %v2046_v57  ;;  %2570 = vrot.lane.b32.xlu1 %v7147_v61, %s5216_s9  ;;  %2568 = vrot.lane.b32.xlu0 %v7150_v1, %s5216_s9 }
 0x348   : > { %vm2150_vm8 = vcmp.gt.f32.partialorder %v2052_v52, 0.0  ;;  %v2182_v60 = vmul.f32 0.01, %v2052_v52 }
 0x349   : > { %vm2149_vm10 = vcmp.gt.f32.partialorder %v2047_v19, 0.0  ;;  %v2181_v8 = vmul.f32 0.01, %v2047_v19 }
 0x34a   : > { %v2214_v10 = vsel %vm2150_vm8, %v2052_v52, %v2182_v60  ;;  %v7157_v35 = vld [vmem:[#allocation3 + $0xb8] sm:$0x3] }
 0x34b   : > { %2303 = vst.msk [vmem:[#allocation3 + $0xc9] sm:$0xff] %vm2231_vm14, %v2214_v10  ;;  %v2213_v22 = vsel %vm2149_vm10, %v2047_v19, %v2181_v8  ;;  %v7160_v21 = vld [vmem:[#allocation3 + $0xb0] sm:$0xff]  ;;  %v2502_v45 = vrot.slane %v7157_v35, 1  ;;  %v7163_v34 = vld [vmem:[#allocation3 + $0xa8] sm:$0xff] }
 0x34c   : > { %2302 = vst.msk [vmem:[#allocation3 + $0xc1] sm:$0xff] %vm2231_vm14, %v2213_v22  ;;  %v2500_v25 = vrot.slane %v7160_v21, 1  ;;  %2399 = vst.msk [vmem:[#allocation4 + $0x78] sm:$0xff] %vm2231_vm14, %v7160_v21  ;;  %v2499_v6 = vrot.slane %v7163_v34, 1 }
 0x34d   : > { %2398 = vst.msk [vmem:[#allocation4 + $0x70] sm:$0xff] %vm2231_vm14, %v7163_v34  ;;  %v5015_v17 = vpop.f32.mrb[0].mxu1 }
 0x34e   : > { %v2062_v24 = vadd.f32 %v5015_v17, %v6983_v59  ;;  %v2056_v56 = vpop.f32.mrb[1].mxu1  ;;  %v7174_v36 = vsel %vm551_vm2, %v2500_v25, %v2502_v45  ;;  %v7177_v14 = vsel %vm551_vm2, %v2499_v6, %v2500_v25 }
 0x34f   : > { %8881 = vst [vmem:[#allocation67_spill] sm:$0xff] %v7174_v36  ;;  %8882 = vst [vmem:[#allocation69_spill] sm:$0xff] %v7177_v14  ;;  %v2057_v50 = vadd.f32 %v6983_v59, %v2056_v56  ;;  %2574 = vrot.lane.b32.xlu1 %v7174_v36, %s5216_s9  ;;  %2572 = vrot.lane.b32.xlu0 %v7177_v14, %s5216_s9 }
 0x350   : > { %vm2152_vm11 = vcmp.gt.f32.partialorder %v2062_v24, 0.0  ;;  %v2184_v20 = vmul.f32 0.01, %v2062_v24 }
 0x351   : > { %vm2151_vm12 = vcmp.gt.f32.partialorder %v2057_v50, 0.0  ;;  %v2183_v0 = vmul.f32 0.01, %v2057_v50 }
 0x352   : > { %v2216_v62 = vsel %vm2152_vm11, %v2062_v24, %v2184_v20  ;;  %v7184_v13 = vld [vmem:[#allocation3 + $0xd0] sm:$0x3] }
 0x353   : > { %2305 = vst.msk [vmem:[#allocation3 + $0xe1] sm:$0xff] %vm2231_vm14, %v2216_v62  ;;  %v2215_v5 = vsel %vm2151_vm12, %v2057_v50, %v2183_v0  ;;  %v7187_v18 = vld [vmem:[#allocation3 + $0xc8] sm:$0xff]  ;;  %v2507_v63 = vrot.slane %v7184_v13, 1  ;;  %v7190_v42 = vld [vmem:[#allocation3 + $0xc0] sm:$0xff] }
 0x354   : > { %2304 = vst.msk [vmem:[#allocation3 + $0xd9] sm:$0xff] %vm2231_vm14, %v2215_v5  ;;  %v2505_v47 = vrot.slane %v7187_v18, 1  ;;  %2401 = vst.msk [vmem:[#allocation4 + $0x88] sm:$0xff] %vm2231_vm14, %v7187_v18  ;;  %v2504_v54 = vrot.slane %v7190_v42, 1 }
 0x355   : > { %2400 = vst.msk [vmem:[#allocation4 + $0x80] sm:$0xff] %vm2231_vm14, %v7190_v42  ;;  %v5018_v4 = vpop.f32.mrb[2].mxu1 }
 0x356   : > { %v2072_v52 = vadd.f32 %v5018_v4, %v6983_v59  ;;  %v2066_v57 = vpop.f32.mrb[3].mxu1  ;;  %v7201_v19 = vsel %vm551_vm2, %v2505_v47, %v2507_v63  ;;  %v7204_v60 = vsel %vm551_vm2, %v2504_v54, %v2505_v47 }
 0x357   : > { %8883 = vst [vmem:[#allocation71_spill] sm:$0xff] %v7201_v19  ;;  %8884 = vst [vmem:[#allocation73_spill] sm:$0xff] %v7204_v60  ;;  %v2067_v8 = vadd.f32 %v6983_v59, %v2066_v57  ;;  %2578 = vrot.lane.b32.xlu1 %v7201_v19, %s5216_s9  ;;  %2576 = vrot.lane.b32.xlu0 %v7204_v60, %s5216_s9 }
 0x358   : > { %vm2154_vm13 = vcmp.gt.f32.partialorder %v2072_v52, 0.0  ;;  %v2186_v10 = vmul.f32 0.01, %v2072_v52 }
 0x359   : > { %vm2153_vm15 = vcmp.gt.f32.partialorder %v2067_v8, 0.0  ;;  %v2185_v22 = vmul.f32 0.01, %v2067_v8 }
 0x35a   : > { %v2218_v45 = vsel %vm2154_vm13, %v2072_v52, %v2186_v10  ;;  %v7211_v25 = vld [vmem:[#allocation3 + $0xe8] sm:$0x3] }
 0x35b   : > { %2307 = vst.msk [vmem:[#allocation3 + $0xf9] sm:$0xff] %vm2231_vm14, %v2218_v45  ;;  %v2217_v6 = vsel %vm2153_vm15, %v2067_v8, %v2185_v22  ;;  %v7214_v17 = vld [vmem:[#allocation3 + $0xe0] sm:$0xff]  ;;  %v2512_v24 = vrot.slane %v7211_v25, 1  ;;  %v7217_v56 = vld [vmem:[#allocation3 + $0xd8] sm:$0xff] }
 0x35c   : > { %2306 = vst.msk [vmem:[#allocation3 + $0xf1] sm:$0xff] %vm2231_vm14, %v2217_v6  ;;  %v2510_v50 = vrot.slane %v7214_v17, 1  ;;  %2403 = vst.msk [vmem:[#allocation4 + $0x98] sm:$0xff] %vm2231_vm14, %v7214_v17  ;;  %v2509_v20 = vrot.slane %v7217_v56, 1 }
 0x35d   : > { %2402 = vst.msk [vmem:[#allocation4 + $0x90] sm:$0xff] %vm2231_vm14, %v7217_v56  ;;  %v5021_v0 = vpop.f32.mrb[4].mxu1 }
 0x35e   : > { %v2082_v62 = vadd.f32 %v5021_v0, %v6983_v59  ;;  %v2076_v5 = vpop.f32.mrb[5].mxu1  ;;  %v7228_v63 = vsel %vm551_vm2, %v2510_v50, %v2512_v24  ;;  %v7231_v47 = vsel %vm551_vm2, %v2509_v20, %v2510_v50 }
 0x35f   : > { %8885 = vst [vmem:[#allocation77_spill] sm:$0xff] %v7228_v63  ;;  %8886 = vst [vmem:[#allocation78_spill] sm:$0xff] %v7231_v47  ;;  %v2077_v54 = vadd.f32 %v6983_v59, %v2076_v5  ;;  %2582 = vrot.lane.b32.xlu1 %v7228_v63, %s5216_s9  ;;  %2580 = vrot.lane.b32.xlu0 %v7231_v47, %s5216_s9 }
 0x360   : > { %vm2156_vm4 = vcmp.gt.f32.partialorder %v2082_v62, 0.0  ;;  %v2188_v4 = vmul.f32 0.01, %v2082_v62 }
 0x361   : > { %vm2155_vm5 = vcmp.gt.f32.partialorder %v2077_v54, 0.0  ;;  %v2187_v52 = vmul.f32 0.01, %v2077_v54 }
 0x362   : > { %v2220_v57 = vsel %vm2156_vm4, %v2082_v62, %v2188_v4  ;;  %v7238_v8 = vld [vmem:[#allocation3 + $0x100] sm:$0x3]  ;;  %vm2849_vm4 = vcmask 195712  }
 0x363   : > { %2309 = vst.msk [vmem:[#allocation3 + $0x111] sm:$0xff] %vm2231_vm14, %v2220_v57  ;;  %v2219_v10 = vsel %vm2155_vm5, %v2077_v54, %v2187_v52  ;;  %v7241_v22 = vld [vmem:[#allocation3 + $0xf8] sm:$0xff]  ;;  %v2517_v45 = vrot.slane %v7238_v8, 1  ;;  %v7244_v6 = vld [vmem:[#allocation3 + $0xf0] sm:$0xff] }
 0x364   : > { %8887 = vst [vmem:[#allocation79_spill] sm:$0xff] %v7241_v22  ;;  %8888 = vst [vmem:[#allocation40_spill] sm:$0xff] %v7244_v6  ;;  %v2515_v24 = vrot.slane %v7241_v22, 1  ;;  %v2514_v50 = vrot.slane %v7244_v6, 1 }
 0x365   : > { %2308 = vst.msk [vmem:[#allocation3 + $0x109] sm:$0xff] %vm2231_vm14, %v2219_v10  ;;  %2405 = vst.msk [vmem:[#allocation4 + $0xa8] sm:$0xff] %vm2231_vm14, %v7241_v22  ;;  %v5024_v20 = vpop.f32.mrb[6].mxu1 }
 0x366   : > { %2404 = vst.msk [vmem:[#allocation4 + $0xa0] sm:$0xff] %vm2231_vm14, %v7244_v6  ;;  %v2092_v0 = vadd.f32 %v5024_v20, %v6983_v59  ;;  %v2086_v62 = vpop.f32.mrb[7].mxu1  ;;  %v7255_v5 = vsel %vm551_vm2, %v2515_v24, %v2517_v45  ;;  %v7258_v54 = vsel %vm551_vm2, %v2514_v50, %v2515_v24 }
 0x367   : > { %8889 = vst [vmem:[#allocation37_spill] sm:$0xff] %v7255_v5  ;;  %8890 = vst [vmem:[#allocation42_spill] sm:$0xff] %v7258_v54  ;;  %v2087_v4 = vadd.f32 %v6983_v59, %v2086_v62  ;;  %2586 = vrot.lane.b32.xlu1 %v7255_v5, %s5216_s9  ;;  %2584 = vrot.lane.b32.xlu0 %v7258_v54, %s5216_s9 }
 0x368   : > { %vm2158_vm6 = vcmp.gt.f32.partialorder %v2092_v0, 0.0  ;;  %v2190_v52 = vmul.f32 0.01, %v2092_v0 }
 0x369   : > { %vm2157_vm7 = vcmp.gt.f32.partialorder %v2087_v4, 0.0  ;;  %v2189_v57 = vmul.f32 0.01, %v2087_v4 }
 0x36a   : > { %v2222_v10 = vsel %vm2158_vm6, %v2092_v0, %v2190_v52  ;;  %v7265_v20 = vld [vmem:[#allocation3 + $0x118] sm:$0x3]  ;;  %vm2980_vm6 = vcmask 261312  }
 0x36b   : > { %2311 = vst.msk [vmem:[#allocation3 + $0x129] sm:$0xff] %vm2231_vm14, %v2222_v10  ;;  %v2221_v45 = vsel %vm2157_vm7, %v2087_v4, %v2189_v57  ;;  %v2522_v50 = vrot.slane %v7265_v20, 1  ;;  %vm3115_vm7 = vcmask 326912  }
 0x36c   : > { %v7268_v24 = vld [vmem:[#allocation3 + $0x110] sm:$0xff]  ;;  %v7271_v62 = vld [vmem:[#allocation3 + $0x108] sm:$0xff]  ;;  %2310 = vst.msk [vmem:[#allocation3 + $0x121] sm:$0xff] %vm2231_vm14, %v2221_v45 }
 0x36d   : > { %v2520_v5 = vrot.slane %v7268_v24, 1  ;;  %2407 = vst.msk [vmem:[#allocation4 + $0xb8] sm:$0xff] %vm2231_vm14, %v7268_v24  ;;  %v2519_v0 = vrot.slane %v7271_v62, 1  ;;  %2406 = vst.msk [vmem:[#allocation4 + $0xb0] sm:$0xff] %vm2231_vm14, %v7271_v62  ;;  %v5027_v52 = vpop.f32.mrb[8].mxu1 }
 0x36e   : > { %v2102_v4 = vadd.f32 %v5027_v52, %v6983_v59  ;;  %v2096_v57 = vpop.f32.mrb[9].mxu1 }
 0x36f   : > { %v7282_v10 = vsel %vm551_vm2, %v2520_v5, %v2522_v50  ;;  %v7285_v54 = vsel %vm551_vm2, %v2519_v0, %v2520_v5  ;;  %v2097_v45 = vadd.f32 %v6983_v59, %v2096_v57 }
 0x370   : > { %8891 = vst [vmem:[#allocation39_spill] sm:$0xff] %v7282_v10  ;;  %8892 = vst [vmem:[#allocation44_spill] sm:$0xff] %v7285_v54  ;;  %2590 = vrot.lane.b32.xlu1 %v7282_v10, %s5216_s9  ;;  %2588 = vrot.lane.b32.xlu0 %v7285_v54, %s5216_s9  ;;  %vm2160_vm8 = vcmp.gt.f32.partialorder %v2102_v4, 0.0  ;;  %v2192_v63 = vmul.f32 0.01, %v2102_v4 }
 0x371   : > { %vm2159_vm10 = vcmp.gt.f32.partialorder %v2097_v45, 0.0  ;;  %v2191_v47 = vmul.f32 0.01, %v2097_v45 }
 0x372   : > { %v2224_v52 = vsel %vm2160_vm8, %v2102_v4, %v2192_v63  ;;  %v7292_v19 = vld [vmem:[#allocation3 + $0x130] sm:$0x3]  ;;  %vm3249_vm8 = vcmask 392512  }
 0x373   : > { %2313 = vst.msk [vmem:[#allocation3 + $0x141] sm:$0xff] %vm2231_vm14, %v2224_v52  ;;  %v2223_v50 = vsel %vm2159_vm10, %v2097_v45, %v2191_v47  ;;  %v7295_v5 = vld [vmem:[#allocation3 + $0x128] sm:$0xff]  ;;  %v2527_v0 = vrot.slane %v7292_v19, 1  ;;  %v7298_v57 = vld [vmem:[#allocation3 + $0x120] sm:$0xff]  ;;  %vm3380_vm10 = vcmask 458112  }
 0x374   : > { %8893 = vst [vmem:[#allocation41_spill] sm:$0xff] %v7295_v5  ;;  %8894 = vst [vmem:[#allocation68_spill] sm:$0xff] %v7298_v57  ;;  %v2525_v10 = vrot.slane %v7295_v5, 1  ;;  %v2524_v63 = vrot.slane %v7298_v57, 1 }
 0x375   : > { %2312 = vst.msk [vmem:[#allocation3 + $0x139] sm:$0xff] %vm2231_vm14, %v2223_v50  ;;  %2409 = vst.msk [vmem:[#allocation4 + $0xc8] sm:$0xff] %vm2231_vm14, %v7295_v5  ;;  %v5030_v4 = vpop.f32.mrb[10].mxu1 }
 0x376   : > { %2408 = vst.msk [vmem:[#allocation4 + $0xc0] sm:$0xff] %vm2231_vm14, %v7298_v57  ;;  %v2112_v47 = vadd.f32 %v5030_v4, %v6983_v59  ;;  %v2106_v45 = vpop.f32.mrb[11].mxu1  ;;  %v7309_v52 = vsel %vm551_vm2, %v2525_v10, %v2527_v0  ;;  %v7312_v54 = vsel %vm551_vm2, %v2524_v63, %v2525_v10 }
 0x377   : > { %8895 = vst [vmem:[#allocation46_spill] sm:$0xff] %v7309_v52  ;;  %8896 = vst [vmem:[#allocation43_spill] sm:$0xff] %v7312_v54  ;;  %v2107_v50 = vadd.f32 %v6983_v59, %v2106_v45  ;;  %2594 = vrot.lane.b32.xlu1 %v7309_v52, %s5216_s9  ;;  %2592 = vrot.lane.b32.xlu0 %v7312_v54, %s5216_s9 }
 0x378   : > { %vm2162_vm11 = vcmp.gt.f32.partialorder %v2112_v47, 0.0  ;;  %v2194_v60 = vmul.f32 0.01, %v2112_v47 }
 0x379   : > { %vm2161_vm12 = vcmp.gt.f32.partialorder %v2107_v50, 0.0  ;;  %v2193_v36 = vmul.f32 0.01, %v2107_v50 }
 0x37a   : > { %v2226_v4 = vsel %vm2162_vm11, %v2112_v47, %v2194_v60  ;;  %v7319_v14 = vld [vmem:[#allocation3 + $0x148] sm:$0x3]  ;;  %vm3515_vm11 = vcmask 523712  }
 0x37b   : > { %2315 = vst.msk [vmem:[#allocation3 + $0x159] sm:$0xff] %vm2231_vm14, %v2226_v4  ;;  %v2225_v0 = vsel %vm2161_vm12, %v2107_v50, %v2193_v36  ;;  %v2532_v63 = vrot.slane %v7319_v14, 1  ;;  %vm3649_vm12 = vcmask 589312  }
 0x37c   : > { %v7322_v10 = vld [vmem:[#allocation3 + $0x140] sm:$0xff]  ;;  %v7325_v45 = vld [vmem:[#allocation3 + $0x138] sm:$0xff]  ;;  %2314 = vst.msk [vmem:[#allocation3 + $0x151] sm:$0xff] %vm2231_vm14, %v2225_v0 }
 0x37d   : > { %v2530_v52 = vrot.slane %v7322_v10, 1  ;;  %2411 = vst.msk [vmem:[#allocation4 + $0xd8] sm:$0xff] %vm2231_vm14, %v7322_v10  ;;  %v2529_v60 = vrot.slane %v7325_v45, 1  ;;  %2410 = vst.msk [vmem:[#allocation4 + $0xd0] sm:$0xff] %vm2231_vm14, %v7325_v45 }
 0x37f   : > { %v7335_v36 = vsel %vm551_vm2, %v2530_v52, %v2532_v63  ;;  %v7338_v47 = vsel %vm551_vm2, %v2529_v60, %v2530_v52 }
 0x380   : > { %8897 = vst [vmem:[#allocation70_spill] sm:$0xff] %v7335_v36  ;;  %8898 = vst [vmem:[#allocation48_spill] sm:$0xff] %v7338_v47  ;;  %2598 = vrot.lane.b32.xlu1 %v7335_v36, %s5216_s9  ;;  %2596 = vrot.lane.b32.xlu0 %v7338_v47, %s5216_s9  ;;  %v5033_v50 = vpop.f32.mrb[12].mxu1 }
 0x381   : > { %v2122_v4 = vadd.f32 %v5033_v50, %v6983_v59  ;;  %v2116_v0 = vpop.f32.mrb[13].mxu1 }
 0x382   : > { %v2117_v54 = vadd.f32 %v6983_v59, %v2116_v0  ;;  %v7346_v61 = vld [vmem:[#allocation3 + $0x160] sm:$0x3] }
 0x383   : > { %vm2164_vm13 = vcmp.gt.f32.partialorder %v2122_v4, 0.0  ;;  %v2196_v63 = vmul.f32 0.01, %v2122_v4  ;;  %v7348_v1 = vld [vmem:[#allocation3 + $0x158] sm:$0xff]  ;;  %v2537_v52 = vrot.slane %v7346_v61, 1  ;;  %v7351_v60 = vld [vmem:[#allocation3 + $0x150] sm:$0xff] }
 0x384   : > { %8899 = vst [vmem:[#allocation45_spill] sm:$0xff] %v7348_v1  ;;  %vm2163_vm15 = vcmp.gt.f32.partialorder %v2117_v54, 0.0  ;;  %v2195_v36 = vmul.f32 0.01, %v2117_v54  ;;  %v2535_v47 = vrot.slane %v7348_v1, 1  ;;  %2413 = vst.msk [vmem:[#allocation4 + $0xe8] sm:$0xff] %vm2231_vm14, %v7348_v1 }
 0x385   : > { %v2534_v50 = vrot.slane %v7351_v60, 1  ;;  %2412 = vst.msk [vmem:[#allocation4 + $0xe0] sm:$0xff] %vm2231_vm14, %v7351_v60  ;;  %v2228_v59 = vsel %vm2164_vm13, %v2122_v4, %v2196_v63  ;;  %v2674_v63 = vrot.slane %v6947_v39, 2  ;;  %vm3720_vm13 = vcmask 588800  }
 0x386   : > { %2317 = vst.msk [vmem:[#allocation3 + $0x171] sm:$0xff] %vm2231_vm14, %v2228_v59  ;;  %v2227_v0 = vsel %vm2163_vm15, %v2117_v54, %v2195_v36  ;;  %v7361_v55 = vsel %vm551_vm2, %v2535_v47, %v2537_v52  ;;  %v2673_v59 = vrot.slane %v6945_v41, 2 }
 0x387   : > { %8900 = vst [vmem:[#allocation75_spill] sm:$0xff] %v7361_v55  ;;  %v7364_v29 = vsel %vm551_vm2, %v2534_v50, %v2535_v47  ;;  %2316 = vst.msk [vmem:[#allocation3 + $0x169] sm:$0xff] %vm2231_vm14, %v2227_v0  ;;  %2602 = vrot.lane.b32.xlu1 %v7361_v55, %s5216_s9  ;;  %v2676_v50 = vrot.slane %v6949_v53, 2 }
 0x388   : > { %8901 = vst [vmem:[#allocation72_spill] sm:$0xff] %v7364_v29  ;;  %2600 = vrot.lane.b32.xlu0 %v7364_v29, %s5216_s9  ;;  %v2675_v53 = vsel %vm761_vm3, %v2673_v59, %v2674_v63  ;;  %v2689_v59 = vrot.slane %v7052_v46, 2 }
 0x389   : > { %v2677_v41 = vsel %vm761_vm3, %v2674_v63, %v2676_v50 }
 0x38d   : > { %v7371_v48 = vld [vmem:[#allocation3 + $0x178] sm:$0x3] }
 0x38e   : > { %v7373_v4 = vld [vmem:[#allocation3 + $0x170] sm:$0xff]  ;;  %v2542_v54 = vrot.slane %v7371_v48, 1  ;;  %v7376_v36 = vld [vmem:[#allocation3 + $0x168] sm:$0xff] }
 0x38f   : > { %v2540_v47 = vrot.slane %v7373_v4, 1  ;;  %v2539_v52 = vrot.slane %v7376_v36, 1  ;;  %2414 = vst.msk [vmem:[#allocation4 + $0xf0] sm:$0xff] %vm2231_vm14, %v7376_v36  ;;  %2415 = vst.msk [vmem:[#allocation4 + $0xf8] sm:$0xff] %vm2231_vm14, %v7373_v4 }
 0x391   : > { %v2549_v0 = vpop.permute.xlu0 %2548  ;;  %v2551_v55 = vpop.permute.xlu1 %2550  ;;  %v7388_v29 = vsel %vm551_vm2, %v2540_v47, %v2542_v54  ;;  %v7391_v39 = vsel %vm551_vm2, %v2539_v52, %v2540_v47  ;;  %v2679_v54 = vrot.slane %v6998_v12, 2  ;;  %v2678_v47 = vrot.slane %v7001_v38, 2 }
 0x392   : > { %8902 = vst [vmem:[#allocation50_spill] sm:$0xff] %v7388_v29  ;;  %8903 = vst [vmem:[#allocation47_spill] sm:$0xff] %v7391_v39  ;;  %2606 = vrot.lane.b32.xlu1 %v7388_v29, %s5216_s9  ;;  %2604 = vrot.lane.b32.xlu0 %v7391_v39, %s5216_s9  ;;  %v2686_v52 = vrot.slane %v7022_v16, 2  ;;  %s5226_s9 = smov 64  }
 0x393   : > { %2643 = vst.msk [vmem:[#allocation4 + $0x10] sm:$0xff] %vm2640_vm1, %v2549_v0  ;;  %2644 = vst.msk [vmem:[#allocation4 + $0x18] sm:$0xff] %vm2640_vm1, %v2551_v55  ;;  %v2684_v55 = vrot.slane %v7025_v11, 2  ;;  %v7409_v50 = vsel %vm761_vm3, %v2679_v54, %v2681_v31  ;;  %v7412_v63 = vsel %vm761_vm3, %v2678_v47, %v2679_v54  ;;  %v2696_v54 = vrot.slane %v7076_v3, 2 }
 0x395   : > { %v7422_v16 = vsel %vm761_vm3, %v2684_v55, %v2686_v52  ;;  %v7425_v31 = vsel %vm761_vm3, %v2683_v7, %v2684_v55 }
 0x396   : > { %2755 = vrot.lane.b32.xlu1 %v2677_v41, %s5218_s11  ;;  %2753 = vrot.lane.b32.xlu0 %v2675_v53, %s5218_s11  ;;  %v2691_v41 = vrot.slane %v7049_v43, 2  ;;  %v2688_v53 = vrot.slane %v7055_v30, 2  ;;  %v2693_v43 = vrot.slane %v7082_v23, 2 }
 0x398   : > { %v7437_v55 = vsel %vm761_vm3, %v2689_v59, %v2691_v41  ;;  %v2701_v41 = vrot.slane %v7103_v33, 2  ;;  %v2703_v33 = vrot.slane %v7136_v51, 2 }
 0x399   : > { %v2555_v0 = vpop.permute.xlu1 %2554  ;;  %v2553_v29 = vpop.permute.xlu0 %2552 }
 0x39a   : > { %2646 = vst.msk [vmem:[#allocation4 + $0x28] sm:$0xff] %vm2640_vm1, %v2555_v0  ;;  %2645 = vst.msk [vmem:[#allocation4 + $0x20] sm:$0xff] %vm2640_vm1, %v2553_v29  ;;  %2759 = vrot.lane.b32.xlu1 %v7409_v50, %s5218_s11  ;;  %2757 = vrot.lane.b32.xlu0 %v7412_v63, %s5218_s11  ;;  %v2694_v29 = vrot.slane %v7079_v9, 2  ;;  %v7440_v0 = vsel %vm761_vm3, %v2688_v53, %v2689_v59  ;;  %v2699_v59 = vrot.slane %v7106_v2, 2  ;;  %v2698_v53 = vrot.slane %v7109_v44, 2 }
 0x39c   : > { %v7450_v3 = vsel %vm761_vm3, %v2694_v29, %v2696_v54  ;;  %v7453_v7 = vsel %vm761_vm3, %v2693_v43, %v2694_v29  ;;  %v2706_v54 = vrot.slane %v7130_v40, 2  ;;  %v7465_v29 = vsel %vm761_vm3, %v2699_v59, %v2701_v41 }
 0x39d   : > { %8904 = vst [vmem:[#allocation74_spill] sm:$0xff] %v7465_v29  ;;  %v7468_v43 = vsel %vm761_vm3, %v2698_v53, %v2699_v59  ;;  %v2709_v59 = vrot.slane %v7160_v21, 2  ;;  %v2711_v53 = vrot.slane %v7157_v35, 2  ;;  %v2713_v35 = vrot.slane %v7190_v42, 2 }
 0x39e   : > { %2763 = vrot.lane.b32.xlu1 %v7422_v16, %s5218_s11  ;;  %2761 = vrot.lane.b32.xlu0 %v7425_v31, %s5218_s11  ;;  %8905 = vst [vmem:[#allocation52_spill] sm:$0xff] %v7468_v43 }
 0x3a1   : > { %v2559_v47 = vpop.permute.xlu1 %2558  ;;  %v2557_v52 = vpop.permute.xlu0 %2556 }
 0x3a2   : > { %2648 = vst.msk [vmem:[#allocation4 + $0x38] sm:$0xff] %vm2640_vm1, %v2559_v47  ;;  %2647 = vst.msk [vmem:[#allocation4 + $0x30] sm:$0xff] %vm2640_vm1, %v2557_v52  ;;  %2767 = vrot.lane.b32.xlu1 %v7437_v55, %s5218_s11  ;;  %2765 = vrot.lane.b32.xlu0 %v7440_v0, %s5218_s11  ;;  %v2704_v47 = vrot.slane %v7133_v26, 2 }
 0x3a4   : > { %v7478_v40 = vsel %vm761_vm3, %v2704_v47, %v2706_v54  ;;  %v7481_v41 = vsel %vm761_vm3, %v2703_v33, %v2704_v47  ;;  %v2716_v54 = vrot.slane %v7184_v13, 2  ;;  %v7493_v47 = vsel %vm761_vm3, %v2709_v59, %v2711_v53 }
 0x3a5   : > { %8906 = vst [vmem:[#allocation49_spill] sm:$0xff] %v7493_v47 }
 0x3a6   : > { %2771 = vrot.lane.b32.xlu1 %v7450_v3, %s5218_s11  ;;  %2769 = vrot.lane.b32.xlu0 %v7453_v7, %s5218_s11 }
 0x3a9   : > { %v2563_v52 = vpop.permute.xlu1 %2562  ;;  %v2561_v39 = vpop.permute.xlu0 %2560 }
 0x3aa   : > { %2650 = vst.msk [vmem:[#allocation4 + $0x48] sm:$0xff] %vm2640_vm1, %v2563_v52  ;;  %2649 = vst.msk [vmem:[#allocation4 + $0x40] sm:$0xff] %vm2640_vm1, %v2561_v39  ;;  %2775 = vrot.lane.b32.xlu1 %v7465_v29, %s5218_s11  ;;  %2773 = vrot.lane.b32.xlu0 %v7468_v43, %s5218_s11  ;;  %v2708_v52 = vrot.slane %v7163_v34, 2  ;;  %v2714_v39 = vrot.slane %v7187_v18, 2 }
 0x3ac   : > { %v7496_v33 = vsel %vm761_vm3, %v2708_v52, %v2709_v59  ;;  %v7506_v13 = vsel %vm761_vm3, %v2714_v39, %v2716_v54  ;;  %v7509_v53 = vsel %vm761_vm3, %v2713_v35, %v2714_v39  ;;  %v2719_v59 = vrot.slane %v7214_v17, 2 }
 0x3ad   : > { %8907 = vst [vmem:[#allocation76_spill] sm:$0xff] %v7496_v33  ;;  %v2721_v52 = vrot.slane %v7211_v25, 2  ;;  %v2726_v54 = vrot.slane %v7238_v8, 2  ;;  %v2723_v25 = vrot.slane %v7244_v6, 2 }
 0x3ae   : > { %2779 = vrot.lane.b32.xlu1 %v7478_v40, %s5218_s11  ;;  %2777 = vrot.lane.b32.xlu0 %v7481_v41, %s5218_s11 }
 0x3af   : > { %v7521_v39 = vsel %vm761_vm3, %v2719_v59, %v2721_v52 }
 0x3b1   : > { %v2567_v29 = vpop.permute.xlu1 %2566  ;;  %v2565_v43 = vpop.permute.xlu0 %2564 }
 0x3b2   : > { %2652 = vst.msk [vmem:[#allocation4 + $0x58] sm:$0xff] %vm2640_vm1, %v2567_v29  ;;  %2651 = vst.msk [vmem:[#allocation4 + $0x50] sm:$0xff] %vm2640_vm1, %v2565_v43  ;;  %2783 = vrot.lane.b32.xlu1 %v7493_v47, %s5218_s11  ;;  %2781 = vrot.lane.b32.xlu0 %v7496_v33, %s5218_s11  ;;  %v2718_v29 = vrot.slane %v7217_v56, 2  ;;  %v2724_v43 = vrot.slane %v7241_v22, 2 }
 0x3b4   : > { %v7524_v35 = vsel %vm761_vm3, %v2718_v29, %v2719_v59  ;;  %v7534_v8 = vsel %vm761_vm3, %v2724_v43, %v2726_v54  ;;  %v7537_v52 = vsel %vm761_vm3, %v2723_v25, %v2724_v43  ;;  %v2729_v59 = vrot.slane %v7268_v24, 2 }
 0x3b5   : > { %v2731_v29 = vrot.slane %v7265_v20, 2  ;;  %v2736_v54 = vrot.slane %v7292_v19, 2  ;;  %v2733_v20 = vrot.slane %v7298_v57, 2 }
 0x3b6   : > { %2787 = vrot.lane.b32.xlu1 %v7506_v13, %s5218_s11  ;;  %2785 = vrot.lane.b32.xlu0 %v7509_v53, %s5218_s11 }
 0x3b7   : > { %v7549_v43 = vsel %vm761_vm3, %v2729_v59, %v2731_v29 }
 0x3b9   : > { %v2571_v47 = vpop.permute.xlu1 %2570  ;;  %v2569_v33 = vpop.permute.xlu0 %2568 }
 0x3ba   : > { %2654 = vst.msk [vmem:[#allocation4 + $0x68] sm:$0xff] %vm2640_vm1, %v2571_v47  ;;  %2653 = vst.msk [vmem:[#allocation4 + $0x60] sm:$0xff] %vm2640_vm1, %v2569_v33  ;;  %2791 = vrot.lane.b32.xlu1 %v7521_v39, %s5218_s11  ;;  %2789 = vrot.lane.b32.xlu0 %v7524_v35, %s5218_s11  ;;  %v2728_v47 = vrot.slane %v7271_v62, 2  ;;  %v2734_v33 = vrot.slane %v7295_v5, 2 }
 0x3bc   : > { %v7552_v25 = vsel %vm761_vm3, %v2728_v47, %v2729_v59  ;;  %v7562_v19 = vsel %vm761_vm3, %v2734_v33, %v2736_v54  ;;  %v7565_v29 = vsel %vm761_vm3, %v2733_v20, %v2734_v33  ;;  %v2739_v59 = vrot.slane %v7322_v10, 2 }
 0x3bd   : > { %v2741_v47 = vrot.slane %v7319_v14, 2  ;;  %v2746_v54 = vrot.slane %v7346_v61, 2  ;;  %v2743_v14 = vrot.slane %v7351_v60, 2 }
 0x3be   : > { %2795 = vrot.lane.b32.xlu1 %v7534_v8, %s5218_s11  ;;  %2793 = vrot.lane.b32.xlu0 %v7537_v52, %s5218_s11 }
 0x3bf   : > { %v7577_v33 = vsel %vm761_vm3, %v2739_v59, %v2741_v47 }
 0x3c1   : > { %v2575_v22 = vpop.permute.xlu1 %2574  ;;  %v2573_v6 = vpop.permute.xlu0 %2572 }
 0x3c2   : > { %2656 = vst.msk [vmem:[#allocation4 + $0x78] sm:$0xff] %vm2640_vm1, %v2575_v22  ;;  %2655 = vst.msk [vmem:[#allocation4 + $0x70] sm:$0xff] %vm2640_vm1, %v2573_v6  ;;  %2799 = vrot.lane.b32.xlu1 %v7549_v43, %s5218_s11  ;;  %2797 = vrot.lane.b32.xlu0 %v7552_v25, %s5218_s11  ;;  %v2738_v22 = vrot.slane %v7325_v45, 2  ;;  %v2744_v6 = vrot.slane %v7348_v1, 2 }
 0x3c4   : > { %v7580_v20 = vsel %vm761_vm3, %v2738_v22, %v2739_v59  ;;  %v7590_v61 = vsel %vm761_vm3, %v2744_v6, %v2746_v54  ;;  %v7593_v47 = vsel %vm761_vm3, %v2743_v14, %v2744_v6  ;;  %v2749_v59 = vrot.slane %v7373_v4, 2 }
 0x3c5   : > { %v2751_v22 = vrot.slane %v7371_v48, 2 }
 0x3c6   : > { %2803 = vrot.lane.b32.xlu1 %v7562_v19, %s5218_s11  ;;  %2801 = vrot.lane.b32.xlu0 %v7565_v29, %s5218_s11 }
 0x3c7   : > { %v7603_v54 = vsel %vm761_vm3, %v2749_v59, %v2751_v22 }
 0x3c9   : > { %v2579_v5 = vpop.permute.xlu1 %2578  ;;  %v2577_v57 = vpop.permute.xlu0 %2576 }
 0x3ca   : > { %2658 = vst.msk [vmem:[#allocation4 + $0x88] sm:$0xff] %vm2640_vm1, %v2579_v5  ;;  %2657 = vst.msk [vmem:[#allocation4 + $0x80] sm:$0xff] %vm2640_vm1, %v2577_v57  ;;  %2807 = vrot.lane.b32.xlu1 %v7577_v33, %s5218_s11  ;;  %2805 = vrot.lane.b32.xlu0 %v7580_v20, %s5218_s11  ;;  %v2748_v5 = vrot.slane %v7376_v36, 2 }
 0x3cc   : > { %v7606_v6 = vsel %vm761_vm3, %v2748_v5, %v2749_v59 }
 0x3ce   : > { %2811 = vrot.lane.b32.xlu1 %v7590_v61, %s5218_s11  ;;  %2809 = vrot.lane.b32.xlu0 %v7593_v47, %s5218_s11 }
 0x3d1   : > { %v2583_v57 = vpop.permute.xlu1 %2582  ;;  %v2581_v1 = vpop.permute.xlu0 %2580 }
 0x3d2   : > { %2660 = vst.msk [vmem:[#allocation4 + $0x98] sm:$0xff] %vm2640_vm1, %v2583_v57  ;;  %2659 = vst.msk [vmem:[#allocation4 + $0x90] sm:$0xff] %vm2640_vm1, %v2581_v1  ;;  %2815 = vrot.lane.b32.xlu1 %v7603_v54, %s5218_s11  ;;  %2813 = vrot.lane.b32.xlu0 %v7606_v6, %s5218_s11 }
 0x3d6   : > { %2886 = vrot.lane.b32.xlu1 %v6998_v12, %s5220_s13  ;;  %2884 = vrot.lane.b32.xlu0 %v7001_v38, %s5220_s13 }
 0x3d9   : > { %v2587_v48 = vpop.permute.xlu1 %2586  ;;  %v2585_v14 = vpop.permute.xlu0 %2584 }
 0x3da   : > { %2662 = vst.msk [vmem:[#allocation4 + $0xa8] sm:$0xff] %vm2640_vm1, %v2587_v48  ;;  %2661 = vst.msk [vmem:[#allocation4 + $0xa0] sm:$0xff] %vm2640_vm1, %v2585_v14  ;;  %2890 = vrot.lane.b32.xlu1 %v7025_v11, %s5220_s13  ;;  %2888 = vrot.lane.b32.xlu0 %v7028_v32, %s5220_s13  ;;  %v2374_v14 = vld [vmem:[%s8538_s3] sm:$0xff] }
 0x3de   : > { %2894 = vrot.lane.b32.xlu1 %v7052_v46, %s5220_s13  ;;  %2892 = vrot.lane.b32.xlu0 %v7055_v30, %s5220_s13 }
 0x3e2   : > { %v2591_v12 = vpop.permute.xlu1 %2590  ;;  %v2589_v38 = vpop.permute.xlu0 %2588  ;;  %2898 = vrot.lane.b32.xlu1 %v7079_v9, %s5220_s13  ;;  %2896 = vrot.lane.b32.xlu0 %v7082_v23, %s5220_s13 }
 0x3e3   : > { %2664 = vst.msk [vmem:[#allocation4 + $0xb8] sm:$0xff] %vm2640_vm1, %v2591_v12  ;;  %2663 = vst.msk [vmem:[#allocation4 + $0xb0] sm:$0xff] %vm2640_vm1, %v2589_v38  ;;  %v2375_v12 = vld [vmem:[%s8538_s3 + $0x8] sm:$0xff] }
 0x3e4   : > { %v5161_v38 = vpack.c.bf16 %v2375_v12, %v2374_v14 }
 0x3e6   : > { %2902 = vrot.lane.b32.xlu1 %v7106_v2, %s5220_s13  ;;  %2900 = vrot.lane.b32.xlu0 %v7109_v44, %s5220_s13 }
 0x3e7   : > { %5162 = vmatprep.subr.bf16.mxu1 %v5161_v38 }
 0x3e8   : > { %5164 = vmatpush3.bf16.msra.mxu1 %v5161_v38 }
 0x3e9   : > { %v2595_v1 = vpop.permute.xlu1 %2594  ;;  %v2593_v59 = vpop.permute.xlu0 %2592 }
 0x3ea   : > { %2666 = vst.msk [vmem:[#allocation4 + $0xc8] sm:$0xff] %vm2640_vm1, %v2595_v1  ;;  %2665 = vst.msk [vmem:[#allocation4 + $0xc0] sm:$0xff] %vm2640_vm1, %v2593_v59  ;;  %2906 = vrot.lane.b32.xlu1 %v7133_v26, %s5220_s13  ;;  %2904 = vrot.lane.b32.xlu0 %v7136_v51, %s5220_s13 }
 0x3ee   : > { %2910 = vrot.lane.b32.xlu1 %v7160_v21, %s5220_s13  ;;  %2908 = vrot.lane.b32.xlu0 %v7163_v34, %s5220_s13 }
 0x3f2   : > { %v2599_v22 = vpop.permute.xlu1 %2598  ;;  %v2597_v5 = vpop.permute.xlu0 %2596  ;;  %2914 = vrot.lane.b32.xlu1 %v7187_v18, %s5220_s13  ;;  %2912 = vrot.lane.b32.xlu0 %v7190_v42, %s5220_s13 }
 0x3f3   : > { %2668 = vst.msk [vmem:[#allocation4 + $0xd8] sm:$0xff] %vm2640_vm1, %v2599_v22  ;;  %2667 = vst.msk [vmem:[#allocation4 + $0xd0] sm:$0xff] %vm2640_vm1, %v2597_v5 }
 0x3f6   : > { %2918 = vrot.lane.b32.xlu1 %v7214_v17, %s5220_s13  ;;  %2916 = vrot.lane.b32.xlu0 %v7217_v56, %s5220_s13 }
 0x3f9   : > { %v2603_v57 = vpop.permute.xlu1 %2602 }
 0x3fa   : > { %v2601_v48 = vpop.permute.xlu0 %2600  ;;  %2670 = vst.msk [vmem:[#allocation4 + $0xe8] sm:$0xff] %vm2640_vm1, %v2603_v57  ;;  %3021 = vrot.lane.b32.xlu1 %v7012_v28, %s5222_s28  ;;  %3019 = vrot.lane.b32.xlu0 %v7015_v15, %s5222_s28  ;;  %v2376_v28 = vld [vmem:[%s8538_s3 + $0x10] sm:$0xff]  ;;  %v2377_v15 = vld [vmem:[%s8538_s3 + $0x18] sm:$0xff] }
 0x3fb   : > { %2669 = vst.msk [vmem:[#allocation4 + $0xe0] sm:$0xff] %vm2640_vm1, %v2601_v48  ;;  %v5165_v1 = vpack.c.bf16 %v2377_v15, %v2376_v28 }
 0x3fd   : > { %5166 = vmatprep.subr.bf16.mxu1 %v5165_v1 }
 0x3fe   : > { %3155 = vrot.lane.b32.xlu1 %v7409_v50, %s5223_s12  ;;  %3153 = vrot.lane.b32.xlu0 %v7412_v63, %s5223_s12  ;;  %v2378_v50 = vld [vmem:[%s8538_s3 + $0x20] sm:$0xff]  ;;  %v2379_v63 = vld [vmem:[%s8538_s3 + $0x28] sm:$0xff] }
 0x3ff   : > { %5168 = vmatpush3.bf16.msra.mxu1 %v5165_v1  ;;  %v5169_v59 = vpack.c.bf16 %v2379_v63, %v2378_v50 }
 0x401   : > { %5170 = vmatprep.subr.bf16.mxu1 %v5169_v59 }
 0x402   : > { %3286 = vrot.lane.b32.xlu1 %v7025_v11, %s5224_s18  ;;  %3284 = vrot.lane.b32.xlu0 %v7028_v32, %s5224_s18  ;;  %v2380_v11 = vld [vmem:[%s8538_s3 + $0x30] sm:$0xff]  ;;  %v2381_v32 = vld [vmem:[%s8538_s3 + $0x38] sm:$0xff] }
 0x403   : > { %5172 = vmatpush3.bf16.msra.mxu1 %v5169_v59  ;;  %v5173_v57 = vpack.c.bf16 %v2381_v32, %v2380_v11 }
 0x404   : > { %v2607_v22 = vpop.permute.xlu1 %2606  ;;  %v2605_v5 = vpop.permute.xlu0 %2604 }
 0x405   : > { %2672 = vst.msk [vmem:[#allocation4 + $0xf8] sm:$0xff] %vm2640_vm1, %v2607_v22  ;;  %2671 = vst.msk [vmem:[#allocation4 + $0xf0] sm:$0xff] %vm2640_vm1, %v2605_v5  ;;  %5174 = vmatprep.subr.bf16.mxu1 %v5173_v57 }
 0x406   : > { %3023 = vrot.lane.b32.xlu1 %v7042_v49, %s5222_s28  ;;  %3419 = vrot.lane.b32.xlu0 %v7042_v49, %s5225_s23  ;;  %v2382_v49 = vld [vmem:[%s8538_s3 + $0x40] sm:$0xff] }
 0x407   : > { %5176 = vmatpush3.bf16.msra.mxu1 %v5173_v57 }
 0x408   : > { %v2756_v48 = vpop.permute.xlu1 %2755  ;;  %v2754_v14 = vpop.permute.xlu0 %2753  ;;  %5053 = vmatprep.subr.mxu1 %v2382_v49 }
 0x409   : > { %2851 = vst.msk [vmem:[#allocation4 + $0x8] sm:$0xff] %vm2849_vm4, %v2756_v48  ;;  %2850 = vst.msk [vmem:[#allocation4] sm:$0xff] %vm2849_vm4, %v2754_v14 }
 0x40a   : > { %3553 = vrot.lane.b32.xlu1 %v7425_v31, %s5226_s9  ;;  %3421 = vrot.lane.b32.xlu0 %v7039_v37, %s5225_s23 }
 0x40b   : > { %5054 = vmatpush3.msra.mxu1 %v2382_v49 }
 0x40c   : > { %v2760_v12 = vpop.permute.xlu1 %2759  ;;  %v2758_v38 = vpop.permute.xlu0 %2757 }
 0x40d   : > { %2853 = vst.msk [vmem:[#allocation4 + $0x18] sm:$0xff] %vm2849_vm4, %v2760_v12  ;;  %2852 = vst.msk [vmem:[#allocation4 + $0x10] sm:$0xff] %vm2849_vm4, %v2758_v38 }
 0x40e   : > { %3157 = vrot.lane.b32.xlu1 %v7425_v31, %s5223_s12  ;;  %3025 = vrot.lane.b32.xlu0 %v7039_v37, %s5222_s28 }
 0x410   : > { %v2764_v28 = vpop.permute.xlu1 %2763  ;;  %v2762_v15 = vpop.permute.xlu0 %2761 }
 0x411   : > { %2855 = vst.msk [vmem:[#allocation4 + $0x28] sm:$0xff] %vm2849_vm4, %v2764_v28  ;;  %2854 = vst.msk [vmem:[#allocation4 + $0x20] sm:$0xff] %vm2849_vm4, %v2762_v15 }
 0x412   : > { %3159 = vrot.lane.b32.xlu1 %v7422_v16, %s5223_s12  ;;  %3555 = vrot.lane.b32.xlu0 %v7422_v16, %s5226_s9 }
 0x414   : > { %v2768_v1 = vpop.permute.xlu1 %2767  ;;  %v2766_v50 = vpop.permute.xlu0 %2765 }
 0x415   : > { %2857 = vst.msk [vmem:[#allocation4 + $0x38] sm:$0xff] %vm2849_vm4, %v2768_v1  ;;  %2856 = vst.msk [vmem:[#allocation4 + $0x30] sm:$0xff] %vm2849_vm4, %v2766_v50 }
 0x416   : > { %3290 = vrot.lane.b32.xlu1 %v7052_v46, %s5224_s18  ;;  %3288 = vrot.lane.b32.xlu0 %v7055_v30, %s5224_s18  ;;  %v5036_v46 = vpop.f32.mrb[14].mxu1  ;;  %v5204_v30 = vld [vmem:[%s8537_s2] ss:$0 sm:$0xff] }
 0x417   : > { %v2132_v59 = vadd.f32 %v5204_v30, %v5036_v46  ;;  %v2126_v22 = vpop.f32.mrb[15].mxu1 }
 0x418   : > { %v2772_v37 = vpop.permute.xlu1 %2771  ;;  %v2770_v31 = vpop.permute.xlu0 %2769 }
 0x419   : > { %2859 = vst.msk [vmem:[#allocation4 + $0x48] sm:$0xff] %vm2849_vm4, %v2772_v37  ;;  %2858 = vst.msk [vmem:[#allocation4 + $0x40] sm:$0xff] %vm2849_vm4, %v2770_v31  ;;  %vm2166_vm1 = vcmp.gt.f32.partialorder %v2132_v59, 0.0  ;;  %v2198_v32 = vmul.f32 0.01, %v2132_v59 }
 0x41a   : > { %3027 = vrot.lane.b32.xlu1 %v7069_v58, %s5222_s28  ;;  %3423 = vrot.lane.b32.xlu0 %v7069_v58, %s5225_s23  ;;  %v2127_v58 = vadd.f32 %v5204_v30, %v2126_v22 }
 0x41b   : > { %v2230_v48 = vsel %vm2166_vm1, %v2132_v59, %v2198_v32  ;;  %v8913_v32 = vld [vmem:[#allocation74_spill] sm:$0xff] }
 0x41c   : > { %v2776_v16 = vpop.permute.xlu1 %2775  ;;  %v2774_v63 = vpop.permute.xlu0 %2773  ;;  %vm2165_vm5 = vcmp.gt.f32.partialorder %v2127_v58, 0.0  ;;  %v2197_v57 = vmul.f32 0.01, %v2127_v58  ;;  %2319 = vst.msk [vmem:[#allocation3 + $0x189] sm:$0xff] %vm2231_vm14, %v2230_v48 }
 0x41d   : > { %2861 = vst.msk [vmem:[#allocation4 + $0x58] sm:$0xff] %vm2849_vm4, %v2776_v16  ;;  %2860 = vst.msk [vmem:[#allocation4 + $0x50] sm:$0xff] %vm2849_vm4, %v2774_v63 }
 0x41e   : > { %3557 = vrot.lane.b32.xlu1 %v7440_v0, %s5226_s9  ;;  %3425 = vrot.lane.b32.xlu0 %v7066_v27, %s5225_s23  ;;  %v2229_v14 = vsel %vm2165_vm5, %v2127_v58, %v2197_v57 }
 0x41f   : > { %2318 = vst.msk [vmem:[#allocation3 + $0x181] sm:$0xff] %vm2231_vm14, %v2229_v14 }
 0x420   : > { %v2780_v5 = vpop.permute.xlu1 %2779  ;;  %v2778_v11 = vpop.permute.xlu0 %2777 }
 0x421   : > { %2863 = vst.msk [vmem:[#allocation4 + $0x68] sm:$0xff] %vm2849_vm4, %v2780_v5  ;;  %2862 = vst.msk [vmem:[#allocation4 + $0x60] sm:$0xff] %vm2849_vm4, %v2778_v11 }
 0x422   : > { %3161 = vrot.lane.b32.xlu1 %v7440_v0, %s5223_s12  ;;  %3029 = vrot.lane.b32.xlu0 %v7066_v27, %s5222_s28 }
 0x424   : > { %v2784_v49 = vpop.permute.xlu1 %2783  ;;  %v2782_v12 = vpop.permute.xlu0 %2781 }
 0x425   : > { %2865 = vst.msk [vmem:[#allocation4 + $0x78] sm:$0xff] %vm2849_vm4, %v2784_v49  ;;  %2864 = vst.msk [vmem:[#allocation4 + $0x70] sm:$0xff] %vm2849_vm4, %v2782_v12  ;;  %v8914_v12 = vld [vmem:[#allocation66_spill] sm:$0xff] }
 0x426   : > { %3163 = vrot.lane.b32.xlu1 %v7437_v55, %s5223_s12  ;;  %3559 = vrot.lane.b32.xlu0 %v7437_v55, %s5226_s9  ;;  %v8908_v55 = vld [vmem:[#allocation62_spill] sm:$0xff] }
 0x428   : > { %v2788_v0 = vpop.permute.xlu1 %2787  ;;  %v2786_v27 = vpop.permute.xlu0 %2785 }
 0x429   : > { %2867 = vst.msk [vmem:[#allocation4 + $0x88] sm:$0xff] %vm2849_vm4, %v2788_v0  ;;  %2866 = vst.msk [vmem:[#allocation4 + $0x80] sm:$0xff] %vm2849_vm4, %v2786_v27 }
 0x42a   : > { %3294 = vrot.lane.b32.xlu1 %v7079_v9, %s5224_s18  ;;  %3292 = vrot.lane.b32.xlu0 %v7082_v23, %s5224_s18  ;;  %v8909_v9 = vld [vmem:[#allocation38_spill] sm:$0xff] }
 0x42c   : > { %v2792_v38 = vpop.permute.xlu1 %2791  ;;  %v2790_v28 = vpop.permute.xlu0 %2789 }
 0x42d   : > { %2869 = vst.msk [vmem:[#allocation4 + $0x98] sm:$0xff] %vm2849_vm4, %v2792_v38  ;;  %2868 = vst.msk [vmem:[#allocation4 + $0x90] sm:$0xff] %vm2849_vm4, %v2790_v28 }
 0x42e   : > { %3031 = vrot.lane.b32.xlu1 %v8908_v55, %s5222_s28  ;;  %3427 = vrot.lane.b32.xlu0 %v8908_v55, %s5225_s23 }
 0x430   : > { %v2796_v15 = vpop.permute.xlu1 %2795  ;;  %v2794_v1 = vpop.permute.xlu0 %2793 }
 0x431   : > { %2871 = vst.msk [vmem:[#allocation4 + $0xa8] sm:$0xff] %vm2849_vm4, %v2796_v15  ;;  %2870 = vst.msk [vmem:[#allocation4 + $0xa0] sm:$0xff] %vm2849_vm4, %v2794_v1 }
 0x432   : > { %3561 = vrot.lane.b32.xlu1 %v7453_v7, %s5226_s9  ;;  %3429 = vrot.lane.b32.xlu0 %v8909_v9, %s5225_s23 }
 0x434   : > { %v2800_v23 = vpop.permute.xlu1 %2799  ;;  %v2798_v50 = vpop.permute.xlu0 %2797 }
 0x435   : > { %2873 = vst.msk [vmem:[#allocation4 + $0xb8] sm:$0xff] %vm2849_vm4, %v2800_v23  ;;  %2872 = vst.msk [vmem:[#allocation4 + $0xb0] sm:$0xff] %vm2849_vm4, %v2798_v50 }
 0x436   : > { %3165 = vrot.lane.b32.xlu1 %v7453_v7, %s5223_s12  ;;  %3033 = vrot.lane.b32.xlu0 %v8909_v9, %s5222_s28 }
 0x438   : > { %v2804_v37 = vpop.permute.xlu1 %2803  ;;  %v2802_v31 = vpop.permute.xlu0 %2801 }
 0x439   : > { %2875 = vst.msk [vmem:[#allocation4 + $0xc8] sm:$0xff] %vm2849_vm4, %v2804_v37  ;;  %2874 = vst.msk [vmem:[#allocation4 + $0xc0] sm:$0xff] %vm2849_vm4, %v2802_v31 }
 0x43a   : > { %3167 = vrot.lane.b32.xlu1 %v7450_v3, %s5223_s12  ;;  %3563 = vrot.lane.b32.xlu0 %v7450_v3, %s5226_s9  ;;  %v8910_v3 = vld [vmem:[#allocation64_spill] sm:$0xff] }
 0x43c   : > { %v2808_v16 = vpop.permute.xlu1 %2807  ;;  %v2806_v63 = vpop.permute.xlu0 %2805 }
 0x43d   : > { %2877 = vst.msk [vmem:[#allocation4 + $0xd8] sm:$0xff] %vm2849_vm4, %v2808_v16  ;;  %2876 = vst.msk [vmem:[#allocation4 + $0xd0] sm:$0xff] %vm2849_vm4, %v2806_v63 }
 0x43e   : > { %3298 = vrot.lane.b32.xlu1 %v7106_v2, %s5224_s18  ;;  %3296 = vrot.lane.b32.xlu0 %v7109_v44, %s5224_s18  ;;  %v8911_v2 = vld [vmem:[#allocation52_spill] sm:$0xff]  ;;  %v8912_v44 = vld [vmem:[#allocation63_spill] sm:$0xff] }
 0x440   : > { %v2812_v7 = vpop.permute.xlu1 %2811  ;;  %v2810_v46 = vpop.permute.xlu0 %2809 }
 0x441   : > { %2879 = vst.msk [vmem:[#allocation4 + $0xe8] sm:$0xff] %vm2849_vm4, %v2812_v7  ;;  %2878 = vst.msk [vmem:[#allocation4 + $0xe0] sm:$0xff] %vm2849_vm4, %v2810_v46  ;;  %v8919_v7 = vld [vmem:[#allocation49_spill] sm:$0xff] }
 0x442   : > { %3035 = vrot.lane.b32.xlu1 %v8910_v3, %s5222_s28  ;;  %3431 = vrot.lane.b32.xlu0 %v8910_v3, %s5225_s23 }
 0x444   : > { %v2816_v30 = vpop.permute.xlu1 %2815  ;;  %v2814_v59 = vpop.permute.xlu0 %2813 }
 0x445   : > { %2881 = vst.msk [vmem:[#allocation4 + $0xf8] sm:$0xff] %vm2849_vm4, %v2816_v30  ;;  %2880 = vst.msk [vmem:[#allocation4 + $0xf0] sm:$0xff] %vm2849_vm4, %v2814_v59 }
 0x446   : > { %3565 = vrot.lane.b32.xlu1 %v8911_v2, %s5226_s9  ;;  %3433 = vrot.lane.b32.xlu0 %v8912_v44, %s5225_s23 }
 0x448   : > { %v2887_v22 = vpop.permute.xlu1 %2886  ;;  %v2885_v58 = vpop.permute.xlu0 %2884 }
 0x449   : > { %2982 = vst.msk [vmem:[#allocation4 + $0x8] sm:$0xff] %vm2980_vm6, %v2887_v22  ;;  %2981 = vst.msk [vmem:[#allocation4] sm:$0xff] %vm2980_vm6, %v2885_v58 }
 0x44a   : > { %3169 = vrot.lane.b32.xlu1 %v8911_v2, %s5223_s12  ;;  %3037 = vrot.lane.b32.xlu0 %v8912_v44, %s5222_s28  ;;  %v8920_v2 = vld [vmem:[#allocation73_spill] sm:$0xff] }
 0x44c   : > { %v2891_v5 = vpop.permute.xlu1 %2890  ;;  %v2889_v11 = vpop.permute.xlu0 %2888 }
 0x44d   : > { %2984 = vst.msk [vmem:[#allocation4 + $0x18] sm:$0xff] %vm2980_vm6, %v2891_v5  ;;  %2983 = vst.msk [vmem:[#allocation4 + $0x10] sm:$0xff] %vm2980_vm6, %v2889_v11 }
 0x44e   : > { %3171 = vrot.lane.b32.xlu1 %v8913_v32, %s5223_s12  ;;  %3567 = vrot.lane.b32.xlu0 %v8913_v32, %s5226_s9 }
 0x450   : > { %v2895_v57 = vpop.permute.xlu1 %2894  ;;  %v2893_v48 = vpop.permute.xlu0 %2892 }
 0x451   : > { %2986 = vst.msk [vmem:[#allocation4 + $0x28] sm:$0xff] %vm2980_vm6, %v2895_v57  ;;  %2985 = vst.msk [vmem:[#allocation4 + $0x20] sm:$0xff] %vm2980_vm6, %v2893_v48 }
 0x452   : > { %3302 = vrot.lane.b32.xlu1 %v7133_v26, %s5224_s18  ;;  %3300 = vrot.lane.b32.xlu0 %v7136_v51, %s5224_s18  ;;  %v8915_v26 = vld [vmem:[#allocation65_spill] sm:$0xff] }
 0x454   : > { %v2899_v14 = vpop.permute.xlu1 %2898  ;;  %v2897_v49 = vpop.permute.xlu0 %2896 }
 0x455   : > { %2988 = vst.msk [vmem:[#allocation4 + $0x38] sm:$0xff] %vm2980_vm6, %v2899_v14  ;;  %2987 = vst.msk [vmem:[#allocation4 + $0x30] sm:$0xff] %vm2980_vm6, %v2897_v49 }
 0x456   : > { %3039 = vrot.lane.b32.xlu1 %v8914_v12, %s5222_s28  ;;  %3435 = vrot.lane.b32.xlu0 %v8914_v12, %s5225_s23 }
 0x458   : > { %v2903_v0 = vpop.permute.xlu1 %2902  ;;  %v2901_v27 = vpop.permute.xlu0 %2900 }
 0x459   : > { %2990 = vst.msk [vmem:[#allocation4 + $0x48] sm:$0xff] %vm2980_vm6, %v2903_v0  ;;  %2989 = vst.msk [vmem:[#allocation4 + $0x40] sm:$0xff] %vm2980_vm6, %v2901_v27 }
 0x45a   : > { %3569 = vrot.lane.b32.xlu1 %v7481_v41, %s5226_s9  ;;  %3437 = vrot.lane.b32.xlu0 %v8915_v26, %s5225_s23 }
 0x45c   : > { %v2907_v51 = vpop.permute.xlu1 %2906  ;;  %v2905_v38 = vpop.permute.xlu0 %2904 }
 0x45d   : > { %2992 = vst.msk [vmem:[#allocation4 + $0x58] sm:$0xff] %vm2980_vm6, %v2907_v51  ;;  %2991 = vst.msk [vmem:[#allocation4 + $0x50] sm:$0xff] %vm2980_vm6, %v2905_v38 }
 0x45e   : > { %3173 = vrot.lane.b32.xlu1 %v7481_v41, %s5223_s12  ;;  %3041 = vrot.lane.b32.xlu0 %v8915_v26, %s5222_s28 }
 0x460   : > { %v2911_v28 = vpop.permute.xlu1 %2910  ;;  %v2909_v55 = vpop.permute.xlu0 %2908 }
 0x461   : > { %2994 = vst.msk [vmem:[#allocation4 + $0x68] sm:$0xff] %vm2980_vm6, %v2911_v28  ;;  %2993 = vst.msk [vmem:[#allocation4 + $0x60] sm:$0xff] %vm2980_vm6, %v2909_v55 }
 0x462   : > { %3175 = vrot.lane.b32.xlu1 %v7478_v40, %s5223_s12  ;;  %3571 = vrot.lane.b32.xlu0 %v7478_v40, %s5226_s9  ;;  %v8916_v40 = vld [vmem:[#allocation69_spill] sm:$0xff] }
 0x464   : > { %v2915_v15 = vpop.permute.xlu1 %2914  ;;  %v2913_v1 = vpop.permute.xlu0 %2912 }
 0x465   : > { %2996 = vst.msk [vmem:[#allocation4 + $0x78] sm:$0xff] %vm2980_vm6, %v2915_v15  ;;  %2995 = vst.msk [vmem:[#allocation4 + $0x70] sm:$0xff] %vm2980_vm6, %v2913_v1 }
 0x466   : > { %3306 = vrot.lane.b32.xlu1 %v7160_v21, %s5224_s18  ;;  %3304 = vrot.lane.b32.xlu0 %v7163_v34, %s5224_s18  ;;  %v8917_v21 = vld [vmem:[#allocation76_spill] sm:$0xff]  ;;  %v8918_v34 = vld [vmem:[#allocation67_spill] sm:$0xff] }
 0x468   : > { %v2919_v41 = vpop.permute.xlu1 %2918  ;;  %v2917_v9 = vpop.permute.xlu0 %2916 }
 0x469   : > { %2998 = vst.msk [vmem:[#allocation4 + $0x88] sm:$0xff] %vm2980_vm6, %v2919_v41  ;;  %2997 = vst.msk [vmem:[#allocation4 + $0x80] sm:$0xff] %vm2980_vm6, %v2917_v9  ;;  %v8926_v9 = vld [vmem:[#allocation79_spill] sm:$0xff] }
 0x46a   : > { %3043 = vrot.lane.b32.xlu1 %v8916_v40, %s5222_s28  ;;  %3439 = vrot.lane.b32.xlu0 %v8916_v40, %s5225_s23 }
 0x46c   : > { %v3022_v23 = vpop.permute.xlu1 %3021  ;;  %v3020_v50 = vpop.permute.xlu0 %3019 }
 0x46d   : > { %3117 = vst.msk [vmem:[#allocation4 + $0x8] sm:$0xff] %vm3115_vm7, %v3022_v23  ;;  %3116 = vst.msk [vmem:[#allocation4] sm:$0xff] %vm3115_vm7, %v3020_v50 }
 0x46e   : > { %3573 = vrot.lane.b32.xlu1 %v8917_v21, %s5226_s9  ;;  %3441 = vrot.lane.b32.xlu0 %v8918_v34, %s5225_s23 }
 0x470   : > { %v3156_v37 = vpop.permute.xlu1 %3155  ;;  %v3154_v31 = vpop.permute.xlu0 %3153 }
 0x471   : > { %3251 = vst.msk [vmem:[#allocation4 + $0x8] sm:$0xff] %vm3249_vm8, %v3156_v37  ;;  %3250 = vst.msk [vmem:[#allocation4] sm:$0xff] %vm3249_vm8, %v3154_v31  ;;  %v8927_v37 = vld [vmem:[#allocation37_spill] sm:$0xff] }
 0x472   : > { %3177 = vrot.lane.b32.xlu1 %v8917_v21, %s5223_s12  ;;  %3045 = vrot.lane.b32.xlu0 %v8918_v34, %s5222_s28 }
 0x474   : > { %v3287_v16 = vpop.permute.xlu1 %3286  ;;  %v3285_v63 = vpop.permute.xlu0 %3284 }
 0x475   : > { %3382 = vst.msk [vmem:[#allocation4 + $0x8] sm:$0xff] %vm3380_vm10, %v3287_v16  ;;  %3381 = vst.msk [vmem:[#allocation4] sm:$0xff] %vm3380_vm10, %v3285_v63 }
 0x476   : > { %3179 = vrot.lane.b32.xlu1 %v8919_v7, %s5223_s12  ;;  %3575 = vrot.lane.b32.xlu0 %v8919_v7, %s5226_s9 }
 0x478   : > { %v3024_v46 = vpop.permute.xlu1 %3023  ;;  %v3420_v3 = vpop.permute.xlu0 %3419 }
 0x479   : > { %3118 = vst.msk [vmem:[#allocation4 + $0x10] sm:$0xff] %vm3115_vm7, %v3024_v46 }
 0x47a   : > { %3516 = vst.msk [vmem:[#allocation4] sm:$0xff] %vm3515_vm11, %v3420_v3  ;;  %3310 = vrot.lane.b32.xlu1 %v7187_v18, %s5224_s18  ;;  %3308 = vrot.lane.b32.xlu0 %v7190_v42, %s5224_s18  ;;  %v8921_v18 = vld [vmem:[#allocation71_spill] sm:$0xff] }
 0x47c   : > { %v3554_v30 = vpop.permute.xlu1 %3553  ;;  %v3422_v59 = vpop.permute.xlu0 %3421 }
 0x47d   : > { %3650 = vst.msk [vmem:[#allocation4] sm:$0xff] %vm3649_vm12, %v3554_v30 }
 0x47e   : > { %3517 = vst.msk [vmem:[#allocation4 + $0x8] sm:$0xff] %vm3515_vm11, %v3422_v59  ;;  %3047 = vrot.lane.b32.xlu1 %v8920_v2, %s5222_s28  ;;  %3443 = vrot.lane.b32.xlu0 %v8920_v2, %s5225_s23 }
 0x480   : > { %v3158_v44 = vpop.permute.xlu1 %3157  ;;  %v3026_v22 = vpop.permute.xlu0 %3025 }
 0x481   : > { %3252 = vst.msk [vmem:[#allocation4 + $0x10] sm:$0xff] %vm3249_vm8, %v3158_v44 }
 0x482   : > { %3119 = vst.msk [vmem:[#allocation4 + $0x18] sm:$0xff] %vm3115_vm7, %v3026_v22  ;;  %3577 = vrot.lane.b32.xlu1 %v7509_v53, %s5226_s9  ;;  %3445 = vrot.lane.b32.xlu0 %v8921_v18, %s5225_s23 }
 0x484   : > { %v3160_v42 = vpop.permute.xlu1 %3159  ;;  %v3556_v58 = vpop.permute.xlu0 %3555  ;;  %v3682_v5 = vld [vmem:[#allocation4] sm:$0xff] }
 0x485   : > { %3253 = vst.msk [vmem:[#allocation4 + $0x18] sm:$0xff] %vm3249_vm8, %v3160_v42  ;;  %5055 = vmatprep.mubr.msk.f32.mxu1 %vm3720_vm13, %v3682_v5  ;;  %v8929_v42 = vld [vmem:[#allocation39_spill] sm:$0xff] }
 0x486   : > { %3651 = vst.msk [vmem:[#allocation4 + $0x8] sm:$0xff] %vm3649_vm12, %v3556_v58  ;;  %3181 = vrot.lane.b32.xlu1 %v7509_v53, %s5223_s12  ;;  %3049 = vrot.lane.b32.xlu0 %v8921_v18, %s5222_s28 }
 0x488   : > { %v3291_v11 = vpop.permute.xlu1 %3290  ;;  %v3289_v32 = vpop.permute.xlu0 %3288 }
 0x489   : > { %3384 = vst.msk [vmem:[#allocation4 + $0x18] sm:$0xff] %vm3380_vm10, %v3291_v11  ;;  %3383 = vst.msk [vmem:[#allocation4 + $0x10] sm:$0xff] %vm3380_vm10, %v3289_v32 }
 0x48a   : > { %3183 = vrot.lane.b32.xlu1 %v7506_v13, %s5223_s12  ;;  %3579 = vrot.lane.b32.xlu0 %v7506_v13, %s5226_s9  ;;  %v8922_v13 = vld [vmem:[#allocation78_spill] sm:$0xff] }
 0x48c   : > { %v3028_v57 = vpop.permute.xlu1 %3027  ;;  %v3424_v48 = vpop.permute.xlu0 %3423 }
 0x48d   : > { %v3683_v14 = vld [vmem:[#allocation4 + $0x8] sm:$0xff]  ;;  %3120 = vst.msk [vmem:[#allocation4 + $0x20] sm:$0xff] %vm3115_vm7, %v3028_v57 }
 0x48e   : > { %3518 = vst.msk [vmem:[#allocation4 + $0x10] sm:$0xff] %vm3515_vm11, %v3424_v48  ;;  %5056 = vmatmul.mubr.msk.f32.vlgmr.msra.gmra.mrb[16].mxu1 %vm3720_vm13, %v3683_v14  ;;  %3314 = vrot.lane.b32.xlu1 %v7214_v17, %s5224_s18  ;;  %v8923_v17 = vld [vmem:[#allocation77_spill] sm:$0xff] }
 0x48f   : > { %3312 = vrot.lane.b32.xlu0 %v7217_v56, %s5224_s18 }
 0x490   : > { %v3558_v53 = vpop.permute.xlu1 %3557  ;;  %v3426_v49 = vpop.permute.xlu0 %3425 }
 0x491   : > { %3652 = vst.msk [vmem:[#allocation4 + $0x10] sm:$0xff] %vm3649_vm12, %v3558_v53 }
 0x492   : > { %3519 = vst.msk [vmem:[#allocation4 + $0x18] sm:$0xff] %vm3515_vm11, %v3426_v49  ;;  %3051 = vrot.lane.b32.xlu1 %v8922_v13, %s5222_s28 }
 0x493   : > { %3447 = vrot.lane.b32.xlu0 %v8922_v13, %s5225_s23  ;;  %v8932_v13 = vld [vmem:[#allocation41_spill] sm:$0xff] }
 0x494   : > { %v3162_v12 = vpop.permute.xlu1 %3161  ;;  %v3030_v0 = vpop.permute.xlu0 %3029 }
 0x495   : > { %3254 = vst.msk [vmem:[#allocation4 + $0x20] sm:$0xff] %vm3249_vm8, %v3162_v12 }
 0x496   : > { %3121 = vst.msk [vmem:[#allocation4 + $0x28] sm:$0xff] %vm3115_vm7, %v3030_v0  ;;  %3581 = vrot.lane.b32.xlu1 %v7524_v35, %s5226_s9 }
 0x497   : > { %3449 = vrot.lane.b32.xlu0 %v8923_v17, %s5225_s23 }
 0x498   : > { %v3164_v56 = vpop.permute.xlu1 %3163  ;;  %v3560_v27 = vpop.permute.xlu0 %3559  ;;  %v3684_v26 = vld [vmem:[#allocation4 + $0x10] sm:$0xff] }
 0x499   : > { %3255 = vst.msk [vmem:[#allocation4 + $0x28] sm:$0xff] %vm3249_vm8, %v3164_v56  ;;  %5058 = vmatprep.mubr.msk.f32.mxu1 %vm3720_vm13, %v3684_v26  ;;  %v8933_v26 = vld [vmem:[#allocation46_spill] sm:$0xff] }
 0x49a   : > { %3653 = vst.msk [vmem:[#allocation4 + $0x18] sm:$0xff] %vm3649_vm12, %v3560_v27  ;;  %3185 = vrot.lane.b32.xlu1 %v7524_v35, %s5223_s12  ;;  %v8924_v35 = vld [vmem:[#allocation40_spill] sm:$0xff] }
 0x49b   : > { %3053 = vrot.lane.b32.xlu0 %v8923_v17, %s5222_s28 }
 0x49c   : > { %v3295_v51 = vpop.permute.xlu1 %3294  ;;  %v3293_v38 = vpop.permute.xlu0 %3292 }
 0x49d   : > { %3386 = vst.msk [vmem:[#allocation4 + $0x28] sm:$0xff] %vm3380_vm10, %v3295_v51  ;;  %3385 = vst.msk [vmem:[#allocation4 + $0x20] sm:$0xff] %vm3380_vm10, %v3293_v38 }
 0x49e   : > { %3187 = vrot.lane.b32.xlu1 %v7521_v39, %s5223_s12 }
 0x49f   : > { %3583 = vrot.lane.b32.xlu0 %v7521_v39, %s5226_s9  ;;  %v8925_v39 = vld [vmem:[#allocation42_spill] sm:$0xff] }
 0x4a0   : > { %v3032_v28 = vpop.permute.xlu1 %3031  ;;  %v3428_v55 = vpop.permute.xlu0 %3427 }
 0x4a1   : > { %v3685_v15 = vld [vmem:[#allocation4 + $0x18] sm:$0xff]  ;;  %3122 = vst.msk [vmem:[#allocation4 + $0x30] sm:$0xff] %vm3115_vm7, %v3032_v28 }
 0x4a2   : > { %3520 = vst.msk [vmem:[#allocation4 + $0x20] sm:$0xff] %vm3515_vm11, %v3428_v55  ;;  %5059 = vmatmul.mubr.msk.f32.gmra.mrb[18].mxu1 %vm3720_vm13, %v3685_v15  ;;  %2920 = vrot.lane.b32.xlu1 %v8924_v35, %s5220_s13  ;;  %v4170_v15 = vld [vmem:[%s8540_s5] sm:$0xf] }
 0x4a3   : > { %3316 = vrot.lane.b32.xlu0 %v8924_v35, %s5224_s18  ;;  %5103 = vmatprep.subr.msk.mxu0 %vm1906_vm9, %v4170_v15 }
 0x4a4   : > { %v3562_v1 = vpop.permute.xlu1 %3561  ;;  %v3430_v41 = vpop.permute.xlu0 %3429  ;;  %5104 = vmatpush3.msk.msra.mxu0 %vm1906_vm9, %v4170_v15 }
 0x4a5   : > { %3654 = vst.msk [vmem:[#allocation4 + $0x20] sm:$0xff] %vm3649_vm12, %v3562_v1 }
 0x4a6   : > { %3521 = vst.msk [vmem:[#allocation4 + $0x28] sm:$0xff] %vm3515_vm11, %v3430_v41  ;;  %3451 = vrot.lane.b32.xlu1 %v8925_v39, %s5225_s23 }
 0x4a7   : > { %3318 = vrot.lane.b32.xlu0 %v8926_v9, %s5224_s18 }
 0x4a8   : > { %v3166_v40 = vpop.permute.xlu1 %3165  ;;  %v3034_v23 = vpop.permute.xlu0 %3033 }
 0x4a9   : > { %3256 = vst.msk [vmem:[#allocation4 + $0x30] sm:$0xff] %vm3249_vm8, %v3166_v40  ;;  %v8936_v40 = vld [vmem:[#allocation48_spill] sm:$0xff] }
 0x4aa   : > { %3123 = vst.msk [vmem:[#allocation4 + $0x38] sm:$0xff] %vm3115_vm7, %v3034_v23  ;;  %3055 = vrot.lane.b32.xlu1 %v8925_v39, %s5222_s28  ;;  %v8937_v23 = vld [vmem:[#allocation8_spill] sm:$0xff] }
 0x4ab   : > { %2922 = vrot.lane.b32.xlu0 %v8926_v9, %s5220_s13  ;;  %v8935_v9 = vld [vmem:[#allocation7_spill] sm:$0xff] }
 0x4ac   : > { %v3168_v50 = vpop.permute.xlu1 %3167  ;;  %v3564_v21 = vpop.permute.xlu0 %3563  ;;  %v3686_v34 = vld [vmem:[#allocation4 + $0x20] sm:$0xff] }
 0x4ad   : > { %3257 = vst.msk [vmem:[#allocation4 + $0x38] sm:$0xff] %vm3249_vm8, %v3168_v50  ;;  %5061 = vmatprep.mubr.msk.f32.mxu1 %vm3720_vm13, %v3686_v34  ;;  %v8938_v34 = vld [vmem:[#allocation9_spill] sm:$0xff] }
 0x4ae   : > { %3655 = vst.msk [vmem:[#allocation4 + $0x28] sm:$0xff] %vm3649_vm12, %v3564_v21  ;;  %3585 = vrot.lane.b32.xlu1 %v7537_v52, %s5226_s9 }
 0x4af   : > { %3453 = vrot.lane.b32.xlu0 %v8927_v37, %s5225_s23 }
 0x4b0   : > { %v3299_v31 = vpop.permute.xlu1 %3298  ;;  %v3297_v16 = vpop.permute.xlu0 %3296 }
 0x4b1   : > { %3388 = vst.msk [vmem:[#allocation4 + $0x38] sm:$0xff] %vm3380_vm10, %v3299_v31  ;;  %3387 = vst.msk [vmem:[#allocation4 + $0x30] sm:$0xff] %vm3380_vm10, %v3297_v16 }
 0x4b2   : > { %3189 = vrot.lane.b32.xlu1 %v7537_v52, %s5223_s12 }
 0x4b3   : > { %3057 = vrot.lane.b32.xlu0 %v8927_v37, %s5222_s28  ;;  %v8939_v37 = vld [vmem:[#allocation10_spill] sm:$0xff] }
 0x4b4   : > { %v3036_v63 = vpop.permute.xlu1 %3035  ;;  %v3432_v7 = vpop.permute.xlu0 %3431 }
 0x4b5   : > { %v3687_v46 = vld [vmem:[#allocation4 + $0x28] sm:$0xff]  ;;  %3124 = vst.msk [vmem:[#allocation4 + $0x40] sm:$0xff] %vm3115_vm7, %v3036_v63  ;;  %v8940_v63 = vld [vmem:[#allocation11_spill] sm:$0xff] }
 0x4b6   : > { %3522 = vst.msk [vmem:[#allocation4 + $0x30] sm:$0xff] %vm3515_vm11, %v3432_v7  ;;  %5062 = vmatmul.mubr.msk.f32.gmra.mrb[20].mxu1 %vm3720_vm13, %v3687_v46  ;;  %3191 = vrot.lane.b32.xlu1 %v7534_v8, %s5223_s12  ;;  %v8941_v7 = vld [vmem:[#allocation70_spill] sm:$0xff]  ;;  %v8942_v46 = vld [vmem:[#allocation12_spill] sm:$0xff] }
 0x4b7   : > { %3587 = vrot.lane.b32.xlu0 %v7534_v8, %s5226_s9  ;;  %v8928_v8 = vld [vmem:[#allocation44_spill] sm:$0xff] }
 0x4b8   : > { %v3566_v3 = vpop.permute.xlu1 %3565  ;;  %v3434_v52 = vpop.permute.xlu0 %3433 }
 0x4b9   : > { %3656 = vst.msk [vmem:[#allocation4 + $0x30] sm:$0xff] %vm3649_vm12, %v3566_v3 }
 0x4ba   : > { %3523 = vst.msk [vmem:[#allocation4 + $0x38] sm:$0xff] %vm3515_vm11, %v3434_v52  ;;  %2924 = vrot.lane.b32.xlu1 %v7271_v62, %s5220_s13  ;;  %v8943_v52 = vld [vmem:[#allocation13_spill] sm:$0xff] }
 0x4bb   : > { %3320 = vrot.lane.b32.xlu0 %v7271_v62, %s5224_s18 }
 0x4bc   : > { %v3170_v30 = vpop.permute.xlu1 %3169  ;;  %v3038_v59 = vpop.permute.xlu0 %3037 }
 0x4bd   : > { %3258 = vst.msk [vmem:[#allocation4 + $0x40] sm:$0xff] %vm3249_vm8, %v3170_v30  ;;  %v8944_v30 = vld [vmem:[#allocation14_spill] sm:$0xff] }
 0x4be   : > { %3125 = vst.msk [vmem:[#allocation4 + $0x48] sm:$0xff] %vm3115_vm7, %v3038_v59  ;;  %3455 = vrot.lane.b32.xlu1 %v8928_v8, %s5225_s23 }
 0x4bf   : > { %3322 = vrot.lane.b32.xlu0 %v7268_v24, %s5224_s18 }
 0x4c0   : > { %v3172_v2 = vpop.permute.xlu1 %3171  ;;  %v3568_v44 = vpop.permute.xlu0 %3567  ;;  %v3688_v22 = vld [vmem:[#allocation4 + $0x30] sm:$0xff] }
 0x4c1   : > { %3259 = vst.msk [vmem:[#allocation4 + $0x48] sm:$0xff] %vm3249_vm8, %v3172_v2  ;;  %5064 = vmatprep.mubr.msk.f32.mxu1 %vm3720_vm13, %v3688_v22 }
 0x4c2   : > { %3657 = vst.msk [vmem:[#allocation4 + $0x38] sm:$0xff] %vm3649_vm12, %v3568_v44  ;;  %3059 = vrot.lane.b32.xlu1 %v8928_v8, %s5222_s28  ;;  %v8945_v44 = vld [vmem:[#allocation15_spill] sm:$0xff] }
 0x4c3   : > { %2926 = vrot.lane.b32.xlu0 %v7268_v24, %s5220_s13 }
 0x4c4   : > { %v3303_v62 = vpop.permute.xlu1 %3302  ;;  %v3301_v18 = vpop.permute.xlu0 %3300 }
 0x4c5   : > { %3390 = vst.msk [vmem:[#allocation4 + $0x48] sm:$0xff] %vm3380_vm10, %v3303_v62  ;;  %3389 = vst.msk [vmem:[#allocation4 + $0x40] sm:$0xff] %vm3380_vm10, %v3301_v18  ;;  %v8947_v18 = vld [vmem:[#allocation17_spill] sm:$0xff] }
 0x4c6   : > { %3589 = vrot.lane.b32.xlu1 %v7552_v25, %s5226_s9 }
 0x4c7   : > { %3457 = vrot.lane.b32.xlu0 %v8929_v42, %s5225_s23 }
 0x4c8   : > { %v3040_v58 = vpop.permute.xlu1 %3039  ;;  %v3436_v5 = vpop.permute.xlu0 %3435 }
 0x4c9   : > { %v3689_v11 = vld [vmem:[#allocation4 + $0x38] sm:$0xff]  ;;  %3126 = vst.msk [vmem:[#allocation4 + $0x50] sm:$0xff] %vm3115_vm7, %v3040_v58 }
 0x4ca   : > { %3524 = vst.msk [vmem:[#allocation4 + $0x40] sm:$0xff] %vm3515_vm11, %v3436_v5  ;;  %5065 = vmatmul.mubr.msk.f32.gmra.mrb[22].mxu1 %vm3720_vm13, %v3689_v11  ;;  %3193 = vrot.lane.b32.xlu1 %v7552_v25, %s5223_s12  ;;  %v8930_v25 = vld [vmem:[#allocation68_spill] sm:$0xff]  ;;  %v8949_v11 = vld [vmem:[#allocation19_spill] sm:$0xff] }
 0x4cb   : > { %3061 = vrot.lane.b32.xlu0 %v8929_v42, %s5222_s28  ;;  %v8948_v42 = vld [vmem:[#allocation18_spill] sm:$0xff] }
 0x4cc   : > { %v3570_v24 = vpop.permute.xlu1 %3569  ;;  %v3438_v32 = vpop.permute.xlu0 %3437 }
 0x4cd   : > { %3658 = vst.msk [vmem:[#allocation4 + $0x40] sm:$0xff] %vm3649_vm12, %v3570_v24  ;;  %v8950_v24 = vld [vmem:[#allocation72_spill] sm:$0xff] }
 0x4ce   : > { %3525 = vst.msk [vmem:[#allocation4 + $0x48] sm:$0xff] %vm3515_vm11, %v3438_v32  ;;  %3195 = vrot.lane.b32.xlu1 %v7549_v43, %s5223_s12  ;;  %v8952_v32 = vld [vmem:[#allocation20_spill] sm:$0xff] }
 0x4cf   : > { %3591 = vrot.lane.b32.xlu0 %v7549_v43, %s5226_s9  ;;  %v8931_v43 = vld [vmem:[#allocation43_spill] sm:$0xff] }
 0x4d0   : > { %v3174_v57 = vpop.permute.xlu1 %3173  ;;  %v3042_v48 = vpop.permute.xlu0 %3041 }
 0x4d1   : > { %3260 = vst.msk [vmem:[#allocation4 + $0x50] sm:$0xff] %vm3249_vm8, %v3174_v57 }
 0x4d2   : > { %3127 = vst.msk [vmem:[#allocation4 + $0x58] sm:$0xff] %vm3115_vm7, %v3042_v48  ;;  %2928 = vrot.lane.b32.xlu1 %v8930_v25, %s5220_s13 }
 0x4d3   : > { %3324 = vrot.lane.b32.xlu0 %v8930_v25, %s5224_s18  ;;  %v8953_v25 = vld [vmem:[#allocation21_spill] sm:$0xff] }
 0x4d4   : > { %v3176_v14 = vpop.permute.xlu1 %3175  ;;  %v3572_v53 = vpop.permute.xlu0 %3571  ;;  %v3690_v49 = vld [vmem:[#allocation4 + $0x40] sm:$0xff] }
 0x4d5   : > { %3261 = vst.msk [vmem:[#allocation4 + $0x58] sm:$0xff] %vm3249_vm8, %v3176_v14  ;;  %5067 = vmatprep.mubr.msk.f32.mxu1 %vm3720_vm13, %v3690_v49  ;;  %v8954_v14 = vld [vmem:[#allocation22_spill] sm:$0xff] }
 0x4d6   : > { %3659 = vst.msk [vmem:[#allocation4 + $0x48] sm:$0xff] %vm3649_vm12, %v3572_v53  ;;  %3459 = vrot.lane.b32.xlu1 %v8931_v43, %s5225_s23 }
 0x4d7   : > { %3326 = vrot.lane.b32.xlu0 %v8932_v13, %s5224_s18 }
 0x4d8   : > { %v3307_v12 = vpop.permute.xlu1 %3306  ;;  %v3305_v0 = vpop.permute.xlu0 %3304 }
 0x4d9   : > { %3392 = vst.msk [vmem:[#allocation4 + $0x58] sm:$0xff] %vm3380_vm10, %v3307_v12  ;;  %3391 = vst.msk [vmem:[#allocation4 + $0x50] sm:$0xff] %vm3380_vm10, %v3305_v0  ;;  %v8957_v12 = vld [vmem:[#allocation24_spill] sm:$0xff] }
 0x4da   : > { %3063 = vrot.lane.b32.xlu1 %v8931_v43, %s5222_s28  ;;  %v8955_v43 = vld [vmem:[#allocation23_spill] sm:$0xff] }
 0x4db   : > { %2930 = vrot.lane.b32.xlu0 %v8932_v13, %s5220_s13  ;;  %v8956_v13 = vld [vmem:[#allocation75_spill] sm:$0xff] }
 0x4dc   : > { %v3044_v17 = vpop.permute.xlu1 %3043  ;;  %v3440_v56 = vpop.permute.xlu0 %3439 }
 0x4dd   : > { %v3691_v27 = vld [vmem:[#allocation4 + $0x48] sm:$0xff]  ;;  %3128 = vst.msk [vmem:[#allocation4 + $0x60] sm:$0xff] %vm3115_vm7, %v3044_v17 }
 0x4de   : > { %3526 = vst.msk [vmem:[#allocation4 + $0x50] sm:$0xff] %vm3515_vm11, %v3440_v56  ;;  %5068 = vmatmul.mubr.msk.f32.gmra.mrb[24].mxu1 %vm3720_vm13, %v3691_v27  ;;  %3593 = vrot.lane.b32.xlu1 %v7565_v29, %s5226_s9  ;;  %v8958_v27 = vld [vmem:[#allocation25_spill] sm:$0xff] }
 0x4df   : > { %3461 = vrot.lane.b32.xlu0 %v8933_v26, %s5225_s23 }
 0x4e0   : > { %v3574_v51 = vpop.permute.xlu1 %3573  ;;  %v3442_v38 = vpop.permute.xlu0 %3441 }
 0x4e1   : > { %3660 = vst.msk [vmem:[#allocation4 + $0x50] sm:$0xff] %vm3649_vm12, %v3574_v51 }
 0x4e2   : > { %3527 = vst.msk [vmem:[#allocation4 + $0x58] sm:$0xff] %vm3515_vm11, %v3442_v38  ;;  %3197 = vrot.lane.b32.xlu1 %v7565_v29, %s5223_s12 }
 0x4e3   : > { %3065 = vrot.lane.b32.xlu0 %v8933_v26, %s5222_s28  ;;  %v8959_v26 = vld [vmem:[#allocation26_spill] sm:$0xff] }
 0x4e4   : > { %v3178_v28 = vpop.permute.xlu1 %3177  ;;  %v3046_v55 = vpop.permute.xlu0 %3045 }
 0x4e5   : > { %3262 = vst.msk [vmem:[#allocation4 + $0x60] sm:$0xff] %vm3249_vm8, %v3178_v28  ;;  %v8960_v28 = vld [vmem:[#allocation28_spill] sm:$0xff] }
 0x4e6   : > { %3129 = vst.msk [vmem:[#allocation4 + $0x68] sm:$0xff] %vm3115_vm7, %v3046_v55  ;;  %3199 = vrot.lane.b32.xlu1 %v7562_v19, %s5223_s12 }
 0x4e7   : > { %3595 = vrot.lane.b32.xlu0 %v7562_v19, %s5226_s9  ;;  %v8934_v19 = vld [vmem:[#allocation6_spill] sm:$0xff] }
 0x4e8   : > { %v3180_v29 = vpop.permute.xlu1 %3179  ;;  %v3576_v35 = vpop.permute.xlu0 %3575  ;;  %v3692_v1 = vld [vmem:[#allocation4 + $0x50] sm:$0xff]  ;;  %5106 = vmatmul.mubr.msk.f32.vlgmr.msra.gmra.mrb[16].mxu0 %vm322_vm0, %v8934_v19 }
 0x4e9   : > { %3263 = vst.msk [vmem:[#allocation4 + $0x68] sm:$0xff] %vm3249_vm8, %v3180_v29  ;;  %5070 = vmatprep.mubr.msk.f32.mxu1 %vm3720_vm13, %v3692_v1  ;;  %5108 = vmatprep.mubr.msk.f32.mxu0 %vm322_vm0, %v8935_v9  ;;  %v8966_v9 = vld [vmem:[#allocation34_spill] sm:$0xff] }
 0x4ea   : > { %3661 = vst.msk [vmem:[#allocation4 + $0x58] sm:$0xff] %vm3649_vm12, %v3576_v35  ;;  %2932 = vrot.lane.b32.xlu1 %v7325_v45, %s5220_s13  ;;  %v8962_v35 = vld [vmem:[#allocation30_spill] sm:$0xff] }
 0x4eb   : > { %3328 = vrot.lane.b32.xlu0 %v7325_v45, %s5224_s18 }
 0x4ec   : > { %v3311_v41 = vpop.permute.xlu1 %3310  ;;  %v3309_v39 = vpop.permute.xlu0 %3308  ;;  %5109 = vmatmul.mubr.msk.f32.gmra.mrb[18].mxu0 %vm322_vm0, %v8937_v23  ;;  %v8967_v23 = vld [vmem:[#allocation35_spill] sm:$0xff] }
 0x4ed   : > { %3394 = vst.msk [vmem:[#allocation4 + $0x68] sm:$0xff] %vm3380_vm10, %v3311_v41  ;;  %3393 = vst.msk [vmem:[#allocation4 + $0x60] sm:$0xff] %vm3380_vm10, %v3309_v39  ;;  %5111 = vmatprep.mubr.msk.f32.mxu0 %vm322_vm0, %v8938_v34  ;;  %v8964_v41 = vld [vmem:[#allocation33_spill] sm:$0xff]  ;;  %v8965_v39 = vld [vmem:[#allocation47_spill] sm:$0xff] }
 0x4ee   : > { %3463 = vrot.lane.b32.xlu1 %v8936_v40, %s5225_s23  ;;  %v8969_v34 = vld [vmem:[#allocation56_spill] sm:$0xff] }
 0x4ef   : > { %3330 = vrot.lane.b32.xlu0 %v7322_v10, %s5224_s18 }
 0x4f0   : > { %v3048_v45 = vpop.permute.xlu1 %3047  ;;  %v3444_v50 = vpop.permute.xlu0 %3443  ;;  %5112 = vmatmul.mubr.msk.f32.gmra.mrb[20].mxu0 %vm322_vm0, %v8939_v37  ;;  %v8970_v37 = vld [vmem:[#allocation50_spill] sm:$0xff] }
 0x4f1   : > { %v3693_v21 = vld [vmem:[#allocation4 + $0x58] sm:$0xff]  ;;  %3130 = vst.msk [vmem:[#allocation4 + $0x70] sm:$0xff] %vm3115_vm7, %v3048_v45  ;;  %5114 = vmatprep.mubr.msk.f32.mxu0 %vm322_vm0, %v8940_v63 }
 0x4f2   : > { %3528 = vst.msk [vmem:[#allocation4 + $0x60] sm:$0xff] %vm3515_vm11, %v3444_v50  ;;  %5071 = vmatmul.mubr.msk.f32.gmra.mrb[26].mxu1 %vm3720_vm13, %v3693_v21  ;;  %3067 = vrot.lane.b32.xlu1 %v8936_v40, %s5222_s28  ;;  %v8968_v45 = vld [vmem:[#allocation36_spill] sm:$0xff] }
 0x4f3   : > { %2934 = vrot.lane.b32.xlu0 %v7322_v10, %s5220_s13 }
 0x4f4   : > { %v3578_v31 = vpop.permute.xlu1 %3577  ;;  %v3446_v16 = vpop.permute.xlu0 %3445  ;;  %5115 = vmatmul.mubr.msk.f32.gmra.mrb[22].mxu0 %vm322_vm0, %v8942_v46 }
 0x4f5   : > { %3662 = vst.msk [vmem:[#allocation4 + $0x60] sm:$0xff] %vm3649_vm12, %v3578_v31  ;;  %5117 = vmatprep.mubr.msk.f32.mxu0 %vm322_vm0, %v8943_v52  ;;  %v8971_v31 = vld [vmem:[#allocation59_spill] sm:$0xff] }
 0x4f6   : > { %3529 = vst.msk [vmem:[#allocation4 + $0x68] sm:$0xff] %vm3515_vm11, %v3446_v16  ;;  %3597 = vrot.lane.b32.xlu1 %v7580_v20, %s5226_s9 }
 0x4f7   : > { %3465 = vrot.lane.b32.xlu0 %v8941_v7, %s5225_s23 }
 0x4f8   : > { %v3182_v10 = vpop.permute.xlu1 %3181  ;;  %v3050_v3 = vpop.permute.xlu0 %3049  ;;  %5118 = vmatmul.mubr.msk.f32.gmra.mrb[24].mxu0 %vm322_vm0, %v8944_v30 }
 0x4f9   : > { %3264 = vst.msk [vmem:[#allocation4 + $0x70] sm:$0xff] %vm3249_vm8, %v3182_v10  ;;  %5120 = vmatprep.mubr.msk.f32.mxu0 %vm322_vm0, %v8945_v44  ;;  %v2368_v10 = vld [vmem:[#allocation3 + $0x180] sm:$0xff] }
 0x4fa   : > { %3131 = vst.msk [vmem:[#allocation4 + $0x78] sm:$0xff] %vm3115_vm7, %v3050_v3  ;;  %3201 = vrot.lane.b32.xlu1 %v7580_v20, %s5223_s12  ;;  %v8946_v20 = vld [vmem:[#allocation16_spill] sm:$0xff] }
 0x4fb   : > { %3069 = vrot.lane.b32.xlu0 %v8941_v7, %s5222_s28  ;;  %v2369_v3 = vld [vmem:[#allocation3 + $0x188] sm:$0xff] }
 0x4fc   : > { %v3184_v59 = vpop.permute.xlu1 %3183  ;;  %v3580_v8 = vpop.permute.xlu0 %3579  ;;  %v3694_v2 = vld [vmem:[#allocation4 + $0x60] sm:$0xff]  ;;  %5121 = vmatmul.mubr.msk.f32.gmra.mrb[26].mxu0 %vm322_vm0, %v8946_v20 }
 0x4fd   : > { %3265 = vst.msk [vmem:[#allocation4 + $0x78] sm:$0xff] %vm3249_vm8, %v3184_v59  ;;  %5073 = vmatprep.mubr.msk.f32.mxu1 %vm3720_vm13, %v3694_v2  ;;  %5123 = vmatprep.mubr.msk.f32.mxu0 %vm322_vm0, %v8947_v18  ;;  %v3014_v59 = vrot.slane %v2368_v10, 1  ;;  %v2370_v20 = vld [vmem:[#allocation3 + $0x190] sm:$0x3]  ;;  %v3148_v18 = vrot.slane %v2368_v10, 2 }
 0x4fe   : > { %3663 = vst.msk [vmem:[#allocation4 + $0x68] sm:$0xff] %vm3649_vm12, %v3580_v8  ;;  %3203 = vrot.lane.b32.xlu1 %v7577_v33, %s5223_s12  ;;  %v3015_v8 = vrot.slane %v2369_v3, 1 }
 0x4ff   : > { %3599 = vrot.lane.b32.xlu0 %v7577_v33, %s5226_s9 }
 0x500   : > { %v3315_v22 = vpop.permute.xlu1 %3314  ;;  %5124 = vmatmul.mubr.msk.f32.gmra.mrb[28].mxu0 %vm322_vm0, %v8948_v42  ;;  %v3149_v42 = vrot.slane %v2369_v3, 2 }
 0x501   : > { %v3313_v62 = vpop.permute.xlu0 %3312  ;;  %3396 = vst.msk [vmem:[#allocation4 + $0x78] sm:$0xff] %vm3380_vm10, %v3315_v22  ;;  %5126 = vmatprep.mubr.msk.f32.mxu0 %vm322_vm0, %v8949_v11 }
 0x502   : > { %3395 = vst.msk [vmem:[#allocation4 + $0x70] sm:$0xff] %vm3380_vm10, %v3313_v62  ;;  %2936 = vrot.lane.b32.xlu1 %v7351_v60, %s5220_s13  ;;  %v3150_v11 = vsel %vm761_vm3, %v3148_v18, %v3149_v42 }
 0x503   : > { %3332 = vrot.lane.b32.xlu0 %v7351_v60, %s5224_s18  ;;  %v8951_v60 = vld [vmem:[#allocation45_spill] sm:$0xff] }
 0x504   : > { %v3052_v33 = vpop.permute.xlu1 %3051  ;;  %5127 = vmatmul.mubr.msk.f32.gmra.mrb[30].mxu0 %vm322_vm0, %v8952_v32 }
 0x505   : > { %v3448_v58 = vpop.permute.xlu0 %3447  ;;  %v3695_v5 = vld [vmem:[#allocation4 + $0x68] sm:$0xff]  ;;  %3132 = vst.msk [vmem:[#allocation4 + $0x80] sm:$0xff] %vm3115_vm7, %v3052_v33  ;;  %5129 = vmatprep.mubr.msk.f32.mxu0 %vm322_vm0, %v8953_v25  ;;  %v3017_v33 = vrot.slane %v2370_v20, 1 }
 0x506   : > { %3530 = vst.msk [vmem:[#allocation4 + $0x70] sm:$0xff] %vm3515_vm11, %v3448_v58  ;;  %5074 = vmatmul.mubr.msk.f32.gmra.mrb[28].mxu1 %vm3720_vm13, %v3695_v5  ;;  %3467 = vrot.lane.b32.xlu1 %v8950_v24, %s5225_s23 }
 0x507   : > { %3334 = vrot.lane.b32.xlu0 %v8951_v60, %s5224_s18 }
 0x508   : > { %v3582_v57 = vpop.permute.xlu1 %3581  ;;  %5130 = vmatmul.mubr.msk.f32.gmra.mrb[32].mxu0 %vm322_vm0, %v8954_v14 }
 0x509   : > { %v3450_v48 = vpop.permute.xlu0 %3449  ;;  %3664 = vst.msk [vmem:[#allocation4 + $0x70] sm:$0xff] %vm3649_vm12, %v3582_v57  ;;  %5132 = vmatprep.mubr.msk.f32.mxu0 %vm322_vm0, %v8955_v43  ;;  %v2373_v43 = vld [vmem:[#allocation3 + $0x1a8] sm:$0x3] }
 0x50a   : > { %3531 = vst.msk [vmem:[#allocation4 + $0x78] sm:$0xff] %vm3515_vm11, %v3450_v48  ;;  %3071 = vrot.lane.b32.xlu1 %v8950_v24, %s5222_s28  ;;  %v3018_v24 = vsel %vm551_vm2, %v3015_v8, %v3017_v33  ;;  %v3151_v48 = vrot.slane %v2370_v20, 2 }
 0x50b   : > { %2938 = vrot.lane.b32.xlu0 %v8951_v60, %s5220_s13 }
 0x50c   : > { %v3186_v53 = vpop.permute.xlu1 %3185  ;;  %5133 = vmatmul.mubr.msk.f32.gmra.mrb[34].mxu0 %vm322_vm0, %v8957_v12 }
 0x50d   : > { %v3054_v49 = vpop.permute.xlu0 %3053  ;;  %3266 = vst.msk [vmem:[#allocation4 + $0x80] sm:$0xff] %vm3249_vm8, %v3186_v53  ;;  %5135 = vmatprep.mubr.msk.f32.mxu0 %vm322_vm0, %v8958_v27  ;;  %v2371_v53 = vld [vmem:[#allocation3 + $0x198] sm:$0xff] }
 0x50e   : > { %3133 = vst.msk [vmem:[#allocation4 + $0x88] sm:$0xff] %vm3115_vm7, %v3054_v49  ;;  %3601 = vrot.lane.b32.xlu1 %v7593_v47, %s5226_s9  ;;  %v2372_v49 = vld [vmem:[#allocation3 + $0x1a0] sm:$0xff]  ;;  %v3414_v12 = vrot.slane %v2371_v53, 1 }
 0x50f   : > { %3469 = vrot.lane.b32.xlu0 %v8956_v13, %s5225_s23 }
 0x510   : > { %v3188_v0 = vpop.permute.xlu1 %3187  ;;  %v3696_v56 = vld [vmem:[#allocation4 + $0x70] sm:$0xff]  ;;  %5136 = vmatmul.mubr.msk.f32.gmra.mrb[36].mxu0 %vm322_vm0, %v8959_v26 }
 0x511   : > { %v3584_v17 = vpop.permute.xlu0 %3583  ;;  %3267 = vst.msk [vmem:[#allocation4 + $0x88] sm:$0xff] %vm3249_vm8, %v3188_v0  ;;  %5076 = vmatprep.mubr.msk.f32.mxu1 %vm3720_vm13, %v3696_v56  ;;  %5138 = vmatprep.mubr.msk.f32.mxu0 %vm322_vm0, %v8960_v28  ;;  %v3415_v0 = vrot.slane %v2372_v49, 1 }
 0x512   : > { %3665 = vst.msk [vmem:[#allocation4 + $0x78] sm:$0xff] %vm3649_vm12, %v3584_v17  ;;  %3205 = vrot.lane.b32.xlu1 %v7593_v47, %s5223_s12  ;;  %v8961_v47 = vld [vmem:[#allocation29_spill] sm:$0xff]  ;;  %v3417_v17 = vrot.slane %v2373_v43, 1 }
 0x513   : > { %3073 = vrot.lane.b32.xlu0 %v8956_v13, %s5222_s28  ;;  %v3152_v13 = vsel %vm761_vm3, %v3149_v42, %v3151_v48  ;;  %v3416_v28 = vsel %vm551_vm2, %v3414_v12, %v3415_v0 }
 0x514   : > { %v2921_v51 = vpop.permute.xlu1 %2920  ;;  %5139 = vmatmul.mubr.msk.f32.gmra.mrb[38].mxu0 %vm322_vm0, %v8961_v47  ;;  %v3418_v47 = vsel %vm551_vm2, %v3415_v0, %v3417_v17 }
 0x515   : > { %v3317_v38 = vpop.permute.xlu0 %3316  ;;  %2999 = vst.msk [vmem:[#allocation4 + $0x90] sm:$0xff] %vm2980_vm6, %v2921_v51  ;;  %5141 = vmatprep.mubr.msk.f32.mxu0 %vm322_vm0, %v8962_v35  ;;  %v3548_v51 = vrot.slane %v2371_v53, 2 }
 0x516   : > { %3397 = vst.msk [vmem:[#allocation4 + $0x80] sm:$0xff] %vm3380_vm10, %v3317_v38  ;;  %3207 = vrot.lane.b32.xlu1 %v7590_v61, %s5223_s12  ;;  %v3549_v38 = vrot.slane %v2372_v49, 2 }
 0x517   : > { %3603 = vrot.lane.b32.xlu0 %v7590_v61, %s5226_s9  ;;  %v8963_v61 = vld [vmem:[#allocation32_spill] sm:$0xff] }
 0x518   : > { %v3452_v55 = vpop.permute.xlu1 %3451  ;;  %5142 = vmatmul.mubr.msk.f32.gmra.mrb[40].mxu0 %vm322_vm0, %v8963_v61  ;;  %v3550_v35 = vsel %vm761_vm3, %v3548_v51, %v3549_v38 }
 0x519   : > { %v3319_v15 = vpop.permute.xlu0 %3318  ;;  %v3697_v29 = vld [vmem:[#allocation4 + $0x78] sm:$0xff]  ;;  %3532 = vst.msk [vmem:[#allocation4 + $0x80] sm:$0xff] %vm3515_vm11, %v3452_v55  ;;  %5144 = vmatprep.mubr.msk.f32.mxu0 %vm322_vm0, %v8964_v41  ;;  %v3551_v55 = vrot.slane %v2373_v43, 2 }
 0x51a   : > { %3398 = vst.msk [vmem:[#allocation4 + $0x88] sm:$0xff] %vm3380_vm10, %v3319_v15  ;;  %5077 = vmatmul.mubr.msk.f32.gmra.mrb[30].mxu1 %vm3720_vm13, %v3697_v29  ;;  %2940 = vrot.lane.b32.xlu1 %v7376_v36, %s5220_s13 }
 0x51b   : > { %3336 = vrot.lane.b32.xlu0 %v7376_v36, %s5224_s18  ;;  %v3552_v61 = vsel %vm761_vm3, %v3549_v38, %v3551_v55 }
 0x51c   : > { %v3056_v1 = vpop.permute.xlu1 %3055  ;;  %5145 = vmatmul.mubr.msk.f32.gmra.mrb[42].mxu0 %vm322_vm0, %v8966_v9 }
 0x51d   : > { %v2923_v19 = vpop.permute.xlu0 %2922  ;;  %3134 = vst.msk [vmem:[#allocation4 + $0x90] sm:$0xff] %vm3115_vm7, %v3056_v1  ;;  %5147 = vmatprep.mubr.msk.f32.mxu0 %vm322_vm0, %v8967_v23 }
 0x51e   : > { %3000 = vst.msk [vmem:[#allocation4 + $0x98] sm:$0xff] %vm2980_vm6, %v2923_v19  ;;  %3471 = vrot.lane.b32.xlu1 %v8965_v39, %s5225_s23 }
 0x51f   : > { %3338 = vrot.lane.b32.xlu0 %v7373_v4, %s5224_s18 }
 0x520   : > { %v3586_v36 = vpop.permute.xlu1 %3585  ;;  %5148 = vmatmul.mubr.msk.f32.gmra.mrb[44].mxu0 %vm322_vm0, %v8968_v45 }
 0x521   : > { %v3454_v40 = vpop.permute.xlu0 %3453  ;;  %3666 = vst.msk [vmem:[#allocation4 + $0x80] sm:$0xff] %vm3649_vm12, %v3586_v36  ;;  %5150 = vmatprep.mubr.msk.f32.mxu0 %vm322_vm0, %v8969_v34 }
 0x522   : > { %3533 = vst.msk [vmem:[#allocation4 + $0x88] sm:$0xff] %vm3515_vm11, %v3454_v40  ;;  %3075 = vrot.lane.b32.xlu1 %v8965_v39, %s5222_s28 }
 0x523   : > { %2942 = vrot.lane.b32.xlu0 %v7373_v4, %s5220_s13 }
 0x524   : > { %v3190_v50 = vpop.permute.xlu1 %3189  ;;  %5151 = vmatmul.mubr.msk.f32.gmra.mrb[46].mxu0 %vm322_vm0, %v8971_v31 }
 0x525   : > { %v3058_v21 = vpop.permute.xlu0 %3057  ;;  %3268 = vst.msk [vmem:[#allocation4 + $0x90] sm:$0xff] %vm3249_vm8, %v3190_v50  ;;  %v8295_v50 = vld [vmem:[%s8539_s4] ss:$0 sm:$0xff] }
 0x526   : > { %3135 = vst.msk [vmem:[#allocation4 + $0x98] sm:$0xff] %vm3115_vm7, %v3058_v21  ;;  %3605 = vrot.lane.b32.xlu1 %v7606_v6, %s5226_s9 }
 0x527   : > { %3473 = vrot.lane.b32.xlu0 %v8970_v37, %s5225_s23 }
 0x528   : > { %v3192_v4 = vpop.permute.xlu1 %3191  ;;  %v3698_v63 = vld [vmem:[#allocation4 + $0x80] sm:$0xff] }
 0x529   : > { %v3588_v16 = vpop.permute.xlu0 %3587  ;;  %3269 = vst.msk [vmem:[#allocation4 + $0x98] sm:$0xff] %vm3249_vm8, %v3192_v4  ;;  %5079 = vmatprep.mubr.msk.f32.mxu1 %vm3720_vm13, %v3698_v63 }
 0x52a   : > { %3667 = vst.msk [vmem:[#allocation4 + $0x88] sm:$0xff] %vm3649_vm12, %v3588_v16  ;;  %3209 = vrot.lane.b32.xlu1 %v7606_v6, %s5223_s12 }
 0x52b   : > { %3077 = vrot.lane.b32.xlu0 %v8970_v37, %s5222_s28 }
 0x52c   : > { %v2925_v7 = vpop.permute.xlu1 %2924 }
 0x52d   : > { %v3321_v46 = vpop.permute.xlu0 %3320  ;;  %3001 = vst.msk [vmem:[#allocation4 + $0xa0] sm:$0xff] %vm2980_vm6, %v2925_v7 }
 0x52e   : > { %3399 = vst.msk [vmem:[#allocation4 + $0x90] sm:$0xff] %vm3380_vm10, %v3321_v46  ;;  %3211 = vrot.lane.b32.xlu1 %v7603_v54, %s5223_s12 }
 0x52f   : > { %3607 = vrot.lane.b32.xlu0 %v7603_v54, %s5226_s9  ;;  %v3016_v54 = vsel %vm551_vm2, %v3014_v59, %v3015_v8 }
 0x530   : > { %v3456_v52 = vpop.permute.xlu1 %3455 }
 0x531   : > { %v3323_v30 = vpop.permute.xlu0 %3322  ;;  %v3699_v6 = vld [vmem:[#allocation4 + $0x88] sm:$0xff]  ;;  %3534 = vst.msk [vmem:[#allocation4 + $0x90] sm:$0xff] %vm3515_vm11, %v3456_v52 }
 0x532   : > { %3400 = vst.msk [vmem:[#allocation4 + $0x98] sm:$0xff] %vm3380_vm10, %v3323_v30  ;;  %5080 = vmatmul.mubr.msk.f32.gmra.mrb[32].mxu1 %vm3720_vm13, %v3699_v6  ;;  %2944 = vrot.lane.b32.xlu1 %v2368_v10, %s5220_s13 }
 0x533   : > { %3340 = vrot.lane.b32.xlu0 %v2368_v10, %s5224_s18 }
 0x534   : > { %v3060_v2 = vpop.permute.xlu1 %3059 }
 0x535   : > { %v2927_v44 = vpop.permute.xlu0 %2926  ;;  %3136 = vst.msk [vmem:[#allocation4 + $0xa0] sm:$0xff] %vm3115_vm7, %v3060_v2 }
 0x536   : > { %3002 = vst.msk [vmem:[#allocation4 + $0xa8] sm:$0xff] %vm2980_vm6, %v2927_v44  ;;  %3475 = vrot.lane.b32.xlu1 %v3016_v54, %s5225_s23 }
 0x537   : > { %3342 = vrot.lane.b32.xlu0 %v2369_v3, %s5224_s18 }
 0x538   : > { %v3590_v22 = vpop.permute.xlu1 %3589 }
 0x539   : > { %v3458_v62 = vpop.permute.xlu0 %3457  ;;  %3668 = vst.msk [vmem:[#allocation4 + $0x90] sm:$0xff] %vm3649_vm12, %v3590_v22 }
 0x53a   : > { %3535 = vst.msk [vmem:[#allocation4 + $0x98] sm:$0xff] %vm3515_vm11, %v3458_v62  ;;  %3079 = vrot.lane.b32.xlu1 %v3016_v54, %s5222_s28 }
 0x53b   : > { %2946 = vrot.lane.b32.xlu0 %v2369_v3, %s5220_s13 }
 0x53c   : > { %v3194_v58 = vpop.permute.xlu1 %3193 }
 0x53d   : > { %v3062_v5 = vpop.permute.xlu0 %3061  ;;  %3270 = vst.msk [vmem:[#allocation4 + $0xa0] sm:$0xff] %vm3249_vm8, %v3194_v58 }
 0x53e   : > { %3137 = vst.msk [vmem:[#allocation4 + $0xa8] sm:$0xff] %vm3115_vm7, %v3062_v5  ;;  %3609 = vrot.lane.b32.xlu1 %v3150_v11, %s5226_s9 }
 0x53f   : > { %3477 = vrot.lane.b32.xlu0 %v3018_v24, %s5225_s23 }
 0x540   : > { %v3196_v60 = vpop.permute.xlu1 %3195  ;;  %v3700_v57 = vld [vmem:[#allocation4 + $0x90] sm:$0xff] }
 0x541   : > { %v3592_v32 = vpop.permute.xlu0 %3591  ;;  %3271 = vst.msk [vmem:[#allocation4 + $0xa8] sm:$0xff] %vm3249_vm8, %v3196_v60  ;;  %5082 = vmatprep.mubr.msk.f32.mxu1 %vm3720_vm13, %v3700_v57 }
 0x542   : > { %3669 = vst.msk [vmem:[#allocation4 + $0x98] sm:$0xff] %vm3649_vm12, %v3592_v32  ;;  %3213 = vrot.lane.b32.xlu1 %v3150_v11, %s5223_s12 }
 0x543   : > { %3081 = vrot.lane.b32.xlu0 %v3018_v24, %s5222_s28 }
 0x544   : > { %v2929_v25 = vpop.permute.xlu1 %2928 }
 0x545   : > { %v3325_v14 = vpop.permute.xlu0 %3324  ;;  %3003 = vst.msk [vmem:[#allocation4 + $0xb0] sm:$0xff] %vm2980_vm6, %v2929_v25 }
 0x546   : > { %3401 = vst.msk [vmem:[#allocation4 + $0xa0] sm:$0xff] %vm3380_vm10, %v3325_v14  ;;  %3215 = vrot.lane.b32.xlu1 %v3152_v13, %s5223_s12 }
 0x547   : > { %3611 = vrot.lane.b32.xlu0 %v3152_v13, %s5226_s9 }
 0x548   : > { %v3460_v56 = vpop.permute.xlu1 %3459 }
 0x549   : > { %v3327_v27 = vpop.permute.xlu0 %3326  ;;  %v3701_v26 = vld [vmem:[#allocation4 + $0x98] sm:$0xff]  ;;  %3536 = vst.msk [vmem:[#allocation4 + $0xa0] sm:$0xff] %vm3515_vm11, %v3460_v56 }
 0x54a   : > { %3402 = vst.msk [vmem:[#allocation4 + $0xa8] sm:$0xff] %vm3380_vm10, %v3327_v27  ;;  %5083 = vmatmul.mubr.msk.f32.gmra.mrb[34].mxu1 %vm3720_vm13, %v3701_v26  ;;  %3346 = vrot.lane.b32.xlu1 %v2372_v49, %s5224_s18 }
 0x54b   : > { %3344 = vrot.lane.b32.xlu0 %v2371_v53, %s5224_s18 }
 0x54c   : > { %v3064_v15 = vpop.permute.xlu1 %3063 }
 0x54d   : > { %v2931_v29 = vpop.permute.xlu0 %2930  ;;  %3138 = vst.msk [vmem:[#allocation4 + $0xb0] sm:$0xff] %vm3115_vm7, %v3064_v15 }
 0x54e   : > { %3004 = vst.msk [vmem:[#allocation4 + $0xb8] sm:$0xff] %vm2980_vm6, %v2931_v29  ;;  %3481 = vrot.lane.b32.xlu1 %v3418_v47, %s5225_s23 }
 0x54f   : > { %3479 = vrot.lane.b32.xlu0 %v3416_v28, %s5225_s23 }
 0x550   : > { %v3594_v1 = vpop.permute.xlu1 %3593 }
 0x551   : > { %v3462_v19 = vpop.permute.xlu0 %3461  ;;  %3670 = vst.msk [vmem:[#allocation4 + $0xa0] sm:$0xff] %vm3649_vm12, %v3594_v1 }
 0x552   : > { %3537 = vst.msk [vmem:[#allocation4 + $0xa8] sm:$0xff] %vm3515_vm11, %v3462_v19  ;;  %3615 = vrot.lane.b32.xlu1 %v3552_v61, %s5226_s9 }
 0x553   : > { %3613 = vrot.lane.b32.xlu0 %v3550_v35, %s5226_s9 }
 0x554   : > { %v3198_v41 = vpop.permute.xlu1 %3197 }
 0x555   : > { %v3066_v39 = vpop.permute.xlu0 %3065  ;;  %3272 = vst.msk [vmem:[#allocation4 + $0xb0] sm:$0xff] %vm3249_vm8, %v3198_v41 }
 0x556   : > { %3139 = vst.msk [vmem:[#allocation4 + $0xb8] sm:$0xff] %vm3115_vm7, %v3066_v39 }
 0x558   : > { %v3200_v9 = vpop.permute.xlu1 %3199  ;;  %v3702_v40 = vld [vmem:[#allocation4 + $0xa0] sm:$0xff] }
 0x559   : > { %v3596_v36 = vpop.permute.xlu0 %3595  ;;  %3273 = vst.msk [vmem:[#allocation4 + $0xb8] sm:$0xff] %vm3249_vm8, %v3200_v9  ;;  %5085 = vmatprep.mubr.msk.f32.mxu1 %vm3720_vm13, %v3702_v40 }
 0x55a   : > { %3671 = vst.msk [vmem:[#allocation4 + $0xa8] sm:$0xff] %vm3649_vm12, %v3596_v36 }
 0x55c   : > { %v2933_v23 = vpop.permute.xlu1 %2932 }
 0x55d   : > { %v3329_v45 = vpop.permute.xlu0 %3328  ;;  %3005 = vst.msk [vmem:[#allocation4 + $0xc0] sm:$0xff] %vm2980_vm6, %v2933_v23 }
 0x55e   : > { %3403 = vst.msk [vmem:[#allocation4 + $0xb0] sm:$0xff] %vm3380_vm10, %v3329_v45 }
 0x560   : > { %v3464_v21 = vpop.permute.xlu1 %3463 }
 0x561   : > { %v5057_v34 = vpop.f32.mrb[16].mxu1  ;;  %v3703_v37 = vld [vmem:[#allocation4 + $0xa8] sm:$0xff]  ;;  %3538 = vst.msk [vmem:[#allocation4 + $0xb0] sm:$0xff] %vm3515_vm11, %v3464_v21  ;;  %v3331_v4 = vpop.permute.xlu0 %3330 }
 0x562   : > { %v3889_v31 = vadd.f32 %v5057_v34, %v8295_v50  ;;  %v3883_v16 = vpop.f32.mrb[17].mxu1  ;;  %5086 = vmatmul.mubr.msk.f32.gmra.mrb[36].mxu1 %vm3720_vm13, %v3703_v37  ;;  %3404 = vst.msk [vmem:[#allocation4 + $0xb8] sm:$0xff] %vm3380_vm10, %v3331_v4 }
 0x563   : > { %v3884_v63 = vadd.f32 %v8295_v50, %v3883_v16 }
 0x564   : > { %vm4043_vm0 = vcmp.gt.f32.partialorder %v3889_v31, 0.0  ;;  %v4075_v7 = vmul.f32 0.01, %v3889_v31  ;;  %v3068_v10 = vpop.permute.xlu1 %3067 }
 0x565   : > { %vm4042_vm2 = vcmp.gt.f32.partialorder %v3884_v63, 0.0  ;;  %v4074_v46 = vmul.f32 0.01, %v3884_v63  ;;  %3140 = vst.msk [vmem:[#allocation4 + $0xc0] sm:$0xff] %vm3115_vm7, %v3068_v10  ;;  %v2935_v52 = vpop.permute.xlu0 %2934 }
 0x566   : > { %v4107_v3 = vsel %vm4043_vm0, %v3889_v31, %v4075_v7  ;;  %3006 = vst.msk [vmem:[#allocation4 + $0xc8] sm:$0xff] %vm2980_vm6, %v2935_v52 }
 0x567   : > { %4139 = vst.msk [vmem:[%s8307_s19 + $0x8] sm:$0xff] %vm2231_vm14, %v4107_v3  ;;  %v4106_v30 = vsel %vm4042_vm2, %v3884_v63, %v4074_v46 }
 0x568   : > { %4138 = vst.msk [vmem:[%s8307_s19] sm:$0xff] %vm2231_vm14, %v4106_v30  ;;  %v3598_v6 = vpop.permute.xlu1 %3597 }
 0x569   : > { %3672 = vst.msk [vmem:[#allocation4 + $0xb0] sm:$0xff] %vm3649_vm12, %v3598_v6  ;;  %v3466_v59 = vpop.permute.xlu0 %3465 }
 0x56a   : > { %3539 = vst.msk [vmem:[#allocation4 + $0xb8] sm:$0xff] %vm3515_vm11, %v3466_v59 }
 0x56c   : > { %v3202_v8 = vpop.permute.xlu1 %3201 }
 0x56d   : > { %3274 = vst.msk [vmem:[#allocation4 + $0xc0] sm:$0xff] %vm3249_vm8, %v3202_v8  ;;  %v3070_v2 = vpop.permute.xlu0 %3069 }
 0x56e   : > { %3141 = vst.msk [vmem:[#allocation4 + $0xc8] sm:$0xff] %vm3115_vm7, %v3070_v2 }
 0x570   : > { %v3204_v44 = vpop.permute.xlu1 %3203  ;;  %v3704_v54 = vld [vmem:[#allocation4 + $0xb0] sm:$0xff] }
 0x571   : > { %3275 = vst.msk [vmem:[#allocation4 + $0xc8] sm:$0xff] %vm3249_vm8, %v3204_v44  ;;  %v3600_v20 = vpop.permute.xlu0 %3599  ;;  %5088 = vmatprep.mubr.msk.f32.mxu1 %vm3720_vm13, %v3704_v54 }
 0x572   : > { %3673 = vst.msk [vmem:[#allocation4 + $0xb8] sm:$0xff] %vm3649_vm12, %v3600_v20 }
 0x574   : > { %v2937_v22 = vpop.permute.xlu1 %2936 }
 0x575   : > { %v5060_v62 = vpop.f32.mrb[18].mxu1  ;;  %3007 = vst.msk [vmem:[#allocation4 + $0xd0] sm:$0xff] %vm2980_vm6, %v2937_v22  ;;  %v3333_v42 = vpop.permute.xlu0 %3332 }
 0x576   : > { %v3899_v18 = vadd.f32 %v5060_v62, %v8295_v50  ;;  %v3893_v33 = vpop.f32.mrb[19].mxu1  ;;  %3405 = vst.msk [vmem:[#allocation4 + $0xc0] sm:$0xff] %vm3380_vm10, %v3333_v42 }
 0x577   : > { %v3894_v58 = vadd.f32 %v8295_v50, %v3893_v33 }
 0x578   : > { %vm4045_vm3 = vcmp.gt.f32.partialorder %v3899_v18, 0.0  ;;  %v4077_v5 = vmul.f32 0.01, %v3899_v18  ;;  %v3468_v24 = vpop.permute.xlu1 %3467 }
 0x579   : > { %vm4044_vm9 = vcmp.gt.f32.partialorder %v3894_v58, 0.0  ;;  %v4076_v11 = vmul.f32 0.01, %v3894_v58  ;;  %3540 = vst.msk [vmem:[#allocation4 + $0xc0] sm:$0xff] %vm3515_vm11, %v3468_v24  ;;  %v3335_v32 = vpop.permute.xlu0 %3334  ;;  %v3705_v57 = vld [vmem:[#allocation4 + $0xb8] sm:$0xff] }
 0x57a   : > { %v4109_v60 = vsel %vm4045_vm3, %v3899_v18, %v4077_v5  ;;  %3406 = vst.msk [vmem:[#allocation4 + $0xc8] sm:$0xff] %vm3380_vm10, %v3335_v32  ;;  %5089 = vmatmul.mubr.msk.f32.gmra.mrb[38].mxu1 %vm3720_vm13, %v3705_v57 }
 0x57b   : > { %4141 = vst.msk [vmem:[%s8307_s19 + $0x18] sm:$0xff] %vm2231_vm14, %v4109_v60  ;;  %v4108_v48 = vsel %vm4044_vm9, %v3894_v58, %v4076_v11  ;;  %vm4564_vm9 = vcmask 57344  }
 0x57c   : > { %4140 = vst.msk [vmem:[%s8307_s19 + $0x10] sm:$0xff] %vm2231_vm14, %v4108_v48  ;;  %v3072_v25 = vpop.permute.xlu1 %3071 }
 0x57d   : > { %3142 = vst.msk [vmem:[#allocation4 + $0xd0] sm:$0xff] %vm3115_vm7, %v3072_v25  ;;  %v2939_v14 = vpop.permute.xlu0 %2938 }
 0x57e   : > { %3008 = vst.msk [vmem:[#allocation4 + $0xd8] sm:$0xff] %vm2980_vm6, %v2939_v14 }
 0x580   : > { %v3602_v53 = vpop.permute.xlu1 %3601 }
 0x581   : > { %3674 = vst.msk [vmem:[#allocation4 + $0xc0] sm:$0xff] %vm3649_vm12, %v3602_v53  ;;  %v3470_v49 = vpop.permute.xlu0 %3469 }
 0x582   : > { %3541 = vst.msk [vmem:[#allocation4 + $0xc8] sm:$0xff] %vm3515_vm11, %v3470_v49 }
 0x584   : > { %v3206_v43 = vpop.permute.xlu1 %3205 }
 0x585   : > { %3276 = vst.msk [vmem:[#allocation4 + $0xd0] sm:$0xff] %vm3249_vm8, %v3206_v43  ;;  %v3074_v13 = vpop.permute.xlu0 %3073 }
 0x586   : > { %3143 = vst.msk [vmem:[#allocation4 + $0xd8] sm:$0xff] %vm3115_vm7, %v3074_v13 }
 0x588   : > { %v3208_v12 = vpop.permute.xlu1 %3207  ;;  %v3706_v17 = vld [vmem:[#allocation4 + $0xc0] sm:$0xff] }
 0x589   : > { %v5063_v0 = vpop.f32.mrb[20].mxu1  ;;  %3277 = vst.msk [vmem:[#allocation4 + $0xd8] sm:$0xff] %vm3249_vm8, %v3208_v12  ;;  %v3604_v56 = vpop.permute.xlu0 %3603  ;;  %5091 = vmatprep.mubr.msk.f32.mxu1 %vm3720_vm13, %v3706_v17 }
 0x58a   : > { %v3909_v27 = vadd.f32 %v5063_v0, %v8295_v50  ;;  %v3903_v26 = vpop.f32.mrb[21].mxu1  ;;  %3675 = vst.msk [vmem:[#allocation4 + $0xc8] sm:$0xff] %vm3649_vm12, %v3604_v56 }
 0x58b   : > { %v3904_v51 = vadd.f32 %v8295_v50, %v3903_v26 }
 0x58c   : > { %vm4047_vm15 = vcmp.gt.f32.partialorder %v3909_v27, 0.0  ;;  %v4079_v38 = vmul.f32 0.01, %v3909_v27  ;;  %v2941_v47 = vpop.permute.xlu1 %2940 }
 0x58d   : > { %vm4046_vm4 = vcmp.gt.f32.partialorder %v3904_v51, 0.0  ;;  %v4078_v28 = vmul.f32 0.01, %v3904_v51  ;;  %3009 = vst.msk [vmem:[#allocation4 + $0xe0] sm:$0xff] %vm2980_vm6, %v2941_v47  ;;  %v3337_v15 = vpop.permute.xlu0 %3336 }
 0x58e   : > { %v4111_v55 = vsel %vm4047_vm15, %v3909_v27, %v4079_v38  ;;  %3407 = vst.msk [vmem:[#allocation4 + $0xd0] sm:$0xff] %vm3380_vm10, %v3337_v15 }
 0x58f   : > { %4143 = vst.msk [vmem:[%s8307_s19 + $0x28] sm:$0xff] %vm2231_vm14, %v4111_v55  ;;  %v4110_v29 = vsel %vm4046_vm4, %v3904_v51, %v4078_v28 }
 0x590   : > { %4142 = vst.msk [vmem:[%s8307_s19 + $0x20] sm:$0xff] %vm2231_vm14, %v4110_v29  ;;  %v3472_v35 = vpop.permute.xlu1 %3471 }
 0x591   : > { %3542 = vst.msk [vmem:[#allocation4 + $0xd0] sm:$0xff] %vm3515_vm11, %v3472_v35  ;;  %v3339_v61 = vpop.permute.xlu0 %3338  ;;  %v3707_v1 = vld [vmem:[#allocation4 + $0xc8] sm:$0xff] }
 0x592   : > { %3408 = vst.msk [vmem:[#allocation4 + $0xd8] sm:$0xff] %vm3380_vm10, %v3339_v61  ;;  %5092 = vmatmul.mubr.msk.f32.gmra.mrb[40].mxu1 %vm3720_vm13, %v3707_v1 }
 0x594   : > { %v3076_v19 = vpop.permute.xlu1 %3075 }
 0x595   : > { %3144 = vst.msk [vmem:[#allocation4 + $0xe0] sm:$0xff] %vm3115_vm7, %v3076_v19  ;;  %v2943_v41 = vpop.permute.xlu0 %2942 }
 0x596   : > { %3010 = vst.msk [vmem:[#allocation4 + $0xe8] sm:$0xff] %vm2980_vm6, %v2943_v41 }
 0x598   : > { %v3606_v39 = vpop.permute.xlu1 %3605 }
 0x599   : > { %3676 = vst.msk [vmem:[#allocation4 + $0xd0] sm:$0xff] %vm3649_vm12, %v3606_v39  ;;  %v3474_v9 = vpop.permute.xlu0 %3473 }
 0x59a   : > { %3543 = vst.msk [vmem:[#allocation4 + $0xd8] sm:$0xff] %vm3515_vm11, %v3474_v9 }
 0x59c   : > { %v3210_v36 = vpop.permute.xlu1 %3209 }
 0x59d   : > { %v5066_v40 = vpop.f32.mrb[22].mxu1  ;;  %3278 = vst.msk [vmem:[#allocation4 + $0xe0] sm:$0xff] %vm3249_vm8, %v3210_v36  ;;  %v3078_v23 = vpop.permute.xlu0 %3077 }
 0x59e   : > { %v3919_v45 = vadd.f32 %v5066_v40, %v8295_v50  ;;  %v3913_v21 = vpop.f32.mrb[23].mxu1  ;;  %3145 = vst.msk [vmem:[#allocation4 + $0xe8] sm:$0xff] %vm3115_vm7, %v3078_v23 }
 0x59f   : > { %v3914_v34 = vadd.f32 %v8295_v50, %v3913_v21 }
 0x5a0   : > { %vm4049_vm1 = vcmp.gt.f32.partialorder %v3919_v45, 0.0  ;;  %v4081_v37 = vmul.f32 0.01, %v3919_v45  ;;  %v3212_v4 = vpop.permute.xlu1 %3211  ;;  %v3708_v16 = vld [vmem:[#allocation4 + $0xd0] sm:$0xff] }
 0x5a1   : > { %vm4048_vm5 = vcmp.gt.f32.partialorder %v3914_v34, 0.0  ;;  %v4080_v31 = vmul.f32 0.01, %v3914_v34  ;;  %3279 = vst.msk [vmem:[#allocation4 + $0xe8] sm:$0xff] %vm3249_vm8, %v3212_v4  ;;  %v3608_v7 = vpop.permute.xlu0 %3607  ;;  %5094 = vmatprep.mubr.msk.f32.mxu1 %vm3720_vm13, %v3708_v16 }
 0x5a2   : > { %v4113_v63 = vsel %vm4049_vm1, %v3919_v45, %v4081_v37  ;;  %3677 = vst.msk [vmem:[#allocation4 + $0xd8] sm:$0xff] %vm3649_vm12, %v3608_v7 }
 0x5a3   : > { %4145 = vst.msk [vmem:[%s8307_s19 + $0x38] sm:$0xff] %vm2231_vm14, %v4113_v63  ;;  %v4112_v46 = vsel %vm4048_vm5, %v3914_v34, %v4080_v31 }
 0x5a4   : > { %4144 = vst.msk [vmem:[%s8307_s19 + $0x30] sm:$0xff] %vm2231_vm14, %v4112_v46  ;;  %v2945_v10 = vpop.permute.xlu1 %2944 }
 0x5a5   : > { %3011 = vst.msk [vmem:[#allocation4 + $0xf0] sm:$0xff] %vm2980_vm6, %v2945_v10  ;;  %v3341_v3 = vpop.permute.xlu0 %3340 }
 0x5a6   : > { %3409 = vst.msk [vmem:[#allocation4 + $0xe0] sm:$0xff] %vm3380_vm10, %v3341_v3 }
 0x5a8   : > { %v3476_v52 = vpop.permute.xlu1 %3475 }
 0x5a9   : > { %3544 = vst.msk [vmem:[#allocation4 + $0xe0] sm:$0xff] %vm3515_vm11, %v3476_v52  ;;  %v3343_v30 = vpop.permute.xlu0 %3342  ;;  %v3709_v6 = vld [vmem:[#allocation4 + $0xd8] sm:$0xff] }
 0x5aa   : > { %3410 = vst.msk [vmem:[#allocation4 + $0xe8] sm:$0xff] %vm3380_vm10, %v3343_v30  ;;  %5095 = vmatmul.mubr.msk.f32.gmra.mrb[42].mxu1 %vm3720_vm13, %v3709_v6 }
 0x5ac   : > { %v3080_v59 = vpop.permute.xlu1 %3079 }
 0x5ad   : > { %3146 = vst.msk [vmem:[#allocation4 + $0xf0] sm:$0xff] %vm3115_vm7, %v3080_v59  ;;  %v2947_v8 = vpop.permute.xlu0 %2946 }
 0x5ae   : > { %3012 = vst.msk [vmem:[#allocation4 + $0xf8] sm:$0xff] %vm2980_vm6, %v2947_v8 }
 0x5b0   : > { %v3610_v2 = vpop.permute.xlu1 %3609 }
 0x5b1   : > { %v5069_v44 = vpop.f32.mrb[24].mxu1  ;;  %3678 = vst.msk [vmem:[#allocation4 + $0xe0] sm:$0xff] %vm3649_vm12, %v3610_v2  ;;  %v3478_v54 = vpop.permute.xlu0 %3477 }
 0x5b2   : > { %v3929_v20 = vadd.f32 %v5069_v44, %v8295_v50  ;;  %v3923_v22 = vpop.f32.mrb[25].mxu1  ;;  %3545 = vst.msk [vmem:[#allocation4 + $0xe8] sm:$0xff] %vm3515_vm11, %v3478_v54 }
 0x5b3   : > { %v3924_v62 = vadd.f32 %v8295_v50, %v3923_v22 }
 0x5b4   : > { %vm4051_vm0 = vcmp.gt.f32.partialorder %v3929_v20, 0.0  ;;  %v4083_v18 = vmul.f32 0.01, %v3929_v20  ;;  %v3214_v33 = vpop.permute.xlu1 %3213 }
 0x5b5   : > { %vm4050_vm2 = vcmp.gt.f32.partialorder %v3924_v62, 0.0  ;;  %v4082_v42 = vmul.f32 0.01, %v3924_v62  ;;  %3280 = vst.msk [vmem:[#allocation4 + $0xf0] sm:$0xff] %vm3249_vm8, %v3214_v33  ;;  %v3082_v5 = vpop.permute.xlu0 %3081 }
 0x5b6   : > { %v4115_v58 = vsel %vm4051_vm0, %v3929_v20, %v4083_v18  ;;  %3147 = vst.msk [vmem:[#allocation4 + $0xf8] sm:$0xff] %vm3115_vm7, %v3082_v5 }
 0x5b7   : > { %4147 = vst.msk [vmem:[%s8307_s19 + $0x48] sm:$0xff] %vm2231_vm14, %v4115_v58  ;;  %v4114_v11 = vsel %vm4050_vm2, %v3924_v62, %v4082_v42 }
 0x5b8   : > { %4146 = vst.msk [vmem:[%s8307_s19 + $0x40] sm:$0xff] %vm2231_vm14, %v4114_v11  ;;  %v3216_v24 = vpop.permute.xlu1 %3215  ;;  %v3710_v60 = vld [vmem:[#allocation4 + $0xe0] sm:$0xff] }
 0x5b9   : > { %3281 = vst.msk [vmem:[#allocation4 + $0xf8] sm:$0xff] %vm3249_vm8, %v3216_v24  ;;  %v3612_v32 = vpop.permute.xlu0 %3611  ;;  %5097 = vmatprep.mubr.msk.f32.mxu1 %vm3720_vm13, %v3710_v60 }
 0x5ba   : > { %3679 = vst.msk [vmem:[#allocation4 + $0xe8] sm:$0xff] %vm3649_vm12, %v3612_v32 }
 0x5bb   : > { %v5107_v47 = vpop.f32.mrb[16].mxu0 }
 0x5bc   : > { %v3347_v57 = vpop.permute.xlu1 %3346  ;;  %v4336_v55 = vpop.f32.mrb[17].mxu0  ;;  %v4496_v15 = vsel %vm2231_vm14, %v5107_v47, 0.0  ;;  %v4567_v29 = vmul.f32 %v5107_v47, %v5107_v47 }
 0x5bd   : > { %v3345_v48 = vpop.permute.xlu0 %3344  ;;  %3412 = vst.msk [vmem:[#allocation4 + $0xf8] sm:$0xff] %vm3380_vm10, %v3347_v57  ;;  %v4495_v35 = vsel %vm2231_vm14, %v4336_v55, 0.0  ;;  %v4566_v61 = vmul.f32 %v4336_v55, %v4336_v55 }
 0x5be   : > { %3411 = vst.msk [vmem:[#allocation4 + $0xf0] sm:$0xff] %vm3380_vm10, %v3345_v48  ;;  %v4497_v19 = vadd.f32 %v4496_v15, %v4495_v35  ;;  %v4599_v36 = vsel %vm2231_vm14, %v4567_v29, 0.0 }
 0x5bf   : > { %v5110_v1 = vpop.f32.mrb[18].mxu0  ;;  %v4598_v40 = vsel %vm2231_vm14, %v4566_v61, 0.0 }
 0x5c0   : > { %v3482_v25 = vpop.permute.xlu1 %3481  ;;  %v4500_v41 = vsel %vm2231_vm14, %v5110_v1, 0.0  ;;  %v4569_v39 = vmul.f32 %v5110_v1, %v5110_v1  ;;  %v4346_v9 = vpop.f32.mrb[19].mxu0  ;;  %v4600_v34 = vadd.f32 %v4599_v36, %v4598_v40 }
 0x5c1   : > { %v3480_v14 = vpop.permute.xlu0 %3479  ;;  %3547 = vst.msk [vmem:[#allocation4 + $0xf8] sm:$0xff] %vm3515_vm11, %v3482_v25  ;;  %v3711_v53 = vld [vmem:[#allocation4 + $0xe8] sm:$0xff]  ;;  %v4498_v23 = vsel %vm2231_vm14, %v4346_v9, 0.0  ;;  %v4568_v45 = vmul.f32 %v4346_v9, %v4346_v9 }
 0x5c2   : > { %3546 = vst.msk [vmem:[#allocation4 + $0xf0] sm:$0xff] %vm3515_vm11, %v3480_v14  ;;  %5098 = vmatmul.mubr.msk.f32.gmra.mrb[44].mxu1 %vm3720_vm13, %v3711_v53  ;;  %v4603_v37 = vsel %vm2231_vm14, %v4569_v39, 0.0  ;;  %v4499_v31 = vadd.f32 %v4498_v23, %v4497_v19 }
 0x5c3   : > { %v5113_v21 = vpop.f32.mrb[20].mxu0  ;;  %v4601_v63 = vsel %vm2231_vm14, %v4568_v45, 0.0 }
 0x5c4   : > { %v3616_v43 = vpop.permute.xlu1 %3615  ;;  %v4356_v4 = vpop.f32.mrb[21].mxu0  ;;  %v4571_v7 = vmul.f32 %v5113_v21, %v5113_v21  ;;  %v4602_v6 = vadd.f32 %v4601_v63, %v4600_v34  ;;  %v4501_v59 = vadd.f32 %v4500_v41, %v4499_v31  ;;  %v4504_v44 = vsel %vm2231_vm14, %v5113_v21, 0.0 }
 0x5c5   : > { %v5072_v49 = vpop.f32.mrb[26].mxu1  ;;  %v3614_v13 = vpop.permute.xlu0 %3613  ;;  %3681 = vst.msk [vmem:[#allocation4 + $0xf8] sm:$0xff] %vm3649_vm12, %v3616_v43  ;;  %v4502_v46 = vsel %vm2231_vm14, %v4356_v4, 0.0  ;;  %v4570_v10 = vmul.f32 %v4356_v4, %v4356_v4 }
 0x5c6   : > { %v3939_v12 = vadd.f32 %v5072_v49, %v8295_v50  ;;  %v3933_v0 = vpop.f32.mrb[27].mxu1  ;;  %3680 = vst.msk [vmem:[#allocation4 + $0xf0] sm:$0xff] %vm3649_vm12, %v3614_v13  ;;  %v4607_v54 = vsel %vm2231_vm14, %v4571_v7, 0.0  ;;  %v4503_v18 = vadd.f32 %v4502_v46, %v4501_v59  ;;  %v4604_v42 = vadd.f32 %v4603_v37, %v4602_v6 }
 0x5c7   : > { %v3934_v17 = vadd.f32 %v8295_v50, %v3933_v0  ;;  %v5116_v3 = vpop.f32.mrb[22].mxu0  ;;  %v4605_v20 = vsel %vm2231_vm14, %v4570_v10, 0.0 }
 0x5c8   : > { %vm4053_vm6 = vcmp.gt.f32.partialorder %v3939_v12, 0.0  ;;  %v4085_v56 = vmul.f32 0.01, %v3939_v12  ;;  %v4366_v8 = vpop.f32.mrb[23].mxu0  ;;  %v4573_v5 = vmul.f32 %v5116_v3, %v5116_v3  ;;  %v4606_v32 = vadd.f32 %v4605_v20, %v4604_v42 }
 0x5c9   : > { %vm4052_vm7 = vcmp.gt.f32.partialorder %v3934_v17, 0.0  ;;  %v4084_v27 = vmul.f32 0.01, %v3934_v17  ;;  %v4506_v11 = vsel %vm2231_vm14, %v4366_v8, 0.0  ;;  %v4505_v57 = vadd.f32 %v4504_v44, %v4503_v18 }
 0x5ca   : > { %v4117_v26 = vsel %vm4053_vm6, %v3939_v12, %v4085_v56  ;;  %v4572_v48 = vmul.f32 %v4366_v8, %v4366_v8  ;;  %v4508_v53 = vsel %vm2231_vm14, %v5116_v3, 0.0  ;;  %v4608_v43 = vadd.f32 %v4607_v54, %v4606_v32 }
 0x5cb   : > { %4149 = vst.msk [vmem:[%s8307_s19 + $0x58] sm:$0xff] %vm2231_vm14, %v4117_v26  ;;  %v4116_v51 = vsel %vm4052_vm7, %v3934_v17, %v4084_v27  ;;  %v5119_v22 = vpop.f32.mrb[24].mxu0  ;;  %v4507_v49 = vadd.f32 %v4506_v11, %v4505_v57  ;;  %v4611_v0 = vsel %vm2231_vm14, %v4573_v5, 0.0 }
 0x5cc   : > { %4148 = vst.msk [vmem:[%s8307_s19 + $0x50] sm:$0xff] %vm2231_vm14, %v4116_v51  ;;  %v3713_v38 = vld [vmem:[#allocation4 + $0xf8] sm:$0xff]  ;;  %v4376_v33 = vpop.f32.mrb[25].mxu0  ;;  %v4609_v13 = vsel %vm2231_vm14, %v4572_v48, 0.0  ;;  %v4575_v17 = vmul.f32 %v5119_v22, %v5119_v22  ;;  %v4512_v51 = vsel %vm2231_vm14, %v5119_v22, 0.0 }
 0x5cd   : > { %v3712_v28 = vld [vmem:[#allocation4 + $0xf0] sm:$0xff]  ;;  %v4574_v12 = vmul.f32 %v4376_v33, %v4376_v33  ;;  %v4510_v56 = vsel %vm2231_vm14, %v4376_v33, 0.0  ;;  %v4610_v27 = vadd.f32 %v4609_v13, %v4608_v43  ;;  %v4509_v26 = vadd.f32 %v4508_v53, %v4507_v49 }
 0x5ce   : > { %5100 = vmatprep.mubr.msk.f32.mxu1 %vm3720_vm13, %v3712_v28  ;;  %v4615_v15 = vsel %vm2231_vm14, %v4575_v17, 0.0 }
 0x5cf   : > { %5101 = vmatmul.mubr.msk.f32.gmra.mrb[46].mxu1 %vm3720_vm13, %v3713_v38  ;;  %v5122_v24 = vpop.f32.mrb[26].mxu0  ;;  %v4613_v38 = vsel %vm2231_vm14, %v4574_v12, 0.0  ;;  %v4511_v47 = vadd.f32 %v4510_v56, %v4509_v26  ;;  %v4612_v55 = vadd.f32 %v4611_v0, %v4610_v27 }
 0x5d0   : > { %v4386_v25 = vpop.f32.mrb[27].mxu0  ;;  %v4577_v29 = vmul.f32 %v5122_v24, %v5122_v24  ;;  %v4516_v19 = vsel %vm2231_vm14, %v5122_v24, 0.0 }
 0x5d1   : > { %v4576_v28 = vmul.f32 %v4386_v25, %v4386_v25  ;;  %v4514_v35 = vsel %vm2231_vm14, %v4386_v25, 0.0  ;;  %v4614_v61 = vadd.f32 %v4613_v38, %v4612_v55  ;;  %v4513_v1 = vadd.f32 %v4512_v51, %v4511_v47 }
 0x5d2   : > { %v4619_v36 = vsel %vm2231_vm14, %v4577_v29, 0.0 }
 0x5d3   : > { %v4617_v41 = vsel %vm2231_vm14, %v4576_v28, 0.0  ;;  %v4515_v39 = vadd.f32 %v4514_v35, %v4513_v1  ;;  %v4616_v9 = vadd.f32 %v4615_v15, %v4614_v61  ;;  %v5125_v40 = vpop.f32.mrb[28].mxu0 }
 0x5d4   : > { %v4396_v45 = vpop.f32.mrb[29].mxu0  ;;  %v4520_v63 = vsel %vm2231_vm14, %v5125_v40, 0.0  ;;  %v4579_v7 = vmul.f32 %v5125_v40, %v5125_v40 }
 0x5d5   : > { %v4618_v23 = vadd.f32 %v4617_v41, %v4616_v9  ;;  %v4517_v21 = vadd.f32 %v4516_v19, %v4515_v39  ;;  %v4518_v34 = vsel %vm2231_vm14, %v4396_v45, 0.0  ;;  %v4578_v37 = vmul.f32 %v4396_v45, %v4396_v45 }
 0x5d7   : > { %v4519_v31 = vadd.f32 %v4518_v34, %v4517_v21  ;;  %v4620_v4 = vadd.f32 %v4619_v36, %v4618_v23  ;;  %v4621_v46 = vsel %vm2231_vm14, %v4578_v37, 0.0  ;;  %v5128_v10 = vpop.f32.mrb[30].mxu0 }
 0x5d8   : > { %v4581_v6 = vmul.f32 %v5128_v10, %v5128_v10  ;;  %v4406_v59 = vpop.f32.mrb[31].mxu0 }
 0x5d9   : > { %v5075_v16 = vpop.f32.mrb[28].mxu1  ;;  %v4521_v44 = vadd.f32 %v4520_v63, %v4519_v31  ;;  %v4522_v54 = vsel %vm2231_vm14, %v4406_v59, 0.0  ;;  %v4580_v18 = vmul.f32 %v4406_v59, %v4406_v59 }
 0x5da   : > { %v3949_v52 = vadd.f32 %v5075_v16, %v8295_v50  ;;  %v3943_v30 = vpop.f32.mrb[29].mxu1 }
 0x5db   : > { %v3944_v2 = vadd.f32 %v8295_v50, %v3943_v30  ;;  %v4622_v30 = vadd.f32 %v4621_v46, %v4620_v4  ;;  %v5131_v20 = vpop.f32.mrb[32].mxu0  ;;  %v4625_v32 = vsel %vm2231_vm14, %v4580_v18, 0.0 }
 0x5dc   : > { %vm4055_vm8 = vcmp.gt.f32.partialorder %v3949_v52, 0.0  ;;  %v4087_v62 = vmul.f32 0.01, %v3949_v52  ;;  %v4416_v42 = vpop.f32.mrb[33].mxu0  ;;  %v4583_v57 = vmul.f32 %v5131_v20, %v5131_v20  ;;  %v4528_v13 = vsel %vm2231_vm14, %v5131_v20, 0.0 }
 0x5dd   : > { %vm4054_vm10 = vcmp.gt.f32.partialorder %v3944_v2, 0.0  ;;  %v4086_v58 = vmul.f32 0.01, %v3944_v2  ;;  %v4526_v49 = vsel %vm2231_vm14, %v4416_v42, 0.0  ;;  %v4582_v12 = vmul.f32 %v4416_v42, %v4416_v42 }
 0x5de   : > { %v4119_v60 = vsel %vm4055_vm8, %v3949_v52, %v4087_v62  ;;  %v4524_v62 = vsel %vm2231_vm14, %v5128_v10, 0.0  ;;  %v4631_v51 = vsel %vm2231_vm14, %v4583_v57, 0.0 }
 0x5df   : > { %4151 = vst.msk [vmem:[%s8307_s19 + $0x68] sm:$0xff] %vm2231_vm14, %v4119_v60  ;;  %v4118_v14 = vsel %vm4054_vm10, %v3944_v2, %v4086_v58  ;;  %v4623_v2 = vsel %vm2231_vm14, %v4579_v7, 0.0  ;;  %v4523_v58 = vadd.f32 %v4522_v54, %v4521_v44  ;;  %v5134_v11 = vpop.f32.mrb[34].mxu0  ;;  %v4627_v60 = vsel %vm2231_vm14, %v4581_v6, 0.0 }
 0x5e0   : > { %4150 = vst.msk [vmem:[%s8307_s19 + $0x60] sm:$0xff] %vm2231_vm14, %v4118_v14  ;;  %v4624_v5 = vadd.f32 %v4623_v2, %v4622_v30  ;;  %v4426_v48 = vpop.f32.mrb[35].mxu0  ;;  %v4629_v38 = vsel %vm2231_vm14, %v4582_v12, 0.0  ;;  %v4585_v28 = vmul.f32 %v5134_v11, %v5134_v11  ;;  %v4532_v35 = vsel %vm2231_vm14, %v5134_v11, 0.0 }
 0x5e1   : > { %v4525_v53 = vadd.f32 %v4524_v62, %v4523_v58  ;;  %v4584_v27 = vmul.f32 %v4426_v48, %v4426_v48  ;;  %v4530_v47 = vsel %vm2231_vm14, %v4426_v48, 0.0 }
 0x5e2   : > { %v4626_v14 = vadd.f32 %v4625_v32, %v4624_v5  ;;  %v4635_v39 = vsel %vm2231_vm14, %v4585_v28, 0.0 }
 0x5e3   : > { %v5137_v43 = vpop.f32.mrb[36].mxu0  ;;  %v4527_v17 = vadd.f32 %v4526_v49, %v4525_v53  ;;  %v4633_v61 = vsel %vm2231_vm14, %v4584_v27, 0.0 }
 0x5e4   : > { %v4436_v0 = vpop.f32.mrb[37].mxu0  ;;  %v4628_v56 = vadd.f32 %v4627_v60, %v4626_v14  ;;  %v4587_v9 = vmul.f32 %v5137_v43, %v5137_v43  ;;  %v4536_v45 = vsel %vm2231_vm14, %v5137_v43, 0.0 }
 0x5e5   : > { %v4529_v29 = vadd.f32 %v4528_v13, %v4527_v17  ;;  %v4586_v1 = vmul.f32 %v4436_v0, %v4436_v0  ;;  %v4534_v36 = vsel %vm2231_vm14, %v4436_v0, 0.0 }
 0x5e6   : > { %v4630_v15 = vadd.f32 %v4629_v38, %v4628_v56  ;;  %v4639_v4 = vsel %vm2231_vm14, %v4587_v9, 0.0 }
 0x5e7   : > { %v5140_v26 = vpop.f32.mrb[38].mxu0  ;;  %v4531_v19 = vadd.f32 %v4530_v47, %v4529_v29  ;;  %v4637_v21 = vsel %vm2231_vm14, %v4586_v1, 0.0 }
 0x5e8   : > { %v4446_v55 = vpop.f32.mrb[39].mxu0  ;;  %v4632_v41 = vadd.f32 %v4631_v51, %v4630_v15  ;;  %v4540_v10 = vsel %vm2231_vm14, %v5140_v26, 0.0 }
 0x5e9   : > { %v4533_v23 = vadd.f32 %v4532_v35, %v4531_v19  ;;  %v4588_v34 = vmul.f32 %v4446_v55, %v4446_v55  ;;  %v4538_v63 = vsel %vm2231_vm14, %v4446_v55, 0.0 }
 0x5ea   : > { %v4634_v40 = vadd.f32 %v4633_v61, %v4632_v41 }
 0x5eb   : > { %v4535_v37 = vadd.f32 %v4534_v36, %v4533_v23  ;;  %v5143_v6 = vpop.f32.mrb[40].mxu0 }
 0x5ec   : > { %v4636_v31 = vadd.f32 %v4635_v39, %v4634_v40  ;;  %v4544_v62 = vsel %vm2231_vm14, %v5143_v6, 0.0  ;;  %v4591_v18 = vmul.f32 %v5143_v6, %v5143_v6 }
 0x5ed   : > { %v5078_v16 = vpop.f32.mrb[30].mxu1  ;;  %v4537_v46 = vadd.f32 %v4536_v45, %v4535_v37 }
 0x5ee   : > { %v3959_v3 = vadd.f32 %v5078_v16, %v8295_v50  ;;  %v3953_v52 = vpop.f32.mrb[31].mxu1  ;;  %v4589_v16 = vmul.f32 %v5140_v26, %v5140_v26  ;;  %v4638_v7 = vadd.f32 %v4637_v21, %v4636_v31  ;;  %v4647_v48 = vsel %vm2231_vm14, %v4591_v18, 0.0 }
 0x5ef   : > { %v3954_v8 = vadd.f32 %v8295_v50, %v3953_v52  ;;  %v4539_v52 = vadd.f32 %v4538_v63, %v4537_v46 }
 0x5f0   : > { %vm4057_vm11 = vcmp.gt.f32.partialorder %v3959_v3, 0.0  ;;  %v4089_v22 = vmul.f32 0.01, %v3959_v3  ;;  %v4640_v30 = vadd.f32 %v4639_v4, %v4638_v7  ;;  %v4643_v59 = vsel %vm2231_vm14, %v4589_v16, 0.0 }
 0x5f1   : > { %vm4056_vm12 = vcmp.gt.f32.partialorder %v3954_v8, 0.0  ;;  %v4088_v33 = vmul.f32 0.01, %v3954_v8  ;;  %v4541_v44 = vadd.f32 %v4540_v10, %v4539_v52 }
 0x5f2   : > { %v4121_v24 = vsel %vm4057_vm11, %v3959_v3, %v4089_v22  ;;  %v4641_v3 = vsel %vm2231_vm14, %v4588_v34, 0.0 }
 0x5f3   : > { %4153 = vst.msk [vmem:[%s8307_s19 + $0x78] sm:$0xff] %vm2231_vm14, %v4121_v24  ;;  %v4120_v25 = vsel %vm4056_vm12, %v3954_v8, %v4088_v33  ;;  %v4456_v8 = vpop.f32.mrb[41].mxu0  ;;  %v4642_v2 = vadd.f32 %v4641_v3, %v4640_v30 }
 0x5f4   : > { %4152 = vst.msk [vmem:[%s8307_s19 + $0x70] sm:$0xff] %vm2231_vm14, %v4120_v25  ;;  %v4542_v54 = vsel %vm2231_vm14, %v4456_v8, 0.0  ;;  %v4590_v20 = vmul.f32 %v4456_v8, %v4456_v8  ;;  %v5146_v58 = vpop.f32.mrb[42].mxu0 }
 0x5f5   : > { %v4543_v42 = vadd.f32 %v4542_v54, %v4541_v44  ;;  %v4644_v33 = vadd.f32 %v4643_v59, %v4642_v2  ;;  %v4593_v60 = vmul.f32 %v5146_v58, %v5146_v58  ;;  %v4466_v32 = vpop.f32.mrb[43].mxu0  ;;  %v4548_v43 = vsel %vm2231_vm14, %v5146_v58, 0.0 }
 0x5f6   : > { %v4645_v24 = vsel %vm2231_vm14, %v4590_v20, 0.0  ;;  %v5149_v53 = vpop.f32.mrb[44].mxu0  ;;  %v4546_v13 = vsel %vm2231_vm14, %v4466_v32, 0.0  ;;  %v4592_v56 = vmul.f32 %v4466_v32, %v4466_v32 }
 0x5f7   : > { %v4646_v25 = vadd.f32 %v4645_v24, %v4644_v33  ;;  %v4545_v14 = vadd.f32 %v4544_v62, %v4543_v42  ;;  %v4476_v12 = vpop.f32.mrb[45].mxu0  ;;  %v4651_v51 = vsel %vm2231_vm14, %v4593_v60, 0.0  ;;  %v4595_v28 = vmul.f32 %v5149_v53, %v5149_v53 }
 0x5f8   : > { %v5152_v27 = vpop.f32.mrb[46].mxu0  ;;  %v4649_v15 = vsel %vm2231_vm14, %v4592_v56, 0.0  ;;  %v4550_v35 = vsel %vm2231_vm14, %v4476_v12, 0.0  ;;  %v4552_v1 = vsel %vm2231_vm14, %v5149_v53, 0.0  ;;  %v4594_v19 = vmul.f32 %v4476_v12, %v4476_v12 }
 0x5f9   : > { %v4547_v17 = vadd.f32 %v4546_v13, %v4545_v14  ;;  %v4648_v38 = vadd.f32 %v4647_v48, %v4646_v25  ;;  %v4486_v47 = vpop.f32.mrb[47].mxu0  ;;  %v4655_v23 = vsel %vm2231_vm14, %v4595_v28, 0.0  ;;  %v4597_v45 = vmul.f32 %v5152_v27, %v5152_v27 }
 0x5fa   : > { %v4653_v9 = vsel %vm2231_vm14, %v4594_v19, 0.0  ;;  %v4554_v36 = vsel %vm2231_vm14, %v4486_v47, 0.0  ;;  %v4596_v40 = vmul.f32 %v4486_v47, %v4486_v47  ;;  %v4556_v37 = vsel %vm2231_vm14, %v5152_v27, 0.0 }
 0x5fb   : > { %v4549_v29 = vadd.f32 %v4548_v43, %v4547_v17  ;;  %v4650_v61 = vadd.f32 %v4649_v15, %v4648_v38  ;;  %v4659_v63 = vsel %vm2231_vm14, %v4597_v45, 0.0 }
 0x5fc   : > { %v4657_v4 = vsel %vm2231_vm14, %v4596_v40, 0.0 }
 0x5fd   : > { %v4551_v41 = vadd.f32 %v4550_v35, %v4549_v29  ;;  %v4652_v39 = vadd.f32 %v4651_v51, %v4650_v61 }
 0x5ff   : > { %v4553_v21 = vadd.f32 %v4552_v1, %v4551_v41  ;;  %v4654_v34 = vadd.f32 %v4653_v9, %v4652_v39 }
 0x601   : > { %v4555_v31 = vadd.f32 %v4554_v36, %v4553_v21  ;;  %v4656_v16 = vadd.f32 %v4655_v23, %v4654_v34 }
 0x603   : > { %v4557_v7 = vadd.f32 %v4556_v37, %v4555_v31  ;;  %v4658_v46 = vadd.f32 %v4657_v4, %v4656_v16 }
 0x605   : > { %v5081_v22 = vpop.f32.mrb[32].mxu1  ;;  %v4558_v10 = vrot.slane %v4557_v7, 4  ;;  %v4660_v3 = vadd.f32 %v4659_v63, %v4658_v46  ;;  %v5205_v46 = vld [vmem:[%s8539_s4] ss:$0 sm:$0xff] }
 0x606   : > { %v3969_v5 = vadd.f32 %v5081_v22, %v8295_v50  ;;  %v3963_v11 = vpop.f32.mrb[33].mxu1 }
 0x607   : > { %v3964_v57 = vadd.f32 %v8295_v50, %v3963_v11  ;;  %v4559_v52 = vadd.f32 %v4558_v10, %v4557_v7  ;;  %v4661_v30 = vrot.slane %v4660_v3, 4 }
 0x608   : > { %vm4059_vm13 = vcmp.gt.f32.partialorder %v3969_v5, 0.0  ;;  %v4091_v49 = vmul.f32 0.01, %v3969_v5 }
 0x609   : > { %vm4058_vm3 = vcmp.gt.f32.partialorder %v3964_v57, 0.0  ;;  %v4090_v0 = vmul.f32 0.01, %v3964_v57  ;;  %v4560_v6 = vrot.slane %v4559_v52, 2  ;;  %v4662_v59 = vadd.f32 %v4661_v30, %v4660_v3 }
 0x60a   : > { %v4123_v26 = vsel %vm4059_vm13, %v3969_v5, %v4091_v49 }
 0x60b   : > { %4155 = vst.msk [vmem:[%s8307_s19 + $0x88] sm:$0xff] %vm2231_vm14, %v4123_v26  ;;  %v4122_v55 = vsel %vm4058_vm3, %v3964_v57, %v4090_v0  ;;  %v4561_v8 = vadd.f32 %v4560_v6, %v4559_v52  ;;  %v4663_v2 = vrot.slane %v4662_v59, 2 }
 0x60c   : > { %4154 = vst.msk [vmem:[%s8307_s19 + $0x80] sm:$0xff] %vm2231_vm14, %v4122_v55 }
 0x60d   : > { %v4562_v54 = vrot.slane %v4561_v8, 1  ;;  %v4664_v62 = vadd.f32 %v4663_v2, %v4662_v59 }
 0x60f   : > { %v4563_v42 = vadd.f32 %v4562_v54, %v4561_v8  ;;  %v4665_v58 = vrot.slane %v4664_v62, 1 }
 0x611   : > { %4565 = vst.msk [vmem:[%s289_s22] sm:$0x1] %vm4564_vm9, %v4563_v42  ;;  %v4666_v24 = vadd.f32 %v4665_v58, %v4664_v62 }
 0x613   : > { %4667 = vst.msk [vmem:[%s289_s22 + $0x1] sm:$0x1] %vm4564_vm9, %v4666_v24 }
 0x61d   : > { %v5084_v44 = vpop.f32.mrb[34].mxu1 }
 0x61e   : > { %v3979_v20 = vadd.f32 %v5084_v44, %v8295_v50  ;;  %v3973_v22 = vpop.f32.mrb[35].mxu1 }
 0x61f   : > { %v3974_v18 = vadd.f32 %v8295_v50, %v3973_v22 }
 0x620   : > { %vm4061_vm15 = vcmp.gt.f32.partialorder %v3979_v20, 0.0  ;;  %v4093_v33 = vmul.f32 0.01, %v3979_v20 }
 0x621   : > { %vm4060_vm4 = vcmp.gt.f32.partialorder %v3974_v18, 0.0  ;;  %v4092_v5 = vmul.f32 0.01, %v3974_v18 }
 0x622   : > { %v4125_v11 = vsel %vm4061_vm15, %v3979_v20, %v4093_v33 }
 0x623   : > { %4157 = vst.msk [vmem:[%s8307_s19 + $0x98] sm:$0xff] %vm2231_vm14, %v4125_v11  ;;  %v4124_v60 = vsel %vm4060_vm4, %v3974_v18, %v4092_v5 }
 0x624   : > { %4156 = vst.msk [vmem:[%s8307_s19 + $0x90] sm:$0xff] %vm2231_vm14, %v4124_v60 }
 0x635   : > { %v5087_v32 = vpop.f32.mrb[36].mxu1 }
 0x636   : > { %v3989_v57 = vadd.f32 %v5087_v32, %v8295_v50  ;;  %v3983_v48 = vpop.f32.mrb[37].mxu1 }
 0x637   : > { %v3984_v25 = vadd.f32 %v8295_v50, %v3983_v48 }
 0x638   : > { %vm4063_vm1 = vcmp.gt.f32.partialorder %v3989_v57, 0.0  ;;  %v4095_v14 = vmul.f32 0.01, %v3989_v57 }
 0x639   : > { %vm4062_vm5 = vcmp.gt.f32.partialorder %v3984_v25, 0.0  ;;  %v4094_v53 = vmul.f32 0.01, %v3984_v25 }
 0x63a   : > { %v4127_v49 = vsel %vm4063_vm1, %v3989_v57, %v4095_v14 }
 0x63b   : > { %4159 = vst.msk [vmem:[%s8307_s19 + $0xa8] sm:$0xff] %vm2231_vm14, %v4127_v49  ;;  %v4126_v43 = vsel %vm4062_vm5, %v3984_v25, %v4094_v53 }
 0x63c   : > { %4158 = vst.msk [vmem:[%s8307_s19 + $0xa0] sm:$0xff] %vm2231_vm14, %v4126_v43 }
 0x64d   : > { %v5090_v13 = vpop.f32.mrb[38].mxu1 }
 0x64e   : > { %v3999_v12 = vadd.f32 %v5090_v13, %v8295_v50  ;;  %v3993_v0 = vpop.f32.mrb[39].mxu1 }
 0x64f   : > { %v3994_v17 = vadd.f32 %v8295_v50, %v3993_v0 }
 0x650   : > { %vm4065_vm0 = vcmp.gt.f32.partialorder %v3999_v12, 0.0  ;;  %v4097_v56 = vmul.f32 0.01, %v3999_v12 }
 0x651   : > { %vm4064_vm2 = vcmp.gt.f32.partialorder %v3994_v17, 0.0  ;;  %v4096_v27 = vmul.f32 0.01, %v3994_v17 }
 0x652   : > { %v4129_v26 = vsel %vm4065_vm0, %v3999_v12, %v4097_v56 }
 0x653   : > { %4161 = vst.msk [vmem:[%s8307_s19 + $0xb8] sm:$0xff] %vm2231_vm14, %v4129_v26  ;;  %v4128_v51 = vsel %vm4064_vm2, %v3994_v17, %v4096_v27 }
 0x654   : > { %4160 = vst.msk [vmem:[%s8307_s19 + $0xb0] sm:$0xff] %vm2231_vm14, %v4128_v51 }
 0x665   : > { %v5093_v38 = vpop.f32.mrb[40].mxu1 }
 0x666   : > { %v4009_v28 = vadd.f32 %v5093_v38, %v8295_v50  ;;  %v4003_v47 = vpop.f32.mrb[41].mxu1 }
 0x667   : > { %v4004_v55 = vadd.f32 %v8295_v50, %v4003_v47 }
 0x668   : > { %vm4067_vm6 = vcmp.gt.f32.partialorder %v4009_v28, 0.0  ;;  %v4099_v15 = vmul.f32 0.01, %v4009_v28 }
 0x669   : > { %vm4066_vm7 = vcmp.gt.f32.partialorder %v4004_v55, 0.0  ;;  %v4098_v29 = vmul.f32 0.01, %v4004_v55 }
 0x66a   : > { %v4131_v35 = vsel %vm4067_vm6, %v4009_v28, %v4099_v15 }
 0x66b   : > { %4163 = vst.msk [vmem:[%s8307_s19 + $0xc8] sm:$0xff] %vm2231_vm14, %v4131_v35  ;;  %v4130_v61 = vsel %vm4066_vm7, %v4004_v55, %v4098_v29 }
 0x66c   : > { %4162 = vst.msk [vmem:[%s8307_s19 + $0xc0] sm:$0xff] %vm2231_vm14, %v4130_v61 }
 0x67d   : > { %v5096_v1 = vpop.f32.mrb[42].mxu1 }
 0x67e   : > { %v4019_v19 = vadd.f32 %v5096_v1, %v8295_v50  ;;  %v4013_v41 = vpop.f32.mrb[43].mxu1 }
 0x67f   : > { %v4014_v39 = vadd.f32 %v8295_v50, %v4013_v41 }
 0x680   : > { %vm4069_vm8 = vcmp.gt.f32.partialorder %v4019_v19, 0.0  ;;  %v4101_v9 = vmul.f32 0.01, %v4019_v19 }
 0x681   : > { %vm4068_vm10 = vcmp.gt.f32.partialorder %v4014_v39, 0.0  ;;  %v4100_v36 = vmul.f32 0.01, %v4014_v39 }
 0x682   : > { %v4133_v40 = vsel %vm4069_vm8, %v4019_v19, %v4101_v9 }
 0x683   : > { %4165 = vst.msk [vmem:[%s8307_s19 + $0xd8] sm:$0xff] %vm2231_vm14, %v4133_v40  ;;  %v4132_v23 = vsel %vm4068_vm10, %v4014_v39, %v4100_v36 }
 0x684   : > { %4164 = vst.msk [vmem:[%s8307_s19 + $0xd0] sm:$0xff] %vm2231_vm14, %v4132_v23 }
 0x695   : > { %v5099_v45 = vpop.f32.mrb[44].mxu1 }
 0x696   : > { %v4029_v21 = vadd.f32 %v5099_v45, %v8295_v50  ;;  %v4023_v34 = vpop.f32.mrb[45].mxu1 }
 0x697   : > { %v4024_v37 = vadd.f32 %v8295_v50, %v4023_v34 }
 0x698   : > { %vm4071_vm11 = vcmp.gt.f32.partialorder %v4029_v21, 0.0  ;;  %v4103_v31 = vmul.f32 0.01, %v4029_v21 }
 0x699   : > { %vm4070_vm12 = vcmp.gt.f32.partialorder %v4024_v37, 0.0  ;;  %v4102_v4 = vmul.f32 0.01, %v4024_v37 }
 0x69a   : > { %v4135_v16 = vsel %vm4071_vm11, %v4029_v21, %v4103_v31 }
 0x69b   : > { %4167 = vst.msk [vmem:[%s8307_s19 + $0xe8] sm:$0xff] %vm2231_vm14, %v4135_v16  ;;  %v4134_v63 = vsel %vm4070_vm12, %v4024_v37, %v4102_v4 }
 0x69c   : > { %4166 = vst.msk [vmem:[%s8307_s19 + $0xe0] sm:$0xff] %vm2231_vm14, %v4134_v63 }
 0x6a2   : > { %v5102_v7 = vpop.f32.mrb[46].mxu1 }
 0x6a3   : > { %v4039_v10 = vadd.f32 %v5205_v46, %v5102_v7  ;;  %v4033_v3 = vpop.f32.mrb[47].mxu1 }
 0x6a4   : > { %v4034_v50 = vadd.f32 %v5205_v46, %v4033_v3 }
 0x6a5   : > { %vm4073_vm13 = vcmp.gt.f32.partialorder %v4039_v10, 0.0  ;;  %v4105_v52 = vmul.f32 0.01, %v4039_v10 }
 0x6a6   : > { %vm4072_vm3 = vcmp.gt.f32.partialorder %v4034_v50, 0.0  ;;  %v4104_v30 = vmul.f32 0.01, %v4034_v50 }
 0x6a7   : > { %v4137_v6 = vsel %vm4073_vm13, %v4039_v10, %v4105_v52 }
 0x6a8   : > { %4169 = vst.msk [vmem:[%s8307_s19 + $0xf8] sm:$0xff] %vm2231_vm14, %v4137_v6  ;;  %v4136_v59 = vsel %vm4072_vm3, %v4034_v50, %v4104_v30 }
 0x6a9   : > { %4168 = vst.msk [vmem:[%s8307_s19 + $0xf0] sm:$0xff] %vm2231_vm14, %v4136_v59 }
 0x6aa PF: > { %s18_s24 = sadd.s32 1, %s5212_s24  }
 0x6ab   : > { %p15_p4 = scmp.ge.s32.totalorder %s18_s24, 4  }
 0x6ad   :  { %17 = sbr.rel (!%p15_p4) target bundleno = 1 (0x1), region = 88 }

</bundles_post_ra>
